<compile_context>
chip_gen: v6e
topology: v6e:2x2x1
jax: 0.10.0
libtpu: 0.0.40
codegen_flags: <defaults>
</compile_context>

<pallas_src>
import functools

import jax
import jax.numpy as jnp
from jax.experimental import pallas as pl
from jax.experimental.pallas import tpu as pltpu

LANE = 128
_BN_EPS = 1e-5


# ------------------------------- helpers ----------------------------------- #

def _round_up(x, m):
    return (x + m - 1) // m * m


def _pick_tile_m(m, target=1024):
    """Row-tile size: full M if it already fits one tile, else `target` (mult of 8)."""
    return m if m <= target else target


def _compiler_params():
    return pltpu.CompilerParams(
        dimension_semantics=("parallel",),          # shard M-tiles across TCs (v7x)
        vmem_limit_bytes=32 * 1024 * 1024,          # explicit scoped-VMEM budget
    )


def _pad_cols(x, c_pad):
    c = x.shape[-1]
    if c == c_pad:
        return x
    pad = [(0, 0)] * (x.ndim - 1) + [(0, c_pad - c)]
    return jnp.pad(x, pad)


# ----------------------------- Pallas kernels ------------------------------ #

def _matmul_bias_kernel(a_ref, b_ref, bias_ref, o_ref):
    # o = a @ b + bias   (ConvTranspose2d-as-matmul), bf16 inputs, f32 accumulate.
    o_ref[...] = (
        jnp.dot(a_ref[...], b_ref[...], preferred_element_type=jnp.float32)
        + bias_ref[...]
    )


def _matmul_bias_stats_kernel(a_ref, b_ref, bias_ref, y_ref, stats_ref, *, tm, m_total):
    # Pass 1 of conv+BN: y = a @ b + bias, plus per-tile per-channel sum / sumsq
    # (masked to the true M so partial boundary tiles don't pollute the stats).
    y = (
        jnp.dot(a_ref[...], b_ref[...], preferred_element_type=jnp.float32)
        + bias_ref[...]
    )
    y_ref[...] = y

    row = pl.program_id(0) * tm + jax.lax.broadcasted_iota(jnp.int32, y.shape, 0)
    ym = jnp.where(row < m_total, y, 0.0)
    s = jnp.sum(ym, axis=0, keepdims=True)            # (1, C)
    sq = jnp.sum(ym * ym, axis=0, keepdims=True)      # (1, C)

    ridx = jax.lax.broadcasted_iota(jnp.int32, stats_ref.shape, 0)  # (8, C)
    stats_ref[...] = jnp.where(ridx == 0, s, 0.0) + jnp.where(ridx == 1, sq, 0.0)


def _affine_relu_kernel(y_ref, scale_ref, shift_ref, o_ref):
    # Pass 2 of conv+BN: out = relu(y * scale + shift)   (scale/shift fold BN params).
    o_ref[...] = jnp.maximum(y_ref[...] * scale_ref[...] + shift_ref[...], 0.0)


# --------------------------- pallas_call wrappers --------------------------- #

def _pallas_matmul_bias(a, b, bias, *, tile_m=1024):
    m, k = a.shape
    _, c = b.shape
    tm = _pick_tile_m(m, tile_m)
    return pl.pallas_call(
        _matmul_bias_kernel,
        out_shape=jax.ShapeDtypeStruct((m, c), jnp.float32),
        grid=(pl.cdiv(m, tm),),
        in_specs=[
            pl.BlockSpec((tm, k), lambda i: (i, 0)),
            pl.BlockSpec((k, c), lambda i: (0, 0)),
            pl.BlockSpec((1, c), lambda i: (0, 0)),
        ],
        out_specs=pl.BlockSpec((tm, c), lambda i: (i, 0)),
        compiler_params=_compiler_params(),
    )(a, b, bias.reshape(1, c))


def _pallas_matmul_bias_stats(a, b, bias, *, tile_m=1024):
    m, k = a.shape
    _, c = b.shape
    tm = _pick_tile_m(m, tile_m)
    n_tiles = pl.cdiv(m, tm)
    kernel = functools.partial(_matmul_bias_stats_kernel, tm=tm, m_total=m)
    y, stats = pl.pallas_call(
        kernel,
        out_shape=(
            jax.ShapeDtypeStruct((m, c), jnp.float32),
            jax.ShapeDtypeStruct((8 * n_tiles, c), jnp.float32),
        ),
        grid=(n_tiles,),
        in_specs=[
            pl.BlockSpec((tm, k), lambda i: (i, 0)),
            pl.BlockSpec((k, c), lambda i: (0, 0)),
            pl.BlockSpec((1, c), lambda i: (0, 0)),
        ],
        out_specs=(
            pl.BlockSpec((tm, c), lambda i: (i, 0)),
            pl.BlockSpec((8, c), lambda i: (i, 0)),
        ),
        compiler_params=_compiler_params(),
    )(a, b, bias.reshape(1, c))
    st = stats.reshape(n_tiles, 8, c)
    return y, jnp.sum(st[:, 0, :], axis=0), jnp.sum(st[:, 1, :], axis=0)


def _pallas_affine_relu(y, scale, shift, *, tile_m=2048):
    m, c = y.shape
    tm = _pick_tile_m(m, tile_m)
    return pl.pallas_call(
        _affine_relu_kernel,
        out_shape=jax.ShapeDtypeStruct((m, c), jnp.float32),
        grid=(pl.cdiv(m, tm),),
        in_specs=[
            pl.BlockSpec((tm, c), lambda i: (i, 0)),
            pl.BlockSpec((1, c), lambda i: (0, 0)),
            pl.BlockSpec((1, c), lambda i: (0, 0)),
        ],
        out_specs=pl.BlockSpec((tm, c), lambda i: (i, 0)),
        compiler_params=_compiler_params(),
    )(y, scale.reshape(1, c), shift.reshape(1, c))


# ------------------------------- NHWC layers -------------------------------- #

def conv_transpose_2x2_s2_nhwc(x, w, b):
    """ConvTranspose2d(k=2, s=2). x: (N,H,W,Cin), w: (Cin,Cout,2,2) -> (N,2H,2W,Cout)."""
    n, h, wd, cin = x.shape
    cout = w.shape[1]
    c_pad = _round_up(cout * 4, LANE)                         # lane-dense output
    a = x.reshape(n * h * wd, cin).astype(jnp.bfloat16)
    wf = _pad_cols(w.reshape(cin, cout * 4), c_pad).astype(jnp.bfloat16)
    bf = _pad_cols(jnp.repeat(b, 4), c_pad).astype(jnp.float32)
    y = _pallas_matmul_bias(a, wf, bf)                        # (N*H*W, c_pad)
    y = y[:, : cout * 4].reshape(n, h, wd, cout, 2, 2)
    # out[n, 2h+a, 2w+bb, co] = y[n, h, w, co, a, bb]
    return y.transpose(0, 1, 4, 2, 5, 3).reshape(n, 2 * h, 2 * wd, cout)


def conv3x3_bn_relu_nhwc(x, w, b, gamma, beta):
    """Conv2d(k=3, pad=1) + BatchNorm2d(training batch stats) + ReLU (NHWC)."""
    n, h, wd, cin = x.shape
    cout = w.shape[0]
    c_pad = _round_up(cout, LANE)
    m = n * h * wd

    # im2col in bf16 (halves the 9x patch traffic); K ordering = (di, dj, ci).
    xp = jnp.pad(x, ((0, 0), (1, 1), (1, 1), (0, 0))).astype(jnp.bfloat16)
    taps = [xp[:, di:di + h, dj:dj + wd, :] for di in range(3) for dj in range(3)]
    a = jnp.concatenate(taps, axis=-1).reshape(m, 9 * cin)
    # TODO(synk): build the 9 taps in-kernel from a halo'd NHWC tile (manual DMA)
    # to avoid materializing the 9x patch matrix in HBM.

    wf = _pad_cols(w.transpose(2, 3, 1, 0).reshape(9 * cin, cout), c_pad).astype(jnp.bfloat16)
    bf = _pad_cols(b, c_pad).astype(jnp.float32)

    # Pass 1: conv-as-matmul, streaming per-channel sum / sum-of-squares.
    y, col_sum, col_sumsq = _pallas_matmul_bias_stats(a, wf, bf)

    # Global batch statistics (PyTorch BN training mode: biased variance over N*H*W).
    mean = col_sum / m
    var = jnp.maximum(col_sumsq / m - mean * mean, 0.0)
    g = _pad_cols(gamma, c_pad)                               # zero in padded lanes
    bt = _pad_cols(beta, c_pad)
    scale = g * jax.lax.rsqrt(var + _BN_EPS)
    shift = bt - mean * scale

    # Pass 2: elementwise normalize + ReLU.
    out = _pallas_affine_relu(y, scale, shift)
    return out[:, :cout].reshape(n, h, wd, cout)


# ------------------------------ module forward ------------------------------ #

def upsampled_part(params, x1, x2):
    """Pallas implementation of upsampledPart.forward(x1, x2). I/O is NCHW."""
    x1 = x1.transpose(0, 2, 3, 1)                             # NHWC internally
    x2 = x2.transpose(0, 2, 3, 1)

    x1 = conv_transpose_2x2_s2_nhwc(x1, params["up_w"], params["up_b"])
    diff_y = x2.shape[1] - x1.shape[1]
    diff_x = x2.shape[2] - x1.shape[2]
    x1 = jnp.pad(
        x1,
        ((0, 0),
         (diff_y // 2, diff_y - diff_y // 2),
         (diff_x // 2, diff_x - diff_x // 2),
         (0, 0)),
    )
    x = jnp.concatenate([x2, x1], axis=-1)                    # channels: [x2 | x1]

    x = conv3x3_bn_relu_nhwc(x, params["c1_w"], params["c1_b"],
                             params["bn1_g"], params["bn1_b"])
    x = conv3x3_bn_relu_nhwc(x, params["c2_w"], params["c2_b"],
                             params["bn2_g"], params["bn2_b"])
    return x.transpose(0, 3, 1, 2)                            # back to NCHW


# ---------------------------- reference (JAX) ------------------------------ #

def _reference(params, x1, x2):
    """Same math in plain jnp (NCHW, independent im2col ordering), bf16 matmuls."""
    def mm(a, b):
        return jnp.dot(a.astype(jnp.bfloat16), b.astype(jnp.bfloat16),
                       preferred_element_type=jnp.float32)

    def ct(x, w, b):
        N, Cin, H, W = x.shape
        Cout = w.shape[1]
        a = x.transpose(0, 2, 3, 1).reshape(N * H * W, Cin)
        y = mm(a, w.reshape(Cin, Cout * 4)) + jnp.repeat(b, 4)[None, :]
        y = y.reshape(N, H, W, Cout, 2, 2)
        return y.transpose(0, 3, 1, 4, 2, 5).reshape(N, Cout, 2 * H, 2 * W)

    def cbr(x, w, b, g, bt):
        N, Cin, H, W = x.shape
        Cout = w.shape[0]
        xp = jnp.pad(x, ((0, 0), (0, 0), (1, 1), (1, 1)))
        cols = [xp[:, :, di:di + H, dj:dj + W] for di in range(3) for dj in range(3)]
        a = jnp.stack(cols, axis=2).transpose(0, 3, 4, 1, 2).reshape(N * H * W, Cin * 9)
        y = mm(a, w.transpose(1, 2, 3, 0).reshape(Cin * 9, Cout)) + b[None, :]
        mean = jnp.mean(y, axis=0, keepdims=True)
        var = jnp.mean((y - mean) ** 2, axis=0, keepdims=True)
        y = jnp.maximum((y - mean) * jax.lax.rsqrt(var + _BN_EPS) * g[None, :] + bt[None, :], 0.0)
        return y.reshape(N, H, W, Cout).transpose(0, 3, 1, 2)

    x1 = ct(x1, params["up_w"], params["up_b"])
    diffY = x2.shape[2] - x1.shape[2]
    diffX = x2.shape[3] - x1.shape[3]
    x1 = jnp.pad(x1, ((0, 0), (0, 0),
                      (diffY // 2, diffY - diffY // 2),
                      (diffX // 2, diffX - diffX // 2)))
    x = jnp.concatenate([x2, x1], axis=1)
    x = cbr(x, params["c1_w"], params["c1_b"], params["bn1_g"], params["bn1_b"])
    x = cbr(x, params["c2_w"], params["c2_b"], params["bn2_g"], params["bn2_b"])
    return x


# --------------------------------- main ------------------------------------ #

if __name__ == "__main__":
    channel_in, channel_out = 8, 4          # UNet convention: channel_in == 2*channel_out
    N, H1, W1 = 2, 16, 16                   # x1 spatial; x2 is 2x larger -> M=2048 (2 tiles)
    key = jax.random.PRNGKey(0)
    ks = jax.random.split(key, 8)

    params = {
        # ConvTranspose2d(channel_in, channel_out, k=2, s=2): weight (Cin, Cout, 2, 2)
        "up_w": 0.1 * jax.random.normal(ks[0], (channel_in, channel_out, 2, 2), jnp.float32),
        "up_b": 0.1 * jax.random.normal(ks[1], (channel_out,), jnp.float32),
        # Conv2d(channel_in, channel_out, 3, pad=1)
        "c1_w": 0.1 * jax.random.normal(ks[2], (channel_out, channel_in, 3, 3), jnp.float32),
        "c1_b": 0.1 * jax.random.normal(ks[3], (channel_out,), jnp.float32),
        "bn1_g": jnp.ones((channel_out,), jnp.float32),
        "bn1_b": jnp.zeros((channel_out,), jnp.float32),
        # Conv2d(channel_out, channel_out, 3, pad=1)
        "c2_w": 0.1 * jax.random.normal(ks[4], (channel_out, channel_out, 3, 3), jnp.float32),
        "c2_b": 0.1 * jax.random.normal(ks[5], (channel_out,), jnp.float32),
        "bn2_g": jnp.ones((channel_out,), jnp.float32),
        "bn2_b": jnp.zeros((channel_out,), jnp.float32),
    }

    x1 = jax.random.normal(ks[6], (N, channel_in, H1, W1), jnp.float32)
    x2 = jax.random.normal(ks[7], (N, channel_out, 2 * H1, 2 * W1), jnp.float32)

    out = jax.jit(upsampled_part)(params, x1, x2)
    out = jax.block_until_ready(out)
    assert out.shape == (N, channel_out, 2 * H1, 2 * W1), out.shape

    ref = jax.block_until_ready(jax.jit(_reference)(params, x1, x2))
    max_err = float(jnp.max(jnp.abs(out - ref)))
    assert jnp.allclose(out, ref, rtol=1e-2, atol=1e-2), max_err

    print("KERNEL_OK")
</pallas_src>

<mosaic_0001>
module attributes {stable_mosaic.version = 11 : i64} {
  func.func @_matmul_bias_kernel(%arg0: i32, %arg1: memref<512x8xbf16, #tpu.memory_space<vmem>>, %arg2: memref<8x128xbf16, #tpu.memory_space<vmem>>, %arg3: memref<1x128xf32, #tpu.memory_space<vmem>>, %arg4: memref<512x128xf32, #tpu.memory_space<vmem>>) attributes {dimension_semantics = [#tpu.dimension_semantics<parallel>], iteration_bounds = array<i64: 1>, scalar_prefetch = 0 : i64, scratch_operands = 0 : i64, tpu.core_type = #tpu.core_type<tc>, window_params = [{transform_indices = @transform_0, window_bounds = array<i64: 512, 8>}, {pipeline_mode = #tpu.pipeline_mode<synchronous>, transform_indices = @transform_1, window_bounds = array<i64: 8, 128>}, {pipeline_mode = #tpu.pipeline_mode<synchronous>, transform_indices = @transform_2, window_bounds = array<i64: 1, 128>}, {transform_indices = @transform_3, window_bounds = array<i64: 512, 128>}]} {
    %c0 = arith.constant 0 : index
    %c0_0 = arith.constant 0 : index
    %0 = vector.load %arg1[%c0, %c0_0] : memref<512x8xbf16, #tpu.memory_space<vmem>>, vector<512x8xbf16>
    %c0_1 = arith.constant 0 : index
    %c0_2 = arith.constant 0 : index
    %1 = vector.load %arg2[%c0_1, %c0_2] : memref<8x128xbf16, #tpu.memory_space<vmem>>, vector<8x128xbf16>
    %cst = arith.constant dense<0.000000e+00> : vector<512x128xf32>
    %2 = tpu.matmul %0, %1, %cst {dimension_numbers = #tpu.dot_dimension_numbers<[1], [0], [0], [1], [0, 0, 1, 1], [], []>} : vector<512x8xbf16>, vector<8x128xbf16>, vector<512x128xf32> -> vector<512x128xf32>
    %c0_3 = arith.constant 0 : index
    %c0_4 = arith.constant 0 : index
    %3 = vector.load %arg3[%c0_3, %c0_4] : memref<1x128xf32, #tpu.memory_space<vmem>>, vector<1x128xf32>
    %4 = vector.broadcast %3 : vector<1x128xf32> to vector<512x128xf32>
    %5 = arith.addf %2, %4 : vector<512x128xf32>
    %c0_5 = arith.constant 0 : index
    %c0_6 = arith.constant 0 : index
    %6 = vector.load %arg4[%c0_5, %c0_6] : memref<512x128xf32, #tpu.memory_space<vmem>>, vector<512x128xf32>
    tpu.vector_store %arg4[%c0_5, %c0_6], %5 {strides = array<i32>} : memref<512x128xf32, #tpu.memory_space<vmem>>, vector<512x128xf32>,
    return
  }
  func.func @transform_0(%arg0: i32) -> (i32, i32) {
    %c0_i32 = arith.constant 0 : i32
    %c0_i32_0 = arith.constant 0 : i32
    return %arg0, %c0_i32 : i32, i32
  }
  func.func @transform_1(%arg0: i32) -> (i32, i32) {
    %c0_i32 = arith.constant 0 : i32
    %c0_i32_0 = arith.constant 0 : i32
    %c0_i32_1 = arith.constant 0 : i32
    return %c0_i32, %c0_i32_0 : i32, i32
  }
  func.func @transform_2(%arg0: i32) -> (i32, i32) {
    %c0_i32 = arith.constant 0 : i32
    %c0_i32_0 = arith.constant 0 : i32
    %c0_i32_1 = arith.constant 0 : i32
    return %c0_i32, %c0_i32_0 : i32, i32
  }
  func.func @transform_3(%arg0: i32) -> (i32, i32) {
    %c0_i32 = arith.constant 0 : i32
    %c0_i32_0 = arith.constant 0 : i32
    return %arg0, %c0_i32 : i32, i32
  }
}

module attributes {stable_mosaic.version = 11 : i64} {
  func.func @_matmul_bias_stats_kernel(%arg0: i32, %arg1: memref<1024x72xbf16, #tpu.memory_space<vmem>>, %arg2: memref<72x128xbf16, #tpu.memory_space<vmem>>, %arg3: memref<1x128xf32, #tpu.memory_space<vmem>>, %arg4: memref<1024x128xf32, #tpu.memory_space<vmem>>, %arg5: memref<8x128xf32, #tpu.memory_space<vmem>>) attributes {dimension_semantics = [#tpu.dimension_semantics<parallel>], iteration_bounds = array<i64: 2>, scalar_prefetch = 0 : i64, scratch_operands = 0 : i64, tpu.core_type = #tpu.core_type<tc>, window_params = [{transform_indices = @transform_0, window_bounds = array<i64: 1024, 72>}, {pipeline_mode = #tpu.pipeline_mode<synchronous>, transform_indices = @transform_1, window_bounds = array<i64: 72, 128>}, {pipeline_mode = #tpu.pipeline_mode<synchronous>, transform_indices = @transform_2, window_bounds = array<i64: 1, 128>}, {transform_indices = @transform_3, window_bounds = array<i64: 1024, 128>}, {transform_indices = @transform_4, window_bounds = array<i64: 8, 128>}]} {
    %c0 = arith.constant 0 : index
    %c0_0 = arith.constant 0 : index
    %0 = vector.load %arg1[%c0, %c0_0] : memref<1024x72xbf16, #tpu.memory_space<vmem>>, vector<1024x72xbf16>
    %c0_1 = arith.constant 0 : index
    %c0_2 = arith.constant 0 : index
    %1 = vector.load %arg2[%c0_1, %c0_2] : memref<72x128xbf16, #tpu.memory_space<vmem>>, vector<72x128xbf16>
    %cst = arith.constant dense<0.000000e+00> : vector<1024x128xf32>
    %2 = tpu.matmul %0, %1, %cst {dimension_numbers = #tpu.dot_dimension_numbers<[1], [0], [0], [1], [0, 0, 1, 1], [], []>} : vector<1024x72xbf16>, vector<72x128xbf16>, vector<1024x128xf32> -> vector<1024x128xf32>
    %c0_3 = arith.constant 0 : index
    %c0_4 = arith.constant 0 : index
    %3 = vector.load %arg3[%c0_3, %c0_4] : memref<1x128xf32, #tpu.memory_space<vmem>>, vector<1x128xf32>
    %4 = vector.broadcast %3 : vector<1x128xf32> to vector<1024x128xf32>
    %5 = arith.addf %2, %4 : vector<1024x128xf32>
    %c0_5 = arith.constant 0 : index
    %c0_6 = arith.constant 0 : index
    %6 = vector.load %arg4[%c0_5, %c0_6] : memref<1024x128xf32, #tpu.memory_space<vmem>>, vector<1024x128xf32>
    tpu.vector_store %arg4[%c0_5, %c0_6], %5 {strides = array<i32>} : memref<1024x128xf32, #tpu.memory_space<vmem>>, vector<1024x128xf32>,
    %c1024_i32 = arith.constant 1024 : i32
    %7 = arith.muli %arg0, %c1024_i32 : i32
    %8 = tpu.iota {dimensions = array<i32: 0>} : vector<1024x128xi32>
    %9 = vector.broadcast %7 : i32 to vector<1024x128xi32>
    %10 = arith.addi %9, %8 : vector<1024x128xi32>
    %c2048_i32 = arith.constant 2048 : i32
    %11 = vector.broadcast %c2048_i32 : i32 to vector<1024x128xi32>
    %12 = arith.cmpi slt, %10, %11 : vector<1024x128xi32>
    %cst_7 = arith.constant 0.000000e+00 : f32
    %13 = vector.broadcast %cst_7 : f32 to vector<1024x128xf32>
    %14 = arith.select %12, %5, %13 : vector<1024x128xi1>, vector<1024x128xf32>
    %cst_8 = arith.constant dense<0.000000e+00> : vector<128xf32>
    %15 = vector.multi_reduction <add>, %14, %cst_8 [0] : vector<1024x128xf32> to vector<128xf32>
    %16 = vector.shape_cast %15 : vector<128xf32> to vector<1x128xf32>
    %17 = arith.mulf %14, %14 : vector<1024x128xf32>
    %cst_9 = arith.constant dense<0.000000e+00> : vector<128xf32>
    %18 = vector.multi_reduction <add>, %17, %cst_9 [0] : vector<1024x128xf32> to vector<128xf32>
    %19 = vector.shape_cast %18 : vector<128xf32> to vector<1x128xf32>
    %20 = tpu.iota {dimensions = array<i32: 0>} : vector<8x128xi32>
    %c0_i32 = arith.constant 0 : i32
    %21 = vector.broadcast %c0_i32 : i32 to vector<8x128xi32>
    %22 = arith.cmpi eq, %20, %21 : vector<8x128xi32>
    %cst_10 = arith.constant 0.000000e+00 : f32
    %23 = vector.shape_cast %16 : vector<1x128xf32> to vector<1x128xf32>
    %24 = vector.broadcast %23 : vector<1x128xf32> to vector<8x128xf32>
    %25 = vector.broadcast %cst_10 : f32 to vector<8x128xf32>
    %26 = arith.select %22, %24, %25 : vector<8x128xi1>, vector<8x128xf32>
    %c1_i32 = arith.constant 1 : i32
    %27 = vector.broadcast %c1_i32 : i32 to vector<8x128xi32>
    %28 = arith.cmpi eq, %20, %27 : vector<8x128xi32>
    %cst_11 = arith.constant 0.000000e+00 : f32
    %29 = vector.shape_cast %19 : vector<1x128xf32> to vector<1x128xf32>
    %30 = vector.broadcast %29 : vector<1x128xf32> to vector<8x128xf32>
    %31 = vector.broadcast %cst_11 : f32 to vector<8x128xf32>
    %32 = arith.select %28, %30, %31 : vector<8x128xi1>, vector<8x128xf32>
    %33 = arith.addf %26, %32 : vector<8x128xf32>
    %c0_12 = arith.constant 0 : index
    %c0_13 = arith.constant 0 : index
    %34 = vector.load %arg5[%c0_12, %c0_13] : memref<8x128xf32, #tpu.memory_space<vmem>>, vector<8x128xf32>
    tpu.vector_store %arg5[%c0_12, %c0_13], %33 {strides = array<i32>} : memref<8x128xf32, #tpu.memory_space<vmem>>, vector<8x128xf32>,
    return
  }
  func.func @transform_0(%arg0: i32) -> (i32, i32) {
    %c0_i32 = arith.constant 0 : i32
    %c0_i32_0 = arith.constant 0 : i32
    return %arg0, %c0_i32 : i32, i32
  }
  func.func @transform_1(%arg0: i32) -> (i32, i32) {
    %c0_i32 = arith.constant 0 : i32
    %c0_i32_0 = arith.constant 0 : i32
    %c0_i32_1 = arith.constant 0 : i32
    return %c0_i32, %c0_i32_0 : i32, i32
  }
  func.func @transform_2(%arg0: i32) -> (i32, i32) {
    %c0_i32 = arith.constant 0 : i32
    %c0_i32_0 = arith.constant 0 : i32
    %c0_i32_1 = arith.constant 0 : i32
    return %c0_i32, %c0_i32_0 : i32, i32
  }
  func.func @transform_3(%arg0: i32) -> (i32, i32) {
    %c0_i32 = arith.constant 0 : i32
    %c0_i32_0 = arith.constant 0 : i32
    return %arg0, %c0_i32 : i32, i32
  }
  func.func @transform_4(%arg0: i32) -> (i32, i32) {
    %c0_i32 = arith.constant 0 : i32
    %c0_i32_0 = arith.constant 0 : i32
    return %arg0, %c0_i32 : i32, i32
  }
}

module attributes {stable_mosaic.version = 11 : i64} {
  func.func @_affine_relu_kernel(%arg0: i32, %arg1: memref<2048x128xf32, #tpu.memory_space<vmem>>, %arg2: memref<1x128xf32, #tpu.memory_space<vmem>>, %arg3: memref<1x128xf32, #tpu.memory_space<vmem>>, %arg4: memref<2048x128xf32, #tpu.memory_space<vmem>>) attributes {dimension_semantics = [#tpu.dimension_semantics<parallel>], iteration_bounds = array<i64: 1>, scalar_prefetch = 0 : i64, scratch_operands = 0 : i64, tpu.core_type = #tpu.core_type<tc>, window_params = [{transform_indices = @transform_0, window_bounds = array<i64: 2048, 128>}, {pipeline_mode = #tpu.pipeline_mode<synchronous>, transform_indices = @transform_1, window_bounds = array<i64: 1, 128>}, {pipeline_mode = #tpu.pipeline_mode<synchronous>, transform_indices = @transform_2, window_bounds = array<i64: 1, 128>}, {transform_indices = @transform_3, window_bounds = array<i64: 2048, 128>}]} {
    %c0 = arith.constant 0 : index
    %c0_0 = arith.constant 0 : index
    %0 = vector.load %arg1[%c0, %c0_0] : memref<2048x128xf32, #tpu.memory_space<vmem>>, vector<2048x128xf32>
    %c0_1 = arith.constant 0 : index
    %c0_2 = arith.constant 0 : index
    %1 = vector.load %arg2[%c0_1, %c0_2] : memref<1x128xf32, #tpu.memory_space<vmem>>, vector<1x128xf32>
    %2 = vector.broadcast %1 : vector<1x128xf32> to vector<2048x128xf32>
    %3 = arith.mulf %0, %2 : vector<2048x128xf32>
    %c0_3 = arith.constant 0 : index
    %c0_4 = arith.constant 0 : index
    %4 = vector.load %arg3[%c0_3, %c0_4] : memref<1x128xf32, #tpu.memory_space<vmem>>, vector<1x128xf32>
    %5 = vector.broadcast %4 : vector<1x128xf32> to vector<2048x128xf32>
    %6 = arith.addf %3, %5 : vector<2048x128xf32>
    %cst = arith.constant 0.000000e+00 : f32
    %7 = vector.broadcast %cst : f32 to vector<2048x128xf32>
    %8 = arith.maximumf %6, %7 : vector<2048x128xf32>
    %c0_5 = arith.constant 0 : index
    %c0_6 = arith.constant 0 : index
    %9 = vector.load %arg4[%c0_5, %c0_6] : memref<2048x128xf32, #tpu.memory_space<vmem>>, vector<2048x128xf32>
    tpu.vector_store %arg4[%c0_5, %c0_6], %8 {strides = array<i32>} : memref<2048x128xf32, #tpu.memory_space<vmem>>, vector<2048x128xf32>,
    return
  }
  func.func @transform_0(%arg0: i32) -> (i32, i32) {
    %c0_i32 = arith.constant 0 : i32
    %c0_i32_0 = arith.constant 0 : i32
    return %arg0, %c0_i32 : i32, i32
  }
  func.func @transform_1(%arg0: i32) -> (i32, i32) {
    %c0_i32 = arith.constant 0 : i32
    %c0_i32_0 = arith.constant 0 : i32
    %c0_i32_1 = arith.constant 0 : i32
    return %c0_i32, %c0_i32_0 : i32, i32
  }
  func.func @transform_2(%arg0: i32) -> (i32, i32) {
    %c0_i32 = arith.constant 0 : i32
    %c0_i32_0 = arith.constant 0 : i32
    %c0_i32_1 = arith.constant 0 : i32
    return %c0_i32, %c0_i32_0 : i32, i32
  }
  func.func @transform_3(%arg0: i32) -> (i32, i32) {
    %c0_i32 = arith.constant 0 : i32
    %c0_i32_0 = arith.constant 0 : i32
    return %arg0, %c0_i32 : i32, i32
  }
}

module attributes {stable_mosaic.version = 11 : i64} {
  func.func @_matmul_bias_stats_kernel(%arg0: i32, %arg1: memref<1024x36xbf16, #tpu.memory_space<vmem>>, %arg2: memref<36x128xbf16, #tpu.memory_space<vmem>>, %arg3: memref<1x128xf32, #tpu.memory_space<vmem>>, %arg4: memref<1024x128xf32, #tpu.memory_space<vmem>>, %arg5: memref<8x128xf32, #tpu.memory_space<vmem>>) attributes {dimension_semantics = [#tpu.dimension_semantics<parallel>], iteration_bounds = array<i64: 2>, scalar_prefetch = 0 : i64, scratch_operands = 0 : i64, tpu.core_type = #tpu.core_type<tc>, window_params = [{transform_indices = @transform_0, window_bounds = array<i64: 1024, 36>}, {pipeline_mode = #tpu.pipeline_mode<synchronous>, transform_indices = @transform_1, window_bounds = array<i64: 36, 128>}, {pipeline_mode = #tpu.pipeline_mode<synchronous>, transform_indices = @transform_2, window_bounds = array<i64: 1, 128>}, {transform_indices = @transform_3, window_bounds = array<i64: 1024, 128>}, {transform_indices = @transform_4, window_bounds = array<i64: 8, 128>}]} {
    %c0 = arith.constant 0 : index
    %c0_0 = arith.constant 0 : index
    %0 = vector.load %arg1[%c0, %c0_0] : memref<1024x36xbf16, #tpu.memory_space<vmem>>, vector<1024x36xbf16>
    %c0_1 = arith.constant 0 : index
    %c0_2 = arith.constant 0 : index
    %1 = vector.load %arg2[%c0_1, %c0_2] : memref<36x128xbf16, #tpu.memory_space<vmem>>, vector<36x128xbf16>
    %cst = arith.constant dense<0.000000e+00> : vector<1024x128xf32>
    %2 = tpu.matmul %0, %1, %cst {dimension_numbers = #tpu.dot_dimension_numbers<[1], [0], [0], [1], [0, 0, 1, 1], [], []>} : vector<1024x36xbf16>, vector<36x128xbf16>, vector<1024x128xf32> -> vector<1024x128xf32>
    %c0_3 = arith.constant 0 : index
    %c0_4 = arith.constant 0 : index
    %3 = vector.load %arg3[%c0_3, %c0_4] : memref<1x128xf32, #tpu.memory_space<vmem>>, vector<1x128xf32>
    %4 = vector.broadcast %3 : vector<1x128xf32> to vector<1024x128xf32>
    %5 = arith.addf %2, %4 : vector<1024x128xf32>
    %c0_5 = arith.constant 0 : index
    %c0_6 = arith.constant 0 : index
    %6 = vector.load %arg4[%c0_5, %c0_6] : memref<1024x128xf32, #tpu.memory_space<vmem>>, vector<1024x128xf32>
    tpu.vector_store %arg4[%c0_5, %c0_6], %5 {strides = array<i32>} : memref<1024x128xf32, #tpu.memory_space<vmem>>, vector<1024x128xf32>,
    %c1024_i32 = arith.constant 1024 : i32
    %7 = arith.muli %arg0, %c1024_i32 : i32
    %8 = tpu.iota {dimensions = array<i32: 0>} : vector<1024x128xi32>
    %9 = vector.broadcast %7 : i32 to vector<1024x128xi32>
    %10 = arith.addi %9, %8 : vector<1024x128xi32>
    %c2048_i32 = arith.constant 2048 : i32
    %11 = vector.broadcast %c2048_i32 : i32 to vector<1024x128xi32>
    %12 = arith.cmpi slt, %10, %11 : vector<1024x128xi32>
    %cst_7 = arith.constant 0.000000e+00 : f32
    %13 = vector.broadcast %cst_7 : f32 to vector<1024x128xf32>
    %14 = arith.select %12, %5, %13 : vector<1024x128xi1>, vector<1024x128xf32>
    %cst_8 = arith.constant dense<0.000000e+00> : vector<128xf32>
    %15 = vector.multi_reduction <add>, %14, %cst_8 [0] : vector<1024x128xf32> to vector<128xf32>
    %16 = vector.shape_cast %15 : vector<128xf32> to vector<1x128xf32>
    %17 = arith.mulf %14, %14 : vector<1024x128xf32>
    %cst_9 = arith.constant dense<0.000000e+00> : vector<128xf32>
    %18 = vector.multi_reduction <add>, %17, %cst_9 [0] : vector<1024x128xf32> to vector<128xf32>
    %19 = vector.shape_cast %18 : vector<128xf32> to vector<1x128xf32>
    %20 = tpu.iota {dimensions = array<i32: 0>} : vector<8x128xi32>
    %c0_i32 = arith.constant 0 : i32
    %21 = vector.broadcast %c0_i32 : i32 to vector<8x128xi32>
    %22 = arith.cmpi eq, %20, %21 : vector<8x128xi32>
    %cst_10 = arith.constant 0.000000e+00 : f32
    %23 = vector.shape_cast %16 : vector<1x128xf32> to vector<1x128xf32>
    %24 = vector.broadcast %23 : vector<1x128xf32> to vector<8x128xf32>
    %25 = vector.broadcast %cst_10 : f32 to vector<8x128xf32>
    %26 = arith.select %22, %24, %25 : vector<8x128xi1>, vector<8x128xf32>
    %c1_i32 = arith.constant 1 : i32
    %27 = vector.broadcast %c1_i32 : i32 to vector<8x128xi32>
    %28 = arith.cmpi eq, %20, %27 : vector<8x128xi32>
    %cst_11 = arith.constant 0.000000e+00 : f32
    %29 = vector.shape_cast %19 : vector<1x128xf32> to vector<1x128xf32>
    %30 = vector.broadcast %29 : vector<1x128xf32> to vector<8x128xf32>
    %31 = vector.broadcast %cst_11 : f32 to vector<8x128xf32>
    %32 = arith.select %28, %30, %31 : vector<8x128xi1>, vector<8x128xf32>
    %33 = arith.addf %26, %32 : vector<8x128xf32>
    %c0_12 = arith.constant 0 : index
    %c0_13 = arith.constant 0 : index
    %34 = vector.load %arg5[%c0_12, %c0_13] : memref<8x128xf32, #tpu.memory_space<vmem>>, vector<8x128xf32>
    tpu.vector_store %arg5[%c0_12, %c0_13], %33 {strides = array<i32>} : memref<8x128xf32, #tpu.memory_space<vmem>>, vector<8x128xf32>,
    return
  }
  func.func @transform_0(%arg0: i32) -> (i32, i32) {
    %c0_i32 = arith.constant 0 : i32
    %c0_i32_0 = arith.constant 0 : i32
    return %arg0, %c0_i32 : i32, i32
  }
  func.func @transform_1(%arg0: i32) -> (i32, i32) {
    %c0_i32 = arith.constant 0 : i32
    %c0_i32_0 = arith.constant 0 : i32
    %c0_i32_1 = arith.constant 0 : i32
    return %c0_i32, %c0_i32_0 : i32, i32
  }
  func.func @transform_2(%arg0: i32) -> (i32, i32) {
    %c0_i32 = arith.constant 0 : i32
    %c0_i32_0 = arith.constant 0 : i32
    %c0_i32_1 = arith.constant 0 : i32
    return %c0_i32, %c0_i32_0 : i32, i32
  }
  func.func @transform_3(%arg0: i32) -> (i32, i32) {
    %c0_i32 = arith.constant 0 : i32
    %c0_i32_0 = arith.constant 0 : i32
    return %arg0, %c0_i32 : i32, i32
  }
  func.func @transform_4(%arg0: i32) -> (i32, i32) {
    %c0_i32 = arith.constant 0 : i32
    %c0_i32_0 = arith.constant 0 : i32
    return %arg0, %c0_i32 : i32, i32
  }
}

</mosaic_0001>

<bundles_post_ra>
// kernel: upsampled_part.5
= control target key start
LH: loop header
LB: loop body
LE: loop exit
PB: predicated region body
PF: predicated region fallthrough
CT: control target
= control target key end

     0   :  { %vm344_vm0 = vcmask 1043456   ;;  %vm247_vm1 = vcmask 64512   ;;  %s1317_s1 = inlined_call_operand.vmem [shape: bf16[8,128], index: 1, kind: input, shape index: {}]   ;;  %s1318_s0 = inlined_call_operand.vmem [shape: bf16[512,8], index: 0, kind: input, shape index: {}]   ;;  %s1319_s2 = inlined_call_operand.vmem [shape: f32[1,128], index: 2, kind: input, shape index: {}]   ;;  %s1320_s3 = inlined_call_operand.vmem [shape: f32[512,128], index: 3, kind: output, shape index: {}]  }
   0x1   :  { %v79_v0 = vld [vmem:[%s1317_s1] sm:$0xf]  ;;  %v875_v4 = vld [vmem:[%s1318_s0 + $0x8] sm:$0xff]   ;;  %v877_v6 = vld [vmem:[%s1318_s0 + $0x10] sm:$0xff]  }
   0x2   :  { %871 = vmatprep.subr.msk.bf16.mxu0 %vm344_vm0, %v79_v0  ;;  %872 = vmatprep.subr.msk.bf16.mxu1 %vm344_vm0, %v79_v0  ;;  %v346_v1 = vsel %vm344_vm0, %v79_v0, 0  ;;  %v873_v2 = vld [vmem:[%s1318_s0] sm:$0xff]   ;;  %v876_v5 = vld [vmem:[%s1318_s0 + $0x88] sm:$0xff]   ;;  %v878_v7 = vld [vmem:[%s1318_s0 + $0x90] sm:$0xff]  }
   0x3   :  { %804 = vmatpush3.bf16.msra.mxu0 %v346_v1  ;;  %870 = vmatpush3.bf16.msra.mxu1 %v346_v1  ;;  %v874_v3 = vld [vmem:[%s1318_s0 + $0x80] sm:$0xff]   ;;  %v879_v8 = vld [vmem:[%s1318_s0 + $0x18] sm:$0xff]   ;;  %v883_v12 = vld [vmem:[%s1318_s0 + $0x28] sm:$0xff]  }
   0x4   :  { %805 = vmatprep.mubr.msk.bf16.mxu0 %vm247_vm1, %v873_v2  ;;  %837 = vmatprep.mubr.msk.bf16.mxu1 %vm247_vm1, %v874_v3  ;;  %v880_v9 = vld [vmem:[%s1318_s0 + $0x98] sm:$0xff]   ;;  %v881_v10 = vld [vmem:[%s1318_s0 + $0x20] sm:$0xff]   ;;  %v884_v13 = vld [vmem:[%s1318_s0 + $0xa8] sm:$0xff]  }
   0x5   :  { %v882_v11 = vld [vmem:[%s1318_s0 + $0xa0] sm:$0xff]   ;;  %v885_v14 = vld [vmem:[%s1318_s0 + $0x30] sm:$0xff]   ;;  %v887_v16 = vld [vmem:[%s1318_s0 + $0x38] sm:$0xff]  }
   0x6   :  { %806 = vmatmul.mubr.msk.bf16.vlgmr.msra.gmra.mxu0 %vm247_vm1, %v875_v4  ;;  %838 = vmatmul.mubr.msk.bf16.vlgmr.msra.gmra.mxu1 %vm247_vm1, %v876_v5  ;;  %v886_v15 = vld [vmem:[%s1318_s0 + $0xb0] sm:$0xff]   ;;  %v888_v17 = vld [vmem:[%s1318_s0 + $0xb8] sm:$0xff]   ;;  %v889_v18 = vld [vmem:[%s1318_s0 + $0x40] sm:$0xff]  }
   0x7   :  { %809 = vmatprep.mubr.msk.bf16.mxu0 %vm247_vm1, %v877_v6  ;;  %841 = vmatprep.mubr.msk.bf16.mxu1 %vm247_vm1, %v878_v7  ;;  %v890_v19 = vld [vmem:[%s1318_s0 + $0xc0] sm:$0xff]   ;;  %v891_v20 = vld [vmem:[%s1318_s0 + $0x48] sm:$0xff]   ;;  %v893_v22 = vld [vmem:[%s1318_s0 + $0x50] sm:$0xff]  }
   0x8   :  { %v892_v21 = vld [vmem:[%s1318_s0 + $0xc8] sm:$0xff]   ;;  %v894_v23 = vld [vmem:[%s1318_s0 + $0xd0] sm:$0xff]   ;;  %v895_v24 = vld [vmem:[%s1318_s0 + $0x58] sm:$0xff]  }
   0x9   :  { %v896_v25 = vld [vmem:[%s1318_s0 + $0xd8] sm:$0xff]   ;;  %v897_v26 = vld [vmem:[%s1318_s0 + $0x60] sm:$0xff]   ;;  %v899_v28 = vld [vmem:[%s1318_s0 + $0x68] sm:$0xff]  }
   0xa   :  { %v898_v27 = vld [vmem:[%s1318_s0 + $0xe0] sm:$0xff]   ;;  %v900_v29 = vld [vmem:[%s1318_s0 + $0xe8] sm:$0xff]   ;;  %v901_v30 = vld [vmem:[%s1318_s0 + $0x70] sm:$0xff]  }
   0xb   :  { %v902_v31 = vld [vmem:[%s1318_s0 + $0xf0] sm:$0xff]   ;;  %v903_v32 = vld [vmem:[%s1318_s0 + $0x78] sm:$0xff]   ;;  %v1059_v34 = vld [vmem:[%s1319_s2] ss:$0 sm:$0xff] }
   0xc   :  { %v904_v33 = vld [vmem:[%s1318_s0 + $0xf8] sm:$0xff]  }
   0xe   :  { %810 = vmatmul.mubr.msk.bf16.gmra.mxu0 %vm247_vm1, %v879_v8  ;;  %842 = vmatmul.mubr.msk.bf16.gmra.mxu1 %vm247_vm1, %v880_v9 }
   0xf   :  { %813 = vmatprep.mubr.msk.bf16.mxu0 %vm247_vm1, %v881_v10  ;;  %845 = vmatprep.mubr.msk.bf16.mxu1 %vm247_vm1, %v882_v11 }
  0x16   :  { %814 = vmatmul.mubr.msk.bf16.gmra.mxu0 %vm247_vm1, %v883_v12  ;;  %846 = vmatmul.mubr.msk.bf16.gmra.mxu1 %vm247_vm1, %v884_v13 }
  0x17   :  { %817 = vmatprep.mubr.msk.bf16.mxu0 %vm247_vm1, %v885_v14  ;;  %849 = vmatprep.mubr.msk.bf16.mxu1 %vm247_vm1, %v886_v15 }
  0x1e   :  { %818 = vmatmul.mubr.msk.bf16.gmra.mxu0 %vm247_vm1, %v887_v16  ;;  %850 = vmatmul.mubr.msk.bf16.gmra.mxu1 %vm247_vm1, %v888_v17 }
  0x1f   :  { %821 = vmatprep.mubr.msk.bf16.mxu0 %vm247_vm1, %v889_v18  ;;  %853 = vmatprep.mubr.msk.bf16.mxu1 %vm247_vm1, %v890_v19 }
  0x26   :  { %822 = vmatmul.mubr.msk.bf16.gmra.mxu0 %vm247_vm1, %v891_v20  ;;  %854 = vmatmul.mubr.msk.bf16.gmra.mxu1 %vm247_vm1, %v892_v21 }
  0x27   :  { %825 = vmatprep.mubr.msk.bf16.mxu0 %vm247_vm1, %v893_v22  ;;  %857 = vmatprep.mubr.msk.bf16.mxu1 %vm247_vm1, %v894_v23 }
  0x2e   :  { %826 = vmatmul.mubr.msk.bf16.gmra.mxu0 %vm247_vm1, %v895_v24  ;;  %858 = vmatmul.mubr.msk.bf16.gmra.mxu1 %vm247_vm1, %v896_v25 }
  0x2f   :  { %829 = vmatprep.mubr.msk.bf16.mxu0 %vm247_vm1, %v897_v26  ;;  %861 = vmatprep.mubr.msk.bf16.mxu1 %vm247_vm1, %v898_v27 }
  0x36   :  { %830 = vmatmul.mubr.msk.bf16.gmra.mxu0 %vm247_vm1, %v899_v28  ;;  %862 = vmatmul.mubr.msk.bf16.gmra.mxu1 %vm247_vm1, %v900_v29 }
  0x37   :  { %833 = vmatprep.mubr.msk.bf16.mxu0 %vm247_vm1, %v901_v30  ;;  %865 = vmatprep.mubr.msk.bf16.mxu1 %vm247_vm1, %v902_v31 }
  0x3e   :  { %834 = vmatmul.mubr.msk.bf16.gmra.mxu0 %vm247_vm1, %v903_v32  ;;  %866 = vmatmul.mubr.msk.bf16.gmra.mxu1 %vm247_vm1, %v904_v33 }
  0xc6   :  { %v807_v35 = vpop.f32.mrf.mxu0  ;;  %v839_v37 = vpop.f32.mrf.mxu1 }
  0xc7   :  { %v391_v36 = vadd.f32 %v807_v35, %v1059_v34  ;;  %v519_v38 = vadd.f32 %v839_v37, %v1059_v34 }
  0xc8   :  { %v382_v39 = vpop.f32.mrf.mxu0  ;;  %v510_v41 = vpop.f32.mrf.mxu1 }
  0xc9   :  { %639 = vst [vmem:[%s1320_s3 + $0x10] sm:$0xff] %v391_v36  ;;  %v383_v40 = vadd.f32 %v1059_v34, %v382_v39  ;;  %671 = vst [vmem:[%s1320_s3 + $0x110] sm:$0xff] %v519_v38  ;;  %v511_v42 = vadd.f32 %v1059_v34, %v510_v41 }
  0xca   :  { %v808_v43 = vpop.f32.mrf.mxu0  ;;  %v840_v45 = vpop.f32.mrf.mxu1 }
  0xcb   :  { %637 = vst [vmem:[%s1320_s3] sm:$0xff] %v383_v40  ;;  %v394_v44 = vadd.f32 %v808_v43, %v1059_v34  ;;  %669 = vst [vmem:[%s1320_s3 + $0x100] sm:$0xff] %v511_v42  ;;  %v522_v46 = vadd.f32 %v840_v45, %v1059_v34 }
  0xcc   :  { %v385_v47 = vpop.f32.mrf.mxu0  ;;  %v513_v49 = vpop.f32.mrf.mxu1 }
  0xcd   :  { %640 = vst [vmem:[%s1320_s3 + $0x18] sm:$0xff] %v394_v44  ;;  %v386_v48 = vadd.f32 %v1059_v34, %v385_v47  ;;  %672 = vst [vmem:[%s1320_s3 + $0x118] sm:$0xff] %v522_v46  ;;  %v514_v50 = vadd.f32 %v1059_v34, %v513_v49 }
  0xce   :  { %v811_v51 = vpop.f32.mrf.mxu0  ;;  %v843_v53 = vpop.f32.mrf.mxu1 }
  0xcf   :  { %638 = vst [vmem:[%s1320_s3 + $0x8] sm:$0xff] %v386_v48  ;;  %v407_v52 = vadd.f32 %v811_v51, %v1059_v34  ;;  %670 = vst [vmem:[%s1320_s3 + $0x108] sm:$0xff] %v514_v50  ;;  %v535_v54 = vadd.f32 %v843_v53, %v1059_v34 }
  0xd0   :  { %v398_v55 = vpop.f32.mrf.mxu0  ;;  %v526_v57 = vpop.f32.mrf.mxu1 }
  0xd1   :  { %643 = vst [vmem:[%s1320_s3 + $0x30] sm:$0xff] %v407_v52  ;;  %v399_v56 = vadd.f32 %v1059_v34, %v398_v55  ;;  %675 = vst [vmem:[%s1320_s3 + $0x130] sm:$0xff] %v535_v54  ;;  %v527_v58 = vadd.f32 %v1059_v34, %v526_v57 }
  0xd2   :  { %v812_v59 = vpop.f32.mrf.mxu0  ;;  %v844_v61 = vpop.f32.mrf.mxu1 }
  0xd3   :  { %641 = vst [vmem:[%s1320_s3 + $0x20] sm:$0xff] %v399_v56  ;;  %v410_v60 = vadd.f32 %v812_v59, %v1059_v34  ;;  %673 = vst [vmem:[%s1320_s3 + $0x120] sm:$0xff] %v527_v58  ;;  %v538_v62 = vadd.f32 %v844_v61, %v1059_v34 }
  0xd4   :  { %v401_v63 = vpop.f32.mrf.mxu0  ;;  %v529_v1 = vpop.f32.mrf.mxu1 }
  0xd5   :  { %644 = vst [vmem:[%s1320_s3 + $0x38] sm:$0xff] %v410_v60  ;;  %v402_v0 = vadd.f32 %v1059_v34, %v401_v63  ;;  %676 = vst [vmem:[%s1320_s3 + $0x138] sm:$0xff] %v538_v62  ;;  %v530_v2 = vadd.f32 %v1059_v34, %v529_v1 }
  0xd6   :  { %v815_v3 = vpop.f32.mrf.mxu0  ;;  %v847_v5 = vpop.f32.mrf.mxu1 }
  0xd7   :  { %642 = vst [vmem:[%s1320_s3 + $0x28] sm:$0xff] %v402_v0  ;;  %v423_v4 = vadd.f32 %v815_v3, %v1059_v34  ;;  %674 = vst [vmem:[%s1320_s3 + $0x128] sm:$0xff] %v530_v2  ;;  %v551_v6 = vadd.f32 %v847_v5, %v1059_v34 }
  0xd8   :  { %v414_v7 = vpop.f32.mrf.mxu0  ;;  %v542_v9 = vpop.f32.mrf.mxu1 }
  0xd9   :  { %647 = vst [vmem:[%s1320_s3 + $0x50] sm:$0xff] %v423_v4  ;;  %v415_v8 = vadd.f32 %v1059_v34, %v414_v7  ;;  %679 = vst [vmem:[%s1320_s3 + $0x150] sm:$0xff] %v551_v6  ;;  %v543_v10 = vadd.f32 %v1059_v34, %v542_v9 }
  0xda   :  { %v816_v11 = vpop.f32.mrf.mxu0  ;;  %v848_v13 = vpop.f32.mrf.mxu1 }
  0xdb   :  { %645 = vst [vmem:[%s1320_s3 + $0x40] sm:$0xff] %v415_v8  ;;  %v426_v12 = vadd.f32 %v816_v11, %v1059_v34  ;;  %677 = vst [vmem:[%s1320_s3 + $0x140] sm:$0xff] %v543_v10  ;;  %v554_v14 = vadd.f32 %v848_v13, %v1059_v34 }
  0xdc   :  { %v417_v15 = vpop.f32.mrf.mxu0  ;;  %v545_v17 = vpop.f32.mrf.mxu1 }
  0xdd   :  { %648 = vst [vmem:[%s1320_s3 + $0x58] sm:$0xff] %v426_v12  ;;  %v418_v16 = vadd.f32 %v1059_v34, %v417_v15  ;;  %680 = vst [vmem:[%s1320_s3 + $0x158] sm:$0xff] %v554_v14  ;;  %v546_v18 = vadd.f32 %v1059_v34, %v545_v17 }
  0xde   :  { %v819_v19 = vpop.f32.mrf.mxu0  ;;  %v851_v21 = vpop.f32.mrf.mxu1 }
  0xdf   :  { %646 = vst [vmem:[%s1320_s3 + $0x48] sm:$0xff] %v418_v16  ;;  %v439_v20 = vadd.f32 %v819_v19, %v1059_v34  ;;  %678 = vst [vmem:[%s1320_s3 + $0x148] sm:$0xff] %v546_v18  ;;  %v567_v22 = vadd.f32 %v851_v21, %v1059_v34 }
  0xe0   :  { %v430_v23 = vpop.f32.mrf.mxu0  ;;  %v558_v25 = vpop.f32.mrf.mxu1 }
  0xe1   :  { %651 = vst [vmem:[%s1320_s3 + $0x70] sm:$0xff] %v439_v20  ;;  %v431_v24 = vadd.f32 %v1059_v34, %v430_v23  ;;  %683 = vst [vmem:[%s1320_s3 + $0x170] sm:$0xff] %v567_v22  ;;  %v559_v26 = vadd.f32 %v1059_v34, %v558_v25 }
  0xe2   :  { %v820_v27 = vpop.f32.mrf.mxu0  ;;  %v852_v29 = vpop.f32.mrf.mxu1 }
  0xe3   :  { %649 = vst [vmem:[%s1320_s3 + $0x60] sm:$0xff] %v431_v24  ;;  %v442_v28 = vadd.f32 %v820_v27, %v1059_v34  ;;  %681 = vst [vmem:[%s1320_s3 + $0x160] sm:$0xff] %v559_v26  ;;  %v570_v30 = vadd.f32 %v852_v29, %v1059_v34 }
  0xe4   :  { %v433_v31 = vpop.f32.mrf.mxu0  ;;  %v561_v33 = vpop.f32.mrf.mxu1 }
  0xe5   :  { %652 = vst [vmem:[%s1320_s3 + $0x78] sm:$0xff] %v442_v28  ;;  %v434_v32 = vadd.f32 %v1059_v34, %v433_v31  ;;  %684 = vst [vmem:[%s1320_s3 + $0x178] sm:$0xff] %v570_v30  ;;  %v562_v35 = vadd.f32 %v1059_v34, %v561_v33 }
  0xe6   :  { %v823_v36 = vpop.f32.mrf.mxu0  ;;  %v855_v38 = vpop.f32.mrf.mxu1 }
  0xe7   :  { %650 = vst [vmem:[%s1320_s3 + $0x68] sm:$0xff] %v434_v32  ;;  %v455_v37 = vadd.f32 %v823_v36, %v1059_v34  ;;  %682 = vst [vmem:[%s1320_s3 + $0x168] sm:$0xff] %v562_v35  ;;  %v583_v39 = vadd.f32 %v855_v38, %v1059_v34 }
  0xe8   :  { %v446_v40 = vpop.f32.mrf.mxu0  ;;  %v574_v42 = vpop.f32.mrf.mxu1 }
  0xe9   :  { %655 = vst [vmem:[%s1320_s3 + $0x90] sm:$0xff] %v455_v37  ;;  %v447_v41 = vadd.f32 %v1059_v34, %v446_v40  ;;  %687 = vst [vmem:[%s1320_s3 + $0x190] sm:$0xff] %v583_v39  ;;  %v575_v43 = vadd.f32 %v1059_v34, %v574_v42 }
  0xea   :  { %v824_v44 = vpop.f32.mrf.mxu0  ;;  %v856_v46 = vpop.f32.mrf.mxu1 }
  0xeb   :  { %653 = vst [vmem:[%s1320_s3 + $0x80] sm:$0xff] %v447_v41  ;;  %v458_v45 = vadd.f32 %v824_v44, %v1059_v34  ;;  %685 = vst [vmem:[%s1320_s3 + $0x180] sm:$0xff] %v575_v43  ;;  %v586_v47 = vadd.f32 %v856_v46, %v1059_v34 }
  0xec   :  { %v449_v48 = vpop.f32.mrf.mxu0  ;;  %v577_v50 = vpop.f32.mrf.mxu1 }
  0xed   :  { %656 = vst [vmem:[%s1320_s3 + $0x98] sm:$0xff] %v458_v45  ;;  %v450_v49 = vadd.f32 %v1059_v34, %v449_v48  ;;  %688 = vst [vmem:[%s1320_s3 + $0x198] sm:$0xff] %v586_v47  ;;  %v578_v51 = vadd.f32 %v1059_v34, %v577_v50 }
  0xee   :  { %v827_v52 = vpop.f32.mrf.mxu0  ;;  %v859_v54 = vpop.f32.mrf.mxu1 }
  0xef   :  { %654 = vst [vmem:[%s1320_s3 + $0x88] sm:$0xff] %v450_v49  ;;  %v471_v53 = vadd.f32 %v827_v52, %v1059_v34  ;;  %686 = vst [vmem:[%s1320_s3 + $0x188] sm:$0xff] %v578_v51  ;;  %v599_v55 = vadd.f32 %v859_v54, %v1059_v34 }
  0xf0   :  { %v462_v56 = vpop.f32.mrf.mxu0  ;;  %v590_v58 = vpop.f32.mrf.mxu1 }
  0xf1   :  { %659 = vst [vmem:[%s1320_s3 + $0xb0] sm:$0xff] %v471_v53  ;;  %v463_v57 = vadd.f32 %v1059_v34, %v462_v56  ;;  %691 = vst [vmem:[%s1320_s3 + $0x1b0] sm:$0xff] %v599_v55  ;;  %v591_v59 = vadd.f32 %v1059_v34, %v590_v58 }
  0xf2   :  { %v828_v60 = vpop.f32.mrf.mxu0  ;;  %v860_v62 = vpop.f32.mrf.mxu1 }
  0xf3   :  { %657 = vst [vmem:[%s1320_s3 + $0xa0] sm:$0xff] %v463_v57  ;;  %v474_v61 = vadd.f32 %v828_v60, %v1059_v34  ;;  %689 = vst [vmem:[%s1320_s3 + $0x1a0] sm:$0xff] %v591_v59  ;;  %v602_v63 = vadd.f32 %v860_v62, %v1059_v34 }
  0xf4   :  { %v465_v0 = vpop.f32.mrf.mxu0  ;;  %v593_v2 = vpop.f32.mrf.mxu1 }
  0xf5   :  { %660 = vst [vmem:[%s1320_s3 + $0xb8] sm:$0xff] %v474_v61  ;;  %v466_v1 = vadd.f32 %v1059_v34, %v465_v0  ;;  %692 = vst [vmem:[%s1320_s3 + $0x1b8] sm:$0xff] %v602_v63  ;;  %v594_v3 = vadd.f32 %v1059_v34, %v593_v2 }
  0xf6   :  { %v831_v4 = vpop.f32.mrf.mxu0  ;;  %v863_v6 = vpop.f32.mrf.mxu1 }
  0xf7   :  { %658 = vst [vmem:[%s1320_s3 + $0xa8] sm:$0xff] %v466_v1  ;;  %v487_v5 = vadd.f32 %v831_v4, %v1059_v34  ;;  %690 = vst [vmem:[%s1320_s3 + $0x1a8] sm:$0xff] %v594_v3  ;;  %v615_v7 = vadd.f32 %v863_v6, %v1059_v34 }
  0xf8   :  { %v478_v8 = vpop.f32.mrf.mxu0  ;;  %v606_v10 = vpop.f32.mrf.mxu1 }
  0xf9   :  { %663 = vst [vmem:[%s1320_s3 + $0xd0] sm:$0xff] %v487_v5  ;;  %v479_v9 = vadd.f32 %v1059_v34, %v478_v8  ;;  %695 = vst [vmem:[%s1320_s3 + $0x1d0] sm:$0xff] %v615_v7  ;;  %v607_v11 = vadd.f32 %v1059_v34, %v606_v10 }
  0xfa   :  { %v832_v12 = vpop.f32.mrf.mxu0  ;;  %v864_v14 = vpop.f32.mrf.mxu1 }
  0xfb   :  { %661 = vst [vmem:[%s1320_s3 + $0xc0] sm:$0xff] %v479_v9  ;;  %v490_v13 = vadd.f32 %v832_v12, %v1059_v34  ;;  %693 = vst [vmem:[%s1320_s3 + $0x1c0] sm:$0xff] %v607_v11  ;;  %v618_v15 = vadd.f32 %v864_v14, %v1059_v34 }
  0xfc   :  { %v481_v16 = vpop.f32.mrf.mxu0  ;;  %v609_v18 = vpop.f32.mrf.mxu1 }
  0xfd   :  { %664 = vst [vmem:[%s1320_s3 + $0xd8] sm:$0xff] %v490_v13  ;;  %v482_v17 = vadd.f32 %v1059_v34, %v481_v16  ;;  %696 = vst [vmem:[%s1320_s3 + $0x1d8] sm:$0xff] %v618_v15  ;;  %v610_v19 = vadd.f32 %v1059_v34, %v609_v18 }
  0xfe   :  { %v835_v20 = vpop.f32.mrf.mxu0  ;;  %v867_v22 = vpop.f32.mrf.mxu1 }
  0xff   :  { %662 = vst [vmem:[%s1320_s3 + $0xc8] sm:$0xff] %v482_v17  ;;  %v503_v21 = vadd.f32 %v835_v20, %v1059_v34  ;;  %694 = vst [vmem:[%s1320_s3 + $0x1c8] sm:$0xff] %v610_v19  ;;  %v631_v23 = vadd.f32 %v867_v22, %v1059_v34 }
 0x100   :  { %v494_v24 = vpop.f32.mrf.mxu0  ;;  %v622_v26 = vpop.f32.mrf.mxu1 }
 0x101   :  { %667 = vst [vmem:[%s1320_s3 + $0xf0] sm:$0xff] %v503_v21  ;;  %v495_v25 = vadd.f32 %v1059_v34, %v494_v24  ;;  %699 = vst [vmem:[%s1320_s3 + $0x1f0] sm:$0xff] %v631_v23  ;;  %v623_v27 = vadd.f32 %v1059_v34, %v622_v26 }
 0x102   :  { %v836_v28 = vpop.f32.mrf.mxu0  ;;  %v868_v30 = vpop.f32.mrf.mxu1 }
 0x103   :  { %665 = vst [vmem:[%s1320_s3 + $0xe0] sm:$0xff] %v495_v25  ;;  %v506_v29 = vadd.f32 %v836_v28, %v1059_v34  ;;  %697 = vst [vmem:[%s1320_s3 + $0x1e0] sm:$0xff] %v623_v27  ;;  %v634_v31 = vadd.f32 %v868_v30, %v1059_v34 }
 0x104   :  { %v497_v32 = vpop.f32.mrf.mxu0  ;;  %v625_v35 = vpop.f32.mrf.mxu1 }
 0x105   :  { %668 = vst [vmem:[%s1320_s3 + $0xf8] sm:$0xff] %v506_v29  ;;  %v498_v33 = vadd.f32 %v1059_v34, %v497_v32  ;;  %700 = vst [vmem:[%s1320_s3 + $0x1f8] sm:$0xff] %v634_v31  ;;  %v626_v36 = vadd.f32 %v1059_v34, %v625_v35 }
 0x107   :  { %666 = vst [vmem:[%s1320_s3 + $0xe8] sm:$0xff] %v498_v33  ;;  %698 = vst [vmem:[%s1320_s3 + $0x1e8] sm:$0xff] %v626_v36 }

// kernel: upsampled_part.6
= control target key start
LH: loop header
LB: loop body
LE: loop exit
PB: predicated region body
PF: predicated region fallthrough
CT: control target
= control target key end

     0   :  { %s3073_s15 = smov 0   ;;  %s4404_s0 = inlined_call_operand.vmem [shape: bf16[2048,72], index: 0, kind: input, shape index: {}]   ;;  %s4405_s1 = inlined_call_operand.vmem [shape: bf16[72,128], index: 1, kind: input, shape index: {}]   ;;  %s4406_s2 = inlined_call_operand.vmem [shape: f32[1,128], index: 2, kind: input, shape index: {}]   ;;  %s4407_s3 = inlined_call_operand.vmem [shape: f32[2048,128], index: 3, kind: output, shape index: {0}]   ;;  %s4408_s4 = inlined_call_operand.vmem [shape: f32[16,128], index: 4, kind: output, shape index: {1}]  }
   0x1 LB: > { %s3079_s16 = sadd.s32 4294967295, %s3046_s15   ;;  %p2580_p0 = scmp.ge.s32.totalorder %s3046_s15, 1  ;;  %s3046_s15 = sphi %s3073_s15, %s15_s15  }
   0x2   : > { %p166_p1 = scmp.lt.s32.totalorder %s3046_s15, 3 }
   0x4   : > { %p167_p2 = pnand %p2580_p0, %p166_p1 }
   0x6   : > { %170 = sbr.rel (%p167_p2) target bundleno = 507 (0x1fb), region = 32 }
   0xb   : > { %v2950_v0 = vld [vmem:[%s4405_s1 + $0x20] ss:$0 sps:$4 sm:$0xff]   ;;  %vm897_vm0 = vcmask 1043456   ;;  %v2951_v1 = vld [vmem:[%s4405_s1 + $0x18] sm:$0xff]   ;;  %s2581_s21 = sshll.u32 %s3079_s16, 7  ;;  %v2952_v3 = vld [vmem:[%s4405_s1 + $0x10] sm:$0xff]  }
   0xc   : > { %2940 = vmatprep.subr.msk.bf16.mxu0 %vm897_vm0, %v2950_v0  ;;  %v899_v2 = vsel %vm897_vm0, %v2950_v0, 0  ;;  %2941 = vmatprep.subr.msk.bf16.mxu1 %vm897_vm0, %v2950_v0  ;;  %p197_p3 = scmp.lt.s32.totalorder %s2581_s21, 255  ;;  %v2953_v4 = vld [vmem:[%s4405_s1 + $0x8] sm:$0xff]   ;;  %vm704_vm1 = vcmask 588800   ;;  %v2954_v6 = vld [vmem:[%s4405_s1] sm:$0xff]   ;;  %s2720_s6 = sshll.u32 %s3079_s16, 10 }
   0xd   : > { %2793 = vmatpush3.bf16.msra.mxu0 %v899_v2  ;;  %2935 = vmatpush3.bf16.msra.mxu1 %v899_v2  ;;  %p208_p4 = scmp.lt.s32.totalorder %s3079_s16, 1 }
   0xe   : > { %2794 = vmatprep.subr.bf16.mxu0 %v2951_v1  ;;  %2931 = vmatprep.subr.bf16.mxu1 %v2951_v1  ;;  %s4416_s21 = smov (!%p197_p3, %s2581_s21), 255 }
   0xf   : > { %s2582_s26 = sshll.u32 %s4416_s21, 2  ;;  %s2584_s7 = sshll.u32 %s4416_s21, 3 }
  0x10   : > { %s3102_s29 = scalar_lea.vmem %s4404_s0, %s2582_s26  ;;  %s3254_s12 = scalar_lea.vmem %s4407_s3, %s2584_s7 }
  0x11   : > { %2795 = vmatpush3.bf16.msra.mxu0 %v2951_v1  ;;  %2936 = vmatpush3.bf16.msra.mxu1 %v2951_v1  ;;  %v2955_v5 = vld [vmem:[%s3102_s29] sm:$0xff]   ;;  %v2956_v7 = vld [vmem:[%s3102_s29 + $0x8] sm:$0xff]   ;;  %v2957_v8 = vld [vmem:[%s3102_s29 + $0x10] sm:$0xff]   ;;  %s4418_s16 = smov (!%p208_p4, %s3079_s16), 1 }
  0x12   : > { %2796 = vmatprep.subr.bf16.mxu0 %v2952_v3  ;;  %2932 = vmatprep.subr.bf16.mxu1 %v2952_v3  ;;  %v2958_v9 = vld [vmem:[%s3102_s29 + $0x18] sm:$0xff]   ;;  %v2959_v10 = vld [vmem:[%s3102_s29 + $0x20] sm:$0xff]   ;;  %v2960_v11 = vld [vmem:[%s3102_s29 + $0x28] sm:$0xff]   ;;  %s2585_s19 = sshll.u32 %s4418_s16, 3 }
  0x13   : > { %2802 = vmatprep.mubr.msk.bf16.mxu0 %vm704_vm1, %v2955_v5  ;;  %v2961_v12 = vld [vmem:[%s3102_s29 + $0x30] sm:$0xff]   ;;  %v2962_v13 = vld [vmem:[%s3102_s29 + $0x38] sm:$0xff]   ;;  %v2963_v14 = vld [vmem:[%s3102_s29 + $0x40] sm:$0xff]   ;;  %s211_s22 = scalar_lea.vmem %s4408_s4, %s2585_s19 }
  0x14   : > { %v2987_v15 = vld [vmem:[%s3102_s29 + $0x100] sm:$0xff]   ;;  %v2988_v16 = vld [vmem:[%s3102_s29 + $0x108] sm:$0xff]   ;;  %v2989_v17 = vld [vmem:[%s3102_s29 + $0x110] sm:$0xff]  }
  0x15   : > { %2797 = vmatpush3.bf16.msra.mxu0 %v2952_v3  ;;  %2937 = vmatpush3.bf16.msra.mxu1 %v2952_v3  ;;  %v2964_v18 = vld [vmem:[%s3102_s29 + $0x48] sm:$0xff]   ;;  %v2990_v19 = vld [vmem:[%s3102_s29 + $0x118] sm:$0xff]   ;;  %v2991_v20 = vld [vmem:[%s3102_s29 + $0x120] sm:$0xff]  }
  0x16   : > { %2798 = vmatprep.subr.bf16.mxu0 %v2953_v4  ;;  %2933 = vmatprep.subr.bf16.mxu1 %v2953_v4  ;;  %v2965_v21 = vld [vmem:[%s3102_s29 + $0x50] sm:$0xff]   ;;  %v2966_v22 = vld [vmem:[%s3102_s29 + $0x58] sm:$0xff]   ;;  %v2992_v23 = vld [vmem:[%s3102_s29 + $0x128] sm:$0xff]  }
  0x17   : > { %2866 = vmatprep.mubr.msk.bf16.mxu1 %vm704_vm1, %v2987_v15  ;;  %v2993_v24 = vld [vmem:[%s3102_s29 + $0x130] sm:$0xff]   ;;  %v2967_v25 = vld [vmem:[%s3102_s29 + $0x60] sm:$0xff]   ;;  %v2994_v26 = vld [vmem:[%s3102_s29 + $0x138] sm:$0xff]  }
  0x18   : > { %v2968_v27 = vld [vmem:[%s3102_s29 + $0x68] sm:$0xff]   ;;  %v2995_v28 = vld [vmem:[%s3102_s29 + $0x140] sm:$0xff]   ;;  %v2969_v29 = vld [vmem:[%s3102_s29 + $0x70] sm:$0xff]  }
  0x19   : > { %2799 = vmatpush3.bf16.msra.mxu0 %v2953_v4  ;;  %2938 = vmatpush3.bf16.msra.mxu1 %v2953_v4  ;;  %v2996_v30 = vld [vmem:[%s3102_s29 + $0x148] sm:$0xff]   ;;  %v2970_v31 = vld [vmem:[%s3102_s29 + $0x78] sm:$0xff]   ;;  %v2997_v32 = vld [vmem:[%s3102_s29 + $0x150] sm:$0xff]  }
  0x1a   : > { %2800 = vmatprep.subr.bf16.mxu0 %v2954_v6  ;;  %2934 = vmatprep.subr.bf16.mxu1 %v2954_v6  ;;  %v2971_v33 = vld [vmem:[%s3102_s29 + $0x80] sm:$0xff]   ;;  %v2998_v34 = vld [vmem:[%s3102_s29 + $0x158] sm:$0xff]   ;;  %v2972_v35 = vld [vmem:[%s3102_s29 + $0x88] sm:$0xff]  }
  0x1b   : > { %v2999_v36 = vld [vmem:[%s3102_s29 + $0x160] sm:$0xff]   ;;  %v2973_v37 = vld [vmem:[%s3102_s29 + $0x90] sm:$0xff]   ;;  %v3000_v38 = vld [vmem:[%s3102_s29 + $0x168] sm:$0xff]  }
  0x1c   : > { %v2974_v39 = vld [vmem:[%s3102_s29 + $0x98] sm:$0xff]   ;;  %v3001_v40 = vld [vmem:[%s3102_s29 + $0x170] sm:$0xff]   ;;  %v2975_v41 = vld [vmem:[%s3102_s29 + $0xa0] sm:$0xff]  }
  0x1d   : > { %2801 = vmatpush3.bf16.msra.mxu0 %v2954_v6  ;;  %2939 = vmatpush3.bf16.msra.mxu1 %v2954_v6  ;;  %v3002_v42 = vld [vmem:[%s3102_s29 + $0x178] sm:$0xff]   ;;  %v2976_v43 = vld [vmem:[%s3102_s29 + $0xa8] sm:$0xff]   ;;  %v3003_v44 = vld [vmem:[%s3102_s29 + $0x180] sm:$0xff]   ;;  %v1575_v6 = vlaneseq }
  0x1e   : > { %v2977_v45 = vld [vmem:[%s3102_s29 + $0xb0] sm:$0xff]   ;;  %v3004_v46 = vld [vmem:[%s3102_s29 + $0x188] sm:$0xff]   ;;  %v2978_v47 = vld [vmem:[%s3102_s29 + $0xb8] sm:$0xff]  }
  0x1f   : > { %v3005_v48 = vld [vmem:[%s3102_s29 + $0x190] sm:$0xff]   ;;  %v2979_v49 = vld [vmem:[%s3102_s29 + $0xc0] sm:$0xff]   ;;  %v3006_v50 = vld [vmem:[%s3102_s29 + $0x198] sm:$0xff]  }
  0x20   : > { %2803 = vmatmul.mubr.msk.bf16.vlgmr.msra.gmra.mxu0 %vm704_vm1, %v2956_v7  ;;  %2867 = vmatmul.mubr.msk.bf16.vlgmr.msra.gmra.mxu1 %vm704_vm1, %v2988_v16  ;;  %v2980_v51 = vld [vmem:[%s3102_s29 + $0xc8] sm:$0xff]   ;;  %v3007_v52 = vld [vmem:[%s3102_s29 + $0x1a0] sm:$0xff]   ;;  %v2981_v53 = vld [vmem:[%s3102_s29 + $0xd0] sm:$0xff]   ;;  %v3235_v7 = vshrl.u32 %v1575_v6, 7 }
  0x21   : > { %2806 = vmatprep.mubr.msk.bf16.mxu0 %vm704_vm1, %v2957_v8  ;;  %2870 = vmatprep.mubr.msk.bf16.mxu1 %vm704_vm1, %v2989_v17  ;;  %v3008_v54 = vld [vmem:[%s3102_s29 + $0x1a8] sm:$0xff]   ;;  %v2982_v55 = vld [vmem:[%s3102_s29 + $0xd8] sm:$0xff]   ;;  %v3009_v56 = vld [vmem:[%s3102_s29 + $0x1b0] sm:$0xff]  }
  0x22   : > { %v2983_v57 = vld [vmem:[%s3102_s29 + $0xe0] sm:$0xff]   ;;  %v3010_v58 = vld [vmem:[%s3102_s29 + $0x1b8] sm:$0xff]   ;;  %v2984_v59 = vld [vmem:[%s3102_s29 + $0xe8] sm:$0xff]   ;;  %v1583_v17 = vadd.s32 56, %v3235_v7 }
  0x23   : > { %v3011_v60 = vld [vmem:[%s3102_s29 + $0x1c0] sm:$0xff]   ;;  %v2985_v61 = vld [vmem:[%s3102_s29 + $0xf0] sm:$0xff]   ;;  %v3012_v62 = vld [vmem:[%s3102_s29 + $0x1c8] sm:$0xff]  }
  0x24   : > { %v2986_v63 = vld [vmem:[%s3102_s29 + $0xf8] sm:$0xff]   ;;  %v3013_v0 = vld [vmem:[%s3102_s29 + $0x1d0] sm:$0xff]   ;;  %v3015_v2 = vld [vmem:[%s3102_s29 + $0x1e0] sm:$0xff]  }
  0x25   : > { %v3014_v1 = vld [vmem:[%s3102_s29 + $0x1d8] sm:$0xff]   ;;  %v3016_v3 = vld [vmem:[%s3102_s29 + $0x1e8] sm:$0xff]   ;;  %v3017_v4 = vld [vmem:[%s3102_s29 + $0x1f0] sm:$0xff]  }
  0x26   : > { %v3018_v5 = vld [vmem:[%s3102_s29 + $0x1f8] sm:$0xff]   ;;  %v3242_v8 = vld [vmem:[%s4406_s2] ss:$0 sm:$0xff] }
  0x28   : > { %2807 = vmatmul.mubr.msk.bf16.gmra.mxu0 %vm704_vm1, %v2958_v9  ;;  %2871 = vmatmul.mubr.msk.bf16.gmra.mxu1 %vm704_vm1, %v2990_v19  ;;  %v1578_v9 = vadd.s32 16, %v3235_v7 }
  0x29   : > { %2810 = vmatprep.mubr.msk.bf16.mxu0 %vm704_vm1, %v2959_v10  ;;  %2874 = vmatprep.mubr.msk.bf16.mxu1 %vm704_vm1, %v2991_v20  ;;  %v1579_v10 = vadd.s32 24, %v3235_v7 }
  0x30   : > { %2811 = vmatmul.mubr.msk.bf16.gmra.mxu0 %vm704_vm1, %v2960_v11  ;;  %2875 = vmatmul.mubr.msk.bf16.gmra.mxu1 %vm704_vm1, %v2992_v23  ;;  %v1577_v11 = vadd.s32 8, %v3235_v7 }
  0x31   : > { %2814 = vmatprep.mubr.msk.bf16.mxu0 %vm704_vm1, %v2961_v12  ;;  %2878 = vmatprep.mubr.msk.bf16.mxu1 %vm704_vm1, %v2993_v24  ;;  %v3247_v12 = vstv %s2720_s6 }
  0x32   : > { %v1705_v16 = vadd.s32 %v3247_v12, %v3235_v7  ;;  %v1707_v19 = vadd.s32 %v3247_v12, %v1578_v9 }
  0x34   : > { %vm1833_vm2 = vcmp.lt.s32.totalorder %v1705_v16, 2048  ;;  %vm1835_vm3 = vcmp.lt.s32.totalorder %v1707_v19, 2048 }
  0x38   : > { %2815 = vmatmul.mubr.msk.bf16.gmra.mxu0 %vm704_vm1, %v2962_v13  ;;  %2879 = vmatmul.mubr.msk.bf16.gmra.mxu1 %vm704_vm1, %v2994_v26  ;;  %v1582_v13 = vadd.s32 48, %v3235_v7 }
  0x39   : > { %2818 = vmatprep.mubr.msk.bf16.mxu0 %vm704_vm1, %v2963_v14  ;;  %2882 = vmatprep.mubr.msk.bf16.mxu1 %vm704_vm1, %v2995_v28  ;;  %v1580_v14 = vadd.s32 32, %v3235_v7  ;;  %v1581_v28 = vadd.s32 40, %v3235_v7 }
  0x3a   : > { %v3266_v24 = vadd.s32 %v3247_v12, %v1582_v13 }
  0x3c   : > { %vm1839_vm6 = vcmp.lt.s32.totalorder %v3266_v24, 2048  ;;  %v1595_v24 = vadd.s32 152, %v3235_v7 }
  0x40   : > { %2819 = vmatmul.mubr.msk.bf16.gmra.mxu0 %vm704_vm1, %v2964_v18  ;;  %2883 = vmatmul.mubr.msk.bf16.gmra.mxu1 %vm704_vm1, %v2996_v30 }
  0x41   : > { %2822 = vmatprep.mubr.msk.bf16.mxu0 %vm704_vm1, %v2965_v21  ;;  %2886 = vmatprep.mubr.msk.bf16.mxu1 %vm704_vm1, %v2997_v32  ;;  %v1708_v21 = vadd.s32 %v3247_v12, %v1579_v10  ;;  %v1591_v10 = vadd.s32 120, %v3235_v7 }
  0x43   : > { %vm1836_vm4 = vcmp.lt.s32.totalorder %v1708_v21, 2048 }
  0x48   : > { %2823 = vmatmul.mubr.msk.bf16.gmra.mxu0 %vm704_vm1, %v2966_v22  ;;  %2887 = vmatmul.mubr.msk.bf16.gmra.mxu1 %vm704_vm1, %v2998_v34  ;;  %v1706_v22 = vadd.s32 %v3247_v12, %v1577_v11 }
  0x49   : > { %2826 = vmatprep.mubr.msk.bf16.mxu0 %vm704_vm1, %v2967_v25  ;;  %2890 = vmatprep.mubr.msk.bf16.mxu1 %vm704_vm1, %v2999_v36  ;;  %v1709_v25 = vadd.s32 %v3247_v12, %v1580_v14  ;;  %v1710_v36 = vadd.s32 %v3247_v12, %v1581_v28 }
  0x4a   : > { %vm1834_vm5 = vcmp.lt.s32.totalorder %v1706_v22, 2048 }
  0x4b   : > { %vm1837_vm7 = vcmp.lt.s32.totalorder %v1709_v25, 2048  ;;  %vm1838_vm9 = vcmp.lt.s32.totalorder %v1710_v36, 2048  ;;  %v1593_v36 = vadd.s32 136, %v3235_v7 }
  0x50   : > { %2827 = vmatmul.mubr.msk.bf16.gmra.mxu0 %vm704_vm1, %v2968_v27  ;;  %2891 = vmatmul.mubr.msk.bf16.gmra.mxu1 %vm704_vm1, %v3000_v38  ;;  %v3270_v27 = vadd.s32 %v3247_v12, %v1583_v17  ;;  %v1587_v38 = vadd.s32 88, %v3235_v7 }
  0x51   : > { %2830 = vmatprep.mubr.msk.bf16.mxu0 %vm704_vm1, %v2969_v29  ;;  %2894 = vmatprep.mubr.msk.bf16.mxu1 %vm704_vm1, %v3001_v40  ;;  %v1586_v29 = vadd.s32 80, %v3235_v7 }
  0x52   : > { %vm1840_vm8 = vcmp.lt.s32.totalorder %v3270_v27, 2048 }
  0x58   : > { %2831 = vmatmul.mubr.msk.bf16.gmra.mxu0 %vm704_vm1, %v2970_v31  ;;  %2895 = vmatmul.mubr.msk.bf16.gmra.mxu1 %vm704_vm1, %v3002_v42  ;;  %v1584_v31 = vadd.s32 64, %v3235_v7 }
  0x59   : > { %2834 = vmatprep.mubr.msk.bf16.mxu0 %vm704_vm1, %v2971_v33  ;;  %2898 = vmatprep.mubr.msk.bf16.mxu1 %vm704_vm1, %v3003_v44 }
  0x5a   : > { %v1713_v42 = vadd.s32 %v3247_v12, %v1584_v31 }
  0x5c   : > { %vm1841_vm11 = vcmp.lt.s32.totalorder %v1713_v42, 2048 }
  0x60   : > { %2835 = vmatmul.mubr.msk.bf16.gmra.mxu0 %vm704_vm1, %v2972_v35  ;;  %2899 = vmatmul.mubr.msk.bf16.gmra.mxu1 %vm704_vm1, %v3004_v46 }
  0x61   : > { %2838 = vmatprep.mubr.msk.bf16.mxu0 %vm704_vm1, %v2973_v37  ;;  %2902 = vmatprep.mubr.msk.bf16.mxu1 %vm704_vm1, %v3005_v48  ;;  %v3283_v37 = vadd.s32 %v3247_v12, %v1586_v29 }
  0x63   : > { %vm1843_vm10 = vcmp.lt.s32.totalorder %v3283_v37, 2048 }
  0x68   : > { %2839 = vmatmul.mubr.msk.bf16.gmra.mxu0 %vm704_vm1, %v2974_v39  ;;  %2903 = vmatmul.mubr.msk.bf16.gmra.mxu1 %vm704_vm1, %v3006_v50  ;;  %v1590_v50 = vadd.s32 112, %v3235_v7 }
  0x69   : > { %2842 = vmatprep.mubr.msk.bf16.mxu0 %vm704_vm1, %v2975_v41  ;;  %2906 = vmatprep.mubr.msk.bf16.mxu1 %vm704_vm1, %v3007_v52 }
  0x70   : > { %2843 = vmatmul.mubr.msk.bf16.gmra.mxu0 %vm704_vm1, %v2976_v43  ;;  %2907 = vmatmul.mubr.msk.bf16.gmra.mxu1 %vm704_vm1, %v3008_v54 }
  0x71   : > { %2846 = vmatprep.mubr.msk.bf16.mxu0 %vm704_vm1, %v2977_v45  ;;  %2910 = vmatprep.mubr.msk.bf16.mxu1 %vm704_vm1, %v3009_v56  ;;  %v3296_v56 = vadd.s32 %v3247_v12, %v1587_v38 }
  0x73   : > { %vm1844_vm12 = vcmp.lt.s32.totalorder %v3296_v56, 2048 }
  0x78   : > { %2847 = vmatmul.mubr.msk.bf16.gmra.mxu0 %vm704_vm1, %v2978_v47  ;;  %2911 = vmatmul.mubr.msk.bf16.gmra.mxu1 %vm704_vm1, %v3010_v58  ;;  %v1585_v47 = vadd.s32 72, %v3235_v7 }
  0x79   : > { %2850 = vmatprep.mubr.msk.bf16.mxu0 %vm704_vm1, %v2979_v49  ;;  %2914 = vmatprep.mubr.msk.bf16.mxu1 %vm704_vm1, %v3011_v60 }
  0x80   : > { %2851 = vmatmul.mubr.msk.bf16.gmra.mxu0 %vm704_vm1, %v2980_v51  ;;  %2915 = vmatmul.mubr.msk.bf16.gmra.mxu1 %vm704_vm1, %v3012_v62  ;;  %v1588_v51 = vadd.s32 96, %v3235_v7 }
  0x81   : > { %2854 = vmatprep.mubr.msk.bf16.mxu0 %vm704_vm1, %v2981_v53  ;;  %2918 = vmatprep.mubr.msk.bf16.mxu1 %vm704_vm1, %v3013_v0 }
  0x88   : > { %2855 = vmatmul.mubr.msk.bf16.gmra.mxu0 %vm704_vm1, %v2982_v55  ;;  %2919 = vmatmul.mubr.msk.bf16.gmra.mxu1 %vm704_vm1, %v3014_v1  ;;  %v1714_v1 = vadd.s32 %v3247_v12, %v1585_v47 }
  0x89   : > { %2858 = vmatprep.mubr.msk.bf16.mxu0 %vm704_vm1, %v2983_v57  ;;  %2922 = vmatprep.mubr.msk.bf16.mxu1 %vm704_vm1, %v3015_v2  ;;  %v3307_v2 = vadd.s32 %v3247_v12, %v1590_v50 }
  0x8a   : > { %vm1842_vm13 = vcmp.lt.s32.totalorder %v1714_v1, 2048 }
  0x8b   : > { %vm1847_vm15 = vcmp.lt.s32.totalorder %v3307_v2, 2048 }
  0x90   : > { %2859 = vmatmul.mubr.msk.bf16.gmra.mxu0 %vm704_vm1, %v2984_v59  ;;  %2923 = vmatmul.mubr.msk.bf16.gmra.mxu1 %vm704_vm1, %v3016_v3  ;;  %v1589_v59 = vadd.s32 104, %v3235_v7  ;;  %v3310_v3 = vadd.s32 %v3247_v12, %v1588_v51  ;;  %v1596_v51 = vadd.s32 160, %v3235_v7 }
  0x91   : > { %2862 = vmatprep.mubr.msk.bf16.mxu0 %vm704_vm1, %v2985_v61  ;;  %2926 = vmatprep.mubr.msk.bf16.mxu1 %vm704_vm1, %v3017_v4 }
  0x92   : > { %vm1845_vm14 = vcmp.lt.s32.totalorder %v3310_v3, 2048  ;;  %v1597_v3 = vadd.s32 168, %v3235_v7 }
  0x94   : > { %v3401_v2 = vadd.s32 %v3247_v12, %v1597_v3 }
  0x98   : > { %2863 = vmatmul.mubr.msk.bf16.gmra.mxu0 %vm704_vm1, %v2986_v63  ;;  %2927 = vmatmul.mubr.msk.bf16.gmra.mxu1 %vm704_vm1, %v3018_v5 }
  0xe0   : > { %v2804_v15 = vpop.f32.mrf.mxu0  ;;  %v2868_v42 = vpop.f32.mrf.mxu1 }
  0xe1   : > { %v944_v18 = vadd.f32 %v2804_v15, %v3242_v8  ;;  %v3320_v15 = vadd.s32 %v3247_v12, %v1589_v59  ;;  %v1200_v47 = vadd.f32 %v2868_v42, %v3242_v8  ;;  %v1600_v42 = vadd.s32 192, %v3235_v7 }
  0xe2   : > { %v935_v20 = vpop.f32.mrf.mxu0 }
  0xe3   : > { %1448 = vst [vmem:[%s3254_s12 + $0x10] sm:$0xff] %v944_v18  ;;  %v936_v23 = vadd.f32 %v3242_v8, %v935_v20  ;;  %v1963_v39 = vsel %vm1835_vm3, %v944_v18, 0.0  ;;  %v1594_v20 = vadd.s32 144, %v3235_v7  ;;  %vm1846_vm0 = vcmp.lt.s32.totalorder %v3320_v15, 2048  ;;  %1512 = vst [vmem:[%s3254_s12 + $0x210] sm:$0xff] %v1200_v47 }
  0xe4   : > { %v2805_v26 = vpop.f32.mrf.mxu0  ;;  %v2224_v52 = vmul.f32 %v1963_v39, %v1963_v39 }
  0xe5   : > { %1446 = vst [vmem:[%s3254_s12] sm:$0xff] %v936_v23  ;;  %v947_v30 = vadd.f32 %v2805_v26, %v3242_v8  ;;  %v1961_v33 = vsel %vm1833_vm2, %v936_v23, 0.0  ;;  %v1592_v23 = vadd.s32 128, %v3235_v7 }
  0xe6   : > { %v938_v32 = vpop.f32.mrf.mxu0  ;;  %v2222_v43 = vmul.f32 %v1961_v33, %v1961_v33 }
  0xe7   : > { %1449 = vst [vmem:[%s3254_s12 + $0x18] sm:$0xff] %v947_v30  ;;  %v939_v34 = vadd.f32 %v3242_v8, %v938_v32  ;;  %v1964_v48 = vsel %vm1836_vm4, %v947_v30, 0.0  ;;  %v3330_v30 = vadd.s32 %v3247_v12, %v1591_v10 }
  0xe8   : > { %v2808_v35 = vpop.f32.mrf.mxu0  ;;  %v2225_v60 = vmul.f32 %v1964_v48, %v1964_v48 }
  0xe9   : > { %1447 = vst [vmem:[%s3254_s12 + $0x8] sm:$0xff] %v939_v34  ;;  %v1962_v40 = vsel %vm1834_vm5, %v939_v34, 0.0  ;;  %v960_v41 = vadd.f32 %v2808_v35, %v3242_v8  ;;  %vm1848_vm1 = vcmp.lt.s32.totalorder %v3330_v30, 2048 }
  0xea   : > { %v2089_v44 = vadd.f32 %v1962_v40, %v1961_v33  ;;  %v2223_v45 = vmul.f32 %v1962_v40, %v1962_v40  ;;  %v951_v46 = vpop.f32.mrf.mxu0  ;;  %v3345_v40 = vadd.s32 %v3247_v12, %v1592_v23 }
  0xeb   : > { %1452 = vst [vmem:[%s3254_s12 + $0x30] sm:$0xff] %v960_v41  ;;  %v952_v49 = vadd.f32 %v3242_v8, %v951_v46  ;;  %v1967_v11 = vsel %vm1839_vm6, %v960_v41, 0.0  ;;  %v3348_v41 = vadd.s32 %v3247_v12, %v1595_v24 }
  0xec   : > { %v2090_v53 = vadd.f32 %v2089_v44, %v1963_v39  ;;  %v2350_v54 = vadd.f32 %v2223_v45, %v2222_v43  ;;  %v2809_v55 = vpop.f32.mrf.mxu0  ;;  %v2228_v25 = vmul.f32 %v1967_v11, %v1967_v11  ;;  %v3342_v39 = vadd.s32 %v3247_v12, %v1594_v20 }
  0xed   : > { %1450 = vst [vmem:[%s3254_s12 + $0x20] sm:$0xff] %v952_v49  ;;  %v1965_v57 = vsel %vm1837_vm7, %v952_v49, 0.0  ;;  %v963_v58 = vadd.f32 %v2809_v55, %v3242_v8  ;;  %vm1849_vm2 = vcmp.lt.s32.totalorder %v3345_v40, 2048  ;;  %vm1852_vm5 = vcmp.lt.s32.totalorder %v3348_v41, 2048 }
  0xee   : > { %v2091_v61 = vadd.f32 %v2090_v53, %v1964_v48  ;;  %v2351_v62 = vadd.f32 %v2350_v54, %v2224_v52  ;;  %v954_v63 = vpop.f32.mrf.mxu0  ;;  %v2226_v6 = vmul.f32 %v1965_v57, %v1965_v57  ;;  %v1191_v52 = vpop.f32.mrf.mxu1  ;;  %vm1851_vm3 = vcmp.lt.s32.totalorder %v3342_v39, 2048 }
  0xef   : > { %1453 = vst [vmem:[%s3254_s12 + $0x38] sm:$0xff] %v963_v58  ;;  %v955_v0 = vadd.f32 %v3242_v8, %v954_v63  ;;  %v1968_v21 = vsel %vm1840_vm8, %v963_v58, 0.0  ;;  %v3359_v58 = vadd.s32 %v3247_v12, %v1593_v36  ;;  %vm1854_vm8 = vcmp.lt.s32.totalorder %v3401_v2, 2048 }
  0xf0   : > { %v2352_v4 = vadd.f32 %v2351_v62, %v2225_v60  ;;  %v2092_v5 = vadd.f32 %v2091_v61, %v1965_v57  ;;  %v2812_v9 = vpop.f32.mrf.mxu0  ;;  %v2229_v32 = vmul.f32 %v1968_v21, %v1968_v21  ;;  %v1598_v60 = vadd.s32 176, %v3235_v7  ;;  %v2869_v62 = vpop.f32.mrf.mxu1 }
  0xf1   : > { %1451 = vst [vmem:[%s3254_s12 + $0x28] sm:$0xff] %v955_v0  ;;  %v1966_v13 = vsel %vm1838_vm9, %v955_v0, 0.0  ;;  %v976_v14 = vadd.f32 %v2812_v9, %v3242_v8  ;;  %v1192_v61 = vadd.f32 %v3242_v8, %v1191_v52  ;;  %v3375_v9 = vadd.s32 %v3247_v12, %v1596_v51 }
  0xf2   : > { %v2353_v16 = vadd.f32 %v2352_v4, %v2226_v6  ;;  %v2093_v17 = vadd.f32 %v2092_v5, %v1966_v13  ;;  %v2227_v18 = vmul.f32 %v1966_v13, %v1966_v13  ;;  %v967_v19 = vpop.f32.mrf.mxu0  ;;  %v1203_v5 = vadd.f32 %v2869_v62, %v3242_v8  ;;  %v1194_v10 = vpop.f32.mrf.mxu1 }
  0xf3   : > { %1456 = vst [vmem:[%s3254_s12 + $0x50] sm:$0xff] %v976_v14  ;;  %v968_v22 = vadd.f32 %v3242_v8, %v967_v19  ;;  %v1971_v48 = vsel %vm1843_vm10, %v976_v14, 0.0  ;;  %1510 = vst [vmem:[%s3254_s12 + $0x200] sm:$0xff] %v1192_v61  ;;  %vm1850_vm4 = vcmp.lt.s32.totalorder %v3359_v58, 2048  ;;  %v1599_v19 = vadd.s32 184, %v3235_v7 }
  0xf4   : > { %v2094_v26 = vadd.f32 %v2093_v17, %v1967_v11  ;;  %v2354_v28 = vadd.f32 %v2353_v16, %v2227_v18  ;;  %v2813_v29 = vpop.f32.mrf.mxu0  ;;  %v2232_v63 = vmul.f32 %v1971_v48, %v1971_v48  ;;  %1513 = vst [vmem:[%s3254_s12 + $0x218] sm:$0xff] %v1203_v5  ;;  %v3385_v18 = vadd.s32 %v3247_v12, %v1598_v60 }
  0xf5   : > { %1454 = vst [vmem:[%s3254_s12 + $0x40] sm:$0xff] %v968_v22  ;;  %v1969_v31 = vsel %vm1841_vm11, %v968_v22, 0.0  ;;  %v979_v27 = vadd.f32 %v2813_v29, %v3242_v8  ;;  %v1195_v20 = vadd.f32 %v3242_v8, %v1194_v10  ;;  %vm1853_vm6 = vcmp.lt.s32.totalorder %v3375_v9, 2048 }
  0xf6   : > { %v2095_v33 = vadd.f32 %v2094_v26, %v1968_v21  ;;  %v2355_v34 = vadd.f32 %v2354_v28, %v2228_v25  ;;  %v970_v35 = vpop.f32.mrf.mxu0  ;;  %v2230_v45 = vmul.f32 %v1969_v31, %v1969_v31  ;;  %v2872_v21 = vpop.f32.mrf.mxu1  ;;  %v1602_v26 = vadd.s32 208, %v3235_v7 }
  0xf7   : > { %1457 = vst [vmem:[%s3254_s12 + $0x58] sm:$0xff] %v979_v27  ;;  %v971_v38 = vadd.f32 %v3242_v8, %v970_v35  ;;  %v1972_v37 = vsel %vm1844_vm12, %v979_v27, 0.0  ;;  %1511 = vst [vmem:[%s3254_s12 + $0x208] sm:$0xff] %v1195_v20  ;;  %v1216_v27 = vadd.f32 %v2872_v21, %v3242_v8  ;;  %vm1855_vm7 = vcmp.lt.s32.totalorder %v3385_v18, 2048 }
  0xf8   : > { %v2356_v43 = vadd.f32 %v2355_v34, %v2229_v32  ;;  %v2096_v44 = vadd.f32 %v2095_v33, %v1969_v31  ;;  %v2816_v46 = vpop.f32.mrf.mxu0  ;;  %v2233_v11 = vmul.f32 %v1972_v37, %v1972_v37  ;;  %v1207_v32 = vpop.f32.mrf.mxu1  ;;  %v3418_v51 = vadd.s32 %v3247_v12, %v1602_v26 }
  0xf9   : > { %1455 = vst [vmem:[%s3254_s12 + $0x48] sm:$0xff] %v971_v38  ;;  %v1970_v49 = vsel %vm1842_vm13, %v971_v38, 0.0  ;;  %v992_v50 = vadd.f32 %v2816_v46, %v3242_v8  ;;  %1516 = vst [vmem:[%s3254_s12 + $0x230] sm:$0xff] %v1216_v27  ;;  %v1603_v40 = vadd.s32 216, %v3235_v7  ;;  %v3428_v60 = vadd.s32 %v3247_v12, %v1600_v42 }
  0xfa   : > { %v2357_v53 = vadd.f32 %v2356_v43, %v2230_v45  ;;  %v2097_v54 = vadd.f32 %v2096_v44, %v1970_v49  ;;  %v2231_v55 = vmul.f32 %v1970_v49, %v1970_v49  ;;  %v983_v57 = vpop.f32.mrf.mxu0  ;;  %v1208_v43 = vadd.f32 %v3242_v8, %v1207_v32  ;;  %v2873_v44 = vpop.f32.mrf.mxu1 }
  0xfb   : > { %1460 = vst [vmem:[%s3254_s12 + $0x70] sm:$0xff] %v992_v50  ;;  %v984_v59 = vadd.f32 %v3242_v8, %v983_v57  ;;  %v1975_v28 = vsel %vm1847_vm15, %v992_v50, 0.0  ;;  %v3411_v49 = vadd.s32 %v3247_v12, %v1599_v19  ;;  %v1219_v52 = vadd.f32 %v2873_v44, %v3242_v8 }
  0xfc   : > { %v2098_v0 = vadd.f32 %v2097_v54, %v1971_v48  ;;  %v2358_v1 = vadd.f32 %v2357_v53, %v2231_v55  ;;  %v2817_v4 = vpop.f32.mrf.mxu0  ;;  %v2236_v45 = vmul.f32 %v1975_v28, %v1975_v28  ;;  %1514 = vst [vmem:[%s3254_s12 + $0x220] sm:$0xff] %v1208_v43  ;;  %v1210_v53 = vpop.f32.mrf.mxu1  ;;  %v1601_v61 = vadd.s32 200, %v3235_v7 }
  0xfd   : > { %1458 = vst [vmem:[%s3254_s12 + $0x60] sm:$0xff] %v984_v59  ;;  %v1973_v56 = vsel %vm1845_vm14, %v984_v59, 0.0  ;;  %v995_v6 = vadd.f32 %v2817_v4, %v3242_v8  ;;  %1517 = vst [vmem:[%s3254_s12 + $0x238] sm:$0xff] %v1219_v52  ;;  %v1211_v62 = vadd.f32 %v3242_v8, %v1210_v53  ;;  %vm1856_vm9 = vcmp.lt.s32.totalorder %v3411_v49, 2048 }
  0xfe   : > { %v2099_v13 = vadd.f32 %v2098_v0, %v1972_v37  ;;  %v2359_v14 = vadd.f32 %v2358_v1, %v2232_v63  ;;  %v986_v16 = vpop.f32.mrf.mxu0  ;;  %v2234_v24 = vmul.f32 %v1973_v56, %v1973_v56  ;;  %v2876_v63 = vpop.f32.mrf.mxu1  ;;  %v3444_v20 = vadd.s32 %v3247_v12, %v1603_v40 }
  0xff   : > { %1461 = vst [vmem:[%s3254_s12 + $0x78] sm:$0xff] %v995_v6  ;;  %v987_v17 = vadd.f32 %v3242_v8, %v986_v16  ;;  %v1976_v15 = vsel %vm1848_vm1, %v995_v6, 0.0  ;;  %1515 = vst [vmem:[%s3254_s12 + $0x228] sm:$0xff] %v1211_v62  ;;  %v3451_v21 = vadd.s32 %v3247_v12, %v1601_v61  ;;  %vm1859_vm10 = vcmp.lt.s32.totalorder %v3418_v51, 2048 }
 0x100   : > { %v2360_v22 = vadd.f32 %v2359_v14, %v2233_v11  ;;  %v2100_v23 = vadd.f32 %v2099_v13, %v1973_v56  ;;  %v2820_v25 = vpop.f32.mrf.mxu0  ;;  %v2237_v54 = vmul.f32 %v1976_v15, %v1976_v15  ;;  %v1604_v56 = vadd.s32 224, %v3235_v7  ;;  %v1223_v14 = vpop.f32.mrf.mxu1 }
 0x101   : > { %1459 = vst [vmem:[%s3254_s12 + $0x68] sm:$0xff] %v987_v17  ;;  %v1974_v29 = vsel %vm1846_vm0, %v987_v17, 0.0  ;;  %v1008_v31 = vadd.f32 %v2820_v25, %v3242_v8  ;;  %v1232_v13 = vadd.f32 %v2876_v63, %v3242_v8  ;;  %v1607_v9 = vadd.s32 248, %v3235_v7 }
 0x102   : > { %v2361_v33 = vadd.f32 %v2360_v22, %v2234_v24  ;;  %v2101_v34 = vadd.f32 %v2100_v23, %v1974_v29  ;;  %v2235_v35 = vmul.f32 %v1974_v29, %v1974_v29  ;;  %v999_v36 = vpop.f32.mrf.mxu0  ;;  %v1224_v22 = vadd.f32 %v3242_v8, %v1223_v14  ;;  %v2877_v23 = vpop.f32.mrf.mxu1 }
 0x103   : > { %1464 = vst [vmem:[%s3254_s12 + $0x90] sm:$0xff] %v1008_v31  ;;  %v1000_v38 = vadd.f32 %v3242_v8, %v999_v36  ;;  %v1979_v6 = vsel %vm1851_vm3, %v1008_v31, 0.0  ;;  %1520 = vst [vmem:[%s3254_s12 + $0x250] sm:$0xff] %v1232_v13  ;;  %v1606_v29 = vadd.s32 240, %v3235_v7  ;;  %v3461_v27 = vadd.s32 %v3247_v12, %v1604_v56 }
 0x104   : > { %v2102_v46 = vadd.f32 %v2101_v34, %v1975_v28  ;;  %v2362_v47 = vadd.f32 %v2361_v33, %v2235_v35  ;;  %v2821_v48 = vpop.f32.mrf.mxu0  ;;  %v2240_v24 = vmul.f32 %v1979_v6, %v1979_v6  ;;  %1518 = vst [vmem:[%s3254_s12 + $0x240] sm:$0xff] %v1224_v22  ;;  %v1235_v32 = vadd.f32 %v2877_v23, %v3242_v8  ;;  %v1226_v33 = vpop.f32.mrf.mxu1 }
 0x105   : > { %1462 = vst [vmem:[%s3254_s12 + $0x80] sm:$0xff] %v1000_v38  ;;  %v1977_v30 = vsel %vm1849_vm2, %v1000_v38, 0.0  ;;  %v1011_v50 = vadd.f32 %v2821_v48, %v3242_v8  ;;  %vm1857_vm11 = vcmp.lt.s32.totalorder %v3428_v60, 2048  ;;  %vm1858_vm12 = vcmp.lt.s32.totalorder %v3451_v21, 2048 }
 0x106   : > { %v2103_v55 = vadd.f32 %v2102_v46, %v1976_v15  ;;  %v2363_v57 = vadd.f32 %v2362_v47, %v2236_v45  ;;  %v1002_v37 = vpop.f32.mrf.mxu0  ;;  %v2238_v4 = vmul.f32 %v1977_v30, %v1977_v30  ;;  %1521 = vst [vmem:[%s3254_s12 + $0x258] sm:$0xff] %v1235_v32  ;;  %v1227_v42 = vadd.f32 %v3242_v8, %v1226_v33  ;;  %v2880_v43 = vpop.f32.mrf.mxu1 }
 0x107   : > { %1465 = vst [vmem:[%s3254_s12 + $0x98] sm:$0xff] %v1011_v50  ;;  %v1003_v59 = vadd.f32 %v3242_v8, %v1002_v37  ;;  %v1980_v39 = vsel %vm1852_vm5, %v1011_v50, 0.0  ;;  %vm1860_vm13 = vcmp.lt.s32.totalorder %v3444_v20, 2048  ;;  %v3475_v48 = vadd.s32 %v3247_v12, %v1606_v29 }
 0x108   : > { %v2364_v0 = vadd.f32 %v2363_v57, %v2237_v54  ;;  %v2104_v1 = vadd.f32 %v2103_v55, %v1977_v30  ;;  %v2824_v5 = vpop.f32.mrf.mxu0  ;;  %v2241_v34 = vmul.f32 %v1980_v39, %v1980_v39  ;;  %1519 = vst [vmem:[%s3254_s12 + $0x248] sm:$0xff] %v1227_v42  ;;  %v1248_v53 = vadd.f32 %v2880_v43, %v3242_v8  ;;  %v1239_v54 = vpop.f32.mrf.mxu1 }
 0x109   : > { %1463 = vst [vmem:[%s3254_s12 + $0x88] sm:$0xff] %v1003_v59  ;;  %v1978_v10 = vsel %vm1850_vm4, %v1003_v59, 0.0  ;;  %v1024_v11 = vadd.f32 %v2824_v5, %v3242_v8  ;;  %vm1861_vm14 = vcmp.lt.s32.totalorder %v3461_v27, 2048  ;;  %v3487_v18 = vadd.s32 %v3247_v12, %v1607_v9 }
 0x10a   : > { %v2365_v16 = vadd.f32 %v2364_v0, %v2238_v4  ;;  %v2105_v3 = vadd.f32 %v2104_v1, %v1978_v10  ;;  %v2239_v17 = vmul.f32 %v1978_v10, %v1978_v10  ;;  %v1015_v19 = vpop.f32.mrf.mxu0  ;;  %v1605_v61 = vadd.s32 232, %v3235_v7  ;;  %1524 = vst [vmem:[%s3254_s12 + $0x270] sm:$0xff] %v1248_v53  ;;  %v2881_v63 = vpop.f32.mrf.mxu1 }
 0x10b   : > { %1468 = vst [vmem:[%s3254_s12 + $0xb0] sm:$0xff] %v1024_v11  ;;  %v1016_v58 = vadd.f32 %v3242_v8, %v1015_v19  ;;  %v1983_v30 = vsel %vm1855_vm7, %v1024_v11, 0.0  ;;  %v1240_v62 = vadd.f32 %v3242_v8, %v1239_v54  ;;  %v1610_v56 = vadd.s32 272, %v3235_v7 }
 0x10c   : > { %v2106_v25 = vadd.f32 %v2105_v3, %v1979_v6  ;;  %v2366_v26 = vadd.f32 %v2365_v16, %v2239_v17  ;;  %v2825_v28 = vpop.f32.mrf.mxu0  ;;  %v2244_v0 = vmul.f32 %v1983_v30, %v1983_v30  ;;  %v1608_v10 = vadd.s32 256, %v3235_v7  ;;  %v1242_v13 = vpop.f32.mrf.mxu1 }
 0x10d   : > { %1466 = vst [vmem:[%s3254_s12 + $0xa0] sm:$0xff] %v1016_v58  ;;  %v1981_v41 = vsel %vm1853_vm6, %v1016_v58, 0.0  ;;  %v1027_v31 = vadd.f32 %v2825_v28, %v3242_v8  ;;  %1522 = vst [vmem:[%s3254_s12 + $0x260] sm:$0xff] %v1240_v62  ;;  %v1251_v11 = vadd.f32 %v2881_v63, %v3242_v8  ;;  %vm1863_vm15 = vcmp.lt.s32.totalorder %v3475_v48, 2048 }
 0x10e   : > { %v2107_v35 = vadd.f32 %v2106_v25, %v1980_v39  ;;  %v2367_v36 = vadd.f32 %v2366_v26, %v2240_v24  ;;  %v1018_v15 = vpop.f32.mrf.mxu0  ;;  %v2242_v46 = vmul.f32 %v1981_v41, %v1981_v41  ;;  %v1611_v19 = vadd.s32 280, %v3235_v7  ;;  %v2884_v23 = vpop.f32.mrf.mxu1 }
 0x10f   : > { %1469 = vst [vmem:[%s3254_s12 + $0xb8] sm:$0xff] %v1027_v31  ;;  %v1019_v38 = vadd.f32 %v3242_v8, %v1018_v15  ;;  %v1984_v2 = vsel %vm1856_vm9, %v1027_v31, 0.0  ;;  %v1734_v39 = vadd.s32 %v3247_v12, %v1605_v61  ;;  %v1609_v58 = vadd.s32 264, %v3235_v7  ;;  %1525 = vst [vmem:[%s3254_s12 + $0x278] sm:$0xff] %v1251_v11 }
 0x110   : > { %v2368_v44 = vadd.f32 %v2367_v36, %v2241_v34  ;;  %v2108_v45 = vadd.f32 %v2107_v35, %v1981_v41  ;;  %v2828_v47 = vpop.f32.mrf.mxu0  ;;  %v2245_v14 = vmul.f32 %v1984_v2, %v1984_v2  ;;  %v1243_v22 = vadd.f32 %v3242_v8, %v1242_v13  ;;  %v1255_v34 = vpop.f32.mrf.mxu1 }
 0x111   : > { %1467 = vst [vmem:[%s3254_s12 + $0xa8] sm:$0xff] %v1019_v38  ;;  %v1982_v50 = vsel %vm1854_vm8, %v1019_v38, 0.0  ;;  %v1040_v52 = vadd.f32 %v2828_v47, %v3242_v8  ;;  %vm1864_vm0 = vcmp.lt.s32.totalorder %v3487_v18, 2048  ;;  %v3514_v29 = vadd.s32 %v3247_v12, %v1610_v56 }
 0x112   : > { %v2369_v55 = vadd.f32 %v2368_v44, %v2242_v46  ;;  %v2109_v57 = vadd.f32 %v2108_v45, %v1982_v50  ;;  %v2243_v37 = vmul.f32 %v1982_v50, %v1982_v50  ;;  %v1031_v40 = vpop.f32.mrf.mxu0  ;;  %v3523_v33 = vadd.s32 %v3247_v12, %v1608_v10  ;;  %1523 = vst [vmem:[%s3254_s12 + $0x268] sm:$0xff] %v1243_v22  ;;  %v2885_v44 = vpop.f32.mrf.mxu1 }
 0x113   : > { %1472 = vst [vmem:[%s3254_s12 + $0xd0] sm:$0xff] %v1040_v52  ;;  %v1032_v59 = vadd.f32 %v3242_v8, %v1031_v40  ;;  %v1987_v41 = vsel %vm1859_vm10, %v1040_v52, 0.0  ;;  %v3527_v38 = vadd.s32 %v3247_v12, %v1611_v19  ;;  %v3534_v42 = vadd.s32 %v3247_v12, %v1609_v58 }
 0x114   : > { %v2110_v1 = vadd.f32 %v2109_v57, %v1983_v30  ;;  %v2370_v4 = vadd.f32 %v2369_v55, %v2243_v37  ;;  %v2829_v5 = vpop.f32.mrf.mxu0  ;;  %v1264_v43 = vadd.f32 %v2884_v23, %v3242_v8  ;;  %v2248_v45 = vmul.f32 %v1987_v41, %v1987_v41  ;;  %v1258_v54 = vpop.f32.mrf.mxu1 }
 0x115   : > { %1470 = vst [vmem:[%s3254_s12 + $0xc0] sm:$0xff] %v1032_v59  ;;  %v1985_v49 = vsel %vm1857_vm11, %v1032_v59, 0.0  ;;  %v1043_v6 = vadd.f32 %v2829_v5, %v3242_v8  ;;  %v1614_v50 = vadd.s32 304, %v3235_v7  ;;  %vm1862_vm1 = vcmp.lt.s32.totalorder %v1734_v39, 2048 }
 0x116   : > { %v2111_v16 = vadd.f32 %v2110_v1, %v1984_v2  ;;  %v2371_v3 = vadd.f32 %v2370_v4, %v2244_v0  ;;  %v1034_v17 = vpop.f32.mrf.mxu0  ;;  %v2246_v26 = vmul.f32 %v1985_v49, %v1985_v49  ;;  %v1612_v53 = vadd.s32 288, %v3235_v7  ;;  %1528 = vst [vmem:[%s3254_s12 + $0x290] sm:$0xff] %v1264_v43  ;;  %v3551_v61 = vpop.f32.mrf.mxu1 }
 0x117   : > { %1473 = vst [vmem:[%s3254_s12 + $0xd8] sm:$0xff] %v1043_v6  ;;  %v1035_v60 = vadd.f32 %v3242_v8, %v1034_v17  ;;  %v1988_v51 = vsel %vm1860_vm13, %v1043_v6, 0.0  ;;  %vm1867_vm2 = vcmp.lt.s32.totalorder %v3514_v29, 2048  ;;  %v1615_v2 = vadd.s32 312, %v3235_v7 }
 0x118   : > { %v2372_v24 = vadd.f32 %v2371_v3, %v2245_v14  ;;  %v2112_v25 = vadd.f32 %v2111_v16, %v1985_v49  ;;  %v2832_v28 = vpop.f32.mrf.mxu0  ;;  %v2249_v55 = vmul.f32 %v1988_v51, %v1988_v51  ;;  %vm1865_vm3 = vcmp.lt.s32.totalorder %v3523_v33, 2048  ;;  %v3566_v10 = vpop.f32.mrf.mxu1 }
 0x119   : > { %1471 = vst [vmem:[%s3254_s12 + $0xc8] sm:$0xff] %v1035_v60  ;;  %v1986_v31 = vsel %vm1858_vm12, %v1035_v60, 0.0  ;;  %v1056_v32 = vadd.f32 %v2832_v28, %v3242_v8  ;;  %vm1866_vm4 = vcmp.lt.s32.totalorder %v3534_v42, 2048  ;;  %v1256_v59 = vadd.f32 %v3242_v8, %v1255_v34 }
 0x11a   : > { %v2373_v35 = vadd.f32 %v2372_v24, %v2246_v26  ;;  %v2113_v36 = vadd.f32 %v2112_v25, %v1986_v31  ;;  %v2247_v15 = vmul.f32 %v1986_v31, %v1986_v31  ;;  %v1047_v9 = vpop.f32.mrf.mxu0  ;;  %vm1868_vm5 = vcmp.lt.s32.totalorder %v3527_v38, 2048  ;;  %v3577_v39 = vpop.f32.mrf.mxu1 }
 0x11b   : > { %1476 = vst [vmem:[%s3254_s12 + $0xf0] sm:$0xff] %v1056_v32  ;;  %v1048_v21 = vadd.f32 %v3242_v8, %v1047_v9  ;;  %v3555_v4 = vadd.s32 %v3247_v12, %v1614_v50  ;;  %v1991_v5 = vsel %vm1863_vm15, %v1056_v32, 0.0  ;;  %v3563_v6 = vadd.s32 %v3247_v12, %v1612_v53  ;;  %1526 = vst [vmem:[%s3254_s12 + $0x280] sm:$0xff] %v1256_v59 }
 0x11c   : > { %v2114_v46 = vadd.f32 %v2113_v36, %v1987_v41  ;;  %v2374_v47 = vadd.f32 %v2373_v35, %v2247_v15  ;;  %v2833_v30 = vpop.f32.mrf.mxu0  ;;  %v3569_v3 = vadd.s32 %v3247_v12, %v1615_v2  ;;  %v1613_v19 = vadd.s32 296, %v3235_v7  ;;  %v3587_v41 = vpop.f32.mrf.mxu1 }
 0x11d   : > { %1474 = vst [vmem:[%s3254_s12 + $0xe0] sm:$0xff] %v1048_v21  ;;  %v1989_v20 = vsel %vm1861_vm14, %v1048_v21, 0.0  ;;  %v1059_v52 = vadd.f32 %v2833_v30, %v3242_v8  ;;  %v1267_v60 = vadd.f32 %v2885_v44, %v3242_v8  ;;  %v2252_v58 = vmul.f32 %v1991_v5, %v1991_v5 }
 0x11e   : > { %v2115_v57 = vadd.f32 %v2114_v46, %v1988_v51  ;;  %v2375_v37 = vadd.f32 %v2374_v47, %v2248_v45  ;;  %v1050_v40 = vpop.f32.mrf.mxu0  ;;  %v2250_v0 = vmul.f32 %v1989_v20, %v1989_v20  ;;  %v1618_v25 = vadd.s32 336, %v3235_v7  ;;  %v3598_v21 = vpop.f32.mrf.mxu1 }
 0x11f   : > { %1477 = vst [vmem:[%s3254_s12 + $0xf8] sm:$0xff] %v1059_v52  ;;  %v1051_v27 = vadd.f32 %v3242_v8, %v1050_v40  ;;  %v1992_v48 = vsel %vm1864_vm0, %v1059_v52, 0.0  ;;  %vm1869_vm6 = vcmp.lt.s32.totalorder %v3563_v6, 2048  ;;  %v1616_v28 = vadd.s32 320, %v3235_v7  ;;  %1529 = vst [vmem:[%s3254_s12 + $0x298] sm:$0xff] %v1267_v60 }
 0x120   : > { %v2376_v62 = vadd.f32 %v2375_v37, %v2249_v55  ;;  %v2116_v63 = vadd.f32 %v2115_v57, %v1989_v20  ;;  %v2836_v1 = vpop.f32.mrf.mxu0  ;;  %v2253_v31 = vmul.f32 %v1992_v48, %v1992_v48  ;;  %vm1871_vm7 = vcmp.lt.s32.totalorder %v3555_v4, 2048  ;;  %v3615_v53 = vpop.f32.mrf.mxu1 }
 0x121   : > { %1475 = vst [vmem:[%s3254_s12 + $0xe8] sm:$0xff] %v1051_v27  ;;  %v1990_v56 = vsel %vm1862_vm1, %v1051_v27, 0.0  ;;  %v1072_v49 = vadd.f32 %v2836_v1, %v3242_v8  ;;  %v1619_v36 = vadd.s32 344, %v3235_v7  ;;  %v1742_v15 = vadd.s32 %v3247_v12, %v1613_v19 }
 0x122   : > { %v2377_v11 = vadd.f32 %v2376_v62, %v2250_v0  ;;  %v2117_v13 = vadd.f32 %v2116_v63, %v1990_v56  ;;  %v2251_v14 = vmul.f32 %v1990_v56, %v1990_v56  ;;  %v1063_v16 = vpop.f32.mrf.mxu0  ;;  %v1617_v9 = vadd.s32 328, %v3235_v7  ;;  %v3631_v59 = vpop.f32.mrf.mxu1 }
 0x123   : > { %1480 = vst [vmem:[%s3254_s12 + $0x110] sm:$0xff] %v1072_v49  ;;  %v1064_v17 = vadd.f32 %v3242_v8, %v1063_v16  ;;  %v3596_v51 = vadd.f32 %v3242_v8, %v1258_v54  ;;  %vm1872_vm8 = vcmp.lt.s32.totalorder %v3569_v3, 2048  ;;  %v3602_v47 = vadd.s32 %v3247_v12, %v1618_v25 }
 0x124   : > { %v2118_v22 = vadd.f32 %v2117_v13, %v1991_v5  ;;  %v2378_v23 = vadd.f32 %v2377_v11, %v2251_v14  ;;  %v2837_v24 = vpop.f32.mrf.mxu0  ;;  %v1995_v30 = vsel %vm1867_vm2, %v1072_v49, 0.0  ;;  %v3611_v52 = vadd.s32 %v3247_v12, %v1616_v28 }
 0x125   : > { %1478 = vst [vmem:[%s3254_s12 + $0x100] sm:$0xff] %v1064_v17  ;;  %v1993_v18 = vsel %vm1865_vm3, %v1064_v17, 0.0  ;;  %v1075_v26 = vadd.f32 %v2837_v24, %v3242_v8  ;;  %1527 = vst [vmem:[%s3254_s12 + $0x288] sm:$0xff] %v3596_v51  ;;  %v3618_v29 = vadd.s32 %v3247_v12, %v1619_v36  ;;  %v3625_v2 = vadd.s32 %v3247_v12, %v1617_v9 }
 0x126   : > { %v2119_v32 = vadd.f32 %v2118_v22, %v1992_v48  ;;  %v2379_v34 = vadd.f32 %v2378_v23, %v2252_v58  ;;  %v1066_v35 = vpop.f32.mrf.mxu0  ;;  %v2254_v45 = vmul.f32 %v1993_v18, %v1993_v18  ;;  %v3629_v27 = vadd.f32 %v3551_v61, %v3242_v8  ;;  %v3641_v61 = vpop.f32.mrf.mxu1 }
 0x127   : > { %1481 = vst [vmem:[%s3254_s12 + $0x118] sm:$0xff] %v1075_v26  ;;  %v1067_v33 = vadd.f32 %v3242_v8, %v1066_v35  ;;  %v1996_v42 = vsel %vm1868_vm5, %v1075_v26, 0.0  ;;  %v2256_v62 = vmul.f32 %v1995_v30, %v1995_v30  ;;  %v1622_v38 = vadd.s32 368, %v3235_v7 }
 0x128   : > { %v2380_v43 = vadd.f32 %v2379_v34, %v2253_v31  ;;  %v2120_v44 = vadd.f32 %v2119_v32, %v1993_v18  ;;  %v2840_v46 = vpop.f32.mrf.mxu0  ;;  %vm1870_vm9 = vcmp.lt.s32.totalorder %v1742_v15, 2048  ;;  %v1620_v49 = vadd.s32 352, %v3235_v7  ;;  %1532 = vst [vmem:[%s3254_s12 + $0x2b0] sm:$0xff] %v3629_v27  ;;  %v3653_v19 = vpop.f32.mrf.mxu1 }
 0x129   : > { %1479 = vst [vmem:[%s3254_s12 + $0x108] sm:$0xff] %v1067_v33  ;;  %v1994_v50 = vsel %vm1866_vm4, %v1067_v33, 0.0  ;;  %v1088_v20 = vadd.f32 %v2840_v46, %v3242_v8  ;;  %v2257_v11 = vmul.f32 %v1996_v42, %v1996_v42  ;;  %vm1875_vm10 = vcmp.lt.s32.totalorder %v3602_v47, 2048 }
 0x12a   : > { %v2381_v54 = vadd.f32 %v2380_v43, %v2254_v45  ;;  %v2121_v55 = vadd.f32 %v2120_v44, %v1994_v50  ;;  %v2255_v57 = vmul.f32 %v1994_v50, %v1994_v50  ;;  %v1079_v37 = vpop.f32.mrf.mxu0  ;;  %v1623_v48 = vadd.s32 376, %v3235_v7  ;;  %v3669_v28 = vpop.f32.mrf.mxu1 }
 0x12b   : > { %1484 = vst [vmem:[%s3254_s12 + $0x130] sm:$0xff] %v1088_v20  ;;  %v1080_v40 = vadd.f32 %v3242_v8, %v1079_v37  ;;  %vm1873_vm11 = vcmp.lt.s32.totalorder %v3611_v52, 2048  ;;  %vm1874_vm12 = vcmp.lt.s32.totalorder %v3625_v2, 2048  ;;  %v3651_v17 = vadd.f32 %v3242_v8, %v3566_v10 }
 0x12c   : > { %v2122_v63 = vadd.f32 %v2121_v55, %v1995_v30  ;;  %v2382_v0 = vadd.f32 %v2381_v54, %v2255_v57  ;;  %v2841_v1 = vpop.f32.mrf.mxu0  ;;  %vm1876_vm13 = vcmp.lt.s32.totalorder %v3618_v29, 2048  ;;  %v3657_v24 = vadd.s32 %v3247_v12, %v1622_v38  ;;  %v3683_v43 = vpop.f32.mrf.mxu1 }
 0x12d   : > { %1482 = vst [vmem:[%s3254_s12 + $0x120] sm:$0xff] %v1080_v40  ;;  %v1997_v5 = vsel %vm1869_vm6, %v1080_v40, 0.0  ;;  %v1091_v56 = vadd.f32 %v2841_v1, %v3242_v8  ;;  %v1999_v25 = vsel %vm1871_vm7, %v1088_v20, 0.0  ;;  %v3665_v26 = vadd.s32 %v3247_v12, %v1620_v49  ;;  %1530 = vst [vmem:[%s3254_s12 + $0x2a0] sm:$0xff] %v3651_v17 }
 0x12e   : > { %v2123_v13 = vadd.f32 %v2122_v63, %v1996_v42  ;;  %v2383_v14 = vadd.f32 %v2382_v0, %v2256_v62  ;;  %v1082_v16 = vpop.f32.mrf.mxu0  ;;  %v2258_v22 = vmul.f32 %v1997_v5, %v1997_v5  ;;  %v3672_v4 = vadd.s32 %v3247_v12, %v1623_v48  ;;  %v3694_v54 = vpop.f32.mrf.mxu1 }
 0x12f   : > { %1485 = vst [vmem:[%s3254_s12 + $0x138] sm:$0xff] %v1091_v56  ;;  %v1083_v6 = vadd.f32 %v3242_v8, %v1082_v16  ;;  %v2000_v36 = vsel %vm1872_vm8, %v1091_v56, 0.0  ;;  %v1621_v15 = vadd.s32 360, %v3235_v7  ;;  %v3681_v9 = vadd.f32 %v3577_v39, %v3242_v8 }
 0x130   : > { %v2384_v60 = vadd.f32 %v2383_v14, %v2257_v11  ;;  %v2124_v58 = vadd.f32 %v2123_v13, %v1997_v5  ;;  %v2844_v23 = vpop.f32.mrf.mxu0  ;;  %v2260_v44 = vmul.f32 %v1999_v25, %v1999_v25  ;;  %v1626_v3 = vadd.s32 400, %v3235_v7  ;;  %v3711_v1 = vpop.f32.mrf.mxu1 }
 0x131   : > { %1483 = vst [vmem:[%s3254_s12 + $0x128] sm:$0xff] %v1083_v6  ;;  %v1998_v18 = vsel %vm1870_vm9, %v1083_v6, 0.0  ;;  %v1104_v10 = vadd.f32 %v2844_v23, %v3242_v8  ;;  %vm1877_vm14 = vcmp.lt.s32.totalorder %v3665_v26, 2048  ;;  %v1624_v39 = vadd.s32 384, %v3235_v7  ;;  %1533 = vst [vmem:[%s3254_s12 + $0x2b8] sm:$0xff] %v3681_v9 }
 0x132   : > { %v2385_v31 = vadd.f32 %v2384_v60, %v2258_v22  ;;  %v2125_v32 = vadd.f32 %v2124_v58, %v1998_v18  ;;  %v2259_v34 = vmul.f32 %v1998_v18, %v1998_v18  ;;  %v1095_v35 = vpop.f32.mrf.mxu0  ;;  %v2261_v55 = vmul.f32 %v2000_v36, %v2000_v36  ;;  %v3728_v48 = vpop.f32.mrf.mxu1 }
 0x133   : > { %1488 = vst [vmem:[%s3254_s12 + $0x150] sm:$0xff] %v1104_v10  ;;  %v1096_v33 = vadd.f32 %v3242_v8, %v1095_v35  ;;  %vm1879_vm15 = vcmp.lt.s32.totalorder %v3657_v24, 2048  ;;  %v1627_v52 = vadd.s32 408, %v3235_v7  ;;  %v1750_v62 = vadd.s32 %v3247_v12, %v1621_v15 }
 0x134   : > { %v2126_v45 = vadd.f32 %v2125_v32, %v1999_v25  ;;  %v2386_v46 = vadd.f32 %v2385_v31, %v2259_v34  ;;  %v2845_v30 = vpop.f32.mrf.mxu0  ;;  %v1625_v63 = vadd.s32 392, %v3235_v7  ;;  %vm1880_vm0 = vcmp.lt.s32.totalorder %v3672_v4, 2048 }
 0x135   : > { %1486 = vst [vmem:[%s3254_s12 + $0x140] sm:$0xff] %v1096_v33  ;;  %v2001_v50 = vsel %vm1873_vm11, %v1096_v33, 0.0  ;;  %v1107_v20 = vadd.f32 %v2845_v30, %v3242_v8  ;;  %v3702_v8 = vld [vmem:[%s4406_s2] ss:$0 sm:$0xff]  ;;  %v3715_v11 = vadd.s32 %v3247_v12, %v1626_v3  ;;  %v2003_v13 = vsel %vm1875_vm10, %v1104_v10, 0.0  ;;  %v3744_v10 = vpop.f32.mrf.mxu1 }
 0x136   : > { %v2127_v57 = vadd.f32 %v2126_v45, %v2000_v36  ;;  %v2387_v37 = vadd.f32 %v2386_v46, %v2260_v44  ;;  %v1098_v42 = vpop.f32.mrf.mxu0  ;;  %v3709_v0 = vadd.f32 %v3702_v8, %v3587_v41  ;;  %v2262_v56 = vmul.f32 %v2001_v50, %v2001_v50 }
 0x137   : > { %1489 = vst [vmem:[%s3254_s12 + $0x158] sm:$0xff] %v1107_v20  ;;  %v1099_v40 = vadd.f32 %v3702_v8, %v1098_v42  ;;  %v3724_v16 = vadd.s32 %v3247_v12, %v1624_v39  ;;  %v3731_v47 = vadd.s32 %v3247_v12, %v1627_v52  ;;  %v2004_v2 = vsel %vm1876_vm13, %v1107_v20, 0.0 }
 0x138   : > { %v2388_v38 = vadd.f32 %v2387_v37, %v2261_v55  ;;  %v2128_v5 = vadd.f32 %v2127_v57, %v2001_v50  ;;  %v2848_v49 = vpop.f32.mrf.mxu0  ;;  %1531 = vst [vmem:[%s3254_s12 + $0x2a8] sm:$0xff] %v3709_v0  ;;  %v3738_v25 = vadd.s32 %v3247_v12, %v1625_v63  ;;  %v3742_v18 = vadd.f32 %v3702_v8, %v3598_v21  ;;  %v3754_v21 = vpop.f32.mrf.mxu1 }
 0x139   : > { %1487 = vst [vmem:[%s3254_s12 + $0x148] sm:$0xff] %v1099_v40  ;;  %v2002_v41 = vsel %vm1874_vm12, %v1099_v40, 0.0  ;;  %v1120_v14 = vadd.f32 %v3702_v8, %v2848_v49  ;;  %v2264_v31 = vmul.f32 %v2003_v13, %v2003_v13  ;;  %v1630_v29 = vadd.s32 432, %v3235_v7 }
 0x13a   : > { %v2389_v6 = vadd.f32 %v2388_v38, %v2262_v56  ;;  %v2129_v60 = vadd.f32 %v2128_v5, %v2002_v41  ;;  %v2263_v58 = vmul.f32 %v2002_v41, %v2002_v41  ;;  %v1111_v22 = vpop.f32.mrf.mxu0  ;;  %vm1878_vm1 = vcmp.lt.s32.totalorder %v1750_v62, 2048  ;;  %1536 = vst [vmem:[%s3254_s12 + $0x2d0] sm:$0xff] %v3742_v18  ;;  %v3766_v20 = vpop.f32.mrf.mxu1 }
 0x13b   : > { %1492 = vst [vmem:[%s3254_s12 + $0x170] sm:$0xff] %v1120_v14  ;;  %v1112_v23 = vadd.f32 %v3702_v8, %v1111_v22  ;;  %v1628_v15 = vadd.s32 416, %v3235_v7  ;;  %v2265_v44 = vmul.f32 %v2004_v2, %v2004_v2  ;;  %vm1883_vm2 = vcmp.lt.s32.totalorder %v3715_v11, 2048 }
 0x13c   : > { %v2130_v32 = vadd.f32 %v2129_v60, %v2003_v13  ;;  %v2390_v34 = vadd.f32 %v2389_v6, %v2263_v58  ;;  %v2849_v35 = vpop.f32.mrf.mxu0  ;;  %v1631_v3 = vadd.s32 440, %v3235_v7  ;;  %vm1881_vm3 = vcmp.lt.s32.totalorder %v3724_v16, 2048  ;;  %v3782_v38 = vpop.f32.mrf.mxu1 }
 0x13d   : > { %1490 = vst [vmem:[%s3254_s12 + $0x160] sm:$0xff] %v1112_v23  ;;  %v2005_v36 = vsel %vm1877_vm14, %v1112_v23, 0.0  ;;  %v1123_v33 = vadd.f32 %v3702_v8, %v2849_v35  ;;  %vm1882_vm4 = vcmp.lt.s32.totalorder %v3738_v25, 2048  ;;  %v3764_v50 = vadd.f32 %v3702_v8, %v3615_v53 }
 0x13e   : > { %v2131_v45 = vadd.f32 %v2130_v32, %v2004_v2  ;;  %v2391_v46 = vadd.f32 %v2390_v34, %v2264_v31  ;;  %v1114_v30 = vpop.f32.mrf.mxu0  ;;  %v2266_v57 = vmul.f32 %v2005_v36, %v2005_v36  ;;  %vm1884_vm5 = vcmp.lt.s32.totalorder %v3731_v47, 2048  ;;  %v3796_v60 = vpop.f32.mrf.mxu1 }
 0x13f   : > { %1493 = vst [vmem:[%s3254_s12 + $0x178] sm:$0xff] %v1123_v33  ;;  %v1115_v26 = vadd.f32 %v3702_v8, %v1114_v30  ;;  %v3770_v42 = vadd.s32 %v3247_v12, %v1630_v29  ;;  %v2007_v52 = vsel %vm1879_vm15, %v1120_v14, 0.0  ;;  %v3778_v63 = vadd.s32 %v3247_v12, %v1628_v15  ;;  %1534 = vst [vmem:[%s3254_s12 + $0x2c0] sm:$0xff] %v3764_v50 }
 0x140   : > { %v2392_v39 = vadd.f32 %v2391_v46, %v2265_v44  ;;  %v2132_v55 = vadd.f32 %v2131_v45, %v2005_v36  ;;  %v2852_v37 = vpop.f32.mrf.mxu0  ;;  %v3785_v24 = vadd.s32 %v3247_v12, %v1631_v3  ;;  %v2008_v62 = vsel %vm1880_vm0, %v1123_v33, 0.0  ;;  %v3807_v34 = vpop.f32.mrf.mxu1 }
 0x141   : > { %1491 = vst [vmem:[%s3254_s12 + $0x168] sm:$0xff] %v1115_v26  ;;  %v2006_v40 = vsel %vm1878_vm1, %v1115_v26, 0.0  ;;  %v1136_v53 = vadd.f32 %v3702_v8, %v2852_v37  ;;  %v1629_v14 = vadd.s32 424, %v3235_v7  ;;  %v3794_v6 = vadd.f32 %v3702_v8, %v3631_v59 }
 0x142   : > { %v2393_v5 = vadd.f32 %v2392_v39, %v2266_v57  ;;  %v2133_v56 = vadd.f32 %v2132_v55, %v2006_v40  ;;  %v2267_v49 = vmul.f32 %v2006_v40, %v2006_v40  ;;  %v1127_v13 = vpop.f32.mrf.mxu0  ;;  %v2268_v58 = vmul.f32 %v2007_v52, %v2007_v52  ;;  %v3819_v30 = vpop.f32.mrf.mxu1 }
 0x143   : > { %1496 = vst [vmem:[%s3254_s12 + $0x190] sm:$0xff] %v1136_v53  ;;  %v1128_v41 = vadd.f32 %v3702_v8, %v1127_v13  ;;  %v1634_v4 = vadd.s32 464, %v3235_v7  ;;  %vm1885_vm6 = vcmp.lt.s32.totalorder %v3778_v63, 2048  ;;  %v1632_v59 = vadd.s32 448, %v3235_v7  ;;  %1537 = vst [vmem:[%s3254_s12 + $0x2d8] sm:$0xff] %v3794_v6 }
 0x144   : > { %v2134_v22 = vadd.f32 %v2133_v56, %v2007_v52  ;;  %v2394_v2 = vadd.f32 %v2393_v5, %v2267_v49  ;;  %v2853_v23 = vpop.f32.mrf.mxu0  ;;  %v2269_v35 = vmul.f32 %v2008_v62, %v2008_v62  ;;  %vm1887_vm7 = vcmp.lt.s32.totalorder %v3770_v42, 2048  ;;  %v3836_v5 = vpop.f32.mrf.mxu1 }
 0x145   : > { %1494 = vst [vmem:[%s3254_s12 + $0x180] sm:$0xff] %v1128_v41  ;;  %v2009_v31 = vsel %vm1881_vm3, %v1128_v41, 0.0  ;;  %v1139_v32 = vadd.f32 %v3702_v8, %v2853_v23  ;;  %v1635_v16 = vadd.s32 472, %v3235_v7  ;;  %v1758_v44 = vadd.s32 %v3247_v12, %v1629_v14 }
 0x146   : > { %v2135_v29 = vadd.f32 %v2134_v22, %v2008_v62  ;;  %v2395_v36 = vadd.f32 %v2394_v2, %v2268_v58  ;;  %v1130_v33 = vpop.f32.mrf.mxu0  ;;  %v1633_v45 = vadd.s32 456, %v3235_v7  ;;  %v3817_v46 = vadd.f32 %v3702_v8, %v3641_v61  ;;  %v3852_v58 = vpop.f32.mrf.mxu1 }
 0x147   : > { %1497 = vst [vmem:[%s3254_s12 + $0x198] sm:$0xff] %v1139_v32  ;;  %v1131_v15 = vadd.f32 %v3702_v8, %v1130_v33  ;;  %v2270_v39 = vmul.f32 %v2009_v31, %v2009_v31  ;;  %vm1888_vm8 = vcmp.lt.s32.totalorder %v3785_v24, 2048  ;;  %v3823_v57 = vadd.s32 %v3247_v12, %v1634_v4 }
 0x148   : > { %v2396_v3 = vadd.f32 %v2395_v36, %v2269_v35  ;;  %v2136_v26 = vadd.f32 %v2135_v29, %v2009_v31  ;;  %v2856_v55 = vpop.f32.mrf.mxu0  ;;  %v2011_v37 = vsel %vm1883_vm2, %v1136_v53, 0.0  ;;  %v3832_v40 = vadd.s32 %v3247_v12, %v1632_v59  ;;  %1535 = vst [vmem:[%s3254_s12 + $0x2c8] sm:$0xff] %v3817_v46 }
 0x149   : > { %1495 = vst [vmem:[%s3254_s12 + $0x188] sm:$0xff] %v1131_v15  ;;  %v2010_v61 = vsel %vm1882_vm4, %v1131_v15, 0.0  ;;  %v1152_v52 = vadd.f32 %v3702_v8, %v2856_v55  ;;  %v3839_v11 = vadd.s32 %v3247_v12, %v1635_v16  ;;  %v2012_v25 = vsel %vm1884_vm5, %v1139_v32, 0.0 }
 0x14a   : > { %v2397_v56 = vadd.f32 %v2396_v3, %v2270_v39  ;;  %v2137_v49 = vadd.f32 %v2136_v26, %v2010_v61  ;;  %v2271_v13 = vmul.f32 %v2010_v61, %v2010_v61  ;;  %v1143_v62 = vpop.f32.mrf.mxu0  ;;  %v3846_v41 = vadd.s32 %v3247_v12, %v1633_v45 }
 0x14b   : > { %1500 = vst [vmem:[%s3254_s12 + $0x1b0] sm:$0xff] %v1152_v52  ;;  %v1144_v53 = vadd.f32 %v3702_v8, %v1143_v62  ;;  %v3850_v14 = vadd.f32 %v3702_v8, %v3653_v19  ;;  %v2272_v22 = vmul.f32 %v2011_v37, %v2011_v37  ;;  %v1638_v47 = vadd.s32 496, %v3235_v7  ;;  %v3862_v19 = vpop.f32.mrf.mxu1 }
 0x14c   : > { %v2138_v2 = vadd.f32 %v2137_v49, %v2011_v37  ;;  %v2398_v23 = vadd.f32 %v2397_v56, %v2271_v13  ;;  %v2857_v4 = vpop.f32.mrf.mxu0  ;;  %vm1886_vm9 = vcmp.lt.s32.totalorder %v1758_v44, 2048  ;;  %v1636_v59 = vadd.s32 480, %v3235_v7 }
 0x14d   : > { %1498 = vst [vmem:[%s3254_s12 + $0x1a0] sm:$0xff] %v1144_v53  ;;  %v2013_v31 = vsel %vm1885_vm6, %v1144_v53, 0.0  ;;  %v1155_v32 = vadd.f32 %v3702_v8, %v2857_v4  ;;  %1540 = vst [vmem:[%s3254_s12 + $0x2f0] sm:$0xff] %v3850_v14  ;;  %v2273_v35 = vmul.f32 %v2012_v25, %v2012_v25  ;;  %vm1891_vm10 = vcmp.lt.s32.totalorder %v3823_v57, 2048  ;;  %v3874_v45 = vpop.f32.mrf.mxu1 }
 0x14e   : > { %v2139_v29 = vadd.f32 %v2138_v2, %v2012_v25  ;;  %v2399_v36 = vadd.f32 %v2398_v23, %v2272_v22  ;;  %v1146_v33 = vpop.f32.mrf.mxu0  ;;  %vm1889_vm11 = vcmp.lt.s32.totalorder %v3832_v40, 2048  ;;  %vm1890_vm12 = vcmp.lt.s32.totalorder %v3846_v41, 2048 }
 0x14f   : > { %1501 = vst [vmem:[%s3254_s12 + $0x1b8] sm:$0xff] %v1155_v32  ;;  %v1147_v63 = vadd.f32 %v3702_v8, %v1146_v33  ;;  %v1639_v16 = vadd.s32 504, %v3235_v7  ;;  %v3872_v15 = vadd.f32 %v3702_v8, %v3669_v28  ;;  %v2274_v39 = vmul.f32 %v2013_v31, %v2013_v31  ;;  %v3890_v13 = vpop.f32.mrf.mxu1 }
 0x150   : > { %v2400_v3 = vadd.f32 %v2399_v36, %v2273_v35  ;;  %v2140_v26 = vadd.f32 %v2139_v29, %v2013_v31  ;;  %v2860_v55 = vpop.f32.mrf.mxu0  ;;  %vm1892_vm13 = vcmp.lt.s32.totalorder %v3839_v11, 2048  ;;  %v3878_v37 = vadd.s32 %v3247_v12, %v1638_v47 }
 0x151   : > { %v2015_v61 = vsel %vm1887_vm7, %v1152_v52, 0.0  ;;  %1499 = vst [vmem:[%s3254_s12 + $0x1a8] sm:$0xff] %v1147_v63  ;;  %v2014_v56 = vsel %vm1886_vm9, %v1147_v63, 0.0  ;;  %v1168_v28 = vadd.f32 %v3702_v8, %v2860_v55  ;;  %v3886_v49 = vadd.s32 %v3247_v12, %v1636_v59  ;;  %1538 = vst [vmem:[%s3254_s12 + $0x2e0] sm:$0xff] %v3872_v15  ;;  %v3905_v24 = vpop.f32.mrf.mxu1 }
 0x152   : > { %v2401_v62 = vadd.f32 %v2400_v3, %v2274_v39  ;;  %v2141_v25 = vadd.f32 %v2140_v26, %v2014_v56  ;;  %v2275_v53 = vmul.f32 %v2014_v56, %v2014_v56  ;;  %v1159_v22 = vpop.f32.mrf.mxu0  ;;  %v1637_v42 = vadd.s32 488, %v3235_v7 }
 0x153   : > { %v2016_v44 = vsel %vm1888_vm8, %v1155_v32, 0.0  ;;  %1504 = vst [vmem:[%s3254_s12 + $0x1d0] sm:$0xff] %v1168_v28  ;;  %v1160_v52 = vadd.f32 %v3702_v8, %v1159_v22  ;;  %v3898_v2 = vadd.s32 %v3247_v12, %v1639_v16  ;;  %v3902_v23 = vadd.f32 %v3702_v8, %v3683_v43  ;;  %v3929_v22 = vpop.f32.mrf.mxu1 }
 0x154   : > { %v2276_v4 = vmul.f32 %v2015_v61, %v2015_v61  ;;  %v2142_v47 = vadd.f32 %v2141_v25, %v2015_v61  ;;  %v2402_v31 = vadd.f32 %v2401_v62, %v2275_v53  ;;  %v2861_v59 = vpop.f32.mrf.mxu0  ;;  %v1642_v35 = vadd.s32 528, %v3235_v7 }
 0x155   : > { %1502 = vst [vmem:[%s3254_s12 + $0x1c0] sm:$0xff] %v1160_v52  ;;  %v2017_v32 = vsel %vm1889_vm11, %v1160_v52, 0.0  ;;  %v1171_v29 = vadd.f32 %v3702_v8, %v2861_v59  ;;  %vm1893_vm14 = vcmp.lt.s32.totalorder %v3886_v49, 2048  ;;  %v1640_v43 = vadd.s32 512, %v3235_v7  ;;  %1541 = vst [vmem:[%s3254_s12 + $0x2f8] sm:$0xff] %v3902_v23  ;;  %v3952_v11 = vpop.f32.mrf.mxu1 }
 0x156   : > { %v2277_v36 = vmul.f32 %v2016_v44, %v2016_v44  ;;  %v2143_v33 = vadd.f32 %v2142_v47, %v2016_v44  ;;  %v2403_v63 = vadd.f32 %v2402_v31, %v2276_v4  ;;  %v1162_v16 = vpop.f32.mrf.mxu0  ;;  %vm1895_vm15 = vcmp.lt.s32.totalorder %v3878_v37, 2048 }
 0x157   : > { %v1766_v3 = vadd.s32 %v3247_v12, %v1637_v42  ;;  %1505 = vst [vmem:[%s3254_s12 + $0x1d8] sm:$0xff] %v1171_v29  ;;  %v1163_v40 = vadd.f32 %v3702_v8, %v1162_v16  ;;  %v1643_v26 = vadd.s32 536, %v3235_v7  ;;  %v1641_v39 = vadd.s32 520, %v3235_v7 }
 0x158   : > { %v3923_v55 = vadd.f32 %v3702_v8, %v3694_v54  ;;  %v2404_v61 = vadd.f32 %v2403_v63, %v2277_v36  ;;  %v2144_v56 = vadd.f32 %v2143_v33, %v2017_v32  ;;  %v2278_v62 = vmul.f32 %v2017_v32, %v2017_v32  ;;  %v2864_v25 = vpop.f32.mrf.mxu0 }
 0x159   : > { %v3926_v53 = vadd.s32 %v3247_v12, %v1642_v35  ;;  %vm1896_vm0 = vcmp.lt.s32.totalorder %v3898_v2, 2048  ;;  %v2019_v42 = vsel %vm1891_vm10, %v1168_v28, 0.0  ;;  %1503 = vst [vmem:[%s3254_s12 + $0x1c8] sm:$0xff] %v1163_v40  ;;  %v2018_v54 = vsel %vm1890_vm12, %v1163_v40, 0.0  ;;  %v3020_v2 = vld [vmem:[%s3254_s12 + $0x200] sm:$0xff] }
 0x15a   : > { %v1184_v44 = vadd.f32 %v3702_v8, %v2864_v25  ;;  %v1769_v52 = vadd.s32 %v3247_v12, %v1640_v43  ;;  %1539 = vst [vmem:[%s3254_s12 + $0x2e8] sm:$0xff] %v3923_v55  ;;  %v2405_v4 = vadd.f32 %v2404_v61, %v2278_v62  ;;  %v2145_v47 = vadd.f32 %v2144_v56, %v2018_v54  ;;  %v1175_v59 = vpop.f32.mrf.mxu0 }
 0x15b   : > { %v2279_v31 = vmul.f32 %v2018_v54, %v2018_v54  ;;  %vm1894_vm1 = vcmp.lt.s32.totalorder %v1766_v3, 2048  ;;  %v2020_v57 = vsel %vm1892_vm13, %v1171_v29, 0.0  ;;  %v1176_v41 = vadd.f32 %v3702_v8, %v1175_v59 }
 0x15c   : > { %1508 = vst [vmem:[%s3254_s12 + $0x1f0] sm:$0xff] %v1184_v44  ;;  %v3945_v28 = vadd.s32 %v3247_v12, %v1643_v26  ;;  %v3949_v35 = vadd.f32 %v3702_v8, %v3711_v1  ;;  %v2280_v32 = vmul.f32 %v2019_v42, %v2019_v42  ;;  %v2146_v43 = vadd.f32 %v2145_v47, %v2019_v42  ;;  %v2865_v33 = vpop.f32.mrf.mxu0 }
 0x15d   : > { %v2406_v36 = vadd.f32 %v2405_v4, %v2279_v31  ;;  %v1770_v63 = vadd.s32 %v3247_v12, %v1641_v39  ;;  %1506 = vst [vmem:[%s3254_s12 + $0x1e0] sm:$0xff] %v1176_v41  ;;  %v2021_v29 = vsel %vm1893_vm14, %v1176_v41, 0.0  ;;  %v1187_v16 = vadd.f32 %v3702_v8, %v2865_v33  ;;  %v3971_v31 = vpop.f32.mrf.mxu1 }
 0x15e   : > { %v1646_v40 = vadd.s32 560, %v3235_v7  ;;  %v1644_v1 = vadd.s32 544, %v3235_v7  ;;  %1544 = vst [vmem:[%s3254_s12 + $0x310] sm:$0xff] %v3949_v35  ;;  %v2281_v26 = vmul.f32 %v2020_v57, %v2020_v57  ;;  %v2147_v61 = vadd.f32 %v2146_v43, %v2020_v57  ;;  %v1178_v39 = vpop.f32.mrf.mxu0 }
 0x15f   : > { %v2407_v56 = vadd.f32 %v2406_v36, %v2280_v32  ;;  %vm1899_vm2 = vcmp.lt.s32.totalorder %v3926_v53, 2048  ;;  %1509 = vst [vmem:[%s3254_s12 + $0x1f8] sm:$0xff] %v1187_v16  ;;  %vm1897_vm3 = vcmp.lt.s32.totalorder %v1769_v52, 2048  ;;  %v1179_v49 = vadd.f32 %v3702_v8, %v1178_v39 }
 0x160   : > { %v1647_v62 = vadd.s32 568, %v3235_v7  ;;  %v3968_v25 = vadd.f32 %v3702_v8, %v3728_v48  ;;  %v2148_v54 = vadd.f32 %v2147_v61, %v2021_v29  ;;  %v2282_v4 = vmul.f32 %v2021_v29, %v2021_v29 }
 0x161   : > { %v2408_v42 = vadd.f32 %v2407_v56, %v2281_v26  ;;  %v1645_v47 = vadd.s32 552, %v3235_v7  ;;  %v2023_v59 = vsel %vm1895_vm15, %v1184_v44, 0.0  ;;  %1507 = vst [vmem:[%s3254_s12 + $0x1e8] sm:$0xff] %v1179_v49  ;;  %v2022_v57 = vsel %vm1894_vm1, %v1179_v49, 0.0  ;;  %v3021_v49 = vld [vmem:[%s3254_s12 + $0x208] sm:$0xff] }
 0x162   : > { %v3978_v41 = vadd.s32 %v3247_v12, %v1646_v40  ;;  %v1773_v48 = vadd.s32 %v3247_v12, %v1644_v1  ;;  %1542 = vst [vmem:[%s3254_s12 + $0x300] sm:$0xff] %v3968_v25  ;;  %v2149_v43 = vadd.f32 %v2148_v54, %v2022_v57  ;;  %v2283_v36 = vmul.f32 %v2022_v57, %v2022_v57 }
 0x163   : > { %v2409_v32 = vadd.f32 %v2408_v42, %v2282_v4  ;;  %v3985_v37 = vadd.f32 %v3702_v8, %v3744_v10  ;;  %v2024_v3 = vsel %vm1896_vm0, %v1187_v16, 0.0  ;;  %vm1900_vm4 = vcmp.lt.s32.totalorder %v3945_v28, 2048  ;;  %v3999_v10 = vpop.f32.mrf.mxu1 }
 0x164   : > { %vm1898_vm5 = vcmp.lt.s32.totalorder %v1770_v63, 2048  ;;  %v3992_v44 = vadd.f32 %v3702_v8, %v3754_v21  ;;  %v2284_v33 = vmul.f32 %v2023_v59, %v2023_v59  ;;  %v2150_v29 = vadd.f32 %v2149_v43, %v2023_v59  ;;  %v3022_v63 = vld [vmem:[%s3254_s12 + $0x210] sm:$0xff] }
 0x165   : > { %v2410_v40 = vadd.f32 %v2409_v32, %v2283_v36  ;;  %v3995_v1 = vadd.s32 %v3247_v12, %v1647_v62  ;;  %1545 = vst [vmem:[%s3254_s12 + $0x318] sm:$0xff] %v3985_v37  ;;  %v2025_v16 = vsel %vm1897_vm3, %v3020_v2, 0.0  ;;  %vm1903_vm6 = vcmp.lt.s32.totalorder %v3978_v41, 2048  ;;  %v4022_v57 = vpop.f32.mrf.mxu1 }
 0x166   : > { %v1774_v21 = vadd.s32 %v3247_v12, %v1645_v47  ;;  %1543 = vst [vmem:[%s3254_s12 + $0x308] sm:$0xff] %v3992_v44  ;;  %v4009_v26 = vadd.f32 %v3702_v8, %v3766_v20  ;;  %v2285_v61 = vmul.f32 %v2024_v3, %v2024_v3  ;;  %v2151_v56 = vadd.f32 %v2150_v29, %v2024_v3  ;;  %v3023_v29 = vld [vmem:[%s3254_s12 + $0x218] sm:$0xff] }
 0x167   : > { %v2411_v39 = vadd.f32 %v2410_v40, %v2284_v33  ;;  %vm1901_vm7 = vcmp.lt.s32.totalorder %v1773_v48, 2048  ;;  %v2026_v52 = vsel %vm1898_vm5, %v3021_v49, 0.0  ;;  %v1650_v62 = vadd.s32 592, %v3235_v7  ;;  %v4049_v28 = vpop.f32.mrf.mxu1  ;;  %v3024_v49 = vld [vmem:[%s3254_s12 + $0x220] sm:$0xff]  ;;  %v3026_v48 = vld [vmem:[%s3254_s12 + $0x228] sm:$0xff] }
 0x168   : > { %v1648_v42 = vadd.s32 576, %v3235_v7  ;;  %1548 = vst [vmem:[%s3254_s12 + $0x330] sm:$0xff] %v4009_v26  ;;  %v4019_v54 = vadd.f32 %v3702_v8, %v3782_v38  ;;  %v2286_v20 = vmul.f32 %v2025_v16, %v2025_v16  ;;  %v2152_v4 = vadd.f32 %v2151_v56, %v2025_v16 }
 0x169   : > { %v2412_v47 = vadd.f32 %v2411_v39, %v2285_v61  ;;  %v1651_v59 = vadd.s32 600, %v3235_v7  ;;  %v2027_v32 = vsel %vm1899_vm2, %v3022_v63, 0.0  ;;  %vm1904_vm8 = vcmp.lt.s32.totalorder %v3995_v1, 2048 }
 0x16a   : > { %vm1902_vm9 = vcmp.lt.s32.totalorder %v1774_v21, 2048  ;;  %v1649_v43 = vadd.s32 584, %v3235_v7  ;;  %1546 = vst [vmem:[%s3254_s12 + $0x320] sm:$0xff] %v4019_v54  ;;  %v2153_v36 = vadd.f32 %v2152_v4, %v2026_v52  ;;  %v2287_v3 = vmul.f32 %v2026_v52, %v2026_v52 }
 0x16b   : > { %v2413_v38 = vadd.f32 %v2412_v47, %v2286_v20  ;;  %v4033_v33 = vadd.f32 %v3702_v8, %v3796_v60  ;;  %v2028_v53 = vsel %vm1900_vm4, %v3023_v29, 0.0  ;;  %v1779_v40 = vadd.s32 %v3247_v12, %v1650_v62  ;;  %v3025_v47 = vld [vmem:[%s3254_s12 + $0x230] sm:$0xff] }
 0x16c   : > { %v1777_v2 = vadd.s32 %v3247_v12, %v1648_v42  ;;  %v4042_v16 = vadd.f32 %v3702_v8, %v3807_v34  ;;  %v2288_v61 = vmul.f32 %v2027_v32, %v2027_v32  ;;  %v2154_v56 = vadd.f32 %v2153_v36, %v2027_v32 }
 0x16d   : > { %v2414_v39 = vadd.f32 %v2413_v38, %v2287_v3  ;;  %v4045_v60 = vadd.s32 %v3247_v12, %v1651_v59  ;;  %1549 = vst [vmem:[%s3254_s12 + $0x338] sm:$0xff] %v4033_v33  ;;  %v2029_v52 = vsel %vm1901_vm7, %v3024_v49, 0.0  ;;  %v1778_v62 = vadd.s32 %v3247_v12, %v1649_v43  ;;  %v4073_v3 = vpop.f32.mrf.mxu1  ;;  %v3027_v49 = vld [vmem:[%s3254_s12 + $0x238] sm:$0xff] }
 0x16e   : > { %v1654_v34 = vadd.s32 624, %v3235_v7  ;;  %1547 = vst [vmem:[%s3254_s12 + $0x328] sm:$0xff] %v4042_v16  ;;  %v4059_v42 = vadd.f32 %v3702_v8, %v3819_v30  ;;  %v2289_v20 = vmul.f32 %v2028_v53, %v2028_v53  ;;  %v2031_v59 = vsel %vm1903_vm6, %v3025_v47, 0.0 }
 0x16f   : > { %v2415_v4 = vadd.f32 %v2414_v39, %v2288_v61  ;;  %v2155_v63 = vadd.f32 %v2154_v56, %v2028_v53  ;;  %v2030_v32 = vsel %vm1902_vm9, %v3026_v48, 0.0  ;;  %vm1907_vm10 = vcmp.lt.s32.totalorder %v1779_v40, 2048  ;;  %v4098_v1 = vpop.f32.mrf.mxu1 }
 0x170   : > { %vm1905_vm11 = vcmp.lt.s32.totalorder %v1777_v2, 2048  ;;  %1552 = vst [vmem:[%s3254_s12 + $0x350] sm:$0xff] %v4059_v42  ;;  %v4070_v30 = vadd.f32 %v3702_v8, %v3836_v5  ;;  %v2290_v38 = vmul.f32 %v2029_v52, %v2029_v52  ;;  %v1652_v41 = vadd.s32 608, %v3235_v7 }
 0x171   : > { %v2156_v43 = vadd.f32 %v2155_v63, %v2029_v52  ;;  %v2416_v36 = vadd.f32 %v2415_v4, %v2289_v20  ;;  %v2292_v21 = vmul.f32 %v2031_v59, %v2031_v59  ;;  %vm1906_vm12 = vcmp.lt.s32.totalorder %v1778_v62, 2048  ;;  %v3028_v20 = vld [vmem:[%s3254_s12 + $0x250] sm:$0xff]  ;;  %v3029_v4 = vld [vmem:[%s3254_s12 + $0x240] sm:$0xff] }
 0x172   : > { %v1783_v29 = vadd.s32 %v3247_v12, %v1654_v34  ;;  %v1653_v53 = vadd.s32 616, %v3235_v7  ;;  %1550 = vst [vmem:[%s3254_s12 + $0x340] sm:$0xff] %v4070_v30  ;;  %v2291_v56 = vmul.f32 %v2030_v32, %v2030_v32  ;;  %v4081_v39 = vadd.f32 %v3702_v8, %v3852_v58 }
 0x173   : > { %v2417_v5 = vadd.f32 %v2416_v36, %v2290_v38  ;;  %v2157_v61 = vadd.f32 %v2156_v43, %v2030_v32  ;;  %v2032_v52 = vsel %vm1904_vm8, %v3027_v49, 0.0  ;;  %v2035_v34 = vsel %vm1907_vm10, %v3028_v20, 0.0  ;;  %v4117_v49 = vpop.f32.mrf.mxu1 }
 0x174   : > { %v2033_v47 = vsel %vm1905_vm11, %v3029_v4, 0.0  ;;  %v4092_v63 = vadd.f32 %v3702_v8, %v3862_v19  ;;  %v1781_v58 = vadd.s32 %v3247_v12, %v1652_v41  ;;  %v1655_v43 = vadd.s32 632, %v3235_v7  ;;  %1553 = vst [vmem:[%s3254_s12 + $0x358] sm:$0xff] %v4081_v39 }
 0x175   : > { %v2158_v48 = vadd.f32 %v2157_v61, %v2031_v59  ;;  %v2418_v32 = vadd.f32 %v2417_v5, %v2291_v56  ;;  %vm1908_vm13 = vcmp.lt.s32.totalorder %v4045_v60, 2048  ;;  %v1782_v40 = vadd.s32 %v3247_v12, %v1653_v53  ;;  %v3030_v5 = vld [vmem:[%s3254_s12 + $0x248] sm:$0xff] }
 0x176   : > { %1551 = vst [vmem:[%s3254_s12 + $0x348] sm:$0xff] %v4092_v63  ;;  %v4106_v19 = vadd.f32 %v3702_v8, %v3874_v45  ;;  %v2293_v2 = vmul.f32 %v2032_v52, %v2032_v52  ;;  %vm1911_vm14 = vcmp.lt.s32.totalorder %v1783_v29, 2048  ;;  %v2296_v36 = vmul.f32 %v2035_v34, %v2035_v34  ;;  %v4143_v29 = vpop.f32.mrf.mxu1 }
 0x177   : > { %v2419_v59 = vadd.f32 %v2418_v32, %v2292_v21  ;;  %v2159_v38 = vadd.f32 %v2158_v48, %v2032_v52  ;;  %v2294_v41 = vmul.f32 %v2033_v47, %v2033_v47  ;;  %v2034_v61 = vsel %vm1906_vm12, %v3030_v5, 0.0  ;;  %v3031_v52 = vld [vmem:[%s3254_s12 + $0x258] sm:$0xff] }
 0x178   : > { %4411 = vst [vmem:[#allocation2_spill] sm:$0xff] %v4106_v19  ;;  %1556 = vst [vmem:[%s3254_s12 + $0x370] sm:$0xff] %v4106_v19  ;;  %v4114_v53 = vadd.f32 %v3702_v8, %v3890_v13  ;;  %vm1909_vm15 = vcmp.lt.s32.totalorder %v1781_v58, 2048  ;;  %v1784_v21 = vadd.s32 %v3247_v12, %v1655_v43  ;;  %v2036_v62 = vsel %vm1908_vm13, %v3031_v52, 0.0  ;;  %v3032_v43 = vld [vmem:[%s3254_s12 + $0x270] sm:$0xff]  ;;  %v4163_v19 = vpop.f32.mrf.mxu1 }
 0x179   : > { %v2160_v45 = vadd.f32 %v2159_v38, %v2033_v47  ;;  %v2420_v56 = vadd.f32 %v2419_v59, %v2293_v2  ;;  %vm1910_vm0 = vcmp.lt.s32.totalorder %v1782_v40, 2048  ;;  %v1658_v20 = vadd.s32 656, %v3235_v7  ;;  %v3033_v2 = vld [vmem:[%s3254_s12 + $0x260] sm:$0xff] }
 0x17a   : > { %v1656_v13 = vadd.s32 640, %v3235_v7  ;;  %1554 = vst [vmem:[%s3254_s12 + $0x360] sm:$0xff] %v4114_v53  ;;  %v2295_v48 = vmul.f32 %v2034_v61, %v2034_v61  ;;  %v4128_v32 = vadd.f32 %v3702_v8, %v3905_v24  ;;  %v2039_v60 = vsel %vm1911_vm14, %v3032_v43, 0.0 }
 0x17b   : > { %v2421_v4 = vadd.f32 %v2420_v56, %v2294_v41  ;;  %v2161_v47 = vadd.f32 %v2160_v45, %v2034_v61  ;;  %v2037_v59 = vsel %vm1909_vm15, %v3033_v2, 0.0  ;;  %v1657_v38 = vadd.s32 648, %v3235_v7  ;;  %v3034_v61 = vld [vmem:[%s3254_s12 + $0x268] sm:$0xff] }
 0x17c   : > { %4412 = vst [vmem:[#allocation3_spill] sm:$0xff] %v4128_v32  ;;  %v4137_v5 = vadd.f32 %v3702_v8, %v3929_v22  ;;  %vm1912_vm1 = vcmp.lt.s32.totalorder %v1784_v21, 2048  ;;  %v2038_v24 = vsel %vm1910_vm0, %v3034_v61, 0.0  ;;  %1557 = vst [vmem:[%s3254_s12 + $0x378] sm:$0xff] %v4128_v32  ;;  %v1787_v58 = vadd.s32 %v3247_v12, %v1658_v20  ;;  %v3035_v61 = vld [vmem:[%s3254_s12 + $0x278] sm:$0xff] }
 0x17d   : > { %v2162_v41 = vadd.f32 %v2161_v47, %v2035_v34  ;;  %v2422_v45 = vadd.f32 %v2421_v4, %v2295_v48  ;;  %v1785_v56 = vadd.s32 %v3247_v12, %v1656_v13  ;;  %v1659_v52 = vadd.s32 664, %v3235_v7 }
 0x17e   : > { %1555 = vst [vmem:[%s3254_s12 + $0x368] sm:$0xff] %v4137_v5  ;;  %v4152_v22 = vadd.f32 %v3702_v8, %v3952_v11  ;;  %v2297_v34 = vmul.f32 %v2036_v62, %v2036_v62  ;;  %v2300_v47 = vmul.f32 %v2039_v60, %v2039_v60  ;;  %v2298_v48 = vmul.f32 %v2037_v59, %v2037_v59 }
 0x17f   : > { %v2423_v40 = vadd.f32 %v2422_v45, %v2296_v36  ;;  %v2163_v4 = vadd.f32 %v2162_v41, %v2036_v62  ;;  %v1786_v43 = vadd.s32 %v3247_v12, %v1657_v38  ;;  %v4159_v20 = vadd.f32 %v3702_v8, %v3971_v31 }
 0x180   : > { %1560 = vst [vmem:[%s3254_s12 + $0x390] sm:$0xff] %v4152_v22  ;;  %v2040_v11 = vsel %vm1912_vm1, %v3035_v61, 0.0  ;;  %v2299_v32 = vmul.f32 %v2038_v24, %v2038_v24  ;;  %vm1915_vm2 = vcmp.lt.s32.totalorder %v1787_v58, 2048  ;;  %vm1913_vm3 = vcmp.lt.s32.totalorder %v1785_v56, 2048 }
 0x181   : > { %v2164_v13 = vadd.f32 %v2163_v4, %v2037_v59  ;;  %v2424_v2 = vadd.f32 %v2423_v40, %v2297_v34  ;;  %v1788_v36 = vadd.s32 %v3247_v12, %v1659_v52  ;;  %v1660_v62 = vadd.s32 672, %v3235_v7  ;;  %1558 = vst [vmem:[%s3254_s12 + $0x380] sm:$0xff] %v4159_v20  ;;  %v3036_v4 = vld [vmem:[%s3254_s12 + $0x290] sm:$0xff] }
 0x182   : > { %v1662_v38 = vadd.s32 688, %v3235_v7  ;;  %v4172_v21 = vadd.f32 %v3702_v8, %v3999_v10  ;;  %v2301_v41 = vmul.f32 %v2040_v11, %v2040_v11  ;;  %vm1914_vm4 = vcmp.lt.s32.totalorder %v1786_v43, 2048  ;;  %v4185_v10 = vpop.f32.mrf.mxu1 }
 0x183   : > { %v2425_v31 = vadd.f32 %v2424_v2, %v2298_v48  ;;  %v2165_v59 = vadd.f32 %v2164_v13, %v2038_v24  ;;  %v1661_v45 = vadd.s32 680, %v3235_v7  ;;  %v4177_v52 = vadd.f32 %v3702_v8, %v4022_v57  ;;  %v3037_v48 = vld [vmem:[%s3254_s12 + $0x280] sm:$0xff] }
 0x184   : > { %v2043_v24 = vsel %vm1915_vm2, %v3036_v4, 0.0  ;;  %v2041_v13 = vsel %vm1913_vm3, %v3037_v48, 0.0  ;;  %1561 = vst [vmem:[%s3254_s12 + $0x398] sm:$0xff] %v4172_v21  ;;  %vm1916_vm5 = vcmp.lt.s32.totalorder %v1788_v36, 2048  ;;  %v1789_v2 = vadd.s32 %v3247_v12, %v1660_v62  ;;  %v1418_v43 = vpop.f32.mrf.mxu1 }
 0x185   : > { %v2166_v34 = vadd.f32 %v2165_v59, %v2039_v60  ;;  %v2426_v40 = vadd.f32 %v2425_v31, %v2299_v32  ;;  %v1663_v57 = vadd.s32 696, %v3235_v7  ;;  %1559 = vst [vmem:[%s3254_s12 + $0x388] sm:$0xff] %v4177_v52  ;;  %v4193_v32 = vadd.f32 %v3702_v8, %v4049_v28 }
 0x186   : > { %v2042_v56 = vsel %vm1914_vm4, %v3596_v51, 0.0  ;;  %v1791_v61 = vadd.s32 %v3247_v12, %v1662_v38  ;;  %v2304_v31 = vmul.f32 %v2043_v24, %v2043_v24  ;;  %v1790_v59 = vadd.s32 %v3247_v12, %v1661_v45 }
 0x187   : > { %v2427_v60 = vadd.f32 %v2426_v40, %v2300_v47  ;;  %v2167_v58 = vadd.f32 %v2166_v34, %v2040_v11  ;;  %1564 = vst [vmem:[%s3254_s12 + $0x3b0] sm:$0xff] %v4193_v32  ;;  %v4203_v62 = vadd.f32 %v3702_v8, %v4073_v3  ;;  %v2302_v28 = vmul.f32 %v2041_v13, %v2041_v13  ;;  %v3038_v47 = vld [vmem:[%s3254_s12 + $0x298] sm:$0xff] }
 0x188   : > { %v2044_v11 = vsel %vm1916_vm5, %v3038_v47, 0.0  ;;  %v2303_v51 = vmul.f32 %v2042_v56, %v2042_v56  ;;  %vm1917_vm6 = vcmp.lt.s32.totalorder %v1789_v2, 2048  ;;  %v1792_v38 = vadd.s32 %v3247_v12, %v1663_v57 }
 0x189   : > { %v2168_v4 = vadd.f32 %v2167_v58, %v2041_v13  ;;  %v2428_v48 = vadd.f32 %v2427_v60, %v2301_v41  ;;  %v1664_v45 = vadd.s32 704, %v3235_v7  ;;  %1562 = vst [vmem:[%s3254_s12 + $0x3a0] sm:$0xff] %v4203_v62  ;;  %vm1919_vm7 = vcmp.lt.s32.totalorder %v1791_v61, 2048 }
 0x18a   : > { %v4213_v3 = vadd.f32 %v3702_v8, %v4098_v1  ;;  %v2305_v36 = vmul.f32 %v2044_v11, %v2044_v11  ;;  %vm1918_vm8 = vcmp.lt.s32.totalorder %v1790_v59, 2048  ;;  %v1665_v41 = vadd.s32 712, %v3235_v7 }
 0x18b   : > { %v2429_v34 = vadd.f32 %v2428_v48, %v2302_v28  ;;  %v2169_v40 = vadd.f32 %v2168_v4, %v2042_v56  ;;  %v4218_v13 = vadd.f32 %v3702_v8, %v4117_v49  ;;  %v2045_v60 = vsel %vm1917_vm6, %v3651_v17, 0.0  ;;  %v2928_v56 = vpop.f32.mrf.mxu1 }
 0x18c   : > { %v1666_v58 = vadd.s32 720, %v3235_v7  ;;  %1565 = vst [vmem:[%s3254_s12 + $0x3b8] sm:$0xff] %v4213_v3  ;;  %v2047_v1 = vsel %vm1919_vm7, %v3629_v27, 0.0  ;;  %vm1920_vm9 = vcmp.lt.s32.totalorder %v1792_v38, 2048  ;;  %v1793_v61 = vadd.s32 %v3247_v12, %v1664_v45 }
 0x18d   : > { %v2170_v2 = vadd.f32 %v2169_v40, %v2043_v24  ;;  %v2430_v57 = vadd.f32 %v2429_v34, %v2303_v51  ;;  %1563 = vst [vmem:[%s3254_s12 + $0x3a8] sm:$0xff] %v4218_v13  ;;  %v4230_v49 = vadd.f32 %v3702_v8, %v4143_v29  ;;  %v2046_v17 = vsel %vm1918_vm8, %v3709_v0, 0.0  ;;  %v1431_v59 = vpop.f32.mrf.mxu1 }
 0x18e   : > { %v1667_v28 = vadd.s32 728, %v3235_v7  ;;  %v2306_v48 = vmul.f32 %v2045_v60, %v2045_v60  ;;  %v1794_v27 = vadd.s32 %v3247_v12, %v1665_v41  ;;  %v4240_v47 = vadd.f32 %v3702_v8, %v4163_v19 }
 0x18f   : > { %v2431_v24 = vadd.f32 %v2430_v57, %v2304_v31  ;;  %v2171_v4 = vadd.f32 %v2170_v2, %v2044_v11  ;;  %1568 = vst [vmem:[%s3254_s12 + $0x3d0] sm:$0xff] %v4230_v49  ;;  %v2048_v31 = vsel %vm1920_vm9, %v3681_v9, 0.0  ;;  %v1795_v11 = vadd.s32 %v3247_v12, %v1666_v58 }
 0x190   : > { %v2308_v38 = vmul.f32 %v2047_v1, %v2047_v1  ;;  %v2307_v0 = vmul.f32 %v2046_v17, %v2046_v17  ;;  %vm1921_vm10 = vcmp.lt.s32.totalorder %v1793_v61, 2048  ;;  %v1668_v45 = vadd.s32 736, %v3235_v7  ;;  %1566 = vst [vmem:[%s3254_s12 + $0x3c0] sm:$0xff] %v4240_v47 }
 0x191   : > { %v2172_v51 = vadd.f32 %v2171_v4, %v2045_v60  ;;  %v2432_v29 = vadd.f32 %v2431_v24, %v2305_v36  ;;  %v1796_v19 = vadd.s32 %v3247_v12, %v1667_v28  ;;  %v4250_v36 = vadd.f32 %v3702_v8, %v4185_v10  ;;  %v2929_v24 = vpop.f32.mrf.mxu1 }
 0x192   : > { %v2309_v9 = vmul.f32 %v2048_v31, %v2048_v31  ;;  %vm1922_vm11 = vcmp.lt.s32.totalorder %v1794_v27, 2048  ;;  %v1669_v41 = vadd.s32 744, %v3235_v7  ;;  %v4254_v2 = vadd.f32 %v3702_v8, %v1418_v43 }
 0x193   : > { %v2433_v34 = vadd.f32 %v2432_v29, %v2306_v48  ;;  %v2173_v40 = vadd.f32 %v2172_v51, %v2046_v17  ;;  %vm1923_vm12 = vcmp.lt.s32.totalorder %v1795_v11, 2048  ;;  %v1670_v58 = vadd.s32 752, %v3235_v7  ;;  %1569 = vst [vmem:[%s3254_s12 + $0x3d8] sm:$0xff] %v4250_v36 }
 0x194   : > { %v2049_v10 = vsel %vm1921_vm10, %v3764_v50, 0.0  ;;  %v1797_v4 = vadd.s32 %v3247_v12, %v1668_v45  ;;  %v1671_v17 = vadd.s32 760, %v3235_v7  ;;  %1567 = vst [vmem:[%s3254_s12 + $0x3c8] sm:$0xff] %v4254_v2  ;;  %v4266_v43 = vadd.f32 %v3702_v8, %v2928_v56 }
 0x195   : > { %v2174_v57 = vadd.f32 %v2173_v40, %v2047_v1  ;;  %v2434_v60 = vadd.f32 %v2433_v34, %v2307_v0  ;;  %vm1924_vm13 = vcmp.lt.s32.totalorder %v1796_v19, 2048  ;;  %v2050_v48 = vsel %vm1922_vm11, %v3817_v46, 0.0 }
 0x196   : > { %v2051_v51 = vsel %vm1923_vm12, %v3742_v18, 0.0  ;;  %v1798_v50 = vadd.s32 %v3247_v12, %v1669_v41  ;;  %1572 = vst [vmem:[%s3254_s12 + $0x3f0] sm:$0xff] %v4266_v43  ;;  %v4275_v61 = vadd.f32 %v3702_v8, %v1431_v59  ;;  %v2310_v11 = vmul.f32 %v2049_v10, %v2049_v10  ;;  %v3039_v59 = vld [vmem:[%s4406_s2] ss:$0 sm:$0xff] }
 0x197   : > { %v2435_v1 = vadd.f32 %v2434_v60, %v2308_v38  ;;  %v2175_v28 = vadd.f32 %v2174_v57, %v2048_v31  ;;  %v1799_v38 = vadd.s32 %v3247_v12, %v1670_v58  ;;  %v1434_v31 = vpop.f32.mrf.mxu1  ;;  %v2052_v0 = vsel %vm1924_vm13, %v3794_v6, 0.0 }
 0x198   : > { %v2311_v45 = vmul.f32 %v2050_v48, %v2050_v48  ;;  %vm1925_vm14 = vcmp.lt.s32.totalorder %v1797_v4, 2048  ;;  %v1800_v18 = vadd.s32 %v3247_v12, %v1671_v17  ;;  %1570 = vst [vmem:[%s3254_s12 + $0x3e0] sm:$0xff] %v4275_v61  ;;  %v1672_v8 = vadd.s32 768, %v3235_v7 }
 0x199   : > { %v2176_v29 = vadd.f32 %v2175_v28, %v2049_v10  ;;  %v2436_v56 = vadd.f32 %v2435_v1, %v2309_v9  ;;  %v4286_v34 = vadd.f32 %v3039_v59, %v2929_v24  ;;  %v2312_v40 = vmul.f32 %v2051_v51, %v2051_v51 }
 0x19a   : > { %vm1926_vm15 = vcmp.lt.s32.totalorder %v1798_v50, 2048  ;;  %v1673_v6 = vadd.s32 776, %v3235_v7  ;;  %v4289_v19 = vadd.f32 %v3039_v59, %v1434_v31  ;;  %vm1927_vm0 = vcmp.lt.s32.totalorder %v1799_v38, 2048 }
 0x19b   : > { %v2437_v46 = vadd.f32 %v2436_v56, %v2310_v11  ;;  %v2177_v27 = vadd.f32 %v2176_v29, %v2050_v48  ;;  %v1674_v57 = vadd.s32 784, %v3235_v7  ;;  %1573 = vst [vmem:[%s3254_s12 + $0x3f8] sm:$0xff] %v4286_v34  ;;  %v2313_v60 = vmul.f32 %v2052_v0, %v2052_v0 }
 0x19c   : > { %v2053_v58 = vsel %vm1925_vm14, %v3872_v15, 0.0  ;;  %vm1928_vm1 = vcmp.lt.s32.totalorder %v1800_v18, 2048  ;;  %v1675_v24 = vadd.s32 792, %v3235_v7  ;;  %1571 = vst [vmem:[%s3254_s12 + $0x3e8] sm:$0xff] %v4289_v19  ;;  %v2054_v1 = vsel %vm1926_vm15, %v3923_v55, 0.0 }
 0x19d   : > { %v2178_v9 = vadd.f32 %v2177_v27, %v2051_v51  ;;  %v2438_v41 = vadd.f32 %v2437_v46, %v2311_v45  ;;  %v1801_v28 = vadd.s32 %v3247_v12, %v1672_v8  ;;  %v2055_v48 = vsel %vm1927_vm0, %v3850_v14, 0.0 }
 0x19e   : > { %v1802_v51 = vadd.s32 %v3247_v12, %v1673_v6  ;;  %v2314_v29 = vmul.f32 %v2053_v58, %v2053_v58  ;;  %v1803_v15 = vadd.s32 %v3247_v12, %v1674_v57  ;;  %v2056_v4 = vsel %vm1928_vm1, %v3902_v23, 0.0 }
 0x19f   : > { %v2439_v10 = vadd.f32 %v2438_v41, %v2312_v40  ;;  %v2179_v17 = vadd.f32 %v2178_v9, %v2052_v0  ;;  %v2315_v56 = vmul.f32 %v2054_v1, %v2054_v1  ;;  %v1804_v38 = vadd.s32 %v3247_v12, %v1675_v24 }
 0x1a0   : > { %v1676_v31 = vadd.s32 800, %v3235_v7  ;;  %vm1929_vm2 = vcmp.lt.s32.totalorder %v1801_v28, 2048  ;;  %v1677_v45 = vadd.s32 808, %v3235_v7  ;;  %v2316_v14 = vmul.f32 %v2055_v48, %v2055_v48 }
 0x1a1   : > { %v2180_v50 = vadd.f32 %v2179_v17, %v2053_v58  ;;  %v2440_v11 = vadd.f32 %v2439_v10, %v2313_v60  ;;  %vm1930_vm3 = vcmp.lt.s32.totalorder %v1802_v51, 2048  ;;  %v2317_v18 = vmul.f32 %v2056_v4, %v2056_v4 }
 0x1a2   : > { %vm1931_vm4 = vcmp.lt.s32.totalorder %v1803_v15, 2048  ;;  %v2057_v8 = vsel %vm1929_vm2, %v3968_v25, 0.0  ;;  %vm1932_vm5 = vcmp.lt.s32.totalorder %v1804_v38, 2048  ;;  %v1678_v23 = vadd.s32 816, %v3235_v7 }
 0x1a3   : > { %v2441_v0 = vadd.f32 %v2440_v11, %v2314_v29  ;;  %v2181_v55 = vadd.f32 %v2180_v50, %v2054_v1  ;;  %v1805_v59 = vadd.s32 %v3247_v12, %v1676_v31  ;;  %v2058_v9 = vsel %vm1930_vm3, %v3992_v44, 0.0 }
 0x1a4   : > { %v1806_v41 = vadd.s32 %v3247_v12, %v1677_v45  ;;  %v1679_v57 = vadd.s32 824, %v3235_v7  ;;  %v2059_v60 = vsel %vm1931_vm4, %v3949_v35, 0.0  ;;  %v2318_v24 = vmul.f32 %v2057_v8, %v2057_v8 }
 0x1a5   : > { %v2182_v46 = vadd.f32 %v2181_v55, %v2055_v48  ;;  %v2442_v27 = vadd.f32 %v2441_v0, %v2315_v56  ;;  %v2060_v25 = vsel %vm1932_vm5, %v3985_v37, 0.0  ;;  %v2319_v17 = vmul.f32 %v2058_v9, %v2058_v9 }
 0x1a6   : > { %v1807_v1 = vadd.s32 %v3247_v12, %v1678_v23  ;;  %vm1933_vm6 = vcmp.lt.s32.totalorder %v1805_v59, 2048  ;;  %vm1934_vm7 = vcmp.lt.s32.totalorder %v1806_v41, 2048  ;;  %v1680_v44 = vadd.s32 832, %v3235_v7 }
 0x1a7   : > { %v2443_v40 = vadd.f32 %v2442_v27, %v2316_v14  ;;  %v2183_v6 = vadd.f32 %v2182_v46, %v2056_v4  ;;  %v2320_v51 = vmul.f32 %v2059_v60, %v2059_v60  ;;  %v1808_v50 = vadd.s32 %v3247_v12, %v1679_v57 }
 0x1a8   : > { %v2061_v35 = vsel %vm1933_vm6, %v4019_v54, 0.0  ;;  %v1681_v15 = vadd.s32 840, %v3235_v7  ;;  %v2321_v4 = vmul.f32 %v2060_v25, %v2060_v25  ;;  %vm1935_vm8 = vcmp.lt.s32.totalorder %v1807_v1, 2048 }
 0x1a9   : > { %v2184_v58 = vadd.f32 %v2183_v6, %v2057_v8  ;;  %v2444_v10 = vadd.f32 %v2443_v40, %v2317_v18  ;;  %v2062_v37 = vsel %vm1934_vm7, %v4042_v16, 0.0  ;;  %v1682_v56 = vadd.s32 848, %v3235_v7 }
 0x1aa   : > { %v1809_v0 = vadd.s32 %v3247_v12, %v1680_v44  ;;  %v1683_v55 = vadd.s32 856, %v3235_v7  ;;  %v2322_v45 = vmul.f32 %v2061_v35, %v2061_v35  ;;  %vm1936_vm9 = vcmp.lt.s32.totalorder %v1808_v50, 2048 }
 0x1ab   : > { %v2445_v28 = vadd.f32 %v2444_v10, %v2318_v24  ;;  %v2185_v48 = vadd.f32 %v2184_v58, %v2058_v9  ;;  %v1810_v54 = vadd.s32 %v3247_v12, %v1681_v15  ;;  %v2063_v46 = vsel %vm1935_vm8, %v4009_v26, 0.0 }
 0x1ac   : > { %v2323_v27 = vmul.f32 %v2062_v37, %v2062_v37  ;;  %v1811_v8 = vadd.s32 %v3247_v12, %v1682_v56  ;;  %v1684_v16 = vadd.s32 864, %v3235_v7  ;;  %vm1937_vm10 = vcmp.lt.s32.totalorder %v1809_v0, 2048 }
 0x1ad   : > { %v2186_v29 = vadd.f32 %v2185_v48, %v2059_v60  ;;  %v2446_v11 = vadd.f32 %v2445_v28, %v2319_v17  ;;  %v1812_v40 = vadd.s32 %v3247_v12, %v1683_v55  ;;  %v2064_v6 = vsel %vm1936_vm9, %v4033_v33, 0.0 }
 0x1ae   : > { %v1686_v9 = vadd.s32 880, %v3235_v7  ;;  %v1685_v41 = vadd.s32 872, %v3235_v7  ;;  %v2324_v57 = vmul.f32 %v2063_v46, %v2063_v46  ;;  %vm1938_vm11 = vcmp.lt.s32.totalorder %v1810_v54, 2048 }
 0x1af   : > { %v2447_v38 = vadd.f32 %v2446_v11, %v2320_v51  ;;  %v2187_v31 = vadd.f32 %v2186_v29, %v2060_v25  ;;  %vm1939_vm12 = vcmp.lt.s32.totalorder %v1811_v8, 2048  ;;  %v2065_v26 = vsel %vm1937_vm10, %v4070_v30, 0.0 }
 0x1b0   : > { %v1813_v24 = vadd.s32 %v3247_v12, %v1684_v16  ;;  %v1687_v10 = vadd.s32 888, %v3235_v7  ;;  %v2325_v25 = vmul.f32 %v2064_v6, %v2064_v6  ;;  %vm1940_vm13 = vcmp.lt.s32.totalorder %v1812_v40, 2048 }
 0x1b1   : > { %v2188_v14 = vadd.f32 %v2187_v31, %v2061_v35  ;;  %v2448_v18 = vadd.f32 %v2447_v38, %v2321_v4  ;;  %v2066_v33 = vsel %vm1938_vm11, %v4092_v63, 0.0  ;;  %v1815_v28 = vadd.s32 %v3247_v12, %v1686_v9 }
 0x1b2   : > { %v1814_v48 = vadd.s32 %v3247_v12, %v1685_v41  ;;  %v1688_v44 = vadd.s32 896, %v3235_v7  ;;  %v2067_v51 = vsel %vm1939_vm12, %v4059_v42, 0.0  ;;  %v2326_v30 = vmul.f32 %v2065_v26, %v2065_v26 }
 0x1b3   : > { %v2449_v23 = vadd.f32 %v2448_v18, %v2322_v45  ;;  %v2189_v59 = vadd.f32 %v2188_v14, %v2062_v37  ;;  %vm1941_vm14 = vcmp.lt.s32.totalorder %v1813_v24, 2048  ;;  %v1816_v11 = vadd.s32 %v3247_v12, %v1687_v10 }
 0x1b4   : > { %v1690_v35 = vadd.s32 912, %v3235_v7  ;;  %v2068_v4 = vsel %vm1940_vm13, %v4081_v39, 0.0  ;;  %v2327_v37 = vmul.f32 %v2066_v33, %v2066_v33  ;;  %v2328_v56 = vmul.f32 %v2067_v51, %v2067_v51 }
 0x1b5   : > { %v2190_v60 = vadd.f32 %v2189_v59, %v2063_v46  ;;  %v2450_v58 = vadd.f32 %v2449_v23, %v2323_v27  ;;  %vm1943_vm15 = vcmp.lt.s32.totalorder %v1815_v28, 2048  ;;  %vm1942_vm0 = vcmp.lt.s32.totalorder %v1814_v48, 2048  ;;  %v4413_v27 = vld [vmem:[#allocation2_spill] sm:$0xff] }
 0x1b6   : > { %v1817_v38 = vadd.s32 %v3247_v12, %v1688_v44  ;;  %v2069_v0 = vsel %vm1941_vm14, %v4114_v53, 0.0  ;;  %v1689_v55 = vadd.s32 904, %v3235_v7  ;;  %v2329_v45 = vmul.f32 %v2068_v4, %v2068_v4 }
 0x1b7   : > { %v2451_v17 = vadd.f32 %v2450_v58, %v2324_v57  ;;  %v2191_v1 = vadd.f32 %v2190_v60, %v2064_v6  ;;  %vm1944_vm1 = vcmp.lt.s32.totalorder %v1816_v11, 2048  ;;  %v1819_v14 = vadd.s32 %v3247_v12, %v1690_v35  ;;  %v4414_v6 = vld [vmem:[#allocation3_spill] sm:$0xff] }
 0x1b8   : > { %v2070_v39 = vsel %vm1942_vm0, %v4137_v5, 0.0  ;;  %v1691_v46 = vadd.s32 920, %v3235_v7  ;;  %v2071_v8 = vsel %vm1943_vm15, %v4413_v27, 0.0  ;;  %v2330_v16 = vmul.f32 %v2069_v0, %v2069_v0 }
 0x1b9   : > { %v2192_v50 = vadd.f32 %v2191_v1, %v2065_v26  ;;  %v2452_v29 = vadd.f32 %v2451_v17, %v2325_v25  ;;  %vm1945_vm2 = vcmp.lt.s32.totalorder %v1817_v38, 2048  ;;  %v1818_v53 = vadd.s32 %v3247_v12, %v1689_v55 }
 0x1ba   : > { %v1692_v40 = vadd.s32 928, %v3235_v7  ;;  %v2072_v9 = vsel %vm1944_vm1, %v4414_v6, 0.0  ;;  %v2331_v41 = vmul.f32 %v2070_v39, %v2070_v39  ;;  %vm1947_vm3 = vcmp.lt.s32.totalorder %v1819_v14, 2048 }
 0x1bb   : > { %v2453_v15 = vadd.f32 %v2452_v29, %v2326_v30  ;;  %v2193_v63 = vadd.f32 %v2192_v50, %v2066_v33  ;;  %v1820_v5 = vadd.s32 %v3247_v12, %v1691_v46  ;;  %v1694_v58 = vadd.s32 944, %v3235_v7 }
 0x1bc   : > { %v2332_v26 = vmul.f32 %v2071_v8, %v2071_v8  ;;  %v2073_v24 = vsel %vm1945_vm2, %v4159_v20, 0.0  ;;  %v1693_v10 = vadd.s32 936, %v3235_v7  ;;  %vm1946_vm4 = vcmp.lt.s32.totalorder %v1818_v53, 2048 }
 0x1bd   : > { %v2194_v31 = vadd.f32 %v2193_v63, %v2067_v51  ;;  %v2454_v42 = vadd.f32 %v2453_v15, %v2327_v37  ;;  %v1821_v1 = vadd.s32 %v3247_v12, %v1692_v40  ;;  %v2333_v33 = vmul.f32 %v2072_v9, %v2072_v9 }
 0x1be   : > { %v2075_v28 = vsel %vm1947_vm3, %v4152_v22, 0.0  ;;  %vm1948_vm5 = vcmp.lt.s32.totalorder %v1820_v5, 2048  ;;  %v1823_v51 = vadd.s32 %v3247_v12, %v1694_v58  ;;  %v2334_v50 = vmul.f32 %v2073_v24, %v2073_v24 }
 0x1bf   : > { %v2455_v18 = vadd.f32 %v2454_v42, %v2328_v56  ;;  %v2195_v54 = vadd.f32 %v2194_v31, %v2068_v4  ;;  %v2074_v30 = vsel %vm1946_vm4, %v4177_v52, 0.0  ;;  %v1695_v20 = vadd.s32 952, %v3235_v7 }
 0x1c0   : > { %v1822_v29 = vadd.s32 %v3247_v12, %v1693_v10  ;;  %vm1949_vm6 = vcmp.lt.s32.totalorder %v1821_v1, 2048  ;;  %v1696_v15 = vadd.s32 960, %v3235_v7  ;;  %v2336_v4 = vmul.f32 %v2075_v28, %v2075_v28 }
 0x1c1   : > { %v2196_v23 = vadd.f32 %v2195_v54, %v2069_v0  ;;  %v2456_v59 = vadd.f32 %v2455_v18, %v2329_v45  ;;  %v2076_v22 = vsel %vm1948_vm5, %v4172_v21, 0.0  ;;  %v2335_v56 = vmul.f32 %v2074_v30, %v2074_v30 }
 0x1c2   : > { %vm1951_vm7 = vcmp.lt.s32.totalorder %v1823_v51, 2048  ;;  %v2077_v38 = vsel %vm1949_vm6, %v4203_v62, 0.0  ;;  %v1824_v52 = vadd.s32 %v3247_v12, %v1695_v20  ;;  %vm1950_vm8 = vcmp.lt.s32.totalorder %v1822_v29, 2048 }
 0x1c3   : > { %v2457_v57 = vadd.f32 %v2456_v59, %v2330_v16  ;;  %v2197_v60 = vadd.f32 %v2196_v23, %v2070_v39  ;;  %v1698_v31 = vadd.s32 976, %v3235_v7  ;;  %v1825_v55 = vadd.s32 %v3247_v12, %v1696_v15 }
 0x1c4   : > { %v1697_v45 = vadd.s32 968, %v3235_v7  ;;  %v2337_v14 = vmul.f32 %v2076_v22, %v2076_v22  ;;  %v2079_v21 = vsel %vm1951_vm7, %v4193_v32, 0.0  ;;  %v2338_v39 = vmul.f32 %v2077_v38, %v2077_v38 }
 0x1c5   : > { %v2198_v25 = vadd.f32 %v2197_v60, %v2071_v8  ;;  %v2458_v17 = vadd.f32 %v2457_v57, %v2331_v41  ;;  %vm1952_vm9 = vcmp.lt.s32.totalorder %v1824_v52, 2048  ;;  %v2078_v62 = vsel %vm1950_vm8, %v4218_v13, 0.0 }
 0x1c6   : > { %v1827_v46 = vadd.s32 %v3247_v12, %v1698_v31  ;;  %v1699_v27 = vadd.s32 984, %v3235_v7  ;;  %vm1953_vm10 = vcmp.lt.s32.totalorder %v1825_v55, 2048  ;;  %v1826_v23 = vadd.s32 %v3247_v12, %v1697_v45 }
 0x1c7   : > { %v2459_v48 = vadd.f32 %v2458_v17, %v2332_v26  ;;  %v2199_v44 = vadd.f32 %v2198_v25, %v2072_v9  ;;  %v2340_v59 = vmul.f32 %v2079_v21, %v2079_v21  ;;  %v2339_v6 = vmul.f32 %v2078_v62, %v2078_v62 }
 0x1c8   : > { %v1700_v32 = vadd.s32 992, %v3235_v7  ;;  %v2080_v9 = vsel %vm1952_vm9, %v4213_v3, 0.0  ;;  %vm1955_vm11 = vcmp.lt.s32.totalorder %v1827_v46, 2048  ;;  %v2081_v13 = vsel %vm1953_vm10, %v4240_v47, 0.0 }
 0x1c9   : > { %v2200_v11 = vadd.f32 %v2199_v44, %v2073_v24  ;;  %v2460_v35 = vadd.f32 %v2459_v48, %v2333_v33  ;;  %v1828_v41 = vadd.s32 %v3247_v12, %v1699_v27  ;;  %vm1954_vm12 = vcmp.lt.s32.totalorder %v1826_v23, 2048 }
 0x1ca   : > { %v1701_v5 = vadd.s32 1000, %v3235_v7  ;;  %v1702_v58 = vadd.s32 1008, %v3235_v7  ;;  %v2341_v26 = vmul.f32 %v2080_v9, %v2080_v9  ;;  %v1829_v25 = vadd.s32 %v3247_v12, %v1700_v32 }
 0x1cb   : > { %v2461_v63 = vadd.f32 %v2460_v35, %v2334_v50  ;;  %v2201_v37 = vadd.f32 %v2200_v11, %v2074_v30  ;;  %v2083_v17 = vsel %vm1955_vm11, %v4230_v49, 0.0  ;;  %v2342_v3 = vmul.f32 %v2081_v13, %v2081_v13 }
 0x1cc   : > { %vm1956_vm13 = vcmp.lt.s32.totalorder %v1828_v41, 2048  ;;  %v2082_v47 = vsel %vm1954_vm12, %v4254_v2, 0.0  ;;  %v1830_v48 = vadd.s32 %v3247_v12, %v1701_v5  ;;  %v1831_v44 = vadd.s32 %v3247_v12, %v1702_v58 }
 0x1cd   : > { %v2202_v42 = vadd.f32 %v2201_v37, %v2075_v28  ;;  %v2462_v0 = vadd.f32 %v2461_v63, %v2335_v56  ;;  %v1703_v28 = vadd.s32 1016, %v3235_v7  ;;  %v2343_v30 = vmul.f32 %v2082_v47, %v2082_v47 }
 0x1ce   : > { %vm1957_vm14 = vcmp.lt.s32.totalorder %v1829_v25, 2048  ;;  %v2344_v20 = vmul.f32 %v2083_v17, %v2083_v17  ;;  %v2084_v29 = vsel %vm1956_vm13, %v4250_v36, 0.0  ;;  %vm1958_vm15 = vcmp.lt.s32.totalorder %v1830_v48, 2048 }
 0x1cf   : > { %v2463_v18 = vadd.f32 %v2462_v0, %v2336_v4  ;;  %v2203_v54 = vadd.f32 %v2202_v42, %v2076_v22  ;;  %v1832_v35 = vadd.s32 %v3247_v12, %v1703_v28  ;;  %v2085_v2 = vsel %vm1957_vm14, %v4275_v61, 0.0 }
 0x1d0   : > { %v2345_v15 = vmul.f32 %v2084_v29, %v2084_v29  ;;  %vm1959_vm0 = vcmp.lt.s32.totalorder %v1831_v44, 2048  ;;  %v2086_v63 = vsel %vm1958_vm15, %v4289_v19, 0.0  ;;  %v2346_v56 = vmul.f32 %v2085_v2, %v2085_v2 }
 0x1d1   : > { %v2204_v8 = vadd.f32 %v2203_v54, %v2077_v38  ;;  %v2464_v16 = vadd.f32 %v2463_v18, %v2337_v14  ;;  %vm1960_vm1 = vcmp.lt.s32.totalorder %v1832_v35, 2048  ;;  %v2087_v36 = vsel %vm1959_vm0, %v4266_v43, 0.0 }
 0x1d2   : > { %v2347_v42 = vmul.f32 %v2086_v63, %v2086_v63  ;;  %v2088_v12 = vsel %vm1960_vm1, %v4286_v34, 0.0  ;;  %v2348_v61 = vmul.f32 %v2087_v36, %v2087_v36  ;;  %vm2483_vm2 = vcmp.eq.s32.totalorder %v3235_v7, 0 }
 0x1d3   : > { %v2465_v53 = vadd.f32 %v2464_v16, %v2338_v39  ;;  %v2205_v40 = vadd.f32 %v2204_v8, %v2078_v62  ;;  %v2349_v45 = vmul.f32 %v2088_v12, %v2088_v12  ;;  %vm2485_vm3 = vcmp.eq.s32.totalorder %v3235_v7, 1 }
 0x1d5   : > { %v2206_v57 = vadd.f32 %v2205_v40, %v2079_v21  ;;  %v2466_v60 = vadd.f32 %v2465_v53, %v2339_v6 }
 0x1d7   : > { %v2467_v24 = vadd.f32 %v2466_v60, %v2340_v59  ;;  %v2207_v10 = vadd.f32 %v2206_v57, %v2080_v9 }
 0x1d9   : > { %v2208_v1 = vadd.f32 %v2207_v10, %v2081_v13  ;;  %v2468_v33 = vadd.f32 %v2467_v24, %v2341_v26 }
 0x1db   : > { %v2469_v51 = vadd.f32 %v2468_v33, %v2342_v3  ;;  %v2209_v50 = vadd.f32 %v2208_v1, %v2082_v47 }
 0x1dd   : > { %v2210_v49 = vadd.f32 %v2209_v50, %v2083_v17  ;;  %v2470_v11 = vadd.f32 %v2469_v51, %v2343_v30 }
 0x1df   : > { %v2471_v4 = vadd.f32 %v2470_v11, %v2344_v20  ;;  %v2211_v22 = vadd.f32 %v2210_v49, %v2084_v29 }
 0x1e1   : > { %v2212_v37 = vadd.f32 %v2211_v22, %v2085_v2  ;;  %v2472_v38 = vadd.f32 %v2471_v4, %v2345_v15 }
 0x1e3   : > { %v2473_v52 = vadd.f32 %v2472_v38, %v2346_v56  ;;  %v2213_v31 = vadd.f32 %v2212_v37, %v2086_v63 }
 0x1e5   : > { %v2214_v0 = vadd.f32 %v2213_v31, %v2087_v36  ;;  %v2474_v55 = vadd.f32 %v2473_v52, %v2347_v42 }
 0x1e7   : > { %v2215_v14 = vadd.f32 %v2214_v0, %v2088_v12  ;;  %v2475_v18 = vadd.f32 %v2474_v55, %v2348_v61 }
 0x1e9   : > { %v2216_v19 = vrot.slane %v2215_v14, 4  ;;  %v2476_v21 = vadd.f32 %v2475_v18, %v2349_v45 }
 0x1eb   : > { %v2217_v54 = vadd.f32 %v2216_v19, %v2215_v14  ;;  %v2477_v39 = vrot.slane %v2476_v21, 4 }
 0x1ed   : > { %v2218_v62 = vrot.slane %v2217_v54, 2  ;;  %v2478_v46 = vadd.f32 %v2477_v39, %v2476_v21 }
 0x1ef   : > { %v2219_v43 = vadd.f32 %v2218_v62, %v2217_v54  ;;  %v2479_v27 = vrot.slane %v2478_v46, 2 }
 0x1f1   : > { %v2220_v8 = vrot.slane %v2219_v43, 1  ;;  %v2480_v16 = vadd.f32 %v2479_v27, %v2478_v46 }
 0x1f3   : > { %v2221_v34 = vadd.f32 %v2220_v8, %v2219_v43  ;;  %v2481_v23 = vrot.slane %v2480_v16, 1 }
 0x1f5   : > { %v2482_v59 = vadd.f32 %v2481_v23, %v2480_v16  ;;  %v2484_v53 = vsel %vm2483_vm2, %v2221_v34, 0.0 }
 0x1f7   : > { %v2486_v40 = vsel %vm2485_vm3, %v2482_v59, 0.0 }
 0x1f8   : > { %v2487_v6 = vadd.f32 %v2486_v40, %v2484_v53 }
 0x1fa   : > { %2488 = vst [vmem:[%s211_s22] sm:$0xff] %v2487_v6 }
 0x1fb PF: > { %s15_s15 = sadd.s32 1, %s3046_s15  }
 0x1fc   : > { %p12_p5 = scmp.ge.s32.totalorder %s15_s15, 4  }
 0x1fe   :  { %14 = sbr.rel (!%p12_p5) target bundleno = 1 (0x1), region = 74 }

// kernel: upsampled_part.7
= control target key start
LH: loop header
LB: loop body
LE: loop exit
PB: predicated region body
PF: predicated region fallthrough
CT: control target
= control target key end

     0   :  { %s3416_s0 = inlined_call_operand.vmem [shape: f32[2048,128], index: 0, kind: input, shape index: {}]   ;;  %s3417_s1 = inlined_call_operand.vmem [shape: f32[1,128], index: 1, kind: input, shape index: {}]   ;;  %s3418_s2 = inlined_call_operand.vmem [shape: f32[1,128], index: 2, kind: input, shape index: {}]   ;;  %s3419_s3 = inlined_call_operand.vmem [shape: f32[2048,128], index: 3, kind: output, shape index: {}]  }
   0x1   :  { %v14_v0 = vld [vmem:[%s3416_s0] sm:$0xff]  ;;  %v15_v4 = vld [vmem:[%s3416_s0 + $0x8] sm:$0xff]  ;;  %v16_v5 = vld [vmem:[%s3416_s0 + $0x10] sm:$0xff] }
   0x2   :  { %v1344_v1 = vld [vmem:[%s3417_s1] ss:$0 sm:$0xff]  ;;  %v17_v6 = vld [vmem:[%s3416_s0 + $0x18] sm:$0xff]  ;;  %v19_v11 = vld [vmem:[%s3416_s0 + $0x28] sm:$0xff] }
   0x3   :  { %v1349_v2 = vld [vmem:[%s3418_s2] ss:$0 sm:$0xff]  ;;  %v277_v3 = vmul.f32 %v1344_v1, %v14_v0  ;;  %v278_v7 = vmul.f32 %v1344_v1, %v15_v4  ;;  %v279_v8 = vmul.f32 %v1344_v1, %v16_v5  ;;  %v280_v9 = vmul.f32 %v1344_v1, %v17_v6  ;;  %v20_v12 = vld [vmem:[%s3416_s0 + $0x30] sm:$0xff]  ;;  %v21_v17 = vld [vmem:[%s3416_s0 + $0x38] sm:$0xff] }
   0x4   :  { %v18_v10 = vld [vmem:[%s3416_s0 + $0x20] sm:$0xff]  ;;  %v282_v15 = vmul.f32 %v1344_v1, %v19_v11  ;;  %v283_v16 = vmul.f32 %v1344_v1, %v20_v12  ;;  %v284_v21 = vmul.f32 %v1344_v1, %v21_v17  ;;  %v23_v27 = vld [vmem:[%s3416_s0 + $0x48] sm:$0xff]  ;;  %v24_v28 = vld [vmem:[%s3416_s0 + $0x50] sm:$0xff] }
   0x5   :  { %v540_v13 = vadd.f32 %v1349_v2, %v277_v3  ;;  %v281_v14 = vmul.f32 %v1344_v1, %v18_v10  ;;  %v541_v18 = vadd.f32 %v1349_v2, %v278_v7  ;;  %v542_v19 = vadd.f32 %v1349_v2, %v279_v8  ;;  %v22_v22 = vld [vmem:[%s3416_s0 + $0x40] sm:$0xff]  ;;  %v25_v29 = vld [vmem:[%s3416_s0 + $0x58] sm:$0xff]  ;;  %v27_v35 = vld [vmem:[%s3416_s0 + $0x68] sm:$0xff] }
   0x6   :  { %v543_v20 = vadd.f32 %v1349_v2, %v280_v9  ;;  %v545_v25 = vadd.f32 %v1349_v2, %v282_v15  ;;  %v546_v26 = vadd.f32 %v1349_v2, %v283_v16  ;;  %v547_v33 = vadd.f32 %v1349_v2, %v284_v21  ;;  %v26_v34 = vld [vmem:[%s3416_s0 + $0x60] sm:$0xff]  ;;  %v28_v36 = vld [vmem:[%s3416_s0 + $0x70] sm:$0xff]  ;;  %v29_v41 = vld [vmem:[%s3416_s0 + $0x78] sm:$0xff] }
   0x7   :  { %v796_v23 = vmax.f32 %v540_v13, 0.0  ;;  %v544_v24 = vadd.f32 %v1349_v2, %v281_v14  ;;  %v797_v30 = vmax.f32 %v541_v18, 0.0  ;;  %v798_v31 = vmax.f32 %v542_v19, 0.0  ;;  %v30_v54 = vld [vmem:[%s3416_s0 + $0x80] sm:$0xff]  ;;  %v31_v59 = vld [vmem:[%s3416_s0 + $0x88] sm:$0xff]  ;;  %v32_v60 = vld [vmem:[%s3416_s0 + $0x90] sm:$0xff] }
   0x8   :  { %v799_v32 = vmax.f32 %v543_v20, 0.0  ;;  %v801_v38 = vmax.f32 %v545_v25, 0.0  ;;  %v802_v39 = vmax.f32 %v546_v26, 0.0  ;;  %v285_v40 = vmul.f32 %v1344_v1, %v22_v22  ;;  %v33_v61 = vld [vmem:[%s3416_s0 + $0x98] sm:$0xff]  ;;  %v34_v4 = vld [vmem:[%s3416_s0 + $0xa0] sm:$0xff]  ;;  %v35_v5 = vld [vmem:[%s3416_s0 + $0xa8] sm:$0xff] }
   0x9   :  { %1052 = vst [vmem:[%s3419_s3] sm:$0xff] %v796_v23  ;;  %v800_v37 = vmax.f32 %v544_v24, 0.0  ;;  %1053 = vst [vmem:[%s3419_s3 + $0x8] sm:$0xff] %v797_v30  ;;  %v803_v42 = vmax.f32 %v547_v33, 0.0  ;;  %v286_v43 = vmul.f32 %v1344_v1, %v23_v27  ;;  %v287_v44 = vmul.f32 %v1344_v1, %v24_v28  ;;  %v36_v6 = vld [vmem:[%s3416_s0 + $0xb0] sm:$0xff]  ;;  %v37_v11 = vld [vmem:[%s3416_s0 + $0xb8] sm:$0xff] }
   0xa   :  { %1054 = vst [vmem:[%s3419_s3 + $0x10] sm:$0xff] %v798_v31  ;;  %1055 = vst [vmem:[%s3419_s3 + $0x18] sm:$0xff] %v799_v32  ;;  %v288_v45 = vmul.f32 %v1344_v1, %v25_v29  ;;  %v548_v46 = vadd.f32 %v1349_v2, %v285_v40  ;;  %v289_v47 = vmul.f32 %v1344_v1, %v26_v34  ;;  %v38_v24 = vld [vmem:[%s3416_s0 + $0xc0] sm:$0xff]  ;;  %v39_v29 = vld [vmem:[%s3416_s0 + $0xc8] sm:$0xff] }
   0xb   :  { %1056 = vst [vmem:[%s3419_s3 + $0x20] sm:$0xff] %v800_v37  ;;  %1057 = vst [vmem:[%s3419_s3 + $0x28] sm:$0xff] %v801_v38  ;;  %v290_v48 = vmul.f32 %v1344_v1, %v27_v35  ;;  %v291_v49 = vmul.f32 %v1344_v1, %v28_v36  ;;  %v549_v50 = vadd.f32 %v1349_v2, %v286_v43  ;;  %v40_v30 = vld [vmem:[%s3416_s0 + $0xd0] sm:$0xff]  ;;  %v41_v31 = vld [vmem:[%s3416_s0 + $0xd8] sm:$0xff] }
   0xc   :  { %1058 = vst [vmem:[%s3419_s3 + $0x30] sm:$0xff] %v802_v39  ;;  %1059 = vst [vmem:[%s3419_s3 + $0x38] sm:$0xff] %v803_v42  ;;  %v550_v51 = vadd.f32 %v1349_v2, %v287_v44  ;;  %v551_v52 = vadd.f32 %v1349_v2, %v288_v45  ;;  %v292_v53 = vmul.f32 %v1344_v1, %v29_v41  ;;  %v804_v55 = vmax.f32 %v548_v46, 0.0  ;;  %v42_v36 = vld [vmem:[%s3416_s0 + $0xe0] sm:$0xff]  ;;  %v43_v37 = vld [vmem:[%s3416_s0 + $0xe8] sm:$0xff] }
   0xd   :  { %v552_v56 = vadd.f32 %v1349_v2, %v289_v47  ;;  %v553_v57 = vadd.f32 %v1349_v2, %v290_v48  ;;  %v554_v58 = vadd.f32 %v1349_v2, %v291_v49  ;;  %v805_v62 = vmax.f32 %v549_v50, 0.0  ;;  %v44_v38 = vld [vmem:[%s3416_s0 + $0xf0] sm:$0xff]  ;;  %v45_v43 = vld [vmem:[%s3416_s0 + $0xf8] sm:$0xff] }
   0xe   :  { %v806_v63 = vmax.f32 %v550_v51, 0.0  ;;  %v807_v0 = vmax.f32 %v551_v52, 0.0  ;;  %v555_v3 = vadd.f32 %v1349_v2, %v292_v53  ;;  %1060 = vst [vmem:[%s3419_s3 + $0x40] sm:$0xff] %v804_v55  ;;  %v293_v10 = vmul.f32 %v1344_v1, %v30_v54 }
   0xf   :  { %v808_v7 = vmax.f32 %v552_v56, 0.0  ;;  %v809_v8 = vmax.f32 %v553_v57, 0.0  ;;  %v810_v9 = vmax.f32 %v554_v58, 0.0  ;;  %1061 = vst [vmem:[%s3419_s3 + $0x48] sm:$0xff] %v805_v62  ;;  %v294_v13 = vmul.f32 %v1344_v1, %v31_v59  ;;  %v46_v56 = vld [vmem:[%s3416_s0 + $0x100] sm:$0xff]  ;;  %v48_v62 = vld [vmem:[%s3416_s0 + $0x110] sm:$0xff] }
  0x10   :  { %1062 = vst [vmem:[%s3419_s3 + $0x50] sm:$0xff] %v806_v63  ;;  %1063 = vst [vmem:[%s3419_s3 + $0x58] sm:$0xff] %v807_v0  ;;  %v811_v12 = vmax.f32 %v555_v3, 0.0  ;;  %v295_v14 = vmul.f32 %v1344_v1, %v32_v60  ;;  %v296_v15 = vmul.f32 %v1344_v1, %v33_v61  ;;  %v556_v16 = vadd.f32 %v1349_v2, %v293_v10  ;;  %v47_v61 = vld [vmem:[%s3416_s0 + $0x108] sm:$0xff]  ;;  %v49_v63 = vld [vmem:[%s3416_s0 + $0x118] sm:$0xff] }
  0x11   :  { %1064 = vst [vmem:[%s3419_s3 + $0x60] sm:$0xff] %v808_v7  ;;  %1065 = vst [vmem:[%s3419_s3 + $0x68] sm:$0xff] %v809_v8  ;;  %v297_v17 = vmul.f32 %v1344_v1, %v34_v4  ;;  %v298_v18 = vmul.f32 %v1344_v1, %v35_v5  ;;  %v299_v19 = vmul.f32 %v1344_v1, %v36_v6  ;;  %v50_v6 = vld [vmem:[%s3416_s0 + $0x120] sm:$0xff]  ;;  %v51_v7 = vld [vmem:[%s3416_s0 + $0x128] sm:$0xff] }
  0x12   :  { %1066 = vst [vmem:[%s3419_s3 + $0x70] sm:$0xff] %v810_v9  ;;  %1067 = vst [vmem:[%s3419_s3 + $0x78] sm:$0xff] %v811_v12  ;;  %v557_v20 = vadd.f32 %v1349_v2, %v294_v13  ;;  %v558_v21 = vadd.f32 %v1349_v2, %v295_v14  ;;  %v559_v22 = vadd.f32 %v1349_v2, %v296_v15  ;;  %v812_v25 = vmax.f32 %v556_v16, 0.0  ;;  %v52_v8 = vld [vmem:[%s3416_s0 + $0x130] sm:$0xff]  ;;  %v53_v13 = vld [vmem:[%s3416_s0 + $0x138] sm:$0xff] }
  0x13   :  { %v300_v23 = vmul.f32 %v1344_v1, %v37_v11  ;;  %v560_v26 = vadd.f32 %v1349_v2, %v297_v17  ;;  %v561_v27 = vadd.f32 %v1349_v2, %v298_v18  ;;  %v562_v28 = vadd.f32 %v1349_v2, %v299_v19 }
  0x14   :  { %v813_v32 = vmax.f32 %v557_v20, 0.0  ;;  %v814_v33 = vmax.f32 %v558_v21, 0.0  ;;  %v815_v34 = vmax.f32 %v559_v22, 0.0  ;;  %1068 = vst [vmem:[%s3419_s3 + $0x80] sm:$0xff] %v812_v25  ;;  %v301_v42 = vmul.f32 %v1344_v1, %v38_v24 }
  0x15   :  { %v563_v35 = vadd.f32 %v1349_v2, %v300_v23  ;;  %v816_v39 = vmax.f32 %v560_v26, 0.0  ;;  %v817_v40 = vmax.f32 %v561_v27, 0.0  ;;  %v818_v41 = vmax.f32 %v562_v28, 0.0  ;;  %v54_v26 = vld [vmem:[%s3416_s0 + $0x140] sm:$0xff] }
  0x16   :  { %1069 = vst [vmem:[%s3419_s3 + $0x88] sm:$0xff] %v813_v32  ;;  %1070 = vst [vmem:[%s3419_s3 + $0x90] sm:$0xff] %v814_v33  ;;  %v302_v45 = vmul.f32 %v1344_v1, %v39_v29  ;;  %v303_v46 = vmul.f32 %v1344_v1, %v40_v30  ;;  %v304_v47 = vmul.f32 %v1344_v1, %v41_v31  ;;  %v55_v31 = vld [vmem:[%s3416_s0 + $0x148] sm:$0xff]  ;;  %v56_v32 = vld [vmem:[%s3416_s0 + $0x150] sm:$0xff] }
  0x17   :  { %1071 = vst [vmem:[%s3419_s3 + $0x98] sm:$0xff] %v815_v34  ;;  %v819_v44 = vmax.f32 %v563_v35, 0.0  ;;  %1072 = vst [vmem:[%s3419_s3 + $0xa0] sm:$0xff] %v816_v39  ;;  %v564_v48 = vadd.f32 %v1349_v2, %v301_v42  ;;  %v305_v49 = vmul.f32 %v1344_v1, %v42_v36  ;;  %v306_v50 = vmul.f32 %v1344_v1, %v43_v37  ;;  %v57_v33 = vld [vmem:[%s3416_s0 + $0x158] sm:$0xff]  ;;  %v59_v39 = vld [vmem:[%s3416_s0 + $0x168] sm:$0xff] }
  0x18   :  { %1073 = vst [vmem:[%s3419_s3 + $0xa8] sm:$0xff] %v817_v40  ;;  %1074 = vst [vmem:[%s3419_s3 + $0xb0] sm:$0xff] %v818_v41  ;;  %v307_v51 = vmul.f32 %v1344_v1, %v44_v38  ;;  %v565_v52 = vadd.f32 %v1349_v2, %v302_v45  ;;  %v566_v53 = vadd.f32 %v1349_v2, %v303_v46  ;;  %v58_v38 = vld [vmem:[%s3416_s0 + $0x160] sm:$0xff]  ;;  %v60_v40 = vld [vmem:[%s3416_s0 + $0x170] sm:$0xff] }
  0x19   :  { %1075 = vst [vmem:[%s3419_s3 + $0xb8] sm:$0xff] %v819_v44  ;;  %v567_v54 = vadd.f32 %v1349_v2, %v304_v47  ;;  %v308_v55 = vmul.f32 %v1344_v1, %v45_v43  ;;  %v820_v57 = vmax.f32 %v564_v48, 0.0  ;;  %v568_v58 = vadd.f32 %v1349_v2, %v305_v49  ;;  %v61_v45 = vld [vmem:[%s3416_s0 + $0x178] sm:$0xff] }
  0x1a   :  { %v569_v59 = vadd.f32 %v1349_v2, %v306_v50  ;;  %v570_v60 = vadd.f32 %v1349_v2, %v307_v51  ;;  %v821_v0 = vmax.f32 %v565_v52, 0.0  ;;  %v822_v3 = vmax.f32 %v566_v53, 0.0 }
  0x1b   :  { %v823_v4 = vmax.f32 %v567_v54, 0.0  ;;  %v571_v5 = vadd.f32 %v1349_v2, %v308_v55  ;;  %1076 = vst [vmem:[%s3419_s3 + $0xc0] sm:$0xff] %v820_v57  ;;  %v824_v9 = vmax.f32 %v568_v58, 0.0  ;;  %v309_v12 = vmul.f32 %v1344_v1, %v46_v56  ;;  %v62_v58 = vld [vmem:[%s3416_s0 + $0x180] sm:$0xff] }
  0x1c   :  { %v825_v10 = vmax.f32 %v569_v59, 0.0  ;;  %v826_v11 = vmax.f32 %v570_v60, 0.0  ;;  %1077 = vst [vmem:[%s3419_s3 + $0xc8] sm:$0xff] %v821_v0  ;;  %1078 = vst [vmem:[%s3419_s3 + $0xd0] sm:$0xff] %v822_v3  ;;  %v310_v15 = vmul.f32 %v1344_v1, %v47_v61  ;;  %v311_v16 = vmul.f32 %v1344_v1, %v48_v62  ;;  %v64_v0 = vld [vmem:[%s3416_s0 + $0x190] sm:$0xff]  ;;  %v65_v3 = vld [vmem:[%s3416_s0 + $0x198] sm:$0xff] }
  0x1d   :  { %1079 = vst [vmem:[%s3419_s3 + $0xd8] sm:$0xff] %v823_v4  ;;  %v827_v14 = vmax.f32 %v571_v5, 0.0  ;;  %v312_v17 = vmul.f32 %v1344_v1, %v49_v63  ;;  %1080 = vst [vmem:[%s3419_s3 + $0xe0] sm:$0xff] %v824_v9  ;;  %v572_v18 = vadd.f32 %v1349_v2, %v309_v12  ;;  %v313_v19 = vmul.f32 %v1344_v1, %v50_v6  ;;  %v63_v63 = vld [vmem:[%s3416_s0 + $0x188] sm:$0xff] }
  0x1e   :  { %1081 = vst [vmem:[%s3419_s3 + $0xe8] sm:$0xff] %v825_v10  ;;  %1082 = vst [vmem:[%s3419_s3 + $0xf0] sm:$0xff] %v826_v11  ;;  %v314_v20 = vmul.f32 %v1344_v1, %v51_v7  ;;  %v315_v21 = vmul.f32 %v1344_v1, %v52_v8  ;;  %v573_v22 = vadd.f32 %v1349_v2, %v310_v15  ;;  %v66_v8 = vld [vmem:[%s3416_s0 + $0x1a0] sm:$0xff]  ;;  %v67_v9 = vld [vmem:[%s3416_s0 + $0x1a8] sm:$0xff] }
  0x1f   :  { %1083 = vst [vmem:[%s3419_s3 + $0xf8] sm:$0xff] %v827_v14  ;;  %v574_v23 = vadd.f32 %v1349_v2, %v311_v16  ;;  %v575_v24 = vadd.f32 %v1349_v2, %v312_v17  ;;  %v316_v25 = vmul.f32 %v1344_v1, %v53_v13  ;;  %v828_v27 = vmax.f32 %v572_v18, 0.0  ;;  %v68_v10 = vld [vmem:[%s3416_s0 + $0x1b0] sm:$0xff]  ;;  %v69_v15 = vld [vmem:[%s3416_s0 + $0x1b8] sm:$0xff] }
  0x20   :  { %v576_v28 = vadd.f32 %v1349_v2, %v313_v19  ;;  %v577_v29 = vadd.f32 %v1349_v2, %v314_v20  ;;  %v578_v30 = vadd.f32 %v1349_v2, %v315_v21  ;;  %v829_v34 = vmax.f32 %v573_v22, 0.0 }
  0x21   :  { %v830_v35 = vmax.f32 %v574_v23, 0.0  ;;  %v831_v36 = vmax.f32 %v575_v24, 0.0  ;;  %v579_v37 = vadd.f32 %v1349_v2, %v316_v25  ;;  %1084 = vst [vmem:[%s3419_s3 + $0x100] sm:$0xff] %v828_v27  ;;  %v317_v44 = vmul.f32 %v1344_v1, %v54_v26 }
  0x22   :  { %v832_v41 = vmax.f32 %v576_v28, 0.0  ;;  %v833_v42 = vmax.f32 %v577_v29, 0.0  ;;  %v834_v43 = vmax.f32 %v578_v30, 0.0  ;;  %1085 = vst [vmem:[%s3419_s3 + $0x108] sm:$0xff] %v829_v34  ;;  %v318_v47 = vmul.f32 %v1344_v1, %v55_v31  ;;  %v70_v28 = vld [vmem:[%s3416_s0 + $0x1c0] sm:$0xff]  ;;  %v72_v34 = vld [vmem:[%s3416_s0 + $0x1d0] sm:$0xff] }
  0x23   :  { %1086 = vst [vmem:[%s3419_s3 + $0x110] sm:$0xff] %v830_v35  ;;  %1087 = vst [vmem:[%s3419_s3 + $0x118] sm:$0xff] %v831_v36  ;;  %v835_v46 = vmax.f32 %v579_v37, 0.0  ;;  %v319_v48 = vmul.f32 %v1344_v1, %v56_v32  ;;  %v320_v49 = vmul.f32 %v1344_v1, %v57_v33  ;;  %v580_v50 = vadd.f32 %v1349_v2, %v317_v44  ;;  %v71_v33 = vld [vmem:[%s3416_s0 + $0x1c8] sm:$0xff]  ;;  %v73_v35 = vld [vmem:[%s3416_s0 + $0x1d8] sm:$0xff] }
  0x24   :  { %1088 = vst [vmem:[%s3419_s3 + $0x120] sm:$0xff] %v832_v41  ;;  %1089 = vst [vmem:[%s3419_s3 + $0x128] sm:$0xff] %v833_v42  ;;  %v321_v51 = vmul.f32 %v1344_v1, %v58_v38  ;;  %v322_v52 = vmul.f32 %v1344_v1, %v59_v39  ;;  %v323_v53 = vmul.f32 %v1344_v1, %v60_v40  ;;  %v74_v40 = vld [vmem:[%s3416_s0 + $0x1e0] sm:$0xff]  ;;  %v75_v41 = vld [vmem:[%s3416_s0 + $0x1e8] sm:$0xff] }
  0x25   :  { %1090 = vst [vmem:[%s3419_s3 + $0x130] sm:$0xff] %v834_v43  ;;  %1091 = vst [vmem:[%s3419_s3 + $0x138] sm:$0xff] %v835_v46  ;;  %v581_v54 = vadd.f32 %v1349_v2, %v318_v47  ;;  %v582_v55 = vadd.f32 %v1349_v2, %v319_v48  ;;  %v583_v56 = vadd.f32 %v1349_v2, %v320_v49  ;;  %v836_v59 = vmax.f32 %v580_v50, 0.0  ;;  %v76_v42 = vld [vmem:[%s3416_s0 + $0x1f0] sm:$0xff]  ;;  %v77_v47 = vld [vmem:[%s3416_s0 + $0x1f8] sm:$0xff] }
  0x26   :  { %v324_v57 = vmul.f32 %v1344_v1, %v61_v45  ;;  %v584_v60 = vadd.f32 %v1349_v2, %v321_v51  ;;  %v585_v61 = vadd.f32 %v1349_v2, %v322_v52  ;;  %v586_v62 = vadd.f32 %v1349_v2, %v323_v53 }
  0x27   :  { %v837_v4 = vmax.f32 %v581_v54, 0.0  ;;  %v838_v5 = vmax.f32 %v582_v55, 0.0  ;;  %v839_v6 = vmax.f32 %v583_v56, 0.0  ;;  %1092 = vst [vmem:[%s3419_s3 + $0x140] sm:$0xff] %v836_v59  ;;  %v325_v14 = vmul.f32 %v1344_v1, %v62_v58 }
  0x28   :  { %v587_v7 = vadd.f32 %v1349_v2, %v324_v57  ;;  %v840_v11 = vmax.f32 %v584_v60, 0.0  ;;  %v841_v12 = vmax.f32 %v585_v61, 0.0  ;;  %v842_v13 = vmax.f32 %v586_v62, 0.0  ;;  %v78_v60 = vld [vmem:[%s3416_s0 + $0x200] sm:$0xff] }
  0x29   :  { %1093 = vst [vmem:[%s3419_s3 + $0x148] sm:$0xff] %v837_v4  ;;  %1094 = vst [vmem:[%s3419_s3 + $0x150] sm:$0xff] %v838_v5  ;;  %v326_v17 = vmul.f32 %v1344_v1, %v63_v63  ;;  %v327_v18 = vmul.f32 %v1344_v1, %v64_v0  ;;  %v328_v19 = vmul.f32 %v1344_v1, %v65_v3  ;;  %v79_v3 = vld [vmem:[%s3416_s0 + $0x208] sm:$0xff]  ;;  %v80_v4 = vld [vmem:[%s3416_s0 + $0x210] sm:$0xff] }
  0x2a   :  { %1095 = vst [vmem:[%s3419_s3 + $0x158] sm:$0xff] %v839_v6  ;;  %v843_v16 = vmax.f32 %v587_v7, 0.0  ;;  %1096 = vst [vmem:[%s3419_s3 + $0x160] sm:$0xff] %v840_v11  ;;  %v588_v20 = vadd.f32 %v1349_v2, %v325_v14  ;;  %v329_v21 = vmul.f32 %v1344_v1, %v66_v8  ;;  %v330_v22 = vmul.f32 %v1344_v1, %v67_v9  ;;  %v81_v5 = vld [vmem:[%s3416_s0 + $0x218] sm:$0xff]  ;;  %v83_v11 = vld [vmem:[%s3416_s0 + $0x228] sm:$0xff] }
  0x2b   :  { %1097 = vst [vmem:[%s3419_s3 + $0x168] sm:$0xff] %v841_v12  ;;  %1098 = vst [vmem:[%s3419_s3 + $0x170] sm:$0xff] %v842_v13  ;;  %v331_v23 = vmul.f32 %v1344_v1, %v68_v10  ;;  %v589_v24 = vadd.f32 %v1349_v2, %v326_v17  ;;  %v590_v25 = vadd.f32 %v1349_v2, %v327_v18  ;;  %v82_v10 = vld [vmem:[%s3416_s0 + $0x220] sm:$0xff]  ;;  %v84_v12 = vld [vmem:[%s3416_s0 + $0x230] sm:$0xff] }
  0x2c   :  { %1099 = vst [vmem:[%s3419_s3 + $0x178] sm:$0xff] %v843_v16  ;;  %v591_v26 = vadd.f32 %v1349_v2, %v328_v19  ;;  %v332_v27 = vmul.f32 %v1344_v1, %v69_v15  ;;  %v844_v29 = vmax.f32 %v588_v20, 0.0  ;;  %v592_v30 = vadd.f32 %v1349_v2, %v329_v21  ;;  %v85_v17 = vld [vmem:[%s3416_s0 + $0x238] sm:$0xff] }
  0x2d   :  { %v593_v31 = vadd.f32 %v1349_v2, %v330_v22  ;;  %v594_v32 = vadd.f32 %v1349_v2, %v331_v23  ;;  %v845_v36 = vmax.f32 %v589_v24, 0.0  ;;  %v846_v37 = vmax.f32 %v590_v25, 0.0 }
  0x2e   :  { %v847_v38 = vmax.f32 %v591_v26, 0.0  ;;  %v595_v39 = vadd.f32 %v1349_v2, %v332_v27  ;;  %1100 = vst [vmem:[%s3419_s3 + $0x180] sm:$0xff] %v844_v29  ;;  %v848_v43 = vmax.f32 %v592_v30, 0.0  ;;  %v333_v46 = vmul.f32 %v1344_v1, %v70_v28  ;;  %v86_v30 = vld [vmem:[%s3416_s0 + $0x240] sm:$0xff] }
  0x2f   :  { %v849_v44 = vmax.f32 %v593_v31, 0.0  ;;  %v850_v45 = vmax.f32 %v594_v32, 0.0  ;;  %1101 = vst [vmem:[%s3419_s3 + $0x188] sm:$0xff] %v845_v36  ;;  %1102 = vst [vmem:[%s3419_s3 + $0x190] sm:$0xff] %v846_v37  ;;  %v334_v49 = vmul.f32 %v1344_v1, %v71_v33  ;;  %v335_v50 = vmul.f32 %v1344_v1, %v72_v34  ;;  %v88_v36 = vld [vmem:[%s3416_s0 + $0x250] sm:$0xff]  ;;  %v89_v37 = vld [vmem:[%s3416_s0 + $0x258] sm:$0xff] }
  0x30   :  { %1103 = vst [vmem:[%s3419_s3 + $0x198] sm:$0xff] %v847_v38  ;;  %v851_v48 = vmax.f32 %v595_v39, 0.0  ;;  %v336_v51 = vmul.f32 %v1344_v1, %v73_v35  ;;  %1104 = vst [vmem:[%s3419_s3 + $0x1a0] sm:$0xff] %v848_v43  ;;  %v596_v52 = vadd.f32 %v1349_v2, %v333_v46  ;;  %v337_v53 = vmul.f32 %v1344_v1, %v74_v40  ;;  %v87_v35 = vld [vmem:[%s3416_s0 + $0x248] sm:$0xff] }
  0x31   :  { %1105 = vst [vmem:[%s3419_s3 + $0x1a8] sm:$0xff] %v849_v44  ;;  %1106 = vst [vmem:[%s3419_s3 + $0x1b0] sm:$0xff] %v850_v45  ;;  %v338_v54 = vmul.f32 %v1344_v1, %v75_v41  ;;  %v339_v55 = vmul.f32 %v1344_v1, %v76_v42  ;;  %v597_v56 = vadd.f32 %v1349_v2, %v334_v49  ;;  %v90_v42 = vld [vmem:[%s3416_s0 + $0x260] sm:$0xff]  ;;  %v91_v43 = vld [vmem:[%s3416_s0 + $0x268] sm:$0xff] }
  0x32   :  { %1107 = vst [vmem:[%s3419_s3 + $0x1b8] sm:$0xff] %v851_v48  ;;  %v598_v57 = vadd.f32 %v1349_v2, %v335_v50  ;;  %v599_v58 = vadd.f32 %v1349_v2, %v336_v51  ;;  %v340_v59 = vmul.f32 %v1344_v1, %v77_v47  ;;  %v852_v61 = vmax.f32 %v596_v52, 0.0  ;;  %v92_v44 = vld [vmem:[%s3416_s0 + $0x270] sm:$0xff]  ;;  %v93_v49 = vld [vmem:[%s3416_s0 + $0x278] sm:$0xff] }
  0x33   :  { %v600_v62 = vadd.f32 %v1349_v2, %v337_v53  ;;  %v601_v63 = vadd.f32 %v1349_v2, %v338_v54  ;;  %v602_v0 = vadd.f32 %v1349_v2, %v339_v55  ;;  %v853_v6 = vmax.f32 %v597_v56, 0.0 }
  0x34   :  { %v854_v7 = vmax.f32 %v598_v57, 0.0  ;;  %v855_v8 = vmax.f32 %v599_v58, 0.0  ;;  %v603_v9 = vadd.f32 %v1349_v2, %v340_v59  ;;  %1108 = vst [vmem:[%s3419_s3 + $0x1c0] sm:$0xff] %v852_v61  ;;  %v341_v16 = vmul.f32 %v1344_v1, %v78_v60 }
  0x35   :  { %v856_v13 = vmax.f32 %v600_v62, 0.0  ;;  %v857_v14 = vmax.f32 %v601_v63, 0.0  ;;  %v858_v15 = vmax.f32 %v602_v0, 0.0  ;;  %1109 = vst [vmem:[%s3419_s3 + $0x1c8] sm:$0xff] %v853_v6  ;;  %v342_v19 = vmul.f32 %v1344_v1, %v79_v3  ;;  %v94_v62 = vld [vmem:[%s3416_s0 + $0x280] sm:$0xff]  ;;  %v96_v6 = vld [vmem:[%s3416_s0 + $0x290] sm:$0xff] }
  0x36   :  { %1110 = vst [vmem:[%s3419_s3 + $0x1d0] sm:$0xff] %v854_v7  ;;  %1111 = vst [vmem:[%s3419_s3 + $0x1d8] sm:$0xff] %v855_v8  ;;  %v859_v18 = vmax.f32 %v603_v9, 0.0  ;;  %v343_v20 = vmul.f32 %v1344_v1, %v80_v4  ;;  %v344_v21 = vmul.f32 %v1344_v1, %v81_v5  ;;  %v604_v22 = vadd.f32 %v1349_v2, %v341_v16  ;;  %v95_v5 = vld [vmem:[%s3416_s0 + $0x288] sm:$0xff]  ;;  %v97_v7 = vld [vmem:[%s3416_s0 + $0x298] sm:$0xff] }
  0x37   :  { %1112 = vst [vmem:[%s3419_s3 + $0x1e0] sm:$0xff] %v856_v13  ;;  %1113 = vst [vmem:[%s3419_s3 + $0x1e8] sm:$0xff] %v857_v14  ;;  %v345_v23 = vmul.f32 %v1344_v1, %v82_v10  ;;  %v346_v24 = vmul.f32 %v1344_v1, %v83_v11  ;;  %v347_v25 = vmul.f32 %v1344_v1, %v84_v12  ;;  %v98_v12 = vld [vmem:[%s3416_s0 + $0x2a0] sm:$0xff]  ;;  %v99_v13 = vld [vmem:[%s3416_s0 + $0x2a8] sm:$0xff] }
  0x38   :  { %1114 = vst [vmem:[%s3419_s3 + $0x1f0] sm:$0xff] %v858_v15  ;;  %1115 = vst [vmem:[%s3419_s3 + $0x1f8] sm:$0xff] %v859_v18  ;;  %v605_v26 = vadd.f32 %v1349_v2, %v342_v19  ;;  %v606_v27 = vadd.f32 %v1349_v2, %v343_v20  ;;  %v607_v28 = vadd.f32 %v1349_v2, %v344_v21  ;;  %v860_v31 = vmax.f32 %v604_v22, 0.0  ;;  %v100_v14 = vld [vmem:[%s3416_s0 + $0x2b0] sm:$0xff]  ;;  %v101_v19 = vld [vmem:[%s3416_s0 + $0x2b8] sm:$0xff] }
  0x39   :  { %v348_v29 = vmul.f32 %v1344_v1, %v85_v17  ;;  %v608_v32 = vadd.f32 %v1349_v2, %v345_v23  ;;  %v609_v33 = vadd.f32 %v1349_v2, %v346_v24  ;;  %v610_v34 = vadd.f32 %v1349_v2, %v347_v25 }
  0x3a   :  { %v861_v38 = vmax.f32 %v605_v26, 0.0  ;;  %v862_v39 = vmax.f32 %v606_v27, 0.0  ;;  %v863_v40 = vmax.f32 %v607_v28, 0.0  ;;  %1116 = vst [vmem:[%s3419_s3 + $0x200] sm:$0xff] %v860_v31  ;;  %v349_v48 = vmul.f32 %v1344_v1, %v86_v30 }
  0x3b   :  { %v611_v41 = vadd.f32 %v1349_v2, %v348_v29  ;;  %v864_v45 = vmax.f32 %v608_v32, 0.0  ;;  %v865_v46 = vmax.f32 %v609_v33, 0.0  ;;  %v866_v47 = vmax.f32 %v610_v34, 0.0  ;;  %v102_v32 = vld [vmem:[%s3416_s0 + $0x2c0] sm:$0xff] }
  0x3c   :  { %1117 = vst [vmem:[%s3419_s3 + $0x208] sm:$0xff] %v861_v38  ;;  %1118 = vst [vmem:[%s3419_s3 + $0x210] sm:$0xff] %v862_v39  ;;  %v350_v51 = vmul.f32 %v1344_v1, %v87_v35  ;;  %v351_v52 = vmul.f32 %v1344_v1, %v88_v36  ;;  %v352_v53 = vmul.f32 %v1344_v1, %v89_v37  ;;  %v103_v37 = vld [vmem:[%s3416_s0 + $0x2c8] sm:$0xff]  ;;  %v104_v38 = vld [vmem:[%s3416_s0 + $0x2d0] sm:$0xff] }
  0x3d   :  { %1119 = vst [vmem:[%s3419_s3 + $0x218] sm:$0xff] %v863_v40  ;;  %v867_v50 = vmax.f32 %v611_v41, 0.0  ;;  %1120 = vst [vmem:[%s3419_s3 + $0x220] sm:$0xff] %v864_v45  ;;  %v612_v54 = vadd.f32 %v1349_v2, %v349_v48  ;;  %v353_v55 = vmul.f32 %v1344_v1, %v90_v42  ;;  %v354_v56 = vmul.f32 %v1344_v1, %v91_v43  ;;  %v105_v39 = vld [vmem:[%s3416_s0 + $0x2d8] sm:$0xff]  ;;  %v107_v45 = vld [vmem:[%s3416_s0 + $0x2e8] sm:$0xff] }
  0x3e   :  { %1121 = vst [vmem:[%s3419_s3 + $0x228] sm:$0xff] %v865_v46  ;;  %1122 = vst [vmem:[%s3419_s3 + $0x230] sm:$0xff] %v866_v47  ;;  %v355_v57 = vmul.f32 %v1344_v1, %v92_v44  ;;  %v613_v58 = vadd.f32 %v1349_v2, %v350_v51  ;;  %v614_v59 = vadd.f32 %v1349_v2, %v351_v52  ;;  %v106_v44 = vld [vmem:[%s3416_s0 + $0x2e0] sm:$0xff]  ;;  %v108_v46 = vld [vmem:[%s3416_s0 + $0x2f0] sm:$0xff] }
  0x3f   :  { %1123 = vst [vmem:[%s3419_s3 + $0x238] sm:$0xff] %v867_v50  ;;  %v615_v60 = vadd.f32 %v1349_v2, %v352_v53  ;;  %v356_v61 = vmul.f32 %v1344_v1, %v93_v49  ;;  %v868_v63 = vmax.f32 %v612_v54, 0.0  ;;  %v616_v0 = vadd.f32 %v1349_v2, %v353_v55  ;;  %v109_v51 = vld [vmem:[%s3416_s0 + $0x2f8] sm:$0xff] }
  0x40   :  { %v617_v3 = vadd.f32 %v1349_v2, %v354_v56  ;;  %v618_v4 = vadd.f32 %v1349_v2, %v355_v57  ;;  %v869_v8 = vmax.f32 %v613_v58, 0.0  ;;  %v870_v9 = vmax.f32 %v614_v59, 0.0 }
  0x41   :  { %v871_v10 = vmax.f32 %v615_v60, 0.0  ;;  %v619_v11 = vadd.f32 %v1349_v2, %v356_v61  ;;  %1124 = vst [vmem:[%s3419_s3 + $0x240] sm:$0xff] %v868_v63  ;;  %v872_v15 = vmax.f32 %v616_v0, 0.0  ;;  %v357_v18 = vmul.f32 %v1344_v1, %v94_v62  ;;  %v110_v0 = vld [vmem:[%s3416_s0 + $0x300] sm:$0xff] }
  0x42   :  { %v873_v16 = vmax.f32 %v617_v3, 0.0  ;;  %v874_v17 = vmax.f32 %v618_v4, 0.0  ;;  %1125 = vst [vmem:[%s3419_s3 + $0x248] sm:$0xff] %v869_v8  ;;  %1126 = vst [vmem:[%s3419_s3 + $0x250] sm:$0xff] %v870_v9  ;;  %v358_v21 = vmul.f32 %v1344_v1, %v95_v5  ;;  %v359_v22 = vmul.f32 %v1344_v1, %v96_v6  ;;  %v112_v8 = vld [vmem:[%s3416_s0 + $0x310] sm:$0xff]  ;;  %v113_v9 = vld [vmem:[%s3416_s0 + $0x318] sm:$0xff] }
  0x43   :  { %1127 = vst [vmem:[%s3419_s3 + $0x258] sm:$0xff] %v871_v10  ;;  %v875_v20 = vmax.f32 %v619_v11, 0.0  ;;  %v360_v23 = vmul.f32 %v1344_v1, %v97_v7  ;;  %1128 = vst [vmem:[%s3419_s3 + $0x260] sm:$0xff] %v872_v15  ;;  %v620_v24 = vadd.f32 %v1349_v2, %v357_v18  ;;  %v361_v25 = vmul.f32 %v1344_v1, %v98_v12  ;;  %v111_v7 = vld [vmem:[%s3416_s0 + $0x308] sm:$0xff] }
  0x44   :  { %1129 = vst [vmem:[%s3419_s3 + $0x268] sm:$0xff] %v873_v16  ;;  %1130 = vst [vmem:[%s3419_s3 + $0x270] sm:$0xff] %v874_v17  ;;  %v362_v26 = vmul.f32 %v1344_v1, %v99_v13  ;;  %v363_v27 = vmul.f32 %v1344_v1, %v100_v14  ;;  %v621_v28 = vadd.f32 %v1349_v2, %v358_v21  ;;  %v114_v14 = vld [vmem:[%s3416_s0 + $0x320] sm:$0xff]  ;;  %v115_v15 = vld [vmem:[%s3416_s0 + $0x328] sm:$0xff] }
  0x45   :  { %1131 = vst [vmem:[%s3419_s3 + $0x278] sm:$0xff] %v875_v20  ;;  %v622_v29 = vadd.f32 %v1349_v2, %v359_v22  ;;  %v623_v30 = vadd.f32 %v1349_v2, %v360_v23  ;;  %v364_v31 = vmul.f32 %v1344_v1, %v101_v19  ;;  %v876_v33 = vmax.f32 %v620_v24, 0.0  ;;  %v116_v16 = vld [vmem:[%s3416_s0 + $0x330] sm:$0xff]  ;;  %v117_v21 = vld [vmem:[%s3416_s0 + $0x338] sm:$0xff] }
  0x46   :  { %v624_v34 = vadd.f32 %v1349_v2, %v361_v25  ;;  %v625_v35 = vadd.f32 %v1349_v2, %v362_v26  ;;  %v626_v36 = vadd.f32 %v1349_v2, %v363_v27  ;;  %v877_v40 = vmax.f32 %v621_v28, 0.0 }
  0x47   :  { %v878_v41 = vmax.f32 %v622_v29, 0.0  ;;  %v879_v42 = vmax.f32 %v623_v30, 0.0  ;;  %v627_v43 = vadd.f32 %v1349_v2, %v364_v31  ;;  %1132 = vst [vmem:[%s3419_s3 + $0x280] sm:$0xff] %v876_v33  ;;  %v365_v50 = vmul.f32 %v1344_v1, %v102_v32 }
  0x48   :  { %v880_v47 = vmax.f32 %v624_v34, 0.0  ;;  %v881_v48 = vmax.f32 %v625_v35, 0.0  ;;  %v882_v49 = vmax.f32 %v626_v36, 0.0  ;;  %1133 = vst [vmem:[%s3419_s3 + $0x288] sm:$0xff] %v877_v40  ;;  %v366_v53 = vmul.f32 %v1344_v1, %v103_v37  ;;  %v118_v34 = vld [vmem:[%s3416_s0 + $0x340] sm:$0xff]  ;;  %v120_v40 = vld [vmem:[%s3416_s0 + $0x350] sm:$0xff] }
  0x49   :  { %1134 = vst [vmem:[%s3419_s3 + $0x290] sm:$0xff] %v878_v41  ;;  %1135 = vst [vmem:[%s3419_s3 + $0x298] sm:$0xff] %v879_v42  ;;  %v883_v52 = vmax.f32 %v627_v43, 0.0  ;;  %v367_v54 = vmul.f32 %v1344_v1, %v104_v38  ;;  %v368_v55 = vmul.f32 %v1344_v1, %v105_v39  ;;  %v628_v56 = vadd.f32 %v1349_v2, %v365_v50  ;;  %v119_v39 = vld [vmem:[%s3416_s0 + $0x348] sm:$0xff] }
  0x4a   :  { %1136 = vst [vmem:[%s3419_s3 + $0x2a0] sm:$0xff] %v880_v47  ;;  %1137 = vst [vmem:[%s3419_s3 + $0x2a8] sm:$0xff] %v881_v48  ;;  %v369_v57 = vmul.f32 %v1344_v1, %v106_v44  ;;  %v370_v58 = vmul.f32 %v1344_v1, %v107_v45  ;;  %v371_v59 = vmul.f32 %v1344_v1, %v108_v46  ;;  %v2170_v44 = vld [vmem:[%s3418_s2] ss:$0 sm:$0xff]  ;;  %v123_v46 = vld [vmem:[%s3416_s0 + $0x368] sm:$0xff] }
  0x4b   :  { %1138 = vst [vmem:[%s3419_s3 + $0x2b0] sm:$0xff] %v882_v49  ;;  %1139 = vst [vmem:[%s3419_s3 + $0x2b8] sm:$0xff] %v883_v52  ;;  %v629_v60 = vadd.f32 %v1349_v2, %v366_v53  ;;  %v630_v61 = vadd.f32 %v1349_v2, %v367_v54  ;;  %v631_v62 = vadd.f32 %v1349_v2, %v368_v55  ;;  %v884_v3 = vmax.f32 %v628_v56, 0.0  ;;  %v122_v45 = vld [vmem:[%s3416_s0 + $0x360] sm:$0xff]  ;;  %v124_v47 = vld [vmem:[%s3416_s0 + $0x370] sm:$0xff] }
  0x4c   :  { %v372_v63 = vmul.f32 %v1344_v1, %v109_v51  ;;  %v632_v4 = vadd.f32 %v1349_v2, %v369_v57  ;;  %v633_v5 = vadd.f32 %v1349_v2, %v370_v58  ;;  %v634_v6 = vadd.f32 %v1349_v2, %v371_v59  ;;  %v2188_v51 = vld [vmem:[%s3417_s1] ss:$0 sm:$0xff]  ;;  %v125_v53 = vld [vmem:[%s3416_s0 + $0x378] sm:$0xff] }
  0x4d   :  { %v885_v10 = vmax.f32 %v629_v60, 0.0  ;;  %v886_v11 = vmax.f32 %v630_v61, 0.0  ;;  %v887_v12 = vmax.f32 %v631_v62, 0.0  ;;  %1140 = vst [vmem:[%s3419_s3 + $0x2c0] sm:$0xff] %v884_v3  ;;  %v373_v20 = vmul.f32 %v1344_v1, %v110_v0 }
  0x4e   :  { %v635_v13 = vadd.f32 %v1349_v2, %v372_v63  ;;  %v888_v17 = vmax.f32 %v632_v4, 0.0  ;;  %v889_v18 = vmax.f32 %v633_v5, 0.0  ;;  %v890_v19 = vmax.f32 %v634_v6, 0.0  ;;  %v126_v4 = vld [vmem:[%s3416_s0 + $0x380] sm:$0xff] }
  0x4f   :  { %1141 = vst [vmem:[%s3419_s3 + $0x2c8] sm:$0xff] %v885_v10  ;;  %1142 = vst [vmem:[%s3419_s3 + $0x2d0] sm:$0xff] %v886_v11  ;;  %v374_v23 = vmul.f32 %v1344_v1, %v111_v7  ;;  %v375_v24 = vmul.f32 %v1344_v1, %v112_v8  ;;  %v376_v25 = vmul.f32 %v1344_v1, %v113_v9  ;;  %v127_v9 = vld [vmem:[%s3416_s0 + $0x388] sm:$0xff]  ;;  %v128_v10 = vld [vmem:[%s3416_s0 + $0x390] sm:$0xff] }
  0x50   :  { %1143 = vst [vmem:[%s3419_s3 + $0x2d8] sm:$0xff] %v887_v12  ;;  %v891_v22 = vmax.f32 %v635_v13, 0.0  ;;  %1144 = vst [vmem:[%s3419_s3 + $0x2e0] sm:$0xff] %v888_v17  ;;  %v636_v26 = vadd.f32 %v1349_v2, %v373_v20  ;;  %v377_v27 = vmul.f32 %v1344_v1, %v114_v14  ;;  %v378_v28 = vmul.f32 %v1344_v1, %v115_v15  ;;  %v129_v11 = vld [vmem:[%s3416_s0 + $0x398] sm:$0xff]  ;;  %v131_v17 = vld [vmem:[%s3416_s0 + $0x3a8] sm:$0xff] }
  0x51   :  { %1145 = vst [vmem:[%s3419_s3 + $0x2e8] sm:$0xff] %v889_v18  ;;  %1146 = vst [vmem:[%s3419_s3 + $0x2f0] sm:$0xff] %v890_v19  ;;  %v379_v29 = vmul.f32 %v1344_v1, %v116_v16  ;;  %v637_v30 = vadd.f32 %v1349_v2, %v374_v23  ;;  %v638_v31 = vadd.f32 %v1349_v2, %v375_v24  ;;  %v130_v16 = vld [vmem:[%s3416_s0 + $0x3a0] sm:$0xff]  ;;  %v132_v18 = vld [vmem:[%s3416_s0 + $0x3b0] sm:$0xff] }
  0x52   :  { %1147 = vst [vmem:[%s3419_s3 + $0x2f8] sm:$0xff] %v891_v22  ;;  %v639_v32 = vadd.f32 %v1349_v2, %v376_v25  ;;  %v380_v33 = vmul.f32 %v1344_v1, %v117_v21  ;;  %v892_v35 = vmax.f32 %v636_v26, 0.0  ;;  %v640_v36 = vadd.f32 %v1349_v2, %v377_v27  ;;  %v121_v1 = vld [vmem:[%s3416_s0 + $0x358] sm:$0xff] }
  0x53   :  { %v641_v37 = vadd.f32 %v1349_v2, %v378_v28  ;;  %v642_v38 = vadd.f32 %v1349_v2, %v379_v29  ;;  %v893_v41 = vmax.f32 %v637_v30, 0.0  ;;  %v894_v42 = vmax.f32 %v638_v31, 0.0  ;;  %v133_v23 = vld [vmem:[%s3416_s0 + $0x3b8] sm:$0xff] }
  0x54   :  { %v895_v43 = vmax.f32 %v639_v32, 0.0  ;;  %v643_v2 = vadd.f32 %v2170_v44, %v380_v33  ;;  %1148 = vst [vmem:[%s3419_s3 + $0x300] sm:$0xff] %v892_v35  ;;  %v896_v48 = vmax.f32 %v640_v36, 0.0  ;;  %v381_v52 = vmul.f32 %v2188_v51, %v118_v34  ;;  %v134_v36 = vld [vmem:[%s3416_s0 + $0x3c0] sm:$0xff] }
  0x55   :  { %v897_v49 = vmax.f32 %v641_v37, 0.0  ;;  %v898_v50 = vmax.f32 %v642_v38, 0.0  ;;  %1149 = vst [vmem:[%s3419_s3 + $0x308] sm:$0xff] %v893_v41  ;;  %1150 = vst [vmem:[%s3419_s3 + $0x310] sm:$0xff] %v894_v42  ;;  %v382_v55 = vmul.f32 %v2188_v51, %v119_v39  ;;  %v383_v56 = vmul.f32 %v2188_v51, %v120_v40  ;;  %v136_v41 = vld [vmem:[%s3416_s0 + $0x3d0] sm:$0xff]  ;;  %v137_v42 = vld [vmem:[%s3416_s0 + $0x3d8] sm:$0xff] }
  0x56   :  { %1151 = vst [vmem:[%s3419_s3 + $0x318] sm:$0xff] %v895_v43  ;;  %v899_v54 = vmax.f32 %v643_v2, 0.0  ;;  %v384_v57 = vmul.f32 %v2188_v51, %v121_v1  ;;  %1152 = vst [vmem:[%s3419_s3 + $0x320] sm:$0xff] %v896_v48  ;;  %v644_v58 = vadd.f32 %v2170_v44, %v381_v52  ;;  %v385_v59 = vmul.f32 %v2188_v51, %v122_v45  ;;  %v135_v1 = vld [vmem:[%s3416_s0 + $0x3c8] sm:$0xff] }
  0x57   :  { %1153 = vst [vmem:[%s3419_s3 + $0x328] sm:$0xff] %v897_v49  ;;  %1154 = vst [vmem:[%s3419_s3 + $0x330] sm:$0xff] %v898_v50  ;;  %v386_v60 = vmul.f32 %v2188_v51, %v123_v46  ;;  %v387_v61 = vmul.f32 %v2188_v51, %v124_v47  ;;  %v645_v62 = vadd.f32 %v2170_v44, %v382_v55  ;;  %v138_v47 = vld [vmem:[%s3416_s0 + $0x3e0] sm:$0xff]  ;;  %v139_v48 = vld [vmem:[%s3416_s0 + $0x3e8] sm:$0xff] }
  0x58   :  { %1155 = vst [vmem:[%s3419_s3 + $0x338] sm:$0xff] %v899_v54  ;;  %v646_v63 = vadd.f32 %v2170_v44, %v383_v56  ;;  %v647_v0 = vadd.f32 %v2170_v44, %v384_v57  ;;  %v388_v3 = vmul.f32 %v2188_v51, %v125_v53  ;;  %v900_v5 = vmax.f32 %v644_v58, 0.0  ;;  %v140_v49 = vld [vmem:[%s3416_s0 + $0x3f0] sm:$0xff]  ;;  %v141_v55 = vld [vmem:[%s3416_s0 + $0x3f8] sm:$0xff] }
  0x59   :  { %v648_v6 = vadd.f32 %v2170_v44, %v385_v59  ;;  %v649_v7 = vadd.f32 %v2170_v44, %v386_v60  ;;  %v650_v8 = vadd.f32 %v2170_v44, %v387_v61  ;;  %v901_v12 = vmax.f32 %v645_v62, 0.0 }
  0x5a   :  { %v902_v13 = vmax.f32 %v646_v63, 0.0  ;;  %v903_v14 = vmax.f32 %v647_v0, 0.0  ;;  %v651_v15 = vadd.f32 %v2170_v44, %v388_v3  ;;  %1156 = vst [vmem:[%s3419_s3 + $0x340] sm:$0xff] %v900_v5  ;;  %v389_v22 = vmul.f32 %v2188_v51, %v126_v4 }
  0x5b   :  { %v904_v19 = vmax.f32 %v648_v6, 0.0  ;;  %v905_v20 = vmax.f32 %v649_v7, 0.0  ;;  %v906_v21 = vmax.f32 %v650_v8, 0.0  ;;  %1157 = vst [vmem:[%s3419_s3 + $0x348] sm:$0xff] %v901_v12  ;;  %v390_v25 = vmul.f32 %v2188_v51, %v127_v9  ;;  %v142_v6 = vld [vmem:[%s3416_s0 + $0x400] sm:$0xff]  ;;  %v144_v12 = vld [vmem:[%s3416_s0 + $0x410] sm:$0xff] }
  0x5c   :  { %1158 = vst [vmem:[%s3419_s3 + $0x350] sm:$0xff] %v902_v13  ;;  %1159 = vst [vmem:[%s3419_s3 + $0x358] sm:$0xff] %v903_v14  ;;  %v907_v24 = vmax.f32 %v651_v15, 0.0  ;;  %v391_v26 = vmul.f32 %v2188_v51, %v128_v10  ;;  %v392_v27 = vmul.f32 %v2188_v51, %v129_v11  ;;  %v652_v28 = vadd.f32 %v2170_v44, %v389_v22  ;;  %v143_v11 = vld [vmem:[%s3416_s0 + $0x408] sm:$0xff]  ;;  %v145_v13 = vld [vmem:[%s3416_s0 + $0x418] sm:$0xff] }
  0x5d   :  { %1160 = vst [vmem:[%s3419_s3 + $0x360] sm:$0xff] %v904_v19  ;;  %1161 = vst [vmem:[%s3419_s3 + $0x368] sm:$0xff] %v905_v20  ;;  %v393_v29 = vmul.f32 %v2188_v51, %v130_v16  ;;  %v394_v30 = vmul.f32 %v2188_v51, %v131_v17  ;;  %v395_v31 = vmul.f32 %v2188_v51, %v132_v18  ;;  %v146_v18 = vld [vmem:[%s3416_s0 + $0x420] sm:$0xff]  ;;  %v147_v19 = vld [vmem:[%s3416_s0 + $0x428] sm:$0xff] }
  0x5e   :  { %1162 = vst [vmem:[%s3419_s3 + $0x370] sm:$0xff] %v906_v21  ;;  %1163 = vst [vmem:[%s3419_s3 + $0x378] sm:$0xff] %v907_v24  ;;  %v653_v32 = vadd.f32 %v2170_v44, %v390_v25  ;;  %v654_v33 = vadd.f32 %v2170_v44, %v391_v26  ;;  %v655_v34 = vadd.f32 %v2170_v44, %v392_v27  ;;  %v908_v37 = vmax.f32 %v652_v28, 0.0  ;;  %v148_v20 = vld [vmem:[%s3416_s0 + $0x430] sm:$0xff]  ;;  %v149_v25 = vld [vmem:[%s3416_s0 + $0x438] sm:$0xff] }
  0x5f   :  { %v396_v35 = vmul.f32 %v2188_v51, %v133_v23  ;;  %v656_v38 = vadd.f32 %v2170_v44, %v393_v29  ;;  %v657_v39 = vadd.f32 %v2170_v44, %v394_v30  ;;  %v658_v40 = vadd.f32 %v2170_v44, %v395_v31 }
  0x60   :  { %v909_v43 = vmax.f32 %v653_v32, 0.0  ;;  %v910_v2 = vmax.f32 %v654_v33, 0.0  ;;  %v911_v45 = vmax.f32 %v655_v34, 0.0  ;;  %1164 = vst [vmem:[%s3419_s3 + $0x380] sm:$0xff] %v908_v37  ;;  %v397_v54 = vmul.f32 %v2188_v51, %v134_v36 }
  0x61   :  { %v659_v46 = vadd.f32 %v2170_v44, %v396_v35  ;;  %v912_v50 = vmax.f32 %v656_v38, 0.0  ;;  %v913_v52 = vmax.f32 %v657_v39, 0.0  ;;  %v914_v53 = vmax.f32 %v658_v40, 0.0  ;;  %v150_v38 = vld [vmem:[%s3416_s0 + $0x440] sm:$0xff] }
  0x62   :  { %1165 = vst [vmem:[%s3419_s3 + $0x388] sm:$0xff] %v909_v43  ;;  %1166 = vst [vmem:[%s3419_s3 + $0x390] sm:$0xff] %v910_v2  ;;  %v398_v57 = vmul.f32 %v2188_v51, %v135_v1  ;;  %v399_v58 = vmul.f32 %v2188_v51, %v136_v41  ;;  %v400_v59 = vmul.f32 %v2188_v51, %v137_v42  ;;  %v151_v42 = vld [vmem:[%s3416_s0 + $0x448] sm:$0xff]  ;;  %v152_v43 = vld [vmem:[%s3416_s0 + $0x450] sm:$0xff] }
  0x63   :  { %1167 = vst [vmem:[%s3419_s3 + $0x398] sm:$0xff] %v911_v45  ;;  %v915_v56 = vmax.f32 %v659_v46, 0.0  ;;  %1168 = vst [vmem:[%s3419_s3 + $0x3a0] sm:$0xff] %v912_v50  ;;  %v660_v60 = vadd.f32 %v2170_v44, %v397_v54  ;;  %v401_v61 = vmul.f32 %v2188_v51, %v138_v47  ;;  %v402_v62 = vmul.f32 %v2188_v51, %v139_v48  ;;  %v153_v2 = vld [vmem:[%s3416_s0 + $0x458] sm:$0xff]  ;;  %v155_v50 = vld [vmem:[%s3416_s0 + $0x468] sm:$0xff] }
  0x64   :  { %1169 = vst [vmem:[%s3419_s3 + $0x3a8] sm:$0xff] %v913_v52  ;;  %1170 = vst [vmem:[%s3419_s3 + $0x3b0] sm:$0xff] %v914_v53  ;;  %v403_v63 = vmul.f32 %v2188_v51, %v140_v49  ;;  %v661_v0 = vadd.f32 %v2170_v44, %v398_v57  ;;  %v662_v3 = vadd.f32 %v2170_v44, %v399_v58  ;;  %v154_v49 = vld [vmem:[%s3416_s0 + $0x460] sm:$0xff]  ;;  %v156_v52 = vld [vmem:[%s3416_s0 + $0x470] sm:$0xff] }
  0x65   :  { %1171 = vst [vmem:[%s3419_s3 + $0x3b8] sm:$0xff] %v915_v56  ;;  %v663_v4 = vadd.f32 %v2170_v44, %v400_v59  ;;  %v404_v5 = vmul.f32 %v2188_v51, %v141_v55  ;;  %v916_v7 = vmax.f32 %v660_v60, 0.0  ;;  %v664_v8 = vadd.f32 %v2170_v44, %v401_v61  ;;  %v157_v57 = vld [vmem:[%s3416_s0 + $0x478] sm:$0xff] }
  0x66   :  { %v665_v9 = vadd.f32 %v2170_v44, %v402_v62  ;;  %v666_v10 = vadd.f32 %v2170_v44, %v403_v63  ;;  %v917_v14 = vmax.f32 %v661_v0, 0.0  ;;  %v918_v15 = vmax.f32 %v662_v3, 0.0 }
  0x67   :  { %v919_v16 = vmax.f32 %v663_v4, 0.0  ;;  %v667_v17 = vadd.f32 %v2170_v44, %v404_v5  ;;  %1172 = vst [vmem:[%s3419_s3 + $0x3c0] sm:$0xff] %v916_v7  ;;  %v920_v21 = vmax.f32 %v664_v8, 0.0  ;;  %v405_v24 = vmul.f32 %v2188_v51, %v142_v6  ;;  %v158_v8 = vld [vmem:[%s3416_s0 + $0x480] sm:$0xff] }
  0x68   :  { %v921_v22 = vmax.f32 %v665_v9, 0.0  ;;  %v922_v23 = vmax.f32 %v666_v10, 0.0  ;;  %1173 = vst [vmem:[%s3419_s3 + $0x3c8] sm:$0xff] %v917_v14  ;;  %1174 = vst [vmem:[%s3419_s3 + $0x3d0] sm:$0xff] %v918_v15  ;;  %v406_v27 = vmul.f32 %v2188_v51, %v143_v11  ;;  %v407_v28 = vmul.f32 %v2188_v51, %v144_v12  ;;  %v160_v14 = vld [vmem:[%s3416_s0 + $0x490] sm:$0xff]  ;;  %v161_v15 = vld [vmem:[%s3416_s0 + $0x498] sm:$0xff] }
  0x69   :  { %1175 = vst [vmem:[%s3419_s3 + $0x3d8] sm:$0xff] %v919_v16  ;;  %v923_v26 = vmax.f32 %v667_v17, 0.0  ;;  %v408_v29 = vmul.f32 %v2188_v51, %v145_v13  ;;  %1176 = vst [vmem:[%s3419_s3 + $0x3e0] sm:$0xff] %v920_v21  ;;  %v668_v30 = vadd.f32 %v2170_v44, %v405_v24  ;;  %v409_v31 = vmul.f32 %v2188_v51, %v146_v18  ;;  %v159_v13 = vld [vmem:[%s3416_s0 + $0x488] sm:$0xff] }
  0x6a   :  { %1177 = vst [vmem:[%s3419_s3 + $0x3e8] sm:$0xff] %v921_v22  ;;  %1178 = vst [vmem:[%s3419_s3 + $0x3f0] sm:$0xff] %v922_v23  ;;  %v410_v32 = vmul.f32 %v2188_v51, %v147_v19  ;;  %v411_v33 = vmul.f32 %v2188_v51, %v148_v20  ;;  %v669_v34 = vadd.f32 %v2170_v44, %v406_v27  ;;  %v162_v20 = vld [vmem:[%s3416_s0 + $0x4a0] sm:$0xff]  ;;  %v163_v21 = vld [vmem:[%s3416_s0 + $0x4a8] sm:$0xff] }
  0x6b   :  { %1179 = vst [vmem:[%s3419_s3 + $0x3f8] sm:$0xff] %v923_v26  ;;  %v670_v35 = vadd.f32 %v2170_v44, %v407_v28  ;;  %v671_v36 = vadd.f32 %v2170_v44, %v408_v29  ;;  %v412_v37 = vmul.f32 %v2188_v51, %v149_v25  ;;  %v924_v39 = vmax.f32 %v668_v30, 0.0  ;;  %v164_v22 = vld [vmem:[%s3416_s0 + $0x4b0] sm:$0xff]  ;;  %v165_v27 = vld [vmem:[%s3416_s0 + $0x4b8] sm:$0xff] }
  0x6c   :  { %v672_v40 = vadd.f32 %v2170_v44, %v409_v31  ;;  %v673_v1 = vadd.f32 %v2170_v44, %v410_v32  ;;  %v674_v41 = vadd.f32 %v2170_v44, %v411_v33  ;;  %v925_v45 = vmax.f32 %v669_v34, 0.0 }
  0x6d   :  { %v926_v46 = vmax.f32 %v670_v35, 0.0  ;;  %v927_v47 = vmax.f32 %v671_v36, 0.0  ;;  %v675_v48 = vadd.f32 %v2170_v44, %v412_v37  ;;  %1180 = vst [vmem:[%s3419_s3 + $0x400] sm:$0xff] %v924_v39  ;;  %v413_v56 = vmul.f32 %v2188_v51, %v150_v38 }
  0x6e   :  { %v928_v53 = vmax.f32 %v672_v40, 0.0  ;;  %v929_v54 = vmax.f32 %v673_v1, 0.0  ;;  %v930_v55 = vmax.f32 %v674_v41, 0.0  ;;  %1181 = vst [vmem:[%s3419_s3 + $0x408] sm:$0xff] %v925_v45  ;;  %v414_v59 = vmul.f32 %v2188_v51, %v151_v42  ;;  %v166_v40 = vld [vmem:[%s3416_s0 + $0x4c0] sm:$0xff]  ;;  %v168_v45 = vld [vmem:[%s3416_s0 + $0x4d0] sm:$0xff] }
  0x6f   :  { %1182 = vst [vmem:[%s3419_s3 + $0x410] sm:$0xff] %v926_v46  ;;  %1183 = vst [vmem:[%s3419_s3 + $0x418] sm:$0xff] %v927_v47  ;;  %v931_v58 = vmax.f32 %v675_v48, 0.0  ;;  %v415_v60 = vmul.f32 %v2188_v51, %v152_v43  ;;  %v416_v61 = vmul.f32 %v2188_v51, %v153_v2  ;;  %v676_v62 = vadd.f32 %v2170_v44, %v413_v56  ;;  %v167_v2 = vld [vmem:[%s3416_s0 + $0x4c8] sm:$0xff]  ;;  %v169_v46 = vld [vmem:[%s3416_s0 + $0x4d8] sm:$0xff] }
  0x70   :  { %1184 = vst [vmem:[%s3419_s3 + $0x420] sm:$0xff] %v928_v53  ;;  %1185 = vst [vmem:[%s3419_s3 + $0x428] sm:$0xff] %v929_v54  ;;  %v417_v63 = vmul.f32 %v2188_v51, %v154_v49  ;;  %v418_v0 = vmul.f32 %v2188_v51, %v155_v50  ;;  %v419_v3 = vmul.f32 %v2188_v51, %v156_v52  ;;  %v170_v52 = vld [vmem:[%s3416_s0 + $0x4e0] sm:$0xff]  ;;  %v171_v53 = vld [vmem:[%s3416_s0 + $0x4e8] sm:$0xff] }
  0x71   :  { %1186 = vst [vmem:[%s3419_s3 + $0x430] sm:$0xff] %v930_v55  ;;  %1187 = vst [vmem:[%s3419_s3 + $0x438] sm:$0xff] %v931_v58  ;;  %v677_v4 = vadd.f32 %v2170_v44, %v414_v59  ;;  %v678_v5 = vadd.f32 %v2170_v44, %v415_v60  ;;  %v679_v6 = vadd.f32 %v2170_v44, %v416_v61  ;;  %v932_v9 = vmax.f32 %v676_v62, 0.0  ;;  %v172_v54 = vld [vmem:[%s3416_s0 + $0x4f0] sm:$0xff]  ;;  %v173_v59 = vld [vmem:[%s3416_s0 + $0x4f8] sm:$0xff] }
  0x72   :  { %v420_v7 = vmul.f32 %v2188_v51, %v157_v57  ;;  %v680_v10 = vadd.f32 %v2170_v44, %v417_v63  ;;  %v681_v11 = vadd.f32 %v2170_v44, %v418_v0  ;;  %v682_v12 = vadd.f32 %v2170_v44, %v419_v3 }
  0x73   :  { %v933_v16 = vmax.f32 %v677_v4, 0.0  ;;  %v934_v17 = vmax.f32 %v678_v5, 0.0  ;;  %v935_v18 = vmax.f32 %v679_v6, 0.0  ;;  %1188 = vst [vmem:[%s3419_s3 + $0x440] sm:$0xff] %v932_v9  ;;  %v421_v26 = vmul.f32 %v2188_v51, %v158_v8 }
  0x74   :  { %v683_v19 = vadd.f32 %v2170_v44, %v420_v7  ;;  %v936_v23 = vmax.f32 %v680_v10, 0.0  ;;  %v937_v24 = vmax.f32 %v681_v11, 0.0  ;;  %v938_v25 = vmax.f32 %v682_v12, 0.0  ;;  %v174_v10 = vld [vmem:[%s3416_s0 + $0x500] sm:$0xff] }
  0x75   :  { %1189 = vst [vmem:[%s3419_s3 + $0x448] sm:$0xff] %v933_v16  ;;  %1190 = vst [vmem:[%s3419_s3 + $0x450] sm:$0xff] %v934_v17  ;;  %v422_v29 = vmul.f32 %v2188_v51, %v159_v13  ;;  %v423_v30 = vmul.f32 %v2188_v51, %v160_v14  ;;  %v424_v31 = vmul.f32 %v2188_v51, %v161_v15  ;;  %v175_v15 = vld [vmem:[%s3416_s0 + $0x508] sm:$0xff]  ;;  %v176_v16 = vld [vmem:[%s3416_s0 + $0x510] sm:$0xff] }
  0x76   :  { %1191 = vst [vmem:[%s3419_s3 + $0x458] sm:$0xff] %v935_v18  ;;  %v939_v28 = vmax.f32 %v683_v19, 0.0  ;;  %1192 = vst [vmem:[%s3419_s3 + $0x460] sm:$0xff] %v936_v23  ;;  %v684_v32 = vadd.f32 %v2170_v44, %v421_v26  ;;  %v425_v33 = vmul.f32 %v2188_v51, %v162_v20  ;;  %v426_v34 = vmul.f32 %v2188_v51, %v163_v21  ;;  %v177_v17 = vld [vmem:[%s3416_s0 + $0x518] sm:$0xff]  ;;  %v179_v23 = vld [vmem:[%s3416_s0 + $0x528] sm:$0xff] }
  0x77   :  { %1193 = vst [vmem:[%s3419_s3 + $0x468] sm:$0xff] %v937_v24  ;;  %1194 = vst [vmem:[%s3419_s3 + $0x470] sm:$0xff] %v938_v25  ;;  %v427_v35 = vmul.f32 %v2188_v51, %v164_v22  ;;  %v685_v36 = vadd.f32 %v2170_v44, %v422_v29  ;;  %v686_v37 = vadd.f32 %v2170_v44, %v423_v30  ;;  %v178_v22 = vld [vmem:[%s3416_s0 + $0x520] sm:$0xff]  ;;  %v180_v24 = vld [vmem:[%s3416_s0 + $0x530] sm:$0xff] }
  0x78   :  { %1195 = vst [vmem:[%s3419_s3 + $0x478] sm:$0xff] %v939_v28  ;;  %v687_v38 = vadd.f32 %v2170_v44, %v424_v31  ;;  %v428_v39 = vmul.f32 %v2188_v51, %v165_v27  ;;  %v940_v1 = vmax.f32 %v684_v32, 0.0  ;;  %v688_v41 = vadd.f32 %v2170_v44, %v425_v33  ;;  %v181_v29 = vld [vmem:[%s3416_s0 + $0x538] sm:$0xff] }
  0x79   :  { %v689_v42 = vadd.f32 %v2170_v44, %v426_v34  ;;  %v690_v43 = vadd.f32 %v2170_v44, %v427_v35  ;;  %v941_v47 = vmax.f32 %v685_v36, 0.0  ;;  %v942_v48 = vmax.f32 %v686_v37, 0.0 }
  0x7a   :  { %v943_v49 = vmax.f32 %v687_v38, 0.0  ;;  %v691_v50 = vadd.f32 %v2170_v44, %v428_v39  ;;  %1196 = vst [vmem:[%s3419_s3 + $0x480] sm:$0xff] %v940_v1  ;;  %v944_v55 = vmax.f32 %v688_v41, 0.0  ;;  %v429_v58 = vmul.f32 %v2188_v51, %v166_v40  ;;  %v182_v41 = vld [vmem:[%s3416_s0 + $0x540] sm:$0xff] }
  0x7b   :  { %v945_v56 = vmax.f32 %v689_v42, 0.0  ;;  %v946_v57 = vmax.f32 %v690_v43, 0.0  ;;  %1197 = vst [vmem:[%s3419_s3 + $0x488] sm:$0xff] %v941_v47  ;;  %1198 = vst [vmem:[%s3419_s3 + $0x490] sm:$0xff] %v942_v48  ;;  %v430_v61 = vmul.f32 %v2188_v51, %v167_v2  ;;  %v431_v62 = vmul.f32 %v2188_v51, %v168_v45  ;;  %v184_v47 = vld [vmem:[%s3416_s0 + $0x550] sm:$0xff]  ;;  %v185_v48 = vld [vmem:[%s3416_s0 + $0x558] sm:$0xff] }
  0x7c   :  { %1199 = vst [vmem:[%s3419_s3 + $0x498] sm:$0xff] %v943_v49  ;;  %v947_v60 = vmax.f32 %v691_v50, 0.0  ;;  %v432_v63 = vmul.f32 %v2188_v51, %v169_v46  ;;  %1200 = vst [vmem:[%s3419_s3 + $0x4a0] sm:$0xff] %v944_v55  ;;  %v692_v0 = vadd.f32 %v2170_v44, %v429_v58  ;;  %v433_v3 = vmul.f32 %v2188_v51, %v170_v52  ;;  %v183_v46 = vld [vmem:[%s3416_s0 + $0x548] sm:$0xff] }
  0x7d   :  { %1201 = vst [vmem:[%s3419_s3 + $0x4a8] sm:$0xff] %v945_v56  ;;  %1202 = vst [vmem:[%s3419_s3 + $0x4b0] sm:$0xff] %v946_v57  ;;  %v434_v4 = vmul.f32 %v2188_v51, %v171_v53  ;;  %v435_v5 = vmul.f32 %v2188_v51, %v172_v54  ;;  %v693_v6 = vadd.f32 %v2170_v44, %v430_v61  ;;  %v186_v54 = vld [vmem:[%s3416_s0 + $0x560] sm:$0xff]  ;;  %v187_v55 = vld [vmem:[%s3416_s0 + $0x568] sm:$0xff] }
  0x7e   :  { %1203 = vst [vmem:[%s3419_s3 + $0x4b8] sm:$0xff] %v947_v60  ;;  %v694_v7 = vadd.f32 %v2170_v44, %v431_v62  ;;  %v695_v8 = vadd.f32 %v2170_v44, %v432_v63  ;;  %v436_v9 = vmul.f32 %v2188_v51, %v173_v59  ;;  %v948_v11 = vmax.f32 %v692_v0, 0.0  ;;  %v188_v56 = vld [vmem:[%s3416_s0 + $0x570] sm:$0xff]  ;;  %v189_v61 = vld [vmem:[%s3416_s0 + $0x578] sm:$0xff] }
  0x7f   :  { %v696_v12 = vadd.f32 %v2170_v44, %v433_v3  ;;  %v697_v13 = vadd.f32 %v2170_v44, %v434_v4  ;;  %v698_v14 = vadd.f32 %v2170_v44, %v435_v5  ;;  %v949_v18 = vmax.f32 %v693_v6, 0.0 }
  0x80   :  { %v950_v19 = vmax.f32 %v694_v7, 0.0  ;;  %v951_v20 = vmax.f32 %v695_v8, 0.0  ;;  %v699_v21 = vadd.f32 %v2170_v44, %v436_v9  ;;  %1204 = vst [vmem:[%s3419_s3 + $0x4c0] sm:$0xff] %v948_v11  ;;  %v437_v28 = vmul.f32 %v2188_v51, %v174_v10 }
  0x81   :  { %v952_v25 = vmax.f32 %v696_v12, 0.0  ;;  %v953_v26 = vmax.f32 %v697_v13, 0.0  ;;  %v954_v27 = vmax.f32 %v698_v14, 0.0  ;;  %1205 = vst [vmem:[%s3419_s3 + $0x4c8] sm:$0xff] %v949_v18  ;;  %v438_v31 = vmul.f32 %v2188_v51, %v175_v15  ;;  %v190_v12 = vld [vmem:[%s3416_s0 + $0x580] sm:$0xff]  ;;  %v192_v18 = vld [vmem:[%s3416_s0 + $0x590] sm:$0xff] }
  0x82   :  { %1206 = vst [vmem:[%s3419_s3 + $0x4d0] sm:$0xff] %v950_v19  ;;  %1207 = vst [vmem:[%s3419_s3 + $0x4d8] sm:$0xff] %v951_v20  ;;  %v955_v30 = vmax.f32 %v699_v21, 0.0  ;;  %v439_v32 = vmul.f32 %v2188_v51, %v176_v16  ;;  %v440_v33 = vmul.f32 %v2188_v51, %v177_v17  ;;  %v700_v34 = vadd.f32 %v2170_v44, %v437_v28  ;;  %v191_v17 = vld [vmem:[%s3416_s0 + $0x588] sm:$0xff]  ;;  %v193_v19 = vld [vmem:[%s3416_s0 + $0x598] sm:$0xff] }
  0x83   :  { %1208 = vst [vmem:[%s3419_s3 + $0x4e0] sm:$0xff] %v952_v25  ;;  %1209 = vst [vmem:[%s3419_s3 + $0x4e8] sm:$0xff] %v953_v26  ;;  %v441_v35 = vmul.f32 %v2188_v51, %v178_v22  ;;  %v442_v36 = vmul.f32 %v2188_v51, %v179_v23  ;;  %v443_v37 = vmul.f32 %v2188_v51, %v180_v24  ;;  %v194_v24 = vld [vmem:[%s3416_s0 + $0x5a0] sm:$0xff]  ;;  %v195_v25 = vld [vmem:[%s3416_s0 + $0x5a8] sm:$0xff] }
  0x84   :  { %1210 = vst [vmem:[%s3419_s3 + $0x4f0] sm:$0xff] %v954_v27  ;;  %1211 = vst [vmem:[%s3419_s3 + $0x4f8] sm:$0xff] %v955_v30  ;;  %v701_v38 = vadd.f32 %v2170_v44, %v438_v31  ;;  %v702_v39 = vadd.f32 %v2170_v44, %v439_v32  ;;  %v703_v40 = vadd.f32 %v2170_v44, %v440_v33  ;;  %v956_v42 = vmax.f32 %v700_v34, 0.0  ;;  %v196_v26 = vld [vmem:[%s3416_s0 + $0x5b0] sm:$0xff]  ;;  %v197_v31 = vld [vmem:[%s3416_s0 + $0x5b8] sm:$0xff] }
  0x85   :  { %v444_v1 = vmul.f32 %v2188_v51, %v181_v29  ;;  %v704_v43 = vadd.f32 %v2170_v44, %v441_v35  ;;  %v705_v2 = vadd.f32 %v2170_v44, %v442_v36  ;;  %v706_v45 = vadd.f32 %v2170_v44, %v443_v37 }
  0x86   :  { %v957_v49 = vmax.f32 %v701_v38, 0.0  ;;  %v958_v50 = vmax.f32 %v702_v39, 0.0  ;;  %v959_v52 = vmax.f32 %v703_v40, 0.0  ;;  %1212 = vst [vmem:[%s3419_s3 + $0x500] sm:$0xff] %v956_v42  ;;  %v445_v60 = vmul.f32 %v2188_v51, %v182_v41 }
  0x87   :  { %v707_v53 = vadd.f32 %v2170_v44, %v444_v1  ;;  %v960_v57 = vmax.f32 %v704_v43, 0.0  ;;  %v961_v58 = vmax.f32 %v705_v2, 0.0  ;;  %v962_v59 = vmax.f32 %v706_v45, 0.0  ;;  %v198_v43 = vld [vmem:[%s3416_s0 + $0x5c0] sm:$0xff] }
  0x88   :  { %1213 = vst [vmem:[%s3419_s3 + $0x508] sm:$0xff] %v957_v49  ;;  %1214 = vst [vmem:[%s3419_s3 + $0x510] sm:$0xff] %v958_v50  ;;  %v446_v63 = vmul.f32 %v2188_v51, %v183_v46  ;;  %v447_v0 = vmul.f32 %v2188_v51, %v184_v47  ;;  %v448_v3 = vmul.f32 %v2188_v51, %v185_v48  ;;  %v199_v48 = vld [vmem:[%s3416_s0 + $0x5c8] sm:$0xff]  ;;  %v200_v49 = vld [vmem:[%s3416_s0 + $0x5d0] sm:$0xff] }
  0x89   :  { %1215 = vst [vmem:[%s3419_s3 + $0x518] sm:$0xff] %v959_v52  ;;  %v963_v62 = vmax.f32 %v707_v53, 0.0  ;;  %1216 = vst [vmem:[%s3419_s3 + $0x520] sm:$0xff] %v960_v57  ;;  %v708_v4 = vadd.f32 %v2170_v44, %v445_v60  ;;  %v449_v5 = vmul.f32 %v2188_v51, %v186_v54  ;;  %v450_v6 = vmul.f32 %v2188_v51, %v187_v55  ;;  %v201_v50 = vld [vmem:[%s3416_s0 + $0x5d8] sm:$0xff]  ;;  %v203_v57 = vld [vmem:[%s3416_s0 + $0x5e8] sm:$0xff] }
  0x8a   :  { %1217 = vst [vmem:[%s3419_s3 + $0x528] sm:$0xff] %v961_v58  ;;  %1218 = vst [vmem:[%s3419_s3 + $0x530] sm:$0xff] %v962_v59  ;;  %v451_v7 = vmul.f32 %v2188_v51, %v188_v56  ;;  %v709_v8 = vadd.f32 %v2170_v44, %v446_v63  ;;  %v710_v9 = vadd.f32 %v2170_v44, %v447_v0  ;;  %v202_v56 = vld [vmem:[%s3416_s0 + $0x5e0] sm:$0xff]  ;;  %v204_v58 = vld [vmem:[%s3416_s0 + $0x5f0] sm:$0xff] }
  0x8b   :  { %1219 = vst [vmem:[%s3419_s3 + $0x538] sm:$0xff] %v963_v62  ;;  %v711_v10 = vadd.f32 %v2170_v44, %v448_v3  ;;  %v452_v11 = vmul.f32 %v2188_v51, %v189_v61  ;;  %v964_v13 = vmax.f32 %v708_v4, 0.0  ;;  %v712_v14 = vadd.f32 %v2170_v44, %v449_v5  ;;  %v205_v63 = vld [vmem:[%s3416_s0 + $0x5f8] sm:$0xff] }
  0x8c   :  { %v713_v15 = vadd.f32 %v2170_v44, %v450_v6  ;;  %v714_v16 = vadd.f32 %v2170_v44, %v451_v7  ;;  %v965_v20 = vmax.f32 %v709_v8, 0.0  ;;  %v966_v21 = vmax.f32 %v710_v9, 0.0 }
  0x8d   :  { %v967_v22 = vmax.f32 %v711_v10, 0.0  ;;  %v715_v23 = vadd.f32 %v2170_v44, %v452_v11  ;;  %1220 = vst [vmem:[%s3419_s3 + $0x540] sm:$0xff] %v964_v13  ;;  %v968_v27 = vmax.f32 %v712_v14, 0.0  ;;  %v453_v30 = vmul.f32 %v2188_v51, %v190_v12  ;;  %v206_v14 = vld [vmem:[%s3416_s0 + $0x600] sm:$0xff] }
  0x8e   :  { %v969_v28 = vmax.f32 %v713_v15, 0.0  ;;  %v970_v29 = vmax.f32 %v714_v16, 0.0  ;;  %1221 = vst [vmem:[%s3419_s3 + $0x548] sm:$0xff] %v965_v20  ;;  %1222 = vst [vmem:[%s3419_s3 + $0x550] sm:$0xff] %v966_v21  ;;  %v454_v33 = vmul.f32 %v2188_v51, %v191_v17  ;;  %v455_v34 = vmul.f32 %v2188_v51, %v192_v18  ;;  %v208_v20 = vld [vmem:[%s3416_s0 + $0x610] sm:$0xff]  ;;  %v209_v21 = vld [vmem:[%s3416_s0 + $0x618] sm:$0xff] }
  0x8f   :  { %1223 = vst [vmem:[%s3419_s3 + $0x558] sm:$0xff] %v967_v22  ;;  %v971_v32 = vmax.f32 %v715_v23, 0.0  ;;  %v456_v35 = vmul.f32 %v2188_v51, %v193_v19  ;;  %1224 = vst [vmem:[%s3419_s3 + $0x560] sm:$0xff] %v968_v27  ;;  %v716_v36 = vadd.f32 %v2170_v44, %v453_v30  ;;  %v457_v37 = vmul.f32 %v2188_v51, %v194_v24  ;;  %v207_v19 = vld [vmem:[%s3416_s0 + $0x608] sm:$0xff] }
  0x90   :  { %1225 = vst [vmem:[%s3419_s3 + $0x568] sm:$0xff] %v969_v28  ;;  %1226 = vst [vmem:[%s3419_s3 + $0x570] sm:$0xff] %v970_v29  ;;  %v458_v38 = vmul.f32 %v2188_v51, %v195_v25  ;;  %v459_v39 = vmul.f32 %v2188_v51, %v196_v26  ;;  %v717_v40 = vadd.f32 %v2170_v44, %v454_v33  ;;  %v210_v26 = vld [vmem:[%s3416_s0 + $0x620] sm:$0xff]  ;;  %v211_v27 = vld [vmem:[%s3416_s0 + $0x628] sm:$0xff] }
  0x91   :  { %1227 = vst [vmem:[%s3419_s3 + $0x578] sm:$0xff] %v971_v32  ;;  %v718_v1 = vadd.f32 %v2170_v44, %v455_v34  ;;  %v719_v41 = vadd.f32 %v2170_v44, %v456_v35  ;;  %v460_v42 = vmul.f32 %v2188_v51, %v197_v31  ;;  %v972_v2 = vmax.f32 %v716_v36, 0.0  ;;  %v212_v28 = vld [vmem:[%s3416_s0 + $0x630] sm:$0xff]  ;;  %v213_v33 = vld [vmem:[%s3416_s0 + $0x638] sm:$0xff] }
  0x92   :  { %v720_v45 = vadd.f32 %v2170_v44, %v457_v37  ;;  %v721_v46 = vadd.f32 %v2170_v44, %v458_v38  ;;  %v722_v47 = vadd.f32 %v2170_v44, %v459_v39  ;;  %v973_v52 = vmax.f32 %v717_v40, 0.0 }
  0x93   :  { %v974_v53 = vmax.f32 %v718_v1, 0.0  ;;  %v975_v54 = vmax.f32 %v719_v41, 0.0  ;;  %v723_v55 = vadd.f32 %v2170_v44, %v460_v42  ;;  %1228 = vst [vmem:[%s3419_s3 + $0x580] sm:$0xff] %v972_v2  ;;  %v461_v62 = vmul.f32 %v2188_v51, %v198_v43 }
  0x94   :  { %v976_v59 = vmax.f32 %v720_v45, 0.0  ;;  %v977_v60 = vmax.f32 %v721_v46, 0.0  ;;  %v978_v61 = vmax.f32 %v722_v47, 0.0  ;;  %1229 = vst [vmem:[%s3419_s3 + $0x588] sm:$0xff] %v973_v52  ;;  %v462_v3 = vmul.f32 %v2188_v51, %v199_v48  ;;  %v214_v45 = vld [vmem:[%s3416_s0 + $0x640] sm:$0xff]  ;;  %v216_v52 = vld [vmem:[%s3416_s0 + $0x650] sm:$0xff] }
  0x95   :  { %1230 = vst [vmem:[%s3419_s3 + $0x590] sm:$0xff] %v974_v53  ;;  %1231 = vst [vmem:[%s3419_s3 + $0x598] sm:$0xff] %v975_v54  ;;  %v979_v0 = vmax.f32 %v723_v55, 0.0  ;;  %v463_v4 = vmul.f32 %v2188_v51, %v200_v49  ;;  %v464_v5 = vmul.f32 %v2188_v51, %v201_v50  ;;  %v724_v6 = vadd.f32 %v2170_v44, %v461_v62  ;;  %v215_v50 = vld [vmem:[%s3416_s0 + $0x648] sm:$0xff]  ;;  %v217_v53 = vld [vmem:[%s3416_s0 + $0x658] sm:$0xff] }
  0x96   :  { %1232 = vst [vmem:[%s3419_s3 + $0x5a0] sm:$0xff] %v976_v59  ;;  %1233 = vst [vmem:[%s3419_s3 + $0x5a8] sm:$0xff] %v977_v60  ;;  %v465_v7 = vmul.f32 %v2188_v51, %v202_v56  ;;  %v466_v8 = vmul.f32 %v2188_v51, %v203_v57  ;;  %v467_v9 = vmul.f32 %v2188_v51, %v204_v58  ;;  %v218_v58 = vld [vmem:[%s3416_s0 + $0x660] sm:$0xff]  ;;  %v219_v59 = vld [vmem:[%s3416_s0 + $0x668] sm:$0xff] }
  0x97   :  { %1234 = vst [vmem:[%s3419_s3 + $0x5b0] sm:$0xff] %v978_v61  ;;  %1235 = vst [vmem:[%s3419_s3 + $0x5b8] sm:$0xff] %v979_v0  ;;  %v725_v10 = vadd.f32 %v2170_v44, %v462_v3  ;;  %v726_v11 = vadd.f32 %v2170_v44, %v463_v4  ;;  %v727_v12 = vadd.f32 %v2170_v44, %v464_v5  ;;  %v980_v15 = vmax.f32 %v724_v6, 0.0  ;;  %v220_v60 = vld [vmem:[%s3416_s0 + $0x670] sm:$0xff]  ;;  %v221_v3 = vld [vmem:[%s3416_s0 + $0x678] sm:$0xff] }
  0x98   :  { %v468_v13 = vmul.f32 %v2188_v51, %v205_v63  ;;  %v728_v16 = vadd.f32 %v2170_v44, %v465_v7  ;;  %v729_v17 = vadd.f32 %v2170_v44, %v466_v8  ;;  %v730_v18 = vadd.f32 %v2170_v44, %v467_v9 }
  0x99   :  { %v981_v22 = vmax.f32 %v725_v10, 0.0  ;;  %v982_v23 = vmax.f32 %v726_v11, 0.0  ;;  %v983_v24 = vmax.f32 %v727_v12, 0.0  ;;  %1236 = vst [vmem:[%s3419_s3 + $0x5c0] sm:$0xff] %v980_v15  ;;  %v469_v32 = vmul.f32 %v2188_v51, %v206_v14 }
  0x9a   :  { %v731_v25 = vadd.f32 %v2170_v44, %v468_v13  ;;  %v984_v29 = vmax.f32 %v728_v16, 0.0  ;;  %v985_v30 = vmax.f32 %v729_v17, 0.0  ;;  %v986_v31 = vmax.f32 %v730_v18, 0.0  ;;  %v222_v16 = vld [vmem:[%s3416_s0 + $0x680] sm:$0xff] }
  0x9b   :  { %1237 = vst [vmem:[%s3419_s3 + $0x5c8] sm:$0xff] %v981_v22  ;;  %1238 = vst [vmem:[%s3419_s3 + $0x5d0] sm:$0xff] %v982_v23  ;;  %v470_v35 = vmul.f32 %v2188_v51, %v207_v19  ;;  %v471_v36 = vmul.f32 %v2188_v51, %v208_v20  ;;  %v472_v37 = vmul.f32 %v2188_v51, %v209_v21  ;;  %v3001_v19 = vld [vmem:[%s3418_s2] ss:$0 sm:$0xff]  ;;  %v224_v22 = vld [vmem:[%s3416_s0 + $0x690] sm:$0xff] }
  0x9c   :  { %1239 = vst [vmem:[%s3419_s3 + $0x5d8] sm:$0xff] %v983_v24  ;;  %v987_v34 = vmax.f32 %v731_v25, 0.0  ;;  %1240 = vst [vmem:[%s3419_s3 + $0x5e0] sm:$0xff] %v984_v29  ;;  %v732_v38 = vadd.f32 %v2170_v44, %v469_v32  ;;  %v473_v39 = vmul.f32 %v2188_v51, %v210_v26  ;;  %v474_v40 = vmul.f32 %v2188_v51, %v211_v27  ;;  %v226_v27 = vld [vmem:[%s3416_s0 + $0x6a0] sm:$0xff]  ;;  %v228_v29 = vld [vmem:[%s3416_s0 + $0x6b0] sm:$0xff] }
  0x9d   :  { %1241 = vst [vmem:[%s3419_s3 + $0x5e8] sm:$0xff] %v985_v30  ;;  %1242 = vst [vmem:[%s3419_s3 + $0x5f0] sm:$0xff] %v986_v31  ;;  %v475_v1 = vmul.f32 %v2188_v51, %v212_v28  ;;  %v733_v41 = vadd.f32 %v2170_v44, %v470_v35  ;;  %v734_v42 = vadd.f32 %v2170_v44, %v471_v36  ;;  %v227_v28 = vld [vmem:[%s3416_s0 + $0x6a8] sm:$0xff]  ;;  %v229_v35 = vld [vmem:[%s3416_s0 + $0x6b8] sm:$0xff] }
  0x9e   :  { %1243 = vst [vmem:[%s3419_s3 + $0x5f8] sm:$0xff] %v987_v34  ;;  %v735_v43 = vadd.f32 %v2170_v44, %v472_v37  ;;  %v476_v2 = vmul.f32 %v2188_v51, %v213_v33  ;;  %v988_v46 = vmax.f32 %v732_v38, 0.0  ;;  %v736_v47 = vadd.f32 %v2170_v44, %v473_v39  ;;  %v3030_v33 = vld [vmem:[%s3417_s1] ss:$0 sm:$0xff] }
  0x9f   :  { %v737_v48 = vadd.f32 %v2170_v44, %v474_v40  ;;  %v738_v49 = vadd.f32 %v2170_v44, %v475_v1  ;;  %v989_v54 = vmax.f32 %v733_v41, 0.0  ;;  %v990_v55 = vmax.f32 %v734_v42, 0.0 }
  0xa0   :  { %v991_v56 = vmax.f32 %v735_v43, 0.0  ;;  %v739_v57 = vadd.f32 %v2170_v44, %v476_v2  ;;  %1244 = vst [vmem:[%s3419_s3 + $0x600] sm:$0xff] %v988_v46  ;;  %v992_v61 = vmax.f32 %v736_v47, 0.0  ;;  %v477_v0 = vmul.f32 %v2188_v51, %v214_v45  ;;  %v230_v47 = vld [vmem:[%s3416_s0 + $0x6c0] sm:$0xff] }
  0xa1   :  { %v993_v62 = vmax.f32 %v737_v48, 0.0  ;;  %v994_v63 = vmax.f32 %v738_v49, 0.0  ;;  %1245 = vst [vmem:[%s3419_s3 + $0x608] sm:$0xff] %v989_v54  ;;  %1246 = vst [vmem:[%s3419_s3 + $0x610] sm:$0xff] %v990_v55  ;;  %v478_v5 = vmul.f32 %v2188_v51, %v215_v50  ;;  %v479_v6 = vmul.f32 %v2188_v51, %v216_v52  ;;  %v232_v54 = vld [vmem:[%s3416_s0 + $0x6d0] sm:$0xff]  ;;  %v233_v55 = vld [vmem:[%s3416_s0 + $0x6d8] sm:$0xff] }
  0xa2   :  { %1247 = vst [vmem:[%s3419_s3 + $0x618] sm:$0xff] %v991_v56  ;;  %v995_v4 = vmax.f32 %v739_v57, 0.0  ;;  %v480_v7 = vmul.f32 %v2188_v51, %v217_v53  ;;  %1248 = vst [vmem:[%s3419_s3 + $0x620] sm:$0xff] %v992_v61  ;;  %v740_v8 = vadd.f32 %v2170_v44, %v477_v0  ;;  %v481_v9 = vmul.f32 %v2188_v51, %v218_v58  ;;  %v231_v53 = vld [vmem:[%s3416_s0 + $0x6c8] sm:$0xff] }
  0xa3   :  { %1249 = vst [vmem:[%s3419_s3 + $0x628] sm:$0xff] %v993_v62  ;;  %1250 = vst [vmem:[%s3419_s3 + $0x630] sm:$0xff] %v994_v63  ;;  %v482_v10 = vmul.f32 %v2188_v51, %v219_v59  ;;  %v483_v11 = vmul.f32 %v2188_v51, %v220_v60  ;;  %v741_v12 = vadd.f32 %v2170_v44, %v478_v5  ;;  %v234_v60 = vld [vmem:[%s3416_s0 + $0x6e0] sm:$0xff]  ;;  %v235_v61 = vld [vmem:[%s3416_s0 + $0x6e8] sm:$0xff] }
  0xa4   :  { %1251 = vst [vmem:[%s3419_s3 + $0x638] sm:$0xff] %v995_v4  ;;  %v742_v13 = vadd.f32 %v2170_v44, %v479_v6  ;;  %v743_v14 = vadd.f32 %v2170_v44, %v480_v7  ;;  %v484_v15 = vmul.f32 %v2188_v51, %v221_v3  ;;  %v996_v17 = vmax.f32 %v740_v8, 0.0  ;;  %v223_v51 = vld [vmem:[%s3416_s0 + $0x688] sm:$0xff]  ;;  %v236_v62 = vld [vmem:[%s3416_s0 + $0x6f0] sm:$0xff]  ;;  %v237_v5 = vld [vmem:[%s3416_s0 + $0x6f8] sm:$0xff] }
  0xa5   :  { %v744_v18 = vadd.f32 %v2170_v44, %v481_v9  ;;  %v745_v20 = vadd.f32 %v3001_v19, %v482_v10  ;;  %v746_v21 = vadd.f32 %v3001_v19, %v483_v11  ;;  %v225_v44 = vld [vmem:[%s3416_s0 + $0x698] sm:$0xff]  ;;  %v997_v23 = vmax.f32 %v741_v12, 0.0 }
  0xa6   :  { %v998_v24 = vmax.f32 %v742_v13, 0.0  ;;  %v999_v25 = vmax.f32 %v743_v14, 0.0  ;;  %v747_v26 = vadd.f32 %v3001_v19, %v484_v15  ;;  %1252 = vst [vmem:[%s3419_s3 + $0x640] sm:$0xff] %v996_v17  ;;  %v485_v34 = vmul.f32 %v3030_v33, %v222_v16 }
  0xa7   :  { %v1000_v30 = vmax.f32 %v744_v18, 0.0  ;;  %v1001_v31 = vmax.f32 %v745_v20, 0.0  ;;  %v1002_v32 = vmax.f32 %v746_v21, 0.0  ;;  %1253 = vst [vmem:[%s3419_s3 + $0x648] sm:$0xff] %v997_v23  ;;  %v486_v37 = vmul.f32 %v3030_v33, %v223_v51  ;;  %v238_v18 = vld [vmem:[%s3416_s0 + $0x700] sm:$0xff]  ;;  %v240_v23 = vld [vmem:[%s3416_s0 + $0x710] sm:$0xff] }
  0xa8   :  { %1254 = vst [vmem:[%s3419_s3 + $0x650] sm:$0xff] %v998_v24  ;;  %1255 = vst [vmem:[%s3419_s3 + $0x658] sm:$0xff] %v999_v25  ;;  %v1003_v36 = vmax.f32 %v747_v26, 0.0  ;;  %v487_v38 = vmul.f32 %v3030_v33, %v224_v22  ;;  %v488_v39 = vmul.f32 %v3030_v33, %v225_v44  ;;  %v748_v40 = vadd.f32 %v3001_v19, %v485_v34  ;;  %v239_v44 = vld [vmem:[%s3416_s0 + $0x708] sm:$0xff]  ;;  %v241_v24 = vld [vmem:[%s3416_s0 + $0x718] sm:$0xff] }
  0xa9   :  { %1256 = vst [vmem:[%s3419_s3 + $0x660] sm:$0xff] %v1000_v30  ;;  %1257 = vst [vmem:[%s3419_s3 + $0x668] sm:$0xff] %v1001_v31  ;;  %v489_v1 = vmul.f32 %v3030_v33, %v226_v27  ;;  %v490_v41 = vmul.f32 %v3030_v33, %v227_v28  ;;  %v491_v42 = vmul.f32 %v3030_v33, %v228_v29  ;;  %v242_v29 = vld [vmem:[%s3416_s0 + $0x720] sm:$0xff]  ;;  %v243_v30 = vld [vmem:[%s3416_s0 + $0x728] sm:$0xff] }
  0xaa   :  { %1258 = vst [vmem:[%s3419_s3 + $0x670] sm:$0xff] %v1002_v32  ;;  %1259 = vst [vmem:[%s3419_s3 + $0x678] sm:$0xff] %v1003_v36  ;;  %v749_v43 = vadd.f32 %v3001_v19, %v486_v37  ;;  %v750_v2 = vadd.f32 %v3001_v19, %v487_v38  ;;  %v751_v45 = vadd.f32 %v3001_v19, %v488_v39  ;;  %v1004_v48 = vmax.f32 %v748_v40, 0.0  ;;  %v244_v31 = vld [vmem:[%s3416_s0 + $0x730] sm:$0xff]  ;;  %v245_v37 = vld [vmem:[%s3416_s0 + $0x738] sm:$0xff] }
  0xab   :  { %v492_v46 = vmul.f32 %v3030_v33, %v229_v35  ;;  %v752_v49 = vadd.f32 %v3001_v19, %v489_v1  ;;  %v753_v50 = vadd.f32 %v3001_v19, %v490_v41  ;;  %v754_v52 = vadd.f32 %v3001_v19, %v491_v42 }
  0xac   :  { %v1005_v56 = vmax.f32 %v749_v43, 0.0  ;;  %v1006_v57 = vmax.f32 %v750_v2, 0.0  ;;  %v1007_v58 = vmax.f32 %v751_v45, 0.0  ;;  %1260 = vst [vmem:[%s3419_s3 + $0x680] sm:$0xff] %v1004_v48  ;;  %v493_v4 = vmul.f32 %v3030_v33, %v230_v47 }
  0xad   :  { %v755_v59 = vadd.f32 %v3001_v19, %v492_v46  ;;  %v1008_v63 = vmax.f32 %v752_v49, 0.0  ;;  %v1009_v0 = vmax.f32 %v753_v50, 0.0  ;;  %v1010_v3 = vmax.f32 %v754_v52, 0.0  ;;  %v246_v49 = vld [vmem:[%s3416_s0 + $0x740] sm:$0xff] }
  0xae   :  { %1261 = vst [vmem:[%s3419_s3 + $0x688] sm:$0xff] %v1005_v56  ;;  %1262 = vst [vmem:[%s3419_s3 + $0x690] sm:$0xff] %v1006_v57  ;;  %v494_v7 = vmul.f32 %v3030_v33, %v231_v53  ;;  %v495_v8 = vmul.f32 %v3030_v33, %v232_v54  ;;  %v496_v9 = vmul.f32 %v3030_v33, %v233_v55  ;;  %v247_v55 = vld [vmem:[%s3416_s0 + $0x748] sm:$0xff]  ;;  %v248_v56 = vld [vmem:[%s3416_s0 + $0x750] sm:$0xff] }
  0xaf   :  { %1263 = vst [vmem:[%s3419_s3 + $0x698] sm:$0xff] %v1007_v58  ;;  %v1011_v6 = vmax.f32 %v755_v59, 0.0  ;;  %1264 = vst [vmem:[%s3419_s3 + $0x6a0] sm:$0xff] %v1008_v63  ;;  %v756_v10 = vadd.f32 %v3001_v19, %v493_v4  ;;  %v497_v11 = vmul.f32 %v3030_v33, %v234_v60  ;;  %v498_v12 = vmul.f32 %v3030_v33, %v235_v61  ;;  %v249_v57 = vld [vmem:[%s3416_s0 + $0x758] sm:$0xff]  ;;  %v251_v63 = vld [vmem:[%s3416_s0 + $0x768] sm:$0xff] }
  0xb0   :  { %1265 = vst [vmem:[%s3419_s3 + $0x6a8] sm:$0xff] %v1009_v0  ;;  %1266 = vst [vmem:[%s3419_s3 + $0x6b0] sm:$0xff] %v1010_v3  ;;  %v499_v13 = vmul.f32 %v3030_v33, %v236_v62  ;;  %v757_v14 = vadd.f32 %v3001_v19, %v494_v7  ;;  %v758_v15 = vadd.f32 %v3001_v19, %v495_v8  ;;  %v250_v62 = vld [vmem:[%s3416_s0 + $0x760] sm:$0xff]  ;;  %v252_v0 = vld [vmem:[%s3416_s0 + $0x770] sm:$0xff] }
  0xb1   :  { %1267 = vst [vmem:[%s3419_s3 + $0x6b8] sm:$0xff] %v1011_v6  ;;  %v759_v16 = vadd.f32 %v3001_v19, %v496_v9  ;;  %v500_v17 = vmul.f32 %v3030_v33, %v237_v5  ;;  %v1012_v20 = vmax.f32 %v756_v10, 0.0  ;;  %v760_v21 = vadd.f32 %v3001_v19, %v497_v11  ;;  %v253_v7 = vld [vmem:[%s3416_s0 + $0x778] sm:$0xff] }
  0xb2   :  { %v761_v51 = vadd.f32 %v3001_v19, %v498_v12  ;;  %v762_v22 = vadd.f32 %v3001_v19, %v499_v13  ;;  %v1013_v25 = vmax.f32 %v757_v14, 0.0  ;;  %v1014_v26 = vmax.f32 %v758_v15, 0.0 }
  0xb3   :  { %v1015_v27 = vmax.f32 %v759_v16, 0.0  ;;  %v763_v28 = vadd.f32 %v3001_v19, %v500_v17  ;;  %1268 = vst [vmem:[%s3419_s3 + $0x6c0] sm:$0xff] %v1012_v20  ;;  %v1016_v32 = vmax.f32 %v760_v21, 0.0  ;;  %v501_v36 = vmul.f32 %v3030_v33, %v238_v18  ;;  %v254_v21 = vld [vmem:[%s3416_s0 + $0x780] sm:$0xff] }
  0xb4   :  { %v1017_v34 = vmax.f32 %v761_v51, 0.0  ;;  %v1018_v35 = vmax.f32 %v762_v22, 0.0  ;;  %1269 = vst [vmem:[%s3419_s3 + $0x6c8] sm:$0xff] %v1013_v25  ;;  %1270 = vst [vmem:[%s3419_s3 + $0x6d0] sm:$0xff] %v1014_v26  ;;  %v502_v39 = vmul.f32 %v3030_v33, %v239_v44  ;;  %v503_v40 = vmul.f32 %v3030_v33, %v240_v23  ;;  %v256_v25 = vld [vmem:[%s3416_s0 + $0x790] sm:$0xff]  ;;  %v257_v26 = vld [vmem:[%s3416_s0 + $0x798] sm:$0xff] }
  0xb5   :  { %1271 = vst [vmem:[%s3419_s3 + $0x6d8] sm:$0xff] %v1015_v27  ;;  %v1019_v38 = vmax.f32 %v763_v28, 0.0  ;;  %v504_v1 = vmul.f32 %v3030_v33, %v241_v24  ;;  %1272 = vst [vmem:[%s3419_s3 + $0x6e0] sm:$0xff] %v1016_v32  ;;  %v764_v41 = vadd.f32 %v3001_v19, %v501_v36  ;;  %v505_v42 = vmul.f32 %v3030_v33, %v242_v29  ;;  %v255_v24 = vld [vmem:[%s3416_s0 + $0x788] sm:$0xff] }
  0xb6   :  { %1273 = vst [vmem:[%s3419_s3 + $0x6e8] sm:$0xff] %v1017_v34  ;;  %1274 = vst [vmem:[%s3419_s3 + $0x6f0] sm:$0xff] %v1018_v35  ;;  %v506_v43 = vmul.f32 %v3030_v33, %v243_v30  ;;  %v507_v2 = vmul.f32 %v3030_v33, %v244_v31  ;;  %v765_v45 = vadd.f32 %v3001_v19, %v502_v39  ;;  %v258_v31 = vld [vmem:[%s3416_s0 + $0x7a0] sm:$0xff]  ;;  %v259_v32 = vld [vmem:[%s3416_s0 + $0x7a8] sm:$0xff] }
  0xb7   :  { %1275 = vst [vmem:[%s3419_s3 + $0x6f8] sm:$0xff] %v1019_v38  ;;  %v766_v46 = vadd.f32 %v3001_v19, %v503_v40  ;;  %v767_v47 = vadd.f32 %v3001_v19, %v504_v1  ;;  %v508_v48 = vmul.f32 %v3030_v33, %v245_v37  ;;  %v1020_v50 = vmax.f32 %v764_v41, 0.0  ;;  %v260_v34 = vld [vmem:[%s3416_s0 + $0x7b0] sm:$0xff]  ;;  %v261_v39 = vld [vmem:[%s3416_s0 + $0x7b8] sm:$0xff] }
  0xb8   :  { %v768_v52 = vadd.f32 %v3001_v19, %v505_v42  ;;  %v769_v53 = vadd.f32 %v3001_v19, %v506_v43  ;;  %v770_v54 = vadd.f32 %v3001_v19, %v507_v2  ;;  %v1021_v58 = vmax.f32 %v765_v45, 0.0 }
  0xb9   :  { %v1022_v59 = vmax.f32 %v766_v46, 0.0  ;;  %v1023_v60 = vmax.f32 %v767_v47, 0.0  ;;  %v771_v61 = vadd.f32 %v3001_v19, %v508_v48  ;;  %1276 = vst [vmem:[%s3419_s3 + $0x700] sm:$0xff] %v1020_v50  ;;  %v509_v6 = vmul.f32 %v3030_v33, %v246_v49 }
  0xba   :  { %v1024_v3 = vmax.f32 %v768_v52, 0.0  ;;  %v1025_v4 = vmax.f32 %v769_v53, 0.0  ;;  %v1026_v5 = vmax.f32 %v770_v54, 0.0  ;;  %1277 = vst [vmem:[%s3419_s3 + $0x708] sm:$0xff] %v1021_v58  ;;  %v510_v9 = vmul.f32 %v3030_v33, %v247_v55  ;;  %v262_v52 = vld [vmem:[%s3416_s0 + $0x7c0] sm:$0xff]  ;;  %v264_v58 = vld [vmem:[%s3416_s0 + $0x7d0] sm:$0xff] }
  0xbb   :  { %1278 = vst [vmem:[%s3419_s3 + $0x710] sm:$0xff] %v1022_v59  ;;  %1279 = vst [vmem:[%s3419_s3 + $0x718] sm:$0xff] %v1023_v60  ;;  %v1027_v8 = vmax.f32 %v771_v61, 0.0  ;;  %v511_v10 = vmul.f32 %v3030_v33, %v248_v56  ;;  %v512_v11 = vmul.f32 %v3030_v33, %v249_v57  ;;  %v772_v12 = vadd.f32 %v3001_v19, %v509_v6  ;;  %v263_v57 = vld [vmem:[%s3416_s0 + $0x7c8] sm:$0xff]  ;;  %v265_v59 = vld [vmem:[%s3416_s0 + $0x7d8] sm:$0xff] }
  0xbc   :  { %1280 = vst [vmem:[%s3419_s3 + $0x720] sm:$0xff] %v1024_v3  ;;  %1281 = vst [vmem:[%s3419_s3 + $0x728] sm:$0xff] %v1025_v4  ;;  %v513_v13 = vmul.f32 %v3030_v33, %v250_v62  ;;  %v514_v14 = vmul.f32 %v3030_v33, %v251_v63  ;;  %v515_v15 = vmul.f32 %v3030_v33, %v252_v0  ;;  %v266_v0 = vld [vmem:[%s3416_s0 + $0x7e0] sm:$0xff]  ;;  %v267_v3 = vld [vmem:[%s3416_s0 + $0x7e8] sm:$0xff] }
  0xbd   :  { %1282 = vst [vmem:[%s3419_s3 + $0x730] sm:$0xff] %v1026_v5  ;;  %1283 = vst [vmem:[%s3419_s3 + $0x738] sm:$0xff] %v1027_v8  ;;  %v773_v16 = vadd.f32 %v3001_v19, %v510_v9  ;;  %v774_v17 = vadd.f32 %v3001_v19, %v511_v10  ;;  %v775_v18 = vadd.f32 %v3001_v19, %v512_v11  ;;  %v1028_v51 = vmax.f32 %v772_v12, 0.0  ;;  %v268_v4 = vld [vmem:[%s3416_s0 + $0x7f0] sm:$0xff]  ;;  %v269_v9 = vld [vmem:[%s3416_s0 + $0x7f8] sm:$0xff] }
  0xbe   :  { %v516_v20 = vmul.f32 %v3030_v33, %v253_v7  ;;  %v776_v22 = vadd.f32 %v3001_v19, %v513_v13  ;;  %v777_v44 = vadd.f32 %v3001_v19, %v514_v14  ;;  %v778_v23 = vadd.f32 %v3001_v19, %v515_v15 }
  0xbf   :  { %v1029_v27 = vmax.f32 %v773_v16, 0.0  ;;  %v1030_v28 = vmax.f32 %v774_v17, 0.0  ;;  %v1031_v29 = vmax.f32 %v775_v18, 0.0  ;;  %1284 = vst [vmem:[%s3419_s3 + $0x740] sm:$0xff] %v1028_v51  ;;  %v517_v38 = vmul.f32 %v3030_v33, %v254_v21 }
  0xc0   :  { %v779_v30 = vadd.f32 %v3001_v19, %v516_v20  ;;  %v1032_v35 = vmax.f32 %v776_v22, 0.0  ;;  %v1033_v36 = vmax.f32 %v777_v44, 0.0  ;;  %v1034_v37 = vmax.f32 %v778_v23, 0.0 }
  0xc1   :  { %1285 = vst [vmem:[%s3419_s3 + $0x748] sm:$0xff] %v1029_v27  ;;  %1286 = vst [vmem:[%s3419_s3 + $0x750] sm:$0xff] %v1030_v28  ;;  %v518_v1 = vmul.f32 %v3030_v33, %v255_v24  ;;  %v519_v41 = vmul.f32 %v3030_v33, %v256_v25  ;;  %v520_v42 = vmul.f32 %v3030_v33, %v257_v26 }
  0xc2   :  { %1287 = vst [vmem:[%s3419_s3 + $0x758] sm:$0xff] %v1031_v29  ;;  %v1035_v40 = vmax.f32 %v779_v30, 0.0  ;;  %1288 = vst [vmem:[%s3419_s3 + $0x760] sm:$0xff] %v1032_v35  ;;  %v780_v43 = vadd.f32 %v3001_v19, %v517_v38  ;;  %v521_v2 = vmul.f32 %v3030_v33, %v258_v31  ;;  %v522_v45 = vmul.f32 %v3030_v33, %v259_v32 }
  0xc3   :  { %1289 = vst [vmem:[%s3419_s3 + $0x768] sm:$0xff] %v1033_v36  ;;  %1290 = vst [vmem:[%s3419_s3 + $0x770] sm:$0xff] %v1034_v37  ;;  %v523_v46 = vmul.f32 %v3030_v33, %v260_v34  ;;  %v781_v47 = vadd.f32 %v3001_v19, %v518_v1  ;;  %v782_v48 = vadd.f32 %v3001_v19, %v519_v41 }
  0xc4   :  { %1291 = vst [vmem:[%s3419_s3 + $0x778] sm:$0xff] %v1035_v40  ;;  %v783_v49 = vadd.f32 %v3001_v19, %v520_v42  ;;  %v524_v50 = vmul.f32 %v3030_v33, %v261_v39  ;;  %v1036_v53 = vmax.f32 %v780_v43, 0.0  ;;  %v784_v54 = vadd.f32 %v3001_v19, %v521_v2 }
  0xc5   :  { %v785_v55 = vadd.f32 %v3001_v19, %v522_v45  ;;  %v786_v56 = vadd.f32 %v3001_v19, %v523_v46  ;;  %v1037_v60 = vmax.f32 %v781_v47, 0.0  ;;  %v1038_v61 = vmax.f32 %v782_v48, 0.0 }
  0xc6   :  { %v1039_v62 = vmax.f32 %v783_v49, 0.0  ;;  %v787_v63 = vadd.f32 %v3001_v19, %v524_v50  ;;  %1292 = vst [vmem:[%s3419_s3 + $0x780] sm:$0xff] %v1036_v53  ;;  %v1040_v5 = vmax.f32 %v784_v54, 0.0  ;;  %v525_v8 = vmul.f32 %v3030_v33, %v262_v52 }
  0xc7   :  { %v1041_v6 = vmax.f32 %v785_v55, 0.0  ;;  %v1042_v7 = vmax.f32 %v786_v56, 0.0  ;;  %1293 = vst [vmem:[%s3419_s3 + $0x788] sm:$0xff] %v1037_v60  ;;  %1294 = vst [vmem:[%s3419_s3 + $0x790] sm:$0xff] %v1038_v61  ;;  %v526_v11 = vmul.f32 %v3030_v33, %v263_v57  ;;  %v527_v12 = vmul.f32 %v3030_v33, %v264_v58 }
  0xc8   :  { %1295 = vst [vmem:[%s3419_s3 + $0x798] sm:$0xff] %v1039_v62  ;;  %v1043_v10 = vmax.f32 %v787_v63, 0.0  ;;  %v528_v13 = vmul.f32 %v3030_v33, %v265_v59  ;;  %1296 = vst [vmem:[%s3419_s3 + $0x7a0] sm:$0xff] %v1040_v5  ;;  %v788_v14 = vadd.f32 %v3001_v19, %v525_v8  ;;  %v529_v15 = vmul.f32 %v3030_v33, %v266_v0 }
  0xc9   :  { %1297 = vst [vmem:[%s3419_s3 + $0x7a8] sm:$0xff] %v1041_v6  ;;  %1298 = vst [vmem:[%s3419_s3 + $0x7b0] sm:$0xff] %v1042_v7  ;;  %v530_v16 = vmul.f32 %v3030_v33, %v267_v3  ;;  %v531_v17 = vmul.f32 %v3030_v33, %v268_v4  ;;  %v789_v18 = vadd.f32 %v3001_v19, %v526_v11 }
  0xca   :  { %1299 = vst [vmem:[%s3419_s3 + $0x7b8] sm:$0xff] %v1043_v10  ;;  %v790_v20 = vadd.f32 %v3001_v19, %v527_v12  ;;  %v791_v21 = vadd.f32 %v3001_v19, %v528_v13  ;;  %v532_v51 = vmul.f32 %v3030_v33, %v269_v9  ;;  %v1044_v22 = vmax.f32 %v788_v14, 0.0 }
  0xcb   :  { %v792_v44 = vadd.f32 %v3001_v19, %v529_v15  ;;  %v793_v23 = vadd.f32 %v3001_v19, %v530_v16  ;;  %v794_v24 = vadd.f32 %v3001_v19, %v531_v17  ;;  %v1045_v25 = vmax.f32 %v789_v18, 0.0 }
  0xcc   :  { %v1046_v26 = vmax.f32 %v790_v20, 0.0  ;;  %v1047_v27 = vmax.f32 %v791_v21, 0.0  ;;  %v795_v28 = vadd.f32 %v3001_v19, %v532_v51  ;;  %1300 = vst [vmem:[%s3419_s3 + $0x7c0] sm:$0xff] %v1044_v22 }
  0xcd   :  { %v1048_v29 = vmax.f32 %v792_v44, 0.0  ;;  %v1049_v30 = vmax.f32 %v793_v23, 0.0  ;;  %v1050_v31 = vmax.f32 %v794_v24, 0.0  ;;  %1301 = vst [vmem:[%s3419_s3 + $0x7c8] sm:$0xff] %v1045_v25 }
  0xce   :  { %1302 = vst [vmem:[%s3419_s3 + $0x7d0] sm:$0xff] %v1046_v26  ;;  %1303 = vst [vmem:[%s3419_s3 + $0x7d8] sm:$0xff] %v1047_v27  ;;  %v1051_v19 = vmax.f32 %v795_v28, 0.0 }
  0xcf   :  { %1304 = vst [vmem:[%s3419_s3 + $0x7e0] sm:$0xff] %v1048_v29  ;;  %1305 = vst [vmem:[%s3419_s3 + $0x7e8] sm:$0xff] %v1049_v30 }
  0xd0   :  { %1306 = vst [vmem:[%s3419_s3 + $0x7f0] sm:$0xff] %v1050_v31  ;;  %1307 = vst [vmem:[%s3419_s3 + $0x7f8] sm:$0xff] %v1051_v19 }

// kernel: upsampled_part.8
= control target key start
LH: loop header
LB: loop body
LE: loop exit
PB: predicated region body
PF: predicated region fallthrough
CT: control target
= control target key end

     0   :  { %s3043_s15 = smov 0   ;;  %s4368_s0 = inlined_call_operand.vmem [shape: bf16[2048,36], index: 0, kind: input, shape index: {}]   ;;  %s4369_s1 = inlined_call_operand.vmem [shape: bf16[36,128], index: 1, kind: input, shape index: {}]   ;;  %s4370_s2 = inlined_call_operand.vmem [shape: f32[1,128], index: 2, kind: input, shape index: {}]   ;;  %s4371_s3 = inlined_call_operand.vmem [shape: f32[2048,128], index: 3, kind: output, shape index: {0}]   ;;  %s4372_s4 = inlined_call_operand.vmem [shape: f32[16,128], index: 4, kind: output, shape index: {1}]  }
   0x1 LB: > { %s3049_s16 = sadd.s32 4294967295, %s3016_s15   ;;  %p2564_p0 = scmp.ge.s32.totalorder %s3016_s15, 1  ;;  %s3016_s15 = sphi %s3043_s15, %s15_s15  }
   0x2   : > { %p166_p1 = scmp.lt.s32.totalorder %s3016_s15, 3 }
   0x4   : > { %p167_p2 = pnand %p2564_p0, %p166_p1 }
   0x6   : > { %170 = sbr.rel (%p167_p2) target bundleno = 498 (0x1f2), region = 32 }
   0xb   : > { %v2922_v0 = vld [vmem:[%s4369_s1 + $0x10] ss:$0 sps:$4 sm:$0x33]   ;;  %vm881_vm0 = vcmask 1041408   ;;  %v2923_v1 = vld [vmem:[%s4369_s1 + $0x8] sm:$0xff]   ;;  %s2565_s21 = sshll.u32 %s3049_s16, 7 }
   0xc   : > { %2912 = vmatprep.subr.msk.bf16.mxu0 %vm881_vm0, %v2922_v0  ;;  %v883_v2 = vsel %vm881_vm0, %v2922_v0, 0  ;;  %2913 = vmatprep.subr.msk.bf16.mxu1 %vm881_vm0, %v2922_v0  ;;  %p197_p3 = scmp.lt.s32.totalorder %s2565_s21, 255  ;;  %v2924_v3 = vld [vmem:[%s4369_s1] sm:$0xff]   ;;  %vm688_vm1 = vcmask 293888   ;;  %s2702_s28 = sshll.u32 %s3049_s16, 10 }
   0xd   : > { %2773 = vmatpush3.bf16.msra.mxu0 %v883_v2  ;;  %2909 = vmatpush3.bf16.msra.mxu1 %v883_v2  ;;  %p208_p4 = scmp.lt.s32.totalorder %s3049_s16, 1 }
   0xe   : > { %2774 = vmatprep.subr.bf16.mxu0 %v2923_v1  ;;  %2907 = vmatprep.subr.bf16.mxu1 %v2923_v1  ;;  %s4377_s21 = smov (!%p197_p3, %s2565_s21), 255 }
   0xf   : > { %s2566_s24 = sshll.u32 %s4377_s21, 2  ;;  %s2568_s29 = sshll.u32 %s4377_s21, 3 }
  0x10   : > { %s3069_s27 = scalar_lea.vmem %s4368_s0, %s2566_s24  ;;  %s3217_s8 = scalar_lea.vmem %s4371_s3, %s2568_s29 }
  0x11   : > { %2775 = vmatpush3.bf16.msra.mxu0 %v2923_v1  ;;  %2910 = vmatpush3.bf16.msra.mxu1 %v2923_v1  ;;  %v2925_v4 = vld [vmem:[%s3069_s27] sm:$0xff]   ;;  %v2926_v5 = vld [vmem:[%s3069_s27 + $0x8] sm:$0xff]   ;;  %v2927_v6 = vld [vmem:[%s3069_s27 + $0x10] sm:$0xff]   ;;  %s4379_s16 = smov (!%p208_p4, %s3049_s16), 1 }
  0x12   : > { %2776 = vmatprep.subr.bf16.mxu0 %v2924_v3  ;;  %2908 = vmatprep.subr.bf16.mxu1 %v2924_v3  ;;  %v2928_v7 = vld [vmem:[%s3069_s27 + $0x18] sm:$0xff]   ;;  %v2929_v8 = vld [vmem:[%s3069_s27 + $0x20] sm:$0xff]   ;;  %v2930_v9 = vld [vmem:[%s3069_s27 + $0x28] sm:$0xff]   ;;  %s2569_s13 = sshll.u32 %s4379_s16, 3 }
  0x13   : > { %2778 = vmatprep.mubr.msk.bf16.mxu0 %vm688_vm1, %v2925_v4  ;;  %v2931_v10 = vld [vmem:[%s3069_s27 + $0x30] sm:$0xff]   ;;  %v2932_v11 = vld [vmem:[%s3069_s27 + $0x38] sm:$0xff]   ;;  %v2933_v12 = vld [vmem:[%s3069_s27 + $0x40] sm:$0xff]   ;;  %v1559_v4 = vlaneseq  ;;  %s211_s18 = scalar_lea.vmem %s4372_s4, %s2569_s13 }
  0x14   : > { %v2934_v13 = vld [vmem:[%s3069_s27 + $0x48] sm:$0xff]   ;;  %v2935_v14 = vld [vmem:[%s3069_s27 + $0x50] sm:$0xff]   ;;  %v2957_v15 = vld [vmem:[%s3069_s27 + $0x100] sm:$0xff]  }
  0x15   : > { %2777 = vmatpush3.bf16.msra.mxu0 %v2924_v3  ;;  %2911 = vmatpush3.bf16.msra.mxu1 %v2924_v3  ;;  %v2958_v16 = vld [vmem:[%s3069_s27 + $0x108] sm:$0xff]   ;;  %v2959_v17 = vld [vmem:[%s3069_s27 + $0x110] sm:$0xff]   ;;  %v2960_v18 = vld [vmem:[%s3069_s27 + $0x118] sm:$0xff]  }
  0x16   : > { %2842 = vmatprep.mubr.msk.bf16.mxu1 %vm688_vm1, %v2957_v15  ;;  %v2961_v19 = vld [vmem:[%s3069_s27 + $0x120] sm:$0xff]   ;;  %v2936_v20 = vld [vmem:[%s3069_s27 + $0x58] sm:$0xff]   ;;  %v2938_v22 = vld [vmem:[%s3069_s27 + $0x68] sm:$0xff]  }
  0x17   : > { %v2937_v21 = vld [vmem:[%s3069_s27 + $0x60] sm:$0xff]   ;;  %v2962_v23 = vld [vmem:[%s3069_s27 + $0x128] sm:$0xff]   ;;  %v2963_v24 = vld [vmem:[%s3069_s27 + $0x130] sm:$0xff]  }
  0x18   : > { %2779 = vmatmul.mubr.msk.bf16.vlgmr.msra.gmra.mxu0 %vm688_vm1, %v2926_v5  ;;  %2843 = vmatmul.mubr.msk.bf16.vlgmr.msra.gmra.mxu1 %vm688_vm1, %v2958_v16  ;;  %v2939_v25 = vld [vmem:[%s3069_s27 + $0x70] sm:$0xff]   ;;  %v2964_v26 = vld [vmem:[%s3069_s27 + $0x138] sm:$0xff]   ;;  %v2965_v27 = vld [vmem:[%s3069_s27 + $0x140] sm:$0xff]   ;;  %v3199_v5 = vshrl.u32 %v1559_v4, 7 }
  0x19   : > { %2782 = vmatprep.mubr.msk.bf16.mxu0 %vm688_vm1, %v2927_v6  ;;  %2846 = vmatprep.mubr.msk.bf16.mxu1 %vm688_vm1, %v2959_v17  ;;  %v2940_v28 = vld [vmem:[%s3069_s27 + $0x78] sm:$0xff]   ;;  %v2941_v29 = vld [vmem:[%s3069_s27 + $0x80] sm:$0xff]   ;;  %v2966_v30 = vld [vmem:[%s3069_s27 + $0x148] sm:$0xff]  }
  0x1a   : > { %v2967_v31 = vld [vmem:[%s3069_s27 + $0x150] sm:$0xff]   ;;  %v2942_v32 = vld [vmem:[%s3069_s27 + $0x88] sm:$0xff]   ;;  %v2968_v34 = vld [vmem:[%s3069_s27 + $0x158] sm:$0xff]   ;;  %v1567_v15 = vadd.s32 56, %v3199_v5 }
  0x1b   : > { %v2943_v33 = vld [vmem:[%s3069_s27 + $0x90] sm:$0xff]   ;;  %v2969_v35 = vld [vmem:[%s3069_s27 + $0x160] sm:$0xff]   ;;  %v2944_v36 = vld [vmem:[%s3069_s27 + $0x98] sm:$0xff]  }
  0x1c   : > { %v2945_v37 = vld [vmem:[%s3069_s27 + $0xa0] sm:$0xff]   ;;  %v2970_v38 = vld [vmem:[%s3069_s27 + $0x168] sm:$0xff]   ;;  %v2971_v39 = vld [vmem:[%s3069_s27 + $0x170] sm:$0xff]  }
  0x1d   : > { %v2946_v40 = vld [vmem:[%s3069_s27 + $0xa8] sm:$0xff]   ;;  %v2947_v41 = vld [vmem:[%s3069_s27 + $0xb0] sm:$0xff]   ;;  %v2972_v42 = vld [vmem:[%s3069_s27 + $0x178] sm:$0xff]  }
  0x1e   : > { %v2973_v43 = vld [vmem:[%s3069_s27 + $0x180] sm:$0xff]   ;;  %v2948_v44 = vld [vmem:[%s3069_s27 + $0xb8] sm:$0xff]   ;;  %v2974_v46 = vld [vmem:[%s3069_s27 + $0x188] sm:$0xff]  }
  0x1f   : > { %v2949_v45 = vld [vmem:[%s3069_s27 + $0xc0] sm:$0xff]   ;;  %v2975_v47 = vld [vmem:[%s3069_s27 + $0x190] sm:$0xff]   ;;  %v2950_v48 = vld [vmem:[%s3069_s27 + $0xc8] sm:$0xff]  }
  0x20   : > { %2783 = vmatmul.mubr.msk.bf16.gmra.mxu0 %vm688_vm1, %v2928_v7  ;;  %2847 = vmatmul.mubr.msk.bf16.gmra.mxu1 %vm688_vm1, %v2960_v18  ;;  %v2951_v49 = vld [vmem:[%s3069_s27 + $0xd0] sm:$0xff]   ;;  %v2976_v50 = vld [vmem:[%s3069_s27 + $0x198] sm:$0xff]   ;;  %v2977_v51 = vld [vmem:[%s3069_s27 + $0x1a0] sm:$0xff]   ;;  %v1562_v7 = vadd.s32 16, %v3199_v5 }
  0x21   : > { %2786 = vmatprep.mubr.msk.bf16.mxu0 %vm688_vm1, %v2929_v8  ;;  %2850 = vmatprep.mubr.msk.bf16.mxu1 %vm688_vm1, %v2961_v19  ;;  %v2952_v52 = vld [vmem:[%s3069_s27 + $0xd8] sm:$0xff]   ;;  %v2953_v53 = vld [vmem:[%s3069_s27 + $0xe0] sm:$0xff]   ;;  %v2978_v54 = vld [vmem:[%s3069_s27 + $0x1a8] sm:$0xff]   ;;  %v1561_v8 = vadd.s32 8, %v3199_v5 }
  0x22   : > { %v2979_v55 = vld [vmem:[%s3069_s27 + $0x1b0] sm:$0xff]   ;;  %v2954_v56 = vld [vmem:[%s3069_s27 + $0xe8] sm:$0xff]   ;;  %v2980_v58 = vld [vmem:[%s3069_s27 + $0x1b8] sm:$0xff]  }
  0x23   : > { %v2955_v57 = vld [vmem:[%s3069_s27 + $0xf0] sm:$0xff]   ;;  %v2981_v59 = vld [vmem:[%s3069_s27 + $0x1c0] sm:$0xff]   ;;  %v2956_v60 = vld [vmem:[%s3069_s27 + $0xf8] sm:$0xff]  }
  0x24   : > { %v2982_v61 = vld [vmem:[%s3069_s27 + $0x1c8] sm:$0xff]   ;;  %v2983_v62 = vld [vmem:[%s3069_s27 + $0x1d0] sm:$0xff]   ;;  %v2984_v63 = vld [vmem:[%s3069_s27 + $0x1d8] sm:$0xff]  }
  0x25   : > { %v2985_v0 = vld [vmem:[%s3069_s27 + $0x1e0] sm:$0xff]   ;;  %v2986_v1 = vld [vmem:[%s3069_s27 + $0x1e8] sm:$0xff]   ;;  %v2987_v2 = vld [vmem:[%s3069_s27 + $0x1f0] sm:$0xff]  }
  0x26   : > { %v2988_v3 = vld [vmem:[%s3069_s27 + $0x1f8] sm:$0xff]   ;;  %v3206_v6 = vld [vmem:[%s4370_s2] ss:$0 sm:$0xff] }
  0x28   : > { %2787 = vmatmul.mubr.msk.bf16.gmra.mxu0 %vm688_vm1, %v2930_v9  ;;  %2851 = vmatmul.mubr.msk.bf16.gmra.mxu1 %vm688_vm1, %v2962_v23  ;;  %v3210_v9 = vstv %s2702_s28 }
  0x29   : > { %2790 = vmatprep.mubr.msk.bf16.mxu0 %vm688_vm1, %v2931_v10  ;;  %2854 = vmatprep.mubr.msk.bf16.mxu1 %vm688_vm1, %v2963_v24  ;;  %v1563_v10 = vadd.s32 24, %v3199_v5  ;;  %v1691_v17 = vadd.s32 %v3210_v9, %v1562_v7  ;;  %v1690_v19 = vadd.s32 %v3210_v9, %v1561_v8  ;;  %v1575_v7 = vadd.s32 120, %v3199_v5 }
  0x2b   : > { %vm1819_vm3 = vcmp.lt.s32.totalorder %v1691_v17, 2048  ;;  %vm1818_vm4 = vcmp.lt.s32.totalorder %v1690_v19, 2048 }
  0x30   : > { %2791 = vmatmul.mubr.msk.bf16.gmra.mxu0 %vm688_vm1, %v2932_v11  ;;  %2855 = vmatmul.mubr.msk.bf16.gmra.mxu1 %vm688_vm1, %v2964_v26  ;;  %v1566_v11 = vadd.s32 48, %v3199_v5  ;;  %v1565_v26 = vadd.s32 40, %v3199_v5 }
  0x31   : > { %2794 = vmatprep.mubr.msk.bf16.mxu0 %vm688_vm1, %v2933_v12  ;;  %2858 = vmatprep.mubr.msk.bf16.mxu1 %vm688_vm1, %v2965_v27 }
  0x38   : > { %2795 = vmatmul.mubr.msk.bf16.gmra.mxu0 %vm688_vm1, %v2934_v13  ;;  %2859 = vmatmul.mubr.msk.bf16.gmra.mxu1 %vm688_vm1, %v2966_v30  ;;  %v1689_v13 = vadd.s32 %v3210_v9, %v3199_v5  ;;  %v1568_v30 = vadd.s32 64, %v3199_v5 }
  0x39   : > { %2798 = vmatprep.mubr.msk.bf16.mxu0 %vm688_vm1, %v2935_v14  ;;  %2862 = vmatprep.mubr.msk.bf16.mxu1 %vm688_vm1, %v2967_v31  ;;  %v1564_v14 = vadd.s32 32, %v3199_v5 }
  0x3a   : > { %vm1817_vm2 = vcmp.lt.s32.totalorder %v1689_v13, 2048 }
  0x3b   : > { %v1693_v24 = vadd.s32 %v3210_v9, %v1564_v14 }
  0x3d   : > { %vm1821_vm7 = vcmp.lt.s32.totalorder %v1693_v24, 2048 }
  0x40   : > { %2799 = vmatmul.mubr.msk.bf16.gmra.mxu0 %vm688_vm1, %v2936_v20  ;;  %2863 = vmatmul.mubr.msk.bf16.gmra.mxu1 %vm688_vm1, %v2968_v34  ;;  %v1694_v34 = vadd.s32 %v3210_v9, %v1565_v26 }
  0x41   : > { %2802 = vmatprep.mubr.msk.bf16.mxu0 %vm688_vm1, %v2937_v21  ;;  %2866 = vmatprep.mubr.msk.bf16.mxu1 %vm688_vm1, %v2969_v35  ;;  %v1692_v21 = vadd.s32 %v3210_v9, %v1563_v10  ;;  %v1571_v35 = vadd.s32 88, %v3199_v5 }
  0x42   : > { %vm1822_vm9 = vcmp.lt.s32.totalorder %v1694_v34, 2048 }
  0x43   : > { %vm1820_vm5 = vcmp.lt.s32.totalorder %v1692_v21, 2048  ;;  %v1576_v21 = vadd.s32 128, %v3199_v5 }
  0x48   : > { %2803 = vmatmul.mubr.msk.bf16.gmra.mxu0 %vm688_vm1, %v2938_v22  ;;  %2867 = vmatmul.mubr.msk.bf16.gmra.mxu1 %vm688_vm1, %v2970_v38  ;;  %v3230_v22 = vadd.s32 %v3210_v9, %v1566_v11 }
  0x49   : > { %2806 = vmatprep.mubr.msk.bf16.mxu0 %vm688_vm1, %v2939_v25  ;;  %2870 = vmatprep.mubr.msk.bf16.mxu1 %vm688_vm1, %v2971_v39  ;;  %v3234_v25 = vadd.s32 %v3210_v9, %v1567_v15 }
  0x4a   : > { %vm1823_vm6 = vcmp.lt.s32.totalorder %v3230_v22, 2048 }
  0x4b   : > { %vm1824_vm8 = vcmp.lt.s32.totalorder %v3234_v25, 2048 }
  0x50   : > { %2807 = vmatmul.mubr.msk.bf16.gmra.mxu0 %vm688_vm1, %v2940_v28  ;;  %2871 = vmatmul.mubr.msk.bf16.gmra.mxu1 %vm688_vm1, %v2972_v42  ;;  %v1570_v28 = vadd.s32 80, %v3199_v5 }
  0x51   : > { %2810 = vmatprep.mubr.msk.bf16.mxu0 %vm688_vm1, %v2941_v29  ;;  %2874 = vmatprep.mubr.msk.bf16.mxu1 %vm688_vm1, %v2973_v43 }
  0x52   : > { %v3250_v39 = vadd.s32 %v3210_v9, %v1570_v28 }
  0x54   : > { %vm1827_vm10 = vcmp.lt.s32.totalorder %v3250_v39, 2048 }
  0x58   : > { %2811 = vmatmul.mubr.msk.bf16.gmra.mxu0 %vm688_vm1, %v2942_v32  ;;  %2875 = vmatmul.mubr.msk.bf16.gmra.mxu1 %vm688_vm1, %v2974_v46 }
  0x59   : > { %2814 = vmatprep.mubr.msk.bf16.mxu0 %vm688_vm1, %v2943_v33  ;;  %2878 = vmatprep.mubr.msk.bf16.mxu1 %vm688_vm1, %v2975_v47  ;;  %v1569_v47 = vadd.s32 72, %v3199_v5 }
  0x60   : > { %2815 = vmatmul.mubr.msk.bf16.gmra.mxu0 %vm688_vm1, %v2944_v36  ;;  %2879 = vmatmul.mubr.msk.bf16.gmra.mxu1 %vm688_vm1, %v2976_v50 }
  0x61   : > { %2818 = vmatprep.mubr.msk.bf16.mxu0 %vm688_vm1, %v2945_v37  ;;  %2882 = vmatprep.mubr.msk.bf16.mxu1 %vm688_vm1, %v2977_v51 }
  0x68   : > { %2819 = vmatmul.mubr.msk.bf16.gmra.mxu0 %vm688_vm1, %v2946_v40  ;;  %2883 = vmatmul.mubr.msk.bf16.gmra.mxu1 %vm688_vm1, %v2978_v54 }
  0x69   : > { %2822 = vmatprep.mubr.msk.bf16.mxu0 %vm688_vm1, %v2947_v41  ;;  %2886 = vmatprep.mubr.msk.bf16.mxu1 %vm688_vm1, %v2979_v55 }
  0x70   : > { %2823 = vmatmul.mubr.msk.bf16.gmra.mxu0 %vm688_vm1, %v2948_v44  ;;  %2887 = vmatmul.mubr.msk.bf16.gmra.mxu1 %vm688_vm1, %v2980_v58  ;;  %v1697_v44 = vadd.s32 %v3210_v9, %v1568_v30 }
  0x71   : > { %2826 = vmatprep.mubr.msk.bf16.mxu0 %vm688_vm1, %v2949_v45  ;;  %2890 = vmatprep.mubr.msk.bf16.mxu1 %vm688_vm1, %v2981_v59 }
  0x72   : > { %vm1825_vm11 = vcmp.lt.s32.totalorder %v1697_v44, 2048 }
  0x78   : > { %2827 = vmatmul.mubr.msk.bf16.gmra.mxu0 %vm688_vm1, %v2950_v48  ;;  %2891 = vmatmul.mubr.msk.bf16.gmra.mxu1 %vm688_vm1, %v2982_v61  ;;  %v1574_v48 = vadd.s32 112, %v3199_v5  ;;  %v1573_v61 = vadd.s32 104, %v3199_v5 }
  0x79   : > { %2830 = vmatprep.mubr.msk.bf16.mxu0 %vm688_vm1, %v2951_v49  ;;  %2894 = vmatprep.mubr.msk.bf16.mxu1 %vm688_vm1, %v2983_v62 }
  0x7a   : > { %v3282_v17 = vadd.s32 %v3210_v9, %v1573_v61 }
  0x7c   : > { %vm1830_vm0 = vcmp.lt.s32.totalorder %v3282_v17, 2048 }
  0x80   : > { %2831 = vmatmul.mubr.msk.bf16.gmra.mxu0 %vm688_vm1, %v2952_v52  ;;  %2895 = vmatmul.mubr.msk.bf16.gmra.mxu1 %vm688_vm1, %v2984_v63  ;;  %v1698_v63 = vadd.s32 %v3210_v9, %v1569_v47  ;;  %v1580_v47 = vadd.s32 160, %v3199_v5 }
  0x81   : > { %2834 = vmatprep.mubr.msk.bf16.mxu0 %vm688_vm1, %v2953_v53  ;;  %2898 = vmatprep.mubr.msk.bf16.mxu1 %vm688_vm1, %v2985_v0  ;;  %v3259_v53 = vadd.s32 %v3210_v9, %v1571_v35  ;;  %v3271_v0 = vadd.s32 %v3210_v9, %v1574_v48 }
  0x82   : > { %vm1826_vm13 = vcmp.lt.s32.totalorder %v1698_v63, 2048  ;;  %v3335_v63 = vadd.s32 %v3210_v9, %v1580_v47 }
  0x83   : > { %vm1828_vm12 = vcmp.lt.s32.totalorder %v3259_v53, 2048  ;;  %vm1831_vm15 = vcmp.lt.s32.totalorder %v3271_v0, 2048  ;;  %v1587_v0 = vadd.s32 216, %v3199_v5 }
  0x88   : > { %2835 = vmatmul.mubr.msk.bf16.gmra.mxu0 %vm688_vm1, %v2954_v56  ;;  %2899 = vmatmul.mubr.msk.bf16.gmra.mxu1 %vm688_vm1, %v2986_v1  ;;  %v1572_v56 = vadd.s32 96, %v3199_v5 }
  0x89   : > { %2838 = vmatprep.mubr.msk.bf16.mxu0 %vm688_vm1, %v2955_v57  ;;  %2902 = vmatprep.mubr.msk.bf16.mxu1 %vm688_vm1, %v2987_v2 }
  0x90   : > { %2839 = vmatmul.mubr.msk.bf16.gmra.mxu0 %vm688_vm1, %v2956_v60  ;;  %2903 = vmatmul.mubr.msk.bf16.gmra.mxu1 %vm688_vm1, %v2988_v3 }
  0xd8   : > { %v2780_v12 = vpop.f32.mrf.mxu0 }
  0xd9   : > { %v928_v16 = vadd.f32 %v2780_v12, %v3206_v6  ;;  %v1701_v12 = vadd.s32 %v3210_v9, %v1572_v56 }
  0xda   : > { %v919_v18 = vpop.f32.mrf.mxu0 }
  0xdb   : > { %1432 = vst [vmem:[%s3217_s8 + $0x10] sm:$0xff] %v928_v16  ;;  %v920_v20 = vadd.f32 %v3206_v6, %v919_v18  ;;  %v1947_v36 = vsel %vm1819_vm3, %v928_v16, 0.0  ;;  %vm1829_vm14 = vcmp.lt.s32.totalorder %v1701_v12, 2048  ;;  %v1586_v12 = vadd.s32 208, %v3199_v5 }
  0xdc   : > { %v2781_v23 = vpop.f32.mrf.mxu0  ;;  %v2208_v49 = vmul.f32 %v1947_v36, %v1947_v36 }
  0xdd   : > { %1430 = vst [vmem:[%s3217_s8] sm:$0xff] %v920_v20  ;;  %v931_v27 = vadd.f32 %v2781_v23, %v3206_v6  ;;  %v1945_v31 = vsel %vm1817_vm2, %v920_v20, 0.0  ;;  %v1578_v20 = vadd.s32 144, %v3199_v5 }
  0xde   : > { %v922_v29 = vpop.f32.mrf.mxu0  ;;  %v2206_v40 = vmul.f32 %v1945_v31, %v1945_v31 }
  0xdf   : > { %1433 = vst [vmem:[%s3217_s8 + $0x18] sm:$0xff] %v931_v27  ;;  %v923_v32 = vadd.f32 %v3206_v6, %v922_v29  ;;  %v1948_v45 = vsel %vm1820_vm5, %v931_v27, 0.0  ;;  %v3291_v27 = vadd.s32 %v3210_v9, %v1575_v7  ;;  %v3302_v35 = vadd.s32 %v3210_v9, %v1578_v20 }
  0xe0   : > { %v2784_v33 = vpop.f32.mrf.mxu0  ;;  %v2209_v57 = vmul.f32 %v1948_v45, %v1948_v45  ;;  %v1583_v7 = vadd.s32 184, %v3199_v5 }
  0xe1   : > { %1431 = vst [vmem:[%s3217_s8 + $0x8] sm:$0xff] %v923_v32  ;;  %v1946_v37 = vsel %vm1818_vm4, %v923_v32, 0.0  ;;  %v944_v38 = vadd.f32 %v2784_v33, %v3206_v6  ;;  %v1577_v33 = vadd.s32 136, %v3199_v5  ;;  %vm1832_vm1 = vcmp.lt.s32.totalorder %v3291_v27, 2048 }
  0xe2   : > { %v2073_v41 = vadd.f32 %v1946_v37, %v1945_v31  ;;  %v2207_v42 = vmul.f32 %v1946_v37, %v1946_v37  ;;  %v935_v43 = vpop.f32.mrf.mxu0  ;;  %v1579_v37 = vadd.s32 152, %v3199_v5  ;;  %vm1835_vm3 = vcmp.lt.s32.totalorder %v3302_v35, 2048 }
  0xe3   : > { %1436 = vst [vmem:[%s3217_s8 + $0x30] sm:$0xff] %v944_v38  ;;  %v936_v46 = vadd.f32 %v3206_v6, %v935_v43  ;;  %v1951_v8 = vsel %vm1823_vm6, %v944_v38, 0.0  ;;  %v1582_v43 = vadd.s32 176, %v3199_v5  ;;  %vm1837_vm6 = vcmp.lt.s32.totalorder %v3335_v63, 2048 }
  0xe4   : > { %v2074_v50 = vadd.f32 %v2073_v41, %v1947_v36  ;;  %v2334_v51 = vadd.f32 %v2207_v42, %v2206_v40  ;;  %v2785_v52 = vpop.f32.mrf.mxu0  ;;  %v2212_v22 = vmul.f32 %v1951_v8, %v1951_v8  ;;  %v3305_v36 = vadd.s32 %v3210_v9, %v1576_v21 }
  0xe5   : > { %1434 = vst [vmem:[%s3217_s8 + $0x20] sm:$0xff] %v936_v46  ;;  %v1949_v54 = vsel %vm1821_vm7, %v936_v46, 0.0  ;;  %v947_v55 = vadd.f32 %v2785_v52, %v3206_v6  ;;  %v3317_v52 = vadd.s32 %v3210_v9, %v1577_v33 }
  0xe6   : > { %v2075_v58 = vadd.f32 %v2074_v50, %v1948_v45  ;;  %v2335_v59 = vadd.f32 %v2334_v51, %v2208_v49  ;;  %v938_v60 = vpop.f32.mrf.mxu0  ;;  %v2210_v3 = vmul.f32 %v1949_v54, %v1949_v54  ;;  %vm1833_vm2 = vcmp.lt.s32.totalorder %v3305_v36, 2048 }
  0xe7   : > { %1437 = vst [vmem:[%s3217_s8 + $0x38] sm:$0xff] %v947_v55  ;;  %v939_v62 = vadd.f32 %v3206_v6, %v938_v60  ;;  %v1952_v18 = vsel %vm1824_vm8, %v947_v55, 0.0  ;;  %v1581_v55 = vadd.s32 168, %v3199_v5  ;;  %v3326_v60 = vadd.s32 %v3210_v9, %v1579_v37 }
  0xe8   : > { %v2336_v1 = vadd.f32 %v2335_v59, %v2209_v57  ;;  %v2076_v2 = vadd.f32 %v2075_v58, %v1949_v54  ;;  %v2788_v4 = vpop.f32.mrf.mxu0  ;;  %v2213_v29 = vmul.f32 %v1952_v18, %v1952_v18  ;;  %vm1834_vm4 = vcmp.lt.s32.totalorder %v3317_v52, 2048 }
  0xe9   : > { %1435 = vst [vmem:[%s3217_s8 + $0x28] sm:$0xff] %v939_v62  ;;  %v1950_v10 = vsel %vm1822_vm9, %v939_v62, 0.0  ;;  %v960_v11 = vadd.f32 %v2788_v4, %v3206_v6  ;;  %v3332_v62 = vadd.s32 %v3210_v9, %v1582_v43  ;;  %vm1836_vm5 = vcmp.lt.s32.totalorder %v3326_v60, 2048 }
  0xea   : > { %v2337_v13 = vadd.f32 %v2336_v1, %v2210_v3  ;;  %v2077_v14 = vadd.f32 %v2076_v2, %v1950_v10  ;;  %v2211_v15 = vmul.f32 %v1950_v10, %v1950_v10  ;;  %v951_v16 = vpop.f32.mrf.mxu0 }
  0xeb   : > { %1440 = vst [vmem:[%s3217_s8 + $0x50] sm:$0xff] %v960_v11  ;;  %v952_v19 = vadd.f32 %v3206_v6, %v951_v16  ;;  %v1955_v44 = vsel %vm1827_vm10, %v960_v11, 0.0  ;;  %v3343_v11 = vadd.s32 %v3210_v9, %v1581_v55  ;;  %vm1839_vm7 = vcmp.lt.s32.totalorder %v3332_v62, 2048 }
  0xec   : > { %v2078_v23 = vadd.f32 %v2077_v14, %v1951_v8  ;;  %v2338_v24 = vadd.f32 %v2337_v13, %v2211_v15  ;;  %v2789_v26 = vpop.f32.mrf.mxu0  ;;  %v2216_v56 = vmul.f32 %v1955_v44, %v1955_v44  ;;  %v2844_v8 = vpop.f32.mrf.mxu1 }
  0xed   : > { %1438 = vst [vmem:[%s3217_s8 + $0x40] sm:$0xff] %v952_v19  ;;  %v1953_v28 = vsel %vm1825_vm11, %v952_v19, 0.0  ;;  %v963_v25 = vadd.f32 %v2789_v26, %v3206_v6  ;;  %v1184_v13 = vadd.f32 %v2844_v8, %v3206_v6  ;;  %v1584_v19 = vadd.s32 192, %v3199_v5 }
  0xee   : > { %v2079_v30 = vadd.f32 %v2078_v23, %v1952_v18  ;;  %v2339_v31 = vadd.f32 %v2338_v24, %v2212_v22  ;;  %v954_v32 = vpop.f32.mrf.mxu0  ;;  %v2214_v41 = vmul.f32 %v1953_v28, %v1953_v28  ;;  %v1175_v20 = vpop.f32.mrf.mxu1  ;;  %vm1838_vm8 = vcmp.lt.s32.totalorder %v3343_v11, 2048 }
  0xef   : > { %1441 = vst [vmem:[%s3217_s8 + $0x58] sm:$0xff] %v963_v25  ;;  %v955_v34 = vadd.f32 %v3206_v6, %v954_v32  ;;  %v1956_v54 = vsel %vm1828_vm12, %v963_v25, 0.0  ;;  %1496 = vst [vmem:[%s3217_s8 + $0x210] sm:$0xff] %v1184_v13  ;;  %v1176_v24 = vadd.f32 %v3206_v6, %v1175_v20  ;;  %v1585_v32 = vadd.s32 200, %v3199_v5 }
  0xf0   : > { %v2340_v38 = vadd.f32 %v2339_v31, %v2213_v29  ;;  %v2080_v40 = vadd.f32 %v2079_v30, %v1953_v28  ;;  %v2792_v42 = vpop.f32.mrf.mxu0  ;;  %v2217_v1 = vmul.f32 %v1956_v54, %v1956_v54  ;;  %v2845_v30 = vpop.f32.mrf.mxu1  ;;  %v3381_v36 = vadd.s32 %v3210_v9, %v1584_v19 }
  0xf1   : > { %1439 = vst [vmem:[%s3217_s8 + $0x48] sm:$0xff] %v955_v34  ;;  %v1954_v45 = vsel %vm1826_vm13, %v955_v34, 0.0  ;;  %v976_v46 = vadd.f32 %v2792_v42, %v3206_v6  ;;  %1494 = vst [vmem:[%s3217_s8 + $0x200] sm:$0xff] %v1176_v24  ;;  %v1187_v33 = vadd.f32 %v2845_v30, %v3206_v6  ;;  %v1588_v13 = vadd.s32 224, %v3199_v5 }
  0xf2   : > { %v2341_v48 = vadd.f32 %v2340_v38, %v2214_v41  ;;  %v2081_v49 = vadd.f32 %v2080_v40, %v1954_v45  ;;  %v2215_v50 = vmul.f32 %v1954_v45, %v1954_v45  ;;  %v967_v51 = vpop.f32.mrf.mxu0  ;;  %v3367_v41 = vadd.s32 %v3210_v9, %v1583_v7  ;;  %v1178_v42 = vpop.f32.mrf.mxu1 }
  0xf3   : > { %1444 = vst [vmem:[%s3217_s8 + $0x70] sm:$0xff] %v976_v46  ;;  %v968_v39 = vadd.f32 %v3206_v6, %v967_v51  ;;  %v1959_v21 = vsel %vm1831_vm15, %v976_v46, 0.0  ;;  %1497 = vst [vmem:[%s3217_s8 + $0x218] sm:$0xff] %v1187_v33  ;;  %v1179_v45 = vadd.f32 %v3206_v6, %v1178_v42  ;;  %vm1841_vm10 = vcmp.lt.s32.totalorder %v3381_v36, 2048 }
  0xf4   : > { %v2082_v57 = vadd.f32 %v2081_v49, %v1955_v44  ;;  %v2342_v58 = vadd.f32 %v2341_v48, %v2215_v50  ;;  %v2793_v59 = vpop.f32.mrf.mxu0  ;;  %v2220_v34 = vmul.f32 %v1959_v21, %v1959_v21  ;;  %v3374_v44 = vadd.s32 %v3210_v9, %v1586_v12  ;;  %v2848_v50 = vpop.f32.mrf.mxu1 }
  0xf5   : > { %1442 = vst [vmem:[%s3217_s8 + $0x60] sm:$0xff] %v968_v39  ;;  %v1957_v61 = vsel %vm1829_vm14, %v968_v39, 0.0  ;;  %v979_v53 = vadd.f32 %v2793_v59, %v3206_v6  ;;  %v3389_v39 = vadd.s32 %v3210_v9, %v1585_v32  ;;  %1495 = vst [vmem:[%s3217_s8 + $0x208] sm:$0xff] %v1179_v45  ;;  %v1200_v55 = vadd.f32 %v2848_v50, %v3206_v6 }
  0xf6   : > { %v2083_v2 = vadd.f32 %v2082_v57, %v1956_v54  ;;  %v2343_v3 = vadd.f32 %v2342_v58, %v2216_v56  ;;  %v970_v4 = vpop.f32.mrf.mxu0  ;;  %v2218_v16 = vmul.f32 %v1957_v61, %v1957_v61  ;;  %v3386_v54 = vadd.s32 %v3210_v9, %v1587_v0 }
  0xf7   : > { %1445 = vst [vmem:[%s3217_s8 + $0x78] sm:$0xff] %v979_v53  ;;  %v971_v10 = vadd.f32 %v3206_v6, %v970_v4  ;;  %v1960_v17 = vsel %vm1832_vm1, %v979_v53, 0.0  ;;  %vm1840_vm9 = vcmp.lt.s32.totalorder %v3367_v41, 2048  ;;  %v1191_v53 = vpop.f32.mrf.mxu1  ;;  %1500 = vst [vmem:[%s3217_s8 + $0x230] sm:$0xff] %v1200_v55  ;;  %vm1843_vm11 = vcmp.lt.s32.totalorder %v3374_v44, 2048 }
  0xf8   : > { %v2344_v14 = vadd.f32 %v2343_v3, %v2217_v1  ;;  %v2084_v15 = vadd.f32 %v2083_v2, %v1957_v61  ;;  %v2796_v18 = vpop.f32.mrf.mxu0  ;;  %v2221_v46 = vmul.f32 %v1960_v17, %v1960_v17  ;;  %v1590_v61 = vadd.s32 240, %v3199_v5 }
  0xf9   : > { %1443 = vst [vmem:[%s3217_s8 + $0x68] sm:$0xff] %v971_v10  ;;  %v1958_v22 = vsel %vm1830_vm0, %v971_v10, 0.0  ;;  %v992_v23 = vadd.f32 %v2796_v18, %v3206_v6  ;;  %v1192_v4 = vadd.f32 %v3206_v6, %v1191_v53  ;;  %vm1842_vm12 = vcmp.lt.s32.totalorder %v3389_v39, 2048 }
  0xfa   : > { %v2345_v26 = vadd.f32 %v2344_v14, %v2218_v16  ;;  %v2085_v28 = vadd.f32 %v2084_v15, %v1958_v22  ;;  %v2219_v25 = vmul.f32 %v1958_v22, %v1958_v22  ;;  %v983_v29 = vpop.f32.mrf.mxu0  ;;  %v2849_v14 = vpop.f32.mrf.mxu1  ;;  %v1591_v15 = vadd.s32 248, %v3199_v5 }
  0xfb   : > { %1448 = vst [vmem:[%s3217_s8 + $0x90] sm:$0xff] %v992_v23  ;;  %v984_v31 = vadd.f32 %v3206_v6, %v983_v29  ;;  %v1963_v1 = vsel %vm1835_vm3, %v992_v23, 0.0  ;;  %1498 = vst [vmem:[%s3217_s8 + $0x220] sm:$0xff] %v1192_v4  ;;  %v1203_v16 = vadd.f32 %v2849_v14, %v3206_v6  ;;  %v1589_v22 = vadd.s32 232, %v3199_v5 }
  0xfc   : > { %v2086_v37 = vadd.f32 %v2085_v28, %v1959_v21  ;;  %v2346_v38 = vadd.f32 %v2345_v26, %v2219_v25  ;;  %v2797_v40 = vpop.f32.mrf.mxu0  ;;  %v2224_v18 = vmul.f32 %v1963_v1, %v1963_v1  ;;  %v1194_v23 = vpop.f32.mrf.mxu1  ;;  %v3422_v30 = vadd.s32 %v3210_v9, %v1590_v61 }
  0xfd   : > { %1446 = vst [vmem:[%s3217_s8 + $0x80] sm:$0xff] %v984_v31  ;;  %v1961_v27 = vsel %vm1833_vm2, %v984_v31, 0.0  ;;  %v995_v43 = vadd.f32 %v2797_v40, %v3206_v6  ;;  %1501 = vst [vmem:[%s3217_s8 + $0x238] sm:$0xff] %v1203_v16  ;;  %v1195_v26 = vadd.f32 %v3206_v6, %v1194_v23  ;;  %v3427_v31 = vadd.s32 %v3210_v9, %v1588_v13 }
  0xfe   : > { %v2087_v47 = vadd.f32 %v2086_v37, %v1960_v17  ;;  %v2347_v48 = vadd.f32 %v2346_v38, %v2220_v34  ;;  %v986_v49 = vpop.f32.mrf.mxu0  ;;  %v2222_v58 = vmul.f32 %v1961_v27, %v1961_v27  ;;  %v2852_v63 = vpop.f32.mrf.mxu1  ;;  %v3430_v32 = vadd.s32 %v3210_v9, %v1591_v15 }
  0xff   : > { %1449 = vst [vmem:[%s3217_s8 + $0x98] sm:$0xff] %v995_v43  ;;  %v987_v51 = vadd.f32 %v3206_v6, %v986_v49  ;;  %v1964_v35 = vsel %vm1836_vm5, %v995_v43, 0.0  ;;  %1499 = vst [vmem:[%s3217_s8 + $0x228] sm:$0xff] %v1195_v26  ;;  %v1216_v33 = vadd.f32 %v2852_v63, %v3206_v6  ;;  %vm1844_vm13 = vcmp.lt.s32.totalorder %v3386_v54, 2048 }
 0x100   : > { %v2348_v56 = vadd.f32 %v2347_v48, %v2221_v46  ;;  %v2088_v57 = vadd.f32 %v2087_v47, %v1961_v27  ;;  %v2800_v59 = vpop.f32.mrf.mxu0  ;;  %v2225_v28 = vmul.f32 %v1964_v35, %v1964_v35  ;;  %v3436_v42 = vadd.s32 %v3210_v9, %v1589_v22  ;;  %v1207_v27 = vpop.f32.mrf.mxu1 }
 0x101   : > { %1447 = vst [vmem:[%s3217_s8 + $0x88] sm:$0xff] %v987_v51  ;;  %v1962_v2 = vsel %vm1834_vm4, %v987_v51, 0.0  ;;  %v1008_v3 = vadd.f32 %v2800_v59, %v3206_v6  ;;  %1504 = vst [vmem:[%s3217_s8 + $0x250] sm:$0xff] %v1216_v33  ;;  %v1208_v47 = vadd.f32 %v3206_v6, %v1207_v27  ;;  %v1594_v55 = vadd.s32 272, %v3199_v5 }
 0x102   : > { %v2349_v7 = vadd.f32 %v2348_v56, %v2222_v58  ;;  %v2089_v8 = vadd.f32 %v2088_v57, %v1962_v2  ;;  %v2223_v10 = vmul.f32 %v1962_v2, %v1962_v2  ;;  %v999_v12 = vpop.f32.mrf.mxu0  ;;  %v2853_v56 = vpop.f32.mrf.mxu1  ;;  %v1592_v57 = vadd.s32 256, %v3199_v5 }
 0x103   : > { %1452 = vst [vmem:[%s3217_s8 + $0xb0] sm:$0xff] %v1008_v3  ;;  %v1000_v52 = vadd.f32 %v3206_v6, %v999_v12  ;;  %v1967_v43 = vsel %vm1839_vm7, %v1008_v3, 0.0  ;;  %1502 = vst [vmem:[%s3217_s8 + $0x240] sm:$0xff] %v1208_v47  ;;  %v1219_v58 = vadd.f32 %v2853_v56, %v3206_v6  ;;  %v1595_v2 = vadd.s32 280, %v3199_v5 }
 0x104   : > { %v2090_v19 = vadd.f32 %v2089_v8, %v1963_v1  ;;  %v2350_v20 = vadd.f32 %v2349_v7, %v2223_v10  ;;  %v2801_v21 = vpop.f32.mrf.mxu0  ;;  %v2228_v59 = vmul.f32 %v1967_v43, %v1967_v43  ;;  %v1210_v3 = vpop.f32.mrf.mxu1  ;;  %vm1845_vm14 = vcmp.lt.s32.totalorder %v3427_v31, 2048 }
 0x105   : > { %1450 = vst [vmem:[%s3217_s8 + $0xa0] sm:$0xff] %v1000_v52  ;;  %v1965_v60 = vsel %vm1837_vm6, %v1000_v52, 0.0  ;;  %v1011_v24 = vadd.f32 %v2801_v21, %v3206_v6  ;;  %1505 = vst [vmem:[%s3217_s8 + $0x258] sm:$0xff] %v1219_v58  ;;  %v1211_v7 = vadd.f32 %v3206_v6, %v1210_v3  ;;  %vm1847_vm15 = vcmp.lt.s32.totalorder %v3422_v30, 2048 }
 0x106   : > { %v2091_v25 = vadd.f32 %v2090_v19, %v1964_v35  ;;  %v2351_v29 = vadd.f32 %v2350_v20, %v2224_v18  ;;  %v1002_v0 = vpop.f32.mrf.mxu0  ;;  %v2226_v38 = vmul.f32 %v1965_v60, %v1965_v60  ;;  %vm1846_vm0 = vcmp.lt.s32.totalorder %v3436_v42, 2048  ;;  %v2856_v36 = vpop.f32.mrf.mxu1 }
 0x107   : > { %1453 = vst [vmem:[%s3217_s8 + $0xb8] sm:$0xff] %v1011_v24  ;;  %v1003_v17 = vadd.f32 %v3206_v6, %v1002_v0  ;;  %v1968_v62 = vsel %vm1840_vm9, %v1011_v24, 0.0  ;;  %v1593_v14 = vadd.s32 264, %v3199_v5  ;;  %v3468_v52 = vadd.s32 %v3210_v9, %v1594_v55  ;;  %1503 = vst [vmem:[%s3217_s8 + $0x248] sm:$0xff] %v1211_v7 }
 0x108   : > { %v2352_v34 = vadd.f32 %v2351_v29, %v2225_v28  ;;  %v2092_v37 = vadd.f32 %v2091_v25, %v1965_v60  ;;  %v2804_v40 = vpop.f32.mrf.mxu0  ;;  %v2229_v8 = vmul.f32 %v1968_v62, %v1968_v62  ;;  %v3471_v15 = vadd.s32 %v3210_v9, %v1592_v57  ;;  %v1223_v23 = vpop.f32.mrf.mxu1 }
 0x109   : > { %1451 = vst [vmem:[%s3217_s8 + $0xa8] sm:$0xff] %v1003_v17  ;;  %v1966_v45 = vsel %vm1838_vm8, %v1003_v17, 0.0  ;;  %v1024_v46 = vadd.f32 %v2804_v40, %v3206_v6  ;;  %v1232_v16 = vadd.f32 %v2856_v36, %v3206_v6  ;;  %vm1848_vm1 = vcmp.lt.s32.totalorder %v3430_v32, 2048 }
 0x10a   : > { %v2353_v48 = vadd.f32 %v2352_v34, %v2226_v38  ;;  %v2093_v49 = vadd.f32 %v2092_v37, %v1966_v45  ;;  %v2227_v50 = vmul.f32 %v1966_v45, %v1966_v45  ;;  %v1015_v51 = vpop.f32.mrf.mxu0  ;;  %v3477_v22 = vadd.s32 %v3210_v9, %v1595_v2  ;;  %v2857_v44 = vpop.f32.mrf.mxu1 }
 0x10b   : > { %1456 = vst [vmem:[%s3217_s8 + $0xd0] sm:$0xff] %v1024_v46  ;;  %v1016_v11 = vadd.f32 %v3206_v6, %v1015_v51  ;;  %v1971_v60 = vsel %vm1843_vm11, %v1024_v46, 0.0  ;;  %1508 = vst [vmem:[%s3217_s8 + $0x270] sm:$0xff] %v1232_v16  ;;  %v1224_v28 = vadd.f32 %v3206_v6, %v1223_v23  ;;  %v3488_v17 = vadd.s32 %v3210_v9, %v1593_v14 }
 0x10c   : > { %v2094_v61 = vadd.f32 %v2093_v49, %v1967_v43  ;;  %v2354_v53 = vadd.f32 %v2353_v48, %v2227_v50  ;;  %v2805_v1 = vpop.f32.mrf.mxu0  ;;  %v1598_v34 = vadd.s32 304, %v3199_v5  ;;  %v1235_v37 = vadd.f32 %v2857_v44, %v3206_v6  ;;  %v1226_v46 = vpop.f32.mrf.mxu1 }
 0x10d   : > { %1454 = vst [vmem:[%s3217_s8 + $0xc0] sm:$0xff] %v1016_v11  ;;  %v1969_v41 = vsel %vm1841_vm10, %v1016_v11, 0.0  ;;  %v1027_v4 = vadd.f32 %v2805_v1, %v3206_v6  ;;  %1506 = vst [vmem:[%s3217_s8 + $0x260] sm:$0xff] %v1224_v28  ;;  %v2232_v38 = vmul.f32 %v1971_v60, %v1971_v60  ;;  %v1596_v45 = vadd.s32 288, %v3199_v5 }
 0x10e   : > { %v2095_v10 = vadd.f32 %v2094_v61, %v1968_v62  ;;  %v2355_v12 = vadd.f32 %v2354_v53, %v2228_v59  ;;  %v1018_v13 = vpop.f32.mrf.mxu0  ;;  %v2230_v20 = vmul.f32 %v1969_v41, %v1969_v41  ;;  %vm1849_vm2 = vcmp.lt.s32.totalorder %v3471_v15, 2048  ;;  %1509 = vst [vmem:[%s3217_s8 + $0x278] sm:$0xff] %v1235_v37  ;;  %v2860_v56 = vpop.f32.mrf.mxu1 }
 0x10f   : > { %1457 = vst [vmem:[%s3217_s8 + $0xd8] sm:$0xff] %v1027_v4  ;;  %v1019_v35 = vadd.f32 %v3206_v6, %v1018_v13  ;;  %v1972_v33 = vsel %vm1844_vm13, %v1027_v4, 0.0  ;;  %v1227_v48 = vadd.f32 %v3206_v6, %v1226_v46  ;;  %vm1851_vm3 = vcmp.lt.s32.totalorder %v3468_v52, 2048 }
 0x110   : > { %v2356_v18 = vadd.f32 %v2355_v12, %v2229_v8  ;;  %v2096_v19 = vadd.f32 %v2095_v10, %v1969_v41  ;;  %v2808_v21 = vpop.f32.mrf.mxu0  ;;  %v2233_v49 = vmul.f32 %v1972_v33, %v1972_v33  ;;  %vm1850_vm4 = vcmp.lt.s32.totalorder %v3488_v17, 2048  ;;  %v1239_v2 = vpop.f32.mrf.mxu1 }
 0x111   : > { %1455 = vst [vmem:[%s3217_s8 + $0xc8] sm:$0xff] %v1019_v35  ;;  %v1970_v24 = vsel %vm1842_vm12, %v1019_v35, 0.0  ;;  %v1040_v26 = vadd.f32 %v2808_v21, %v3206_v6  ;;  %v3510_v62 = vadd.s32 %v3210_v9, %v1598_v34  ;;  %v1599_v11 = vadd.s32 312, %v3199_v5  ;;  %1507 = vst [vmem:[%s3217_s8 + $0x268] sm:$0xff] %v1227_v48 }
 0x112   : > { %v2357_v25 = vadd.f32 %v2356_v18, %v2230_v20  ;;  %v2097_v29 = vadd.f32 %v2096_v19, %v1970_v24  ;;  %v2231_v0 = vmul.f32 %v1970_v24, %v1970_v24  ;;  %v1031_v63 = vpop.f32.mrf.mxu0  ;;  %v1248_v57 = vadd.f32 %v2860_v56, %v3206_v6  ;;  %v2861_v36 = vpop.f32.mrf.mxu1 }
 0x113   : > { %1460 = vst [vmem:[%s3217_s8 + $0xf0] sm:$0xff] %v1040_v26  ;;  %v1032_v39 = vadd.f32 %v3206_v6, %v1031_v63  ;;  %vm1852_vm5 = vcmp.lt.s32.totalorder %v3477_v22, 2048  ;;  %v3517_v1 = vadd.s32 %v3210_v9, %v1596_v45  ;;  %v1975_v3 = vsel %vm1847_vm15, %v1040_v26, 0.0 }
 0x114   : > { %v2098_v40 = vadd.f32 %v2097_v29, %v1971_v60  ;;  %v2358_v27 = vadd.f32 %v2357_v25, %v2231_v0  ;;  %v2809_v43 = vpop.f32.mrf.mxu0  ;;  %v1597_v7 = vadd.s32 296, %v3199_v5  ;;  %1512 = vst [vmem:[%s3217_s8 + $0x290] sm:$0xff] %v1248_v57  ;;  %v1240_v14 = vadd.f32 %v3206_v6, %v1239_v2  ;;  %v1242_v60 = vpop.f32.mrf.mxu1 }
 0x115   : > { %1458 = vst [vmem:[%s3217_s8 + $0xe0] sm:$0xff] %v1032_v39  ;;  %v1973_v54 = vsel %vm1845_vm14, %v1032_v39, 0.0  ;;  %v1043_v47 = vadd.f32 %v2809_v43, %v3206_v6  ;;  %v3533_v35 = vadd.s32 %v3210_v9, %v1599_v11  ;;  %v1602_v16 = vadd.s32 336, %v3199_v5 }
 0x116   : > { %v2099_v50 = vadd.f32 %v2098_v40, %v1972_v33  ;;  %v2359_v51 = vadd.f32 %v2358_v27, %v2232_v38  ;;  %v1034_v55 = vpop.f32.mrf.mxu0  ;;  %v2234_v61 = vmul.f32 %v1973_v54, %v1973_v54  ;;  %v2236_v18 = vmul.f32 %v1975_v3, %v1975_v3  ;;  %1510 = vst [vmem:[%s3217_s8 + $0x280] sm:$0xff] %v1240_v14  ;;  %v2864_v44 = vpop.f32.mrf.mxu1 }
 0x117   : > { %1461 = vst [vmem:[%s3217_s8 + $0xf8] sm:$0xff] %v1043_v47  ;;  %v1035_v31 = vadd.f32 %v3206_v6, %v1034_v55  ;;  %v1976_v30 = vsel %vm1848_vm1, %v1043_v47, 0.0  ;;  %v1600_v23 = vadd.s32 320, %v3199_v5  ;;  %vm1853_vm6 = vcmp.lt.s32.totalorder %v3517_v1, 2048 }
 0x118   : > { %v2360_v58 = vadd.f32 %v2359_v51, %v2233_v49  ;;  %v2100_v59 = vadd.f32 %v2099_v50, %v1973_v54  ;;  %v2812_v53 = vpop.f32.mrf.mxu0  ;;  %v3544_v26 = vadd.s32 %v3210_v9, %v1597_v7  ;;  %v2237_v28 = vmul.f32 %v1976_v30, %v1976_v30  ;;  %v1255_v45 = vpop.f32.mrf.mxu1 }
 0x119   : > { %1459 = vst [vmem:[%s3217_s8 + $0xe8] sm:$0xff] %v1035_v31  ;;  %v1974_v41 = vsel %vm1846_vm0, %v1035_v31, 0.0  ;;  %v1056_v4 = vadd.f32 %v2812_v53, %v3206_v6  ;;  %vm1855_vm7 = vcmp.lt.s32.totalorder %v3510_v62, 2048  ;;  %v1251_v63 = vadd.f32 %v2861_v36, %v3206_v6 }
 0x11a   : > { %v2361_v8 = vadd.f32 %v2360_v58, %v2234_v61  ;;  %v2101_v10 = vadd.f32 %v2100_v59, %v1974_v41  ;;  %v2235_v12 = vmul.f32 %v1974_v41, %v1974_v41  ;;  %v1047_v13 = vpop.f32.mrf.mxu0  ;;  %v3551_v33 = vadd.s32 %v3210_v9, %v1602_v16  ;;  %v3570_v31 = vpop.f32.mrf.mxu1 }
 0x11b   : > { %1464 = vst [vmem:[%s3217_s8 + $0x110] sm:$0xff] %v1056_v4  ;;  %v1048_v42 = vadd.f32 %v3206_v6, %v1047_v13  ;;  %v1603_v39 = vadd.s32 344, %v3199_v5  ;;  %v1601_v34 = vadd.s32 328, %v3199_v5  ;;  %vm1856_vm8 = vcmp.lt.s32.totalorder %v3533_v35, 2048  ;;  %1513 = vst [vmem:[%s3217_s8 + $0x298] sm:$0xff] %v1251_v63 }
 0x11c   : > { %v2102_v19 = vadd.f32 %v2101_v10, %v1975_v3  ;;  %v2362_v20 = vadd.f32 %v2361_v8, %v2235_v12  ;;  %v2813_v21 = vpop.f32.mrf.mxu0  ;;  %v3557_v43 = vadd.s32 %v3210_v9, %v1600_v23  ;;  %v1979_v46 = vsel %vm1851_vm3, %v1056_v4, 0.0  ;;  %v3585_v22 = vpop.f32.mrf.mxu1 }
 0x11d   : > { %1462 = vst [vmem:[%s3217_s8 + $0x100] sm:$0xff] %v1048_v42  ;;  %v1977_v32 = vsel %vm1849_vm2, %v1048_v42, 0.0  ;;  %v1059_v24 = vadd.f32 %v2813_v21, %v3206_v6  ;;  %v1604_v48 = vadd.s32 352, %v3199_v5  ;;  %v3568_v56 = vadd.f32 %v3206_v6, %v1242_v60 }
 0x11e   : > { %v2103_v25 = vadd.f32 %v2102_v19, %v1976_v30  ;;  %v2363_v29 = vadd.f32 %v2362_v20, %v2236_v18  ;;  %v1050_v0 = vpop.f32.mrf.mxu0  ;;  %v2238_v40 = vmul.f32 %v1977_v32, %v1977_v32  ;;  %v3577_v11 = vadd.s32 %v3210_v9, %v1603_v39  ;;  %v3598_v14 = vpop.f32.mrf.mxu1 }
 0x11f   : > { %1465 = vst [vmem:[%s3217_s8 + $0x118] sm:$0xff] %v1059_v24  ;;  %v1051_v15 = vadd.f32 %v3206_v6, %v1050_v0  ;;  %v1980_v52 = vsel %vm1852_vm5, %v1059_v24, 0.0  ;;  %v3580_v57 = vadd.s32 %v3210_v9, %v1601_v34  ;;  %v2240_v58 = vmul.f32 %v1979_v46, %v1979_v46  ;;  %1511 = vst [vmem:[%s3217_s8 + $0x288] sm:$0xff] %v3568_v56 }
 0x120   : > { %v2364_v37 = vadd.f32 %v2363_v29, %v2237_v28  ;;  %v2104_v38 = vadd.f32 %v2103_v25, %v1977_v32  ;;  %v2816_v27 = vpop.f32.mrf.mxu0  ;;  %v1606_v2 = vadd.s32 368, %v3199_v5  ;;  %vm1854_vm9 = vcmp.lt.s32.totalorder %v3544_v26, 2048  ;;  %v3611_v19 = vpop.f32.mrf.mxu1 }
 0x121   : > { %1463 = vst [vmem:[%s3217_s8 + $0x108] sm:$0xff] %v1051_v15  ;;  %v1978_v54 = vsel %vm1850_vm4, %v1051_v15, 0.0  ;;  %v1072_v47 = vadd.f32 %v2816_v27, %v3206_v6  ;;  %v3593_v4 = vadd.s32 %v3210_v9, %v1604_v48  ;;  %v2241_v7 = vmul.f32 %v1980_v52, %v1980_v52 }
 0x122   : > { %v2365_v49 = vadd.f32 %v2364_v37, %v2238_v40  ;;  %v2105_v50 = vadd.f32 %v2104_v38, %v1978_v54  ;;  %v2239_v51 = vmul.f32 %v1978_v54, %v1978_v54  ;;  %v1063_v55 = vpop.f32.mrf.mxu0  ;;  %v3596_v13 = vadd.f32 %v2864_v44, %v3206_v6  ;;  %v3624_v62 = vpop.f32.mrf.mxu1 }
 0x123   : > { %1468 = vst [vmem:[%s3217_s8 + $0x130] sm:$0xff] %v1072_v47  ;;  %v1064_v17 = vadd.f32 %v3206_v6, %v1063_v55  ;;  %vm1859_vm10 = vcmp.lt.s32.totalorder %v3551_v33, 2048  ;;  %vm1857_vm11 = vcmp.lt.s32.totalorder %v3557_v43, 2048  ;;  %vm1858_vm12 = vcmp.lt.s32.totalorder %v3580_v57, 2048 }
 0x124   : > { %v2106_v59 = vadd.f32 %v2105_v50, %v1979_v46  ;;  %v2366_v61 = vadd.f32 %v2365_v49, %v2239_v51  ;;  %v2817_v53 = vpop.f32.mrf.mxu0  ;;  %vm1860_vm13 = vcmp.lt.s32.totalorder %v3577_v11, 2048  ;;  %v3607_v18 = vadd.s32 %v3210_v9, %v1606_v2  ;;  %1516 = vst [vmem:[%s3217_s8 + $0x2b0] sm:$0xff] %v3596_v13  ;;  %v3635_v40 = vpop.f32.mrf.mxu1 }
 0x125   : > { %1466 = vst [vmem:[%s3217_s8 + $0x120] sm:$0xff] %v1064_v17  ;;  %v1981_v3 = vsel %vm1853_vm6, %v1064_v17, 0.0  ;;  %v1075_v41 = vadd.f32 %v2817_v53, %v3206_v6  ;;  %v1983_v20 = vsel %vm1855_vm7, %v1072_v47, 0.0  ;;  %v1607_v60 = vadd.s32 376, %v3199_v5 }
 0x126   : > { %v2107_v8 = vadd.f32 %v2106_v59, %v1980_v52  ;;  %v2367_v10 = vadd.f32 %v2366_v61, %v2240_v58  ;;  %v1066_v12 = vpop.f32.mrf.mxu0  ;;  %v2242_v42 = vmul.f32 %v1981_v3, %v1981_v3  ;;  %vm1861_vm14 = vcmp.lt.s32.totalorder %v3593_v4, 2048  ;;  %v3650_v43 = vpop.f32.mrf.mxu1 }
 0x127   : > { %1469 = vst [vmem:[%s3217_s8 + $0x138] sm:$0xff] %v1075_v41  ;;  %v1067_v1 = vadd.f32 %v3206_v6, %v1066_v12  ;;  %v3622_v29 = vadd.f32 %v3206_v6, %v1255_v45  ;;  %v1984_v26 = vsel %vm1856_vm8, %v1075_v41, 0.0  ;;  %v1605_v63 = vadd.s32 360, %v3199_v5  ;;  %v3674_v41 = vld [vmem:[%s4370_s2] ss:$0 sm:$0xff] }
 0x128   : > { %v2368_v36 = vadd.f32 %v2367_v10, %v2241_v7  ;;  %v2108_v30 = vadd.f32 %v2107_v8, %v1981_v3  ;;  %v2820_v16 = vpop.f32.mrf.mxu0  ;;  %v1610_v44 = vadd.s32 400, %v3199_v5  ;;  %v2244_v15 = vmul.f32 %v1983_v20, %v1983_v20 }
 0x129   : > { %1467 = vst [vmem:[%s3217_s8 + $0x128] sm:$0xff] %v1067_v1  ;;  %v1982_v21 = vsel %vm1854_vm9, %v1067_v1, 0.0  ;;  %v1088_v23 = vadd.f32 %v2820_v16, %v3206_v6  ;;  %v1608_v38 = vadd.s32 384, %v3199_v5  ;;  %1514 = vst [vmem:[%s3217_s8 + $0x2a0] sm:$0xff] %v3622_v29  ;;  %v3642_v45 = vadd.s32 %v3210_v9, %v1607_v60 }
 0x12a   : > { %v2369_v32 = vadd.f32 %v2368_v36, %v2242_v42  ;;  %v2109_v24 = vadd.f32 %v2108_v30, %v1982_v21  ;;  %v2243_v28 = vmul.f32 %v1982_v21, %v1982_v21  ;;  %v1079_v25 = vpop.f32.mrf.mxu0  ;;  %v1611_v46 = vadd.s32 408, %v3199_v5 }
 0x12b   : > { %1472 = vst [vmem:[%s3217_s8 + $0x150] sm:$0xff] %v1088_v23  ;;  %v1080_v0 = vadd.f32 %v3206_v6, %v1079_v25  ;;  %v2245_v54 = vmul.f32 %v1984_v26, %v1984_v26  ;;  %vm1863_vm15 = vcmp.lt.s32.totalorder %v3607_v18, 2048  ;;  %v3648_v50 = vadd.f32 %v3570_v31, %v3206_v6  ;;  %v3664_v31 = vpop.f32.mrf.mxu1 }
 0x12c   : > { %v2110_v39 = vadd.f32 %v2109_v24, %v1983_v20  ;;  %v2370_v34 = vadd.f32 %v2369_v32, %v2243_v28  ;;  %v2821_v37 = vpop.f32.mrf.mxu0  ;;  %v1734_v55 = vadd.s32 %v3210_v9, %v1605_v63  ;;  %v3656_v52 = vadd.s32 %v3210_v9, %v1610_v44 }
 0x12d   : > { %1470 = vst [vmem:[%s3217_s8 + $0x140] sm:$0xff] %v1080_v0  ;;  %v1985_v35 = vsel %vm1857_vm11, %v1080_v0, 0.0  ;;  %v1091_v27 = vadd.f32 %v2821_v37, %v3206_v6  ;;  %v1609_v17 = vadd.s32 392, %v3199_v5  ;;  %v3660_v2 = vadd.s32 %v3210_v9, %v1608_v38  ;;  %1517 = vst [vmem:[%s3217_s8 + $0x2b8] sm:$0xff] %v3648_v50  ;;  %v3684_v36 = vpop.f32.mrf.mxu1 }
 0x12e   : > { %v2111_v47 = vadd.f32 %v2110_v39, %v1984_v26  ;;  %v2371_v48 = vadd.f32 %v2370_v34, %v2244_v15  ;;  %v1082_v49 = vpop.f32.mrf.mxu0  ;;  %v2246_v61 = vmul.f32 %v1985_v35, %v1985_v35  ;;  %v3678_v8 = vadd.s32 %v3210_v9, %v1611_v46 }
 0x12f   : > { %1473 = vst [vmem:[%s3217_s8 + $0x158] sm:$0xff] %v1091_v27  ;;  %v1083_v51 = vadd.f32 %v3206_v6, %v1082_v49  ;;  %v1987_v6 = vsel %vm1859_vm10, %v1088_v23, 0.0  ;;  %v3682_v57 = vadd.f32 %v3674_v41, %v3585_v22  ;;  %v1988_v30 = vsel %vm1860_vm13, %v1091_v27, 0.0  ;;  %v3697_v24 = vpop.f32.mrf.mxu1 }
 0x130   : > { %v2372_v58 = vadd.f32 %v2371_v48, %v2245_v54  ;;  %v2112_v59 = vadd.f32 %v2111_v47, %v1985_v35  ;;  %v2824_v53 = vpop.f32.mrf.mxu0  ;;  %v3691_v16 = vadd.s32 %v3210_v9, %v1609_v17  ;;  %v1614_v20 = vadd.s32 432, %v3199_v5 }
 0x131   : > { %1471 = vst [vmem:[%s3217_s8 + $0x148] sm:$0xff] %v1083_v51  ;;  %v1986_v3 = vsel %vm1858_vm12, %v1083_v51, 0.0  ;;  %v1104_v7 = vadd.f32 %v3674_v41, %v2824_v53  ;;  %v2248_v21 = vmul.f32 %v1987_v6, %v1987_v6  ;;  %v1612_v22 = vadd.s32 416, %v3199_v5  ;;  %1515 = vst [vmem:[%s3217_s8 + $0x2a8] sm:$0xff] %v3682_v57  ;;  %v3709_v15 = vpop.f32.mrf.mxu1 }
 0x132   : > { %v2373_v10 = vadd.f32 %v2372_v58, %v2246_v61  ;;  %v2113_v12 = vadd.f32 %v2112_v59, %v1986_v3  ;;  %v2247_v1 = vmul.f32 %v1986_v3, %v1986_v3  ;;  %v1095_v33 = vpop.f32.mrf.mxu0  ;;  %vm1864_vm0 = vcmp.lt.s32.totalorder %v3642_v45, 2048 }
 0x133   : > { %1476 = vst [vmem:[%s3217_s8 + $0x170] sm:$0xff] %v1104_v7  ;;  %v1096_v42 = vadd.f32 %v3674_v41, %v1095_v33  ;;  %vm1862_vm1 = vcmp.lt.s32.totalorder %v1734_v55, 2048  ;;  %v2249_v25 = vmul.f32 %v1988_v30, %v1988_v30  ;;  %vm1867_vm2 = vcmp.lt.s32.totalorder %v3656_v52, 2048  ;;  %v3724_v27 = vpop.f32.mrf.mxu1 }
 0x134   : > { %v2114_v23 = vadd.f32 %v2113_v12, %v1987_v6  ;;  %v2374_v60 = vadd.f32 %v2373_v10, %v2247_v1  ;;  %v2825_v32 = vpop.f32.mrf.mxu0  ;;  %v3707_v44 = vadd.f32 %v3674_v41, %v3598_v14  ;;  %vm1865_vm3 = vcmp.lt.s32.totalorder %v3660_v2, 2048 }
 0x135   : > { %1474 = vst [vmem:[%s3217_s8 + $0x160] sm:$0xff] %v1096_v42  ;;  %v1989_v11 = vsel %vm1861_vm14, %v1096_v42, 0.0  ;;  %v1107_v28 = vadd.f32 %v3674_v41, %v2825_v32  ;;  %vm1866_vm4 = vcmp.lt.s32.totalorder %v3691_v16, 2048  ;;  %v3716_v39 = vadd.s32 %v3210_v9, %v1614_v20  ;;  %v3736_v61 = vpop.f32.mrf.mxu1 }
 0x136   : > { %v2115_v26 = vadd.f32 %v2114_v23, %v1988_v30  ;;  %v2375_v0 = vadd.f32 %v2374_v60, %v2248_v21  ;;  %v1098_v63 = vpop.f32.mrf.mxu0  ;;  %v2250_v38 = vmul.f32 %v1989_v11, %v1989_v11  ;;  %vm1868_vm5 = vcmp.lt.s32.totalorder %v3678_v8, 2048  ;;  %1520 = vst [vmem:[%s3217_s8 + $0x2d0] sm:$0xff] %v3707_v44 }
 0x137   : > { %1477 = vst [vmem:[%s3217_s8 + $0x178] sm:$0xff] %v1107_v28  ;;  %v1099_v4 = vadd.f32 %v3674_v41, %v1098_v63  ;;  %v3720_v14 = vadd.s32 %v3210_v9, %v1612_v22  ;;  %v1991_v46 = vsel %vm1863_vm15, %v1104_v7, 0.0  ;;  %v1615_v48 = vadd.s32 440, %v3199_v5  ;;  %v3747_v1 = vpop.f32.mrf.mxu1 }
 0x138   : > { %v2376_v34 = vadd.f32 %v2375_v0, %v2249_v25  ;;  %v2116_v37 = vadd.f32 %v2115_v26, %v1989_v11  ;;  %v2828_v35 = vpop.f32.mrf.mxu0  ;;  %v3734_v59 = vadd.f32 %v3674_v41, %v3611_v19  ;;  %v1992_v18 = vsel %vm1864_vm0, %v1107_v28, 0.0 }
 0x139   : > { %1475 = vst [vmem:[%s3217_s8 + $0x168] sm:$0xff] %v1099_v4  ;;  %v1990_v54 = vsel %vm1862_vm1, %v1099_v4, 0.0  ;;  %v1120_v47 = vadd.f32 %v3674_v41, %v2828_v35  ;;  %v1613_v53 = vadd.s32 424, %v3199_v5  ;;  %v1618_v6 = vadd.s32 464, %v3199_v5  ;;  %v3760_v2 = vpop.f32.mrf.mxu1 }
 0x13a   : > { %v2377_v49 = vadd.f32 %v2376_v34, %v2250_v38  ;;  %v2117_v51 = vadd.f32 %v2116_v37, %v1990_v54  ;;  %v2251_v17 = vmul.f32 %v1990_v54, %v1990_v54  ;;  %v1111_v58 = vpop.f32.mrf.mxu0  ;;  %v2252_v3 = vmul.f32 %v1991_v46, %v1991_v46  ;;  %1518 = vst [vmem:[%s3217_s8 + $0x2c0] sm:$0xff] %v3734_v59 }
 0x13b   : > { %1480 = vst [vmem:[%s3217_s8 + $0x190] sm:$0xff] %v1120_v47  ;;  %v1112_v55 = vadd.f32 %v3674_v41, %v1111_v58  ;;  %v1616_v19 = vadd.s32 448, %v3199_v5  ;;  %vm1869_vm6 = vcmp.lt.s32.totalorder %v3720_v14, 2048  ;;  %v1619_v30 = vadd.s32 472, %v3199_v5  ;;  %v3776_v4 = vpop.f32.mrf.mxu1 }
 0x13c   : > { %v2118_v7 = vadd.f32 %v2117_v51, %v1991_v46  ;;  %v2378_v10 = vadd.f32 %v2377_v49, %v2251_v17  ;;  %v2829_v12 = vpop.f32.mrf.mxu0  ;;  %v2253_v42 = vmul.f32 %v1992_v18, %v1992_v18  ;;  %vm1871_vm7 = vcmp.lt.s32.totalorder %v3716_v39, 2048 }
 0x13d   : > { %1478 = vst [vmem:[%s3217_s8 + $0x180] sm:$0xff] %v1112_v55  ;;  %v1993_v45 = vsel %vm1865_vm3, %v1112_v55, 0.0  ;;  %v1123_v33 = vadd.f32 %v3674_v41, %v2829_v12  ;;  %v3758_v60 = vadd.f32 %v3674_v41, %v3624_v62  ;;  %v3765_v22 = vadd.s32 %v3210_v9, %v1615_v48  ;;  %v3791_v52 = vpop.f32.mrf.mxu1 }
 0x13e   : > { %v2119_v20 = vadd.f32 %v2118_v7, %v1992_v18  ;;  %v2379_v21 = vadd.f32 %v2378_v10, %v2252_v3  ;;  %v1114_v23 = vpop.f32.mrf.mxu0  ;;  %v1742_v11 = vadd.s32 %v3210_v9, %v1613_v53  ;;  %v3769_v28 = vadd.s32 %v3210_v9, %v1618_v6 }
 0x13f   : > { %1481 = vst [vmem:[%s3217_s8 + $0x198] sm:$0xff] %v1123_v33  ;;  %v1115_v32 = vadd.f32 %v3674_v41, %v1114_v23  ;;  %v2254_v0 = vmul.f32 %v1993_v45, %v1993_v45  ;;  %v3772_v62 = vadd.s32 %v3210_v9, %v1616_v19  ;;  %1521 = vst [vmem:[%s3217_s8 + $0x2d8] sm:$0xff] %v3758_v60  ;;  %v1995_v34 = vsel %vm1867_vm2, %v1120_v47, 0.0  ;;  %v3802_v3 = vpop.f32.mrf.mxu1 }
 0x140   : > { %v2380_v25 = vadd.f32 %v2379_v21, %v2253_v42  ;;  %v2120_v26 = vadd.f32 %v2119_v20, %v1993_v45  ;;  %v2832_v63 = vpop.f32.mrf.mxu0  ;;  %v3785_v35 = vadd.s32 %v3210_v9, %v1619_v30  ;;  %v3789_v51 = vadd.f32 %v3674_v41, %v3635_v40 }
 0x141   : > { %1479 = vst [vmem:[%s3217_s8 + $0x188] sm:$0xff] %v1115_v32  ;;  %v1994_v37 = vsel %vm1866_vm4, %v1115_v32, 0.0  ;;  %v1136_v38 = vadd.f32 %v3674_v41, %v2832_v63  ;;  %v1996_v16 = vsel %vm1868_vm5, %v1123_v33, 0.0  ;;  %v1617_v17 = vadd.s32 456, %v3199_v5  ;;  %v3814_v30 = vpop.f32.mrf.mxu1 }
 0x142   : > { %v2381_v46 = vadd.f32 %v2380_v25, %v2254_v0  ;;  %v2121_v54 = vadd.f32 %v2120_v26, %v1994_v37  ;;  %v2255_v48 = vmul.f32 %v1994_v37, %v1994_v37  ;;  %v1127_v49 = vpop.f32.mrf.mxu0  ;;  %v1622_v58 = vadd.s32 496, %v3199_v5  ;;  %1519 = vst [vmem:[%s3217_s8 + $0x2c8] sm:$0xff] %v3789_v51 }
 0x143   : > { %1484 = vst [vmem:[%s3217_s8 + $0x1b0] sm:$0xff] %v1136_v38  ;;  %v1128_v47 = vadd.f32 %v3674_v41, %v1127_v49  ;;  %v2256_v18 = vmul.f32 %v1995_v34, %v1995_v34  ;;  %v1620_v40 = vadd.s32 480, %v3199_v5  ;;  %vm1872_vm8 = vcmp.lt.s32.totalorder %v3765_v22, 2048  ;;  %v3829_v26 = vpop.f32.mrf.mxu1 }
 0x144   : > { %v2122_v55 = vadd.f32 %v2121_v54, %v1995_v34  ;;  %v2382_v53 = vadd.f32 %v2381_v46, %v2255_v48  ;;  %v2833_v6 = vpop.f32.mrf.mxu0  ;;  %vm1870_vm9 = vcmp.lt.s32.totalorder %v1742_v11, 2048  ;;  %v2257_v10 = vmul.f32 %v1996_v16, %v1996_v16 }
 0x145   : > { %1482 = vst [vmem:[%s3217_s8 + $0x1a0] sm:$0xff] %v1128_v47  ;;  %v1997_v8 = vsel %vm1869_vm6, %v1128_v47, 0.0  ;;  %v1139_v7 = vadd.f32 %v3674_v41, %v2833_v6  ;;  %vm1875_vm10 = vcmp.lt.s32.totalorder %v3769_v28, 2048  ;;  %v3812_v33 = vadd.f32 %v3674_v41, %v3650_v43  ;;  %v3841_v47 = vpop.f32.mrf.mxu1 }
 0x146   : > { %v2123_v12 = vadd.f32 %v2122_v55, %v1996_v16  ;;  %v2383_v19 = vadd.f32 %v2382_v53, %v2256_v18  ;;  %v1130_v45 = vpop.f32.mrf.mxu0  ;;  %vm1873_vm11 = vcmp.lt.s32.totalorder %v3772_v62, 2048  ;;  %v1746_v42 = vadd.s32 %v3210_v9, %v1617_v17 }
 0x147   : > { %1485 = vst [vmem:[%s3217_s8 + $0x1b8] sm:$0xff] %v1139_v7  ;;  %v1131_v14 = vadd.f32 %v3674_v41, %v1130_v45  ;;  %v3821_v20 = vadd.s32 %v3210_v9, %v1622_v58  ;;  %v2258_v32 = vmul.f32 %v1997_v8, %v1997_v8  ;;  %vm1876_vm12 = vcmp.lt.s32.totalorder %v3785_v35, 2048  ;;  %1524 = vst [vmem:[%s3217_s8 + $0x2f0] sm:$0xff] %v3812_v33 }
 0x148   : > { %v2384_v21 = vadd.f32 %v2383_v19, %v2257_v10  ;;  %v2124_v23 = vadd.f32 %v2123_v12, %v1997_v8  ;;  %v2836_v25 = vpop.f32.mrf.mxu0  ;;  %v3825_v43 = vadd.s32 %v3210_v9, %v1620_v40  ;;  %v1999_v0 = vsel %vm1871_vm7, %v1136_v38, 0.0 }
 0x149   : > { %1483 = vst [vmem:[%s3217_s8 + $0x1a8] sm:$0xff] %v1131_v14  ;;  %v1998_v63 = vsel %vm1870_vm9, %v1131_v14, 0.0  ;;  %v1152_v34 = vadd.f32 %v3674_v41, %v2836_v25  ;;  %v1623_v37 = vadd.s32 504, %v3199_v5  ;;  %v3839_v16 = vadd.f32 %v3674_v41, %v3664_v31  ;;  %v3851_v31 = vpop.f32.mrf.mxu1 }
 0x14a   : > { %v2385_v46 = vadd.f32 %v2384_v21, %v2258_v32  ;;  %v2125_v54 = vadd.f32 %v2124_v23, %v1998_v63  ;;  %v2259_v48 = vmul.f32 %v1998_v63, %v1998_v63  ;;  %v1143_v49 = vpop.f32.mrf.mxu0  ;;  %v2000_v39 = vsel %vm1872_vm8, %v1139_v7, 0.0 }
 0x14b   : > { %1488 = vst [vmem:[%s3217_s8 + $0x1d0] sm:$0xff] %v1152_v34  ;;  %v1144_v11 = vadd.f32 %v3674_v41, %v1143_v49  ;;  %vm1874_vm13 = vcmp.lt.s32.totalorder %v1746_v42, 2048  ;;  %v1621_v38 = vadd.s32 488, %v3199_v5  ;;  %v2260_v17 = vmul.f32 %v1999_v0, %v1999_v0  ;;  %1522 = vst [vmem:[%s3217_s8 + $0x2e0] sm:$0xff] %v3839_v16  ;;  %v3866_v62 = vpop.f32.mrf.mxu1 }
 0x14c   : > { %v2126_v58 = vadd.f32 %v2125_v54, %v1999_v0  ;;  %v2386_v18 = vadd.f32 %v2385_v46, %v2259_v48  ;;  %v2837_v55 = vpop.f32.mrf.mxu0  ;;  %vm1877_vm14 = vcmp.lt.s32.totalorder %v3825_v43, 2048  ;;  %v1626_v6 = vadd.s32 528, %v3199_v5 }
 0x14d   : > { %1486 = vst [vmem:[%s3217_s8 + $0x1c0] sm:$0xff] %v1144_v11  ;;  %v2001_v22 = vsel %vm1873_vm11, %v1144_v11, 0.0  ;;  %v1155_v53 = vadd.f32 %v3674_v41, %v2837_v55  ;;  %v3859_v40 = vadd.s32 %v3210_v9, %v1623_v37  ;;  %v2261_v8 = vmul.f32 %v2000_v39, %v2000_v39 }
 0x14e   : > { %v2127_v7 = vadd.f32 %v2126_v58, %v2000_v39  ;;  %v2387_v10 = vadd.f32 %v2386_v18, %v2260_v17  ;;  %v1146_v12 = vpop.f32.mrf.mxu0  ;;  %vm1879_vm15 = vcmp.lt.s32.totalorder %v3821_v20, 2048  ;;  %v3864_v19 = vadd.f32 %v3674_v41, %v3684_v36  ;;  %v3876_v36 = vpop.f32.mrf.mxu1 }
 0x14f   : > { %1489 = vst [vmem:[%s3217_s8 + $0x1d8] sm:$0xff] %v1155_v53  ;;  %v1147_v45 = vadd.f32 %v3674_v41, %v1146_v12  ;;  %v1624_v14 = vadd.s32 512, %v3199_v5  ;;  %v1750_v21 = vadd.s32 %v3210_v9, %v1621_v38  ;;  %v1625_v23 = vadd.s32 520, %v3199_v5 }
 0x150   : > { %v2388_v32 = vadd.f32 %v2387_v10, %v2261_v8  ;;  %v2128_v25 = vadd.f32 %v2127_v7, %v2001_v22  ;;  %v2262_v0 = vmul.f32 %v2001_v22, %v2001_v22  ;;  %v2840_v63 = vpop.f32.mrf.mxu0  ;;  %v1627_v37 = vadd.s32 536, %v3199_v5  ;;  %1525 = vst [vmem:[%s3217_s8 + $0x2f8] sm:$0xff] %v3864_v19  ;;  %v3890_v28 = vpop.f32.mrf.mxu1 }
 0x151   : > { %v2003_v46 = vsel %vm1875_vm10, %v1152_v34, 0.0  ;;  %1487 = vst [vmem:[%s3217_s8 + $0x1c8] sm:$0xff] %v1147_v45  ;;  %v2002_v54 = vsel %vm1874_vm13, %v1147_v45, 0.0  ;;  %v1168_v48 = vadd.f32 %v3674_v41, %v2840_v63  ;;  %v3884_v49 = vadd.s32 %v3210_v9, %v1626_v6 }
 0x152   : > { %v2389_v39 = vadd.f32 %v2388_v32, %v2262_v0  ;;  %v2129_v11 = vadd.f32 %v2128_v25, %v2002_v54  ;;  %v2263_v38 = vmul.f32 %v2002_v54, %v2002_v54  ;;  %v1159_v17 = vpop.f32.mrf.mxu0  ;;  %v3888_v58 = vadd.f32 %v3674_v41, %v3697_v24  ;;  %v3903_v24 = vpop.f32.mrf.mxu1 }
 0x153   : > { %v2004_v42 = vsel %vm1876_vm12, %v1155_v53, 0.0  ;;  %1492 = vst [vmem:[%s3217_s8 + $0x1f0] sm:$0xff] %v1168_v48  ;;  %v1160_v34 = vadd.f32 %v3674_v41, %v1159_v17  ;;  %v1753_v18 = vadd.s32 %v3210_v9, %v1624_v14  ;;  %v3898_v55 = vadd.s32 %v3210_v9, %v1625_v23 }
 0x154   : > { %v2264_v22 = vmul.f32 %v2003_v46, %v2003_v46  ;;  %v2130_v6 = vadd.f32 %v2129_v11, %v2003_v46  ;;  %v2390_v8 = vadd.f32 %v2389_v39, %v2263_v38  ;;  %v2841_v7 = vpop.f32.mrf.mxu0  ;;  %vm1880_vm0 = vcmp.lt.s32.totalorder %v3859_v40, 2048  ;;  %1523 = vst [vmem:[%s3217_s8 + $0x2e8] sm:$0xff] %v3888_v58  ;;  %v3917_v43 = vpop.f32.mrf.mxu1 }
 0x155   : > { %1490 = vst [vmem:[%s3217_s8 + $0x1e0] sm:$0xff] %v1160_v34  ;;  %v2005_v35 = vsel %vm1877_vm14, %v1160_v34, 0.0  ;;  %v1171_v53 = vadd.f32 %v3674_v41, %v2841_v7  ;;  %vm1878_vm1 = vcmp.lt.s32.totalorder %v1750_v21, 2048  ;;  %v3910_v10 = vadd.s32 %v3210_v9, %v1627_v37 }
 0x156   : > { %v2265_v12 = vmul.f32 %v2004_v42, %v2004_v42  ;;  %v2131_v45 = vadd.f32 %v2130_v6, %v2004_v42  ;;  %v2391_v14 = vadd.f32 %v2390_v8, %v2264_v22  ;;  %vm1883_vm2 = vcmp.lt.s32.totalorder %v3884_v49, 2048  ;;  %v1162_v23 = vpop.f32.mrf.mxu0  ;;  %v3935_v17 = vpop.f32.mrf.mxu1  ;;  %v2993_v49 = vld [vmem:[%s3217_s8 + $0x218] sm:$0xff] }
 0x157   : > { %v3915_v32 = vadd.f32 %v3674_v41, %v3709_v15  ;;  %1493 = vst [vmem:[%s3217_s8 + $0x1f8] sm:$0xff] %v1171_v53  ;;  %vm1881_vm3 = vcmp.lt.s32.totalorder %v1753_v18, 2048  ;;  %v1163_v25 = vadd.f32 %v3674_v41, %v1162_v23  ;;  %vm1882_vm4 = vcmp.lt.s32.totalorder %v3898_v55, 2048 }
 0x158   : > { %v1630_v0 = vadd.s32 560, %v3199_v5  ;;  %v2392_v63 = vadd.f32 %v2391_v14, %v2265_v12  ;;  %v2132_v37 = vadd.f32 %v2131_v45, %v2005_v35  ;;  %v2266_v46 = vmul.f32 %v2005_v35, %v2005_v35 }
 0x159   : > { %v1628_v54 = vadd.s32 544, %v3199_v5  ;;  %1528 = vst [vmem:[%s3217_s8 + $0x310] sm:$0xff] %v3915_v32  ;;  %v2007_v15 = vsel %vm1879_vm15, %v1168_v48, 0.0  ;;  %1491 = vst [vmem:[%s3217_s8 + $0x1e8] sm:$0xff] %v1163_v25  ;;  %v2006_v39 = vsel %vm1878_vm1, %v1163_v25, 0.0  ;;  %v1631_v11 = vadd.s32 568, %v3199_v5 }
 0x15a   : > { %v3933_v38 = vadd.f32 %v3674_v41, %v3724_v27  ;;  %v2393_v42 = vadd.f32 %v2392_v63, %v2266_v46  ;;  %v2133_v34 = vadd.f32 %v2132_v37, %v2006_v39  ;;  %v2267_v22 = vmul.f32 %v2006_v39, %v2006_v39  ;;  %v2992_v39 = vld [vmem:[%s3217_s8 + $0x210] sm:$0xff] }
 0x15b   : > { %v1629_v20 = vadd.s32 552, %v3199_v5  ;;  %v2008_v21 = vsel %vm1880_vm0, %v1171_v53, 0.0  ;;  %v3941_v48 = vadd.s32 %v3210_v9, %v1630_v0  ;;  %v3947_v27 = vadd.f32 %v3674_v41, %v3736_v61  ;;  %v2990_v53 = vld [vmem:[%s3217_s8 + $0x200] sm:$0xff]  ;;  %v2991_v0 = vld [vmem:[%s3217_s8 + $0x208] sm:$0xff] }
 0x15c   : > { %1526 = vst [vmem:[%s3217_s8 + $0x300] sm:$0xff] %v3933_v38  ;;  %v3951_v6 = vadd.f32 %v3674_v41, %v3747_v1  ;;  %v2268_v8 = vmul.f32 %v2007_v15, %v2007_v15  ;;  %v2134_v7 = vadd.f32 %v2133_v34, %v2007_v15  ;;  %v2394_v35 = vadd.f32 %v2393_v42, %v2267_v22  ;;  %v3968_v1 = vpop.f32.mrf.mxu1 }
 0x15d   : > { %v1757_v40 = vadd.s32 %v3210_v9, %v1628_v54  ;;  %v2009_v12 = vsel %vm1881_vm3, %v2990_v53, 0.0  ;;  %vm1884_vm5 = vcmp.lt.s32.totalorder %v3910_v10, 2048  ;;  %v3958_v45 = vadd.s32 %v3210_v9, %v1631_v11  ;;  %1529 = vst [vmem:[%s3217_s8 + $0x318] sm:$0xff] %v3947_v27 }
 0x15e   : > { %1527 = vst [vmem:[%s3217_s8 + $0x308] sm:$0xff] %v3951_v6  ;;  %v3966_v61 = vadd.f32 %v3674_v41, %v3760_v2  ;;  %v2269_v14 = vmul.f32 %v2008_v21, %v2008_v21  ;;  %v2135_v18 = vadd.f32 %v2134_v7, %v2008_v21  ;;  %v2395_v23 = vadd.f32 %v2394_v35, %v2268_v8 }
 0x15f   : > { %v1758_v25 = vadd.s32 %v3210_v9, %v1629_v20  ;;  %v2010_v63 = vsel %vm1882_vm4, %v2991_v0, 0.0  ;;  %vm1887_vm6 = vcmp.lt.s32.totalorder %v3941_v48, 2048  ;;  %v1634_v37 = vadd.s32 592, %v3199_v5 }
 0x160   : > { %1532 = vst [vmem:[%s3217_s8 + $0x330] sm:$0xff] %v3966_v61  ;;  %v3980_v2 = vadd.f32 %v3674_v41, %v3776_v4  ;;  %v2270_v46 = vmul.f32 %v2009_v12, %v2009_v12  ;;  %v2136_v54 = vadd.f32 %v2135_v18, %v2009_v12  ;;  %v2396_v15 = vadd.f32 %v2395_v23, %v2269_v14  ;;  %v3990_v4 = vpop.f32.mrf.mxu1  ;;  %v2994_v18 = vld [vmem:[%s3217_s8 + $0x220] sm:$0xff] }
 0x161   : > { %vm1885_vm7 = vcmp.lt.s32.totalorder %v1757_v40, 2048  ;;  %v2011_v55 = vsel %vm1883_vm2, %v2992_v39, 0.0  ;;  %vm1888_vm8 = vcmp.lt.s32.totalorder %v3958_v45, 2048  ;;  %v1632_v11 = vadd.s32 576, %v3199_v5  ;;  %v2995_v40 = vld [vmem:[%s3217_s8 + $0x228] sm:$0xff] }
 0x162   : > { %v1635_v42 = vadd.s32 600, %v3199_v5  ;;  %1530 = vst [vmem:[%s3217_s8 + $0x320] sm:$0xff] %v3980_v2  ;;  %v2397_v34 = vadd.f32 %v2396_v15, %v2270_v46  ;;  %v2137_v22 = vadd.f32 %v2136_v54, %v2010_v63  ;;  %v2271_v20 = vmul.f32 %v2010_v63, %v2010_v63 }
 0x163   : > { %v3994_v21 = vadd.f32 %v3674_v41, %v3791_v52  ;;  %v2012_v8 = vsel %vm1884_vm5, %v2993_v49, 0.0  ;;  %vm1886_vm9 = vcmp.lt.s32.totalorder %v1758_v25, 2048  ;;  %v4000_v7 = vadd.s32 %v3210_v9, %v1634_v37  ;;  %v4016_v37 = vpop.f32.mrf.mxu1  ;;  %v2997_v49 = vld [vmem:[%s3217_s8 + $0x238] sm:$0xff] }
 0x164   : > { %v1633_v35 = vadd.s32 584, %v3199_v5  ;;  %v2272_v53 = vmul.f32 %v2011_v55, %v2011_v55  ;;  %v2138_v12 = vadd.f32 %v2137_v22, %v2011_v55  ;;  %v2398_v14 = vadd.f32 %v2397_v34, %v2271_v20 }
 0x165   : > { %1533 = vst [vmem:[%s3217_s8 + $0x338] sm:$0xff] %v3994_v21  ;;  %v4007_v52 = vadd.f32 %v3674_v41, %v3802_v3  ;;  %v2013_v10 = vsel %vm1885_vm7, %v2994_v18, 0.0  ;;  %v1761_v23 = vadd.s32 %v3210_v9, %v1632_v11  ;;  %v4013_v0 = vadd.s32 %v3210_v9, %v1635_v42 }
 0x166   : > { %v1638_v63 = vadd.s32 624, %v3199_v5  ;;  %v2273_v46 = vmul.f32 %v2012_v8, %v2012_v8  ;;  %v2399_v54 = vadd.f32 %v2398_v14, %v2272_v53  ;;  %v2139_v15 = vadd.f32 %v2138_v12, %v2012_v8  ;;  %v4042_v53 = vpop.f32.mrf.mxu1 }
 0x167   : > { %1531 = vst [vmem:[%s3217_s8 + $0x328] sm:$0xff] %v4007_v52  ;;  %v4022_v3 = vadd.f32 %v3674_v41, %v3814_v30  ;;  %v2014_v39 = vsel %vm1886_vm9, %v2995_v40, 0.0  ;;  %vm1891_vm10 = vcmp.lt.s32.totalorder %v4000_v7, 2048  ;;  %v1762_v55 = vadd.s32 %v3210_v9, %v1633_v35  ;;  %v2996_v30 = vld [vmem:[%s3217_s8 + $0x230] sm:$0xff] }
 0x168   : > { %v1636_v11 = vadd.s32 608, %v3199_v5  ;;  %v2140_v42 = vadd.f32 %v2139_v15, %v2013_v10  ;;  %v2274_v34 = vmul.f32 %v2013_v10, %v2013_v10  ;;  %v2400_v22 = vadd.f32 %v2399_v54, %v2273_v46  ;;  %v2998_v15 = vld [vmem:[%s3217_s8 + $0x240] sm:$0xff] }
 0x169   : > { %1536 = vst [vmem:[%s3217_s8 + $0x350] sm:$0xff] %v4022_v3  ;;  %v4033_v20 = vadd.f32 %v3674_v41, %v3829_v26  ;;  %v2015_v25 = vsel %vm1887_vm6, %v2996_v30, 0.0  ;;  %v2016_v8 = vsel %vm1888_vm8, %v2997_v49, 0.0  ;;  %vm1889_vm11 = vcmp.lt.s32.totalorder %v1761_v23, 2048  ;;  %v3000_v23 = vld [vmem:[%s3217_s8 + $0x250] sm:$0xff] }
 0x16a   : > { %v1767_v35 = vadd.s32 %v3210_v9, %v1638_v63  ;;  %v2401_v12 = vadd.f32 %v2400_v22, %v2274_v34  ;;  %v2141_v14 = vadd.f32 %v2140_v42, %v2014_v39  ;;  %v2275_v18 = vmul.f32 %v2014_v39, %v2014_v39  ;;  %v2999_v22 = vld [vmem:[%s3217_s8 + $0x248] sm:$0xff] }
 0x16b   : > { %1534 = vst [vmem:[%s3217_s8 + $0x340] sm:$0xff] %v4033_v20  ;;  %v4048_v26 = vadd.f32 %v3674_v41, %v3841_v47  ;;  %vm1892_vm12 = vcmp.lt.s32.totalorder %v4013_v0, 2048  ;;  %vm1890_vm13 = vcmp.lt.s32.totalorder %v1762_v55, 2048  ;;  %v1765_v48 = vadd.s32 %v3210_v9, %v1636_v11  ;;  %v4062_v11 = vpop.f32.mrf.mxu1 }
 0x16c   : > { %v1637_v45 = vadd.s32 616, %v3199_v5  ;;  %v2276_v10 = vmul.f32 %v2015_v25, %v2015_v25  ;;  %v2142_v63 = vadd.f32 %v2141_v14, %v2015_v25  ;;  %v2402_v46 = vadd.f32 %v2401_v12, %v2275_v18  ;;  %v3001_v18 = vld [vmem:[%s3217_s8 + $0x258] sm:$0xff] }
 0x16d   : > { %1537 = vst [vmem:[%s3217_s8 + $0x358] sm:$0xff] %v4048_v26  ;;  %v4057_v54 = vadd.f32 %v3674_v41, %v3851_v31  ;;  %v2277_v47 = vmul.f32 %v2016_v8, %v2016_v8  ;;  %v2017_v40 = vsel %vm1889_vm11, %v2998_v15, 0.0  ;;  %vm1895_vm14 = vcmp.lt.s32.totalorder %v1767_v35, 2048 }
 0x16e   : > { %v1639_v39 = vadd.s32 632, %v3199_v5  ;;  %v2403_v42 = vadd.f32 %v2402_v46, %v2276_v10  ;;  %v2143_v34 = vadd.f32 %v2142_v63, %v2016_v8  ;;  %v2018_v30 = vsel %vm1890_vm13, %v2999_v22, 0.0  ;;  %v4088_v46 = vpop.f32.mrf.mxu1 }
 0x16f   : > { %1535 = vst [vmem:[%s3217_s8 + $0x348] sm:$0xff] %v4057_v54  ;;  %v4070_v31 = vadd.f32 %v3674_v41, %v3866_v62  ;;  %v2019_v25 = vsel %vm1891_vm10, %v3000_v23, 0.0  ;;  %vm1893_vm15 = vcmp.lt.s32.totalorder %v1765_v48, 2048  ;;  %v1766_v49 = vadd.s32 %v3210_v9, %v1637_v45 }
 0x170   : > { %v1640_v12 = vadd.s32 640, %v3199_v5  ;;  %v2144_v8 = vadd.f32 %v2143_v34, %v2017_v40  ;;  %v2278_v55 = vmul.f32 %v2017_v40, %v2017_v40  ;;  %v2404_v14 = vadd.f32 %v2403_v42, %v2277_v47  ;;  %v3002_v40 = vld [vmem:[%s3217_s8 + $0x270] sm:$0xff]  ;;  %v3003_v34 = vld [vmem:[%s3217_s8 + $0x260] sm:$0xff] }
 0x171   : > { %1540 = vst [vmem:[%s3217_s8 + $0x370] sm:$0xff] %v4070_v31  ;;  %v4081_v62 = vadd.f32 %v3674_v41, %v3876_v36  ;;  %v2020_v7 = vsel %vm1892_vm12, %v3001_v18, 0.0  ;;  %v2279_v10 = vmul.f32 %v2018_v30, %v2018_v30  ;;  %v1768_v45 = vadd.s32 %v3210_v9, %v1639_v39 }
 0x172   : > { %v1642_v63 = vadd.s32 656, %v3199_v5  ;;  %v2405_v47 = vadd.f32 %v2404_v14, %v2278_v55  ;;  %v2145_v15 = vadd.f32 %v2144_v8, %v2018_v30  ;;  %v2023_v42 = vsel %vm1895_vm14, %v3002_v40, 0.0  ;;  %v4109_v14 = vpop.f32.mrf.mxu1 }
 0x173   : > { %1538 = vst [vmem:[%s3217_s8 + $0x360] sm:$0xff] %v4081_v62  ;;  %v4096_v36 = vadd.f32 %v3674_v41, %v3890_v28  ;;  %v2280_v0 = vmul.f32 %v2019_v25, %v2019_v25  ;;  %v2021_v39 = vsel %vm1893_vm15, %v3003_v34, 0.0  ;;  %v1769_v22 = vadd.s32 %v3210_v9, %v1640_v12 }
 0x174   : > { %v1641_v23 = vadd.s32 648, %v3199_v5  ;;  %v2146_v30 = vadd.f32 %v2145_v15, %v2019_v25  ;;  %v2406_v8 = vadd.f32 %v2405_v47, %v2279_v10  ;;  %vm1894_vm0 = vcmp.lt.s32.totalorder %v1766_v49, 2048 }
 0x175   : > { %1541 = vst [vmem:[%s3217_s8 + $0x378] sm:$0xff] %v4096_v36  ;;  %v4106_v35 = vadd.f32 %v3674_v41, %v3903_v24  ;;  %v2281_v28 = vmul.f32 %v2020_v7, %v2020_v7  ;;  %v2284_v55 = vmul.f32 %v2023_v42, %v2023_v42  ;;  %vm1896_vm1 = vcmp.lt.s32.totalorder %v1768_v45, 2048  ;;  %v3004_v24 = vld [vmem:[%s3217_s8 + $0x268] sm:$0xff]  ;;  %v3006_v45 = vld [vmem:[%s3217_s8 + $0x280] sm:$0xff] }
 0x176   : > { %v1643_v48 = vadd.s32 664, %v3199_v5  ;;  %v2407_v12 = vadd.f32 %v2406_v8, %v2280_v0  ;;  %v2147_v18 = vadd.f32 %v2146_v30, %v2020_v7  ;;  %v2282_v25 = vmul.f32 %v2021_v39, %v2021_v39 }
 0x177   : > { %1539 = vst [vmem:[%s3217_s8 + $0x368] sm:$0xff] %v4106_v35  ;;  %v4115_v49 = vadd.f32 %v3674_v41, %v3917_v43  ;;  %v2022_v10 = vsel %vm1894_vm0, %v3004_v24, 0.0  ;;  %v1771_v47 = vadd.s32 %v3210_v9, %v1642_v63  ;;  %vm1897_vm2 = vcmp.lt.s32.totalorder %v1769_v22, 2048  ;;  %v3005_v43 = vld [vmem:[%s3217_s8 + $0x278] sm:$0xff] }
 0x178   : > { %v1770_v15 = vadd.s32 %v3210_v9, %v1641_v23  ;;  %v2148_v40 = vadd.f32 %v2147_v18, %v2021_v39  ;;  %v2408_v34 = vadd.f32 %v2407_v12, %v2281_v28  ;;  %v1644_v7 = vadd.s32 672, %v3199_v5  ;;  %v4132_v23 = vpop.f32.mrf.mxu1 }
 0x179   : > { %4374 = vst [vmem:[#allocation2_spill] sm:$0xff] %v4115_v49  ;;  %1544 = vst [vmem:[%s3217_s8 + $0x390] sm:$0xff] %v4115_v49  ;;  %v4125_v0 = vadd.f32 %v3674_v41, %v3935_v17  ;;  %v2024_v30 = vsel %vm1896_vm1, %v3005_v43, 0.0  ;;  %v1772_v63 = vadd.s32 %v3210_v9, %v1643_v48  ;;  %v1646_v8 = vadd.s32 688, %v3199_v5 }
 0x17a   : > { %v1645_v39 = vadd.s32 680, %v3199_v5  ;;  %v2409_v28 = vadd.f32 %v2408_v34, %v2282_v25  ;;  %v2149_v12 = vadd.f32 %v2148_v40, %v2022_v10  ;;  %v2283_v18 = vmul.f32 %v2022_v10, %v2022_v10  ;;  %v2901_v40 = vpop.f32.mrf.mxu1 }
 0x17b   : > { %1542 = vst [vmem:[%s3217_s8 + $0x380] sm:$0xff] %v4125_v0  ;;  %v4138_v17 = vadd.f32 %v3674_v41, %v3968_v1  ;;  %vm1899_vm3 = vcmp.lt.s32.totalorder %v1771_v47, 2048  ;;  %v2025_v48 = vsel %vm1897_vm2, %v3006_v45, 0.0  ;;  %vm1898_vm4 = vcmp.lt.s32.totalorder %v1770_v15, 2048 }
 0x17c   : > { %v1647_v24 = vadd.s32 696, %v3199_v5  ;;  %v2150_v43 = vadd.f32 %v2149_v12, %v2023_v42  ;;  %v2410_v49 = vadd.f32 %v2409_v28, %v2283_v18  ;;  %v1773_v25 = vadd.s32 %v3210_v9, %v1644_v7  ;;  %v1402_v47 = vpop.f32.mrf.mxu1 }
 0x17d   : > { %1545 = vst [vmem:[%s3217_s8 + $0x398] sm:$0xff] %v4138_v17  ;;  %v4148_v10 = vadd.f32 %v3674_v41, %v3990_v4  ;;  %v2285_v1 = vmul.f32 %v2024_v30, %v2024_v30  ;;  %vm1900_vm5 = vcmp.lt.s32.totalorder %v1772_v63, 2048  ;;  %v1775_v22 = vadd.s32 %v3210_v9, %v1646_v8  ;;  %v3007_v4 = vld [vmem:[%s3217_s8 + $0x290] sm:$0xff] }
 0x17e   : > { %v1774_v15 = vadd.s32 %v3210_v9, %v1645_v39  ;;  %v2411_v34 = vadd.f32 %v2410_v49, %v2284_v55  ;;  %v2151_v42 = vadd.f32 %v2150_v43, %v2024_v30  ;;  %v2026_v28 = vsel %vm1898_vm4, %v3568_v56, 0.0  ;;  %v3008_v55 = vld [vmem:[%s3217_s8 + $0x298] sm:$0xff] }
 0x17f   : > { %1543 = vst [vmem:[%s3217_s8 + $0x388] sm:$0xff] %v4148_v10  ;;  %v4157_v7 = vadd.f32 %v3674_v41, %v4016_v37  ;;  %v2027_v12 = vsel %vm1899_vm3, %v3007_v4, 0.0  ;;  %v2286_v18 = vmul.f32 %v2025_v48, %v2025_v48  ;;  %v1776_v8 = vadd.s32 %v3210_v9, %v1647_v24 }
 0x180   : > { %v2152_v39 = vadd.f32 %v2151_v42, %v2025_v48  ;;  %v2412_v45 = vadd.f32 %v2411_v34, %v2285_v1  ;;  %vm1901_vm6 = vcmp.lt.s32.totalorder %v1773_v25, 2048  ;;  %v4166_v56 = vadd.f32 %v3674_v41, %v4042_v53 }
 0x181   : > { %1548 = vst [vmem:[%s3217_s8 + $0x3b0] sm:$0xff] %v4157_v7  ;;  %v2028_v37 = vsel %vm1900_vm5, %v3008_v55, 0.0  ;;  %v2287_v49 = vmul.f32 %v2026_v28, %v2026_v28  ;;  %vm1903_vm7 = vcmp.lt.s32.totalorder %v1775_v22, 2048  ;;  %vm1902_vm8 = vcmp.lt.s32.totalorder %v1774_v15, 2048 }
 0x182   : > { %v2413_v30 = vadd.f32 %v2412_v45, %v2286_v18  ;;  %v2153_v43 = vadd.f32 %v2152_v39, %v2026_v28  ;;  %v1648_v48 = vadd.s32 704, %v3199_v5  ;;  %1546 = vst [vmem:[%s3217_s8 + $0x3a0] sm:$0xff] %v4166_v56  ;;  %v4175_v24 = vadd.f32 %v3674_v41, %v4062_v11 }
 0x183   : > { %v2288_v53 = vmul.f32 %v2027_v12, %v2027_v12  ;;  %v2029_v25 = vsel %vm1901_vm6, %v3622_v29, 0.0  ;;  %vm1904_vm9 = vcmp.lt.s32.totalorder %v1776_v8, 2048  ;;  %v1649_v63 = vadd.s32 712, %v3199_v5 }
 0x184   : > { %v2154_v1 = vadd.f32 %v2153_v43, %v2027_v12  ;;  %v2414_v34 = vadd.f32 %v2413_v30, %v2287_v49  ;;  %v1650_v42 = vadd.s32 720, %v3199_v5  ;;  %1549 = vst [vmem:[%s3217_s8 + $0x3b8] sm:$0xff] %v4175_v24  ;;  %v4184_v28 = vadd.f32 %v3674_v41, %v4088_v46  ;;  %v2904_v12 = vpop.f32.mrf.mxu1 }
 0x185   : > { %v2289_v4 = vmul.f32 %v2028_v37, %v2028_v37  ;;  %v2031_v11 = vsel %vm1903_vm7, %v3596_v13, 0.0  ;;  %v2030_v29 = vsel %vm1902_vm8, %v3682_v57, 0.0  ;;  %v1651_v18 = vadd.s32 728, %v3199_v5 }
 0x186   : > { %v2415_v39 = vadd.f32 %v2414_v34, %v2288_v53  ;;  %v2155_v45 = vadd.f32 %v2154_v1, %v2028_v37  ;;  %v1777_v55 = vadd.s32 %v3210_v9, %v1648_v48  ;;  %1547 = vst [vmem:[%s3217_s8 + $0x3a8] sm:$0xff] %v4184_v28  ;;  %v4196_v46 = vadd.f32 %v3674_v41, %v4109_v14 }
 0x187   : > { %v2290_v49 = vmul.f32 %v2029_v25, %v2029_v25  ;;  %v2032_v13 = vsel %vm1904_vm9, %v3648_v50, 0.0  ;;  %v1778_v57 = vadd.s32 %v3210_v9, %v1649_v63  ;;  %v1779_v30 = vadd.s32 %v3210_v9, %v1650_v42  ;;  %v1415_v50 = vpop.f32.mrf.mxu1 }
 0x188   : > { %v2156_v22 = vadd.f32 %v2155_v45, %v2029_v25  ;;  %v2416_v15 = vadd.f32 %v2415_v39, %v2289_v4  ;;  %1552 = vst [vmem:[%s3217_s8 + $0x3d0] sm:$0xff] %v4196_v46  ;;  %v4206_v37 = vadd.f32 %v3674_v41, %v4132_v23  ;;  %v2292_v43 = vmul.f32 %v2031_v11, %v2031_v11 }
 0x189   : > { %v2291_v14 = vmul.f32 %v2030_v29, %v2030_v29  ;;  %v1780_v48 = vadd.s32 %v3210_v9, %v1651_v18  ;;  %v1652_v8 = vadd.s32 736, %v3199_v5  ;;  %vm1905_vm10 = vcmp.lt.s32.totalorder %v1777_v55, 2048  ;;  %v2905_v45 = vpop.f32.mrf.mxu1 }
 0x18a   : > { %v2417_v53 = vadd.f32 %v2416_v15, %v2290_v49  ;;  %v2157_v63 = vadd.f32 %v2156_v22, %v2030_v29  ;;  %1550 = vst [vmem:[%s3217_s8 + $0x3c0] sm:$0xff] %v4206_v37  ;;  %v4213_v25 = vadd.f32 %v3674_v41, %v2901_v40  ;;  %v2293_v1 = vmul.f32 %v2032_v13, %v2032_v13 }
 0x18b   : > { %vm1906_vm11 = vcmp.lt.s32.totalorder %v1778_v57, 2048  ;;  %v1654_v23 = vadd.s32 752, %v3199_v5  ;;  %v1653_v34 = vadd.s32 744, %v3199_v5  ;;  %vm1907_vm12 = vcmp.lt.s32.totalorder %v1779_v30, 2048 }
 0x18c   : > { %v2158_v42 = vadd.f32 %v2157_v63, %v2031_v11  ;;  %v2418_v4 = vadd.f32 %v2417_v53, %v2291_v14  ;;  %1553 = vst [vmem:[%s3217_s8 + $0x3d8] sm:$0xff] %v4213_v25  ;;  %v4220_v29 = vadd.f32 %v3674_v41, %v1402_v47  ;;  %v2033_v18 = vsel %vm1905_vm10, %v3734_v59, 0.0 }
 0x18d   : > { %vm1908_vm13 = vcmp.lt.s32.totalorder %v1780_v48, 2048  ;;  %v1781_v40 = vadd.s32 %v3210_v9, %v1652_v8  ;;  %v1655_v39 = vadd.s32 760, %v3199_v5  ;;  %v2034_v11 = vsel %vm1906_vm11, %v3789_v51, 0.0 }
 0x18e   : > { %v2419_v55 = vadd.f32 %v2418_v4, %v2292_v43  ;;  %v2159_v49 = vadd.f32 %v2158_v42, %v2032_v13  ;;  %1551 = vst [vmem:[%s3217_s8 + $0x3c8] sm:$0xff] %v4220_v29  ;;  %v4229_v57 = vadd.f32 %v3674_v41, %v2904_v12  ;;  %v2035_v47 = vsel %vm1907_vm12, %v3707_v44, 0.0  ;;  %v1418_v43 = vpop.f32.mrf.mxu1  ;;  %v3009_v42 = vld [vmem:[%s4370_s2] ss:$0 sm:$0xff] }
 0x18f   : > { %v1783_v59 = vadd.s32 %v3210_v9, %v1654_v23  ;;  %v1782_v22 = vadd.s32 %v3210_v9, %v1653_v34  ;;  %v2294_v30 = vmul.f32 %v2033_v18, %v2033_v18  ;;  %v4237_v13 = vadd.f32 %v3674_v41, %v1415_v50 }
 0x190   : > { %v2160_v15 = vadd.f32 %v2159_v49, %v2033_v18  ;;  %v2420_v14 = vadd.f32 %v2419_v55, %v2293_v1  ;;  %1556 = vst [vmem:[%s3217_s8 + $0x3f0] sm:$0xff] %v4229_v57  ;;  %v2036_v51 = vsel %vm1908_vm13, %v3758_v60, 0.0  ;;  %v2295_v12 = vmul.f32 %v2034_v11, %v2034_v11 }
 0x191   : > { %vm1909_vm14 = vcmp.lt.s32.totalorder %v1781_v40, 2048  ;;  %v1784_v44 = vadd.s32 %v3210_v9, %v1655_v39  ;;  %v1656_v63 = vadd.s32 768, %v3199_v5  ;;  %1554 = vst [vmem:[%s3217_s8 + $0x3e0] sm:$0xff] %v4237_v13  ;;  %v4246_v1 = vadd.f32 %v3674_v41, %v2905_v45 }
 0x192   : > { %v2421_v8 = vadd.f32 %v2420_v14, %v2294_v30  ;;  %v2161_v53 = vadd.f32 %v2160_v15, %v2034_v11  ;;  %v2296_v50 = vmul.f32 %v2035_v47, %v2035_v47  ;;  %vm1911_vm15 = vcmp.lt.s32.totalorder %v1783_v59, 2048 }
 0x193   : > { %vm1910_vm0 = vcmp.lt.s32.totalorder %v1782_v22, 2048  ;;  %v1657_v60 = vadd.s32 776, %v3199_v5  ;;  %v1658_v34 = vadd.s32 784, %v3199_v5  ;;  %1557 = vst [vmem:[%s3217_s8 + $0x3f8] sm:$0xff] %v4246_v1  ;;  %v4255_v4 = vadd.f32 %v3009_v42, %v1418_v43 }
 0x194   : > { %v2162_v48 = vadd.f32 %v2161_v53, %v2035_v47  ;;  %v2422_v23 = vadd.f32 %v2421_v8, %v2295_v12  ;;  %v2297_v41 = vmul.f32 %v2036_v51, %v2036_v51  ;;  %v2037_v18 = vsel %vm1909_vm14, %v3839_v16, 0.0 }
 0x195   : > { %vm1912_vm1 = vcmp.lt.s32.totalorder %v1784_v44, 2048  ;;  %v1659_v39 = vadd.s32 792, %v3199_v5  ;;  %v2038_v49 = vsel %vm1910_vm0, %v3888_v58, 0.0  ;;  %v1785_v11 = vadd.s32 %v3210_v9, %v1656_v63  ;;  %1555 = vst [vmem:[%s3217_s8 + $0x3e8] sm:$0xff] %v4255_v4 }
 0x196   : > { %v2423_v45 = vadd.f32 %v2422_v23, %v2296_v50  ;;  %v2163_v55 = vadd.f32 %v2162_v48, %v2036_v51  ;;  %v2039_v47 = vsel %vm1911_vm15, %v3812_v33, 0.0  ;;  %v1786_v22 = vadd.s32 %v3210_v9, %v1657_v60 }
 0x197   : > { %v2298_v30 = vmul.f32 %v2037_v18, %v2037_v18  ;;  %v1787_v16 = vadd.s32 %v3210_v9, %v1658_v34  ;;  %v2040_v14 = vsel %vm1912_vm1, %v3864_v19, 0.0  ;;  %v2299_v12 = vmul.f32 %v2038_v49, %v2038_v49 }
 0x198   : > { %v2164_v15 = vadd.f32 %v2163_v55, %v2037_v18  ;;  %v2424_v40 = vadd.f32 %v2423_v45, %v2297_v41  ;;  %v1788_v51 = vadd.s32 %v3210_v9, %v1659_v39  ;;  %v1660_v58 = vadd.s32 800, %v3199_v5 }
 0x199   : > { %vm1913_vm2 = vcmp.lt.s32.totalorder %v1785_v11, 2048  ;;  %v1661_v59 = vadd.s32 808, %v3199_v5  ;;  %v2300_v33 = vmul.f32 %v2039_v47, %v2039_v47  ;;  %vm1914_vm3 = vcmp.lt.s32.totalorder %v1786_v22, 2048 }
 0x19a   : > { %v2425_v44 = vadd.f32 %v2424_v40, %v2298_v30  ;;  %v2165_v43 = vadd.f32 %v2164_v15, %v2038_v49  ;;  %v2301_v8 = vmul.f32 %v2040_v14, %v2040_v14  ;;  %vm1915_vm4 = vcmp.lt.s32.totalorder %v1787_v16, 2048 }
 0x19b   : > { %v2041_v50 = vsel %vm1913_vm2, %v3933_v38, 0.0  ;;  %vm1916_vm5 = vcmp.lt.s32.totalorder %v1788_v51, 2048  ;;  %v1662_v19 = vadd.s32 816, %v3199_v5  ;;  %v1789_v60 = vadd.s32 %v3210_v9, %v1660_v58 }
 0x19c   : > { %v2166_v53 = vadd.f32 %v2165_v43, %v2039_v47  ;;  %v2426_v63 = vadd.f32 %v2425_v44, %v2299_v12  ;;  %v2042_v34 = vsel %vm1914_vm3, %v3951_v6, 0.0  ;;  %v1790_v42 = vadd.s32 %v3210_v9, %v1661_v59 }
 0x19d   : > { %v1663_v41 = vadd.s32 824, %v3199_v5  ;;  %v2043_v18 = vsel %vm1915_vm4, %v3915_v32, 0.0  ;;  %v2302_v45 = vmul.f32 %v2041_v50, %v2041_v50  ;;  %v2044_v38 = vsel %vm1916_vm5, %v3947_v27, 0.0 }
 0x19e   : > { %v2427_v48 = vadd.f32 %v2426_v63, %v2300_v33  ;;  %v2167_v23 = vadd.f32 %v2166_v53, %v2040_v14  ;;  %v2303_v49 = vmul.f32 %v2042_v34, %v2042_v34  ;;  %v1791_v11 = vadd.s32 %v3210_v9, %v1662_v19 }
 0x19f   : > { %vm1917_vm6 = vcmp.lt.s32.totalorder %v1789_v60, 2048  ;;  %vm1918_vm7 = vcmp.lt.s32.totalorder %v1790_v42, 2048  ;;  %v1664_v6 = vadd.s32 832, %v3199_v5  ;;  %v2304_v15 = vmul.f32 %v2043_v18, %v2043_v18 }
 0x1a0   : > { %v2168_v39 = vadd.f32 %v2167_v23, %v2041_v50  ;;  %v2428_v55 = vadd.f32 %v2427_v48, %v2301_v8  ;;  %v1792_v30 = vadd.s32 %v3210_v9, %v1663_v41  ;;  %v2045_v32 = vsel %vm1917_vm6, %v3980_v2, 0.0 }
 0x1a1   : > { %v1665_v14 = vadd.s32 840, %v3199_v5  ;;  %v2305_v12 = vmul.f32 %v2044_v38, %v2044_v38  ;;  %vm1919_vm8 = vcmp.lt.s32.totalorder %v1791_v11, 2048  ;;  %v2046_v27 = vsel %vm1918_vm7, %v4007_v52, 0.0 }
 0x1a2   : > { %v2429_v47 = vadd.f32 %v2428_v55, %v2302_v45  ;;  %v2169_v22 = vadd.f32 %v2168_v39, %v2042_v34  ;;  %v1666_v51 = vadd.s32 848, %v3199_v5  ;;  %v1793_v43 = vadd.s32 %v3210_v9, %v1664_v6 }
 0x1a3   : > { %v1667_v59 = vadd.s32 856, %v3199_v5  ;;  %v2306_v33 = vmul.f32 %v2045_v32, %v2045_v32  ;;  %vm1920_vm9 = vcmp.lt.s32.totalorder %v1792_v30, 2048  ;;  %v1794_v2 = vadd.s32 %v3210_v9, %v1665_v14 }
 0x1a4   : > { %v2170_v40 = vadd.f32 %v2169_v22, %v2043_v18  ;;  %v2430_v16 = vadd.f32 %v2429_v47, %v2303_v49  ;;  %v2047_v63 = vsel %vm1919_vm8, %v3966_v61, 0.0  ;;  %v2307_v50 = vmul.f32 %v2046_v27, %v2046_v27 }
 0x1a5   : > { %v1795_v19 = vadd.s32 %v3210_v9, %v1666_v51  ;;  %v1668_v52 = vadd.s32 864, %v3199_v5  ;;  %vm1921_vm10 = vcmp.lt.s32.totalorder %v1793_v43, 2048  ;;  %v1796_v23 = vadd.s32 %v3210_v9, %v1667_v59 }
 0x1a6   : > { %v2431_v58 = vadd.f32 %v2430_v16, %v2304_v15  ;;  %v2171_v44 = vadd.f32 %v2170_v40, %v2044_v38  ;;  %v2048_v34 = vsel %vm1920_vm9, %v3994_v21, 0.0  ;;  %v1670_v42 = vadd.s32 880, %v3199_v5 }
 0x1a7   : > { %v1669_v41 = vadd.s32 872, %v3199_v5  ;;  %v2308_v18 = vmul.f32 %v2047_v63, %v2047_v63  ;;  %vm1922_vm11 = vcmp.lt.s32.totalorder %v1794_v2, 2048  ;;  %vm1923_vm12 = vcmp.lt.s32.totalorder %v1795_v19, 2048 }
 0x1a8   : > { %v2172_v8 = vadd.f32 %v2171_v44, %v2045_v32  ;;  %v2432_v53 = vadd.f32 %v2431_v58, %v2305_v12  ;;  %v2049_v61 = vsel %vm1921_vm10, %v4033_v20, 0.0  ;;  %v1797_v55 = vadd.s32 %v3210_v9, %v1668_v52 }
 0x1a9   : > { %v1671_v38 = vadd.s32 888, %v3199_v5  ;;  %v2309_v49 = vmul.f32 %v2048_v34, %v2048_v34  ;;  %vm1924_vm13 = vcmp.lt.s32.totalorder %v1796_v23, 2048  ;;  %v2050_v21 = vsel %vm1922_vm11, %v4057_v54, 0.0 }
 0x1aa   : > { %v2433_v60 = vadd.f32 %v2432_v53, %v2306_v33  ;;  %v2173_v48 = vadd.f32 %v2172_v8, %v2046_v27  ;;  %v1799_v22 = vadd.s32 %v3210_v9, %v1670_v42  ;;  %v1798_v6 = vadd.s32 %v3210_v9, %v1669_v41 }
 0x1ab   : > { %v1672_v15 = vadd.s32 896, %v3199_v5  ;;  %v2051_v30 = vsel %vm1923_vm12, %v4022_v3, 0.0  ;;  %v2310_v20 = vmul.f32 %v2049_v61, %v2049_v61  ;;  %vm1925_vm14 = vcmp.lt.s32.totalorder %v1797_v55, 2048 }
 0x1ac   : > { %v2174_v39 = vadd.f32 %v2173_v48, %v2047_v63  ;;  %v2434_v45 = vadd.f32 %v2433_v60, %v2307_v50  ;;  %v1800_v32 = vadd.s32 %v3210_v9, %v1671_v38  ;;  %v1674_v14 = vadd.s32 912, %v3199_v5 }
 0x1ad   : > { %v2052_v27 = vsel %vm1924_vm13, %v4048_v26, 0.0  ;;  %v2311_v51 = vmul.f32 %v2050_v21, %v2050_v21  ;;  %v2312_v58 = vmul.f32 %v2051_v30, %v2051_v30  ;;  %vm1927_vm15 = vcmp.lt.s32.totalorder %v1799_v22, 2048 }
 0x1ae   : > { %v2435_v11 = vadd.f32 %v2434_v45, %v2308_v18  ;;  %v2175_v47 = vadd.f32 %v2174_v39, %v2048_v34  ;;  %vm1926_vm0 = vcmp.lt.s32.totalorder %v1798_v6, 2048  ;;  %v1801_v44 = vadd.s32 %v3210_v9, %v1672_v15 }
 0x1af   : > { %v2053_v59 = vsel %vm1925_vm14, %v4081_v62, 0.0  ;;  %v1673_v33 = vadd.s32 904, %v3199_v5  ;;  %v2313_v8 = vmul.f32 %v2052_v27, %v2052_v27  ;;  %vm1928_vm1 = vcmp.lt.s32.totalorder %v1800_v32, 2048 }
 0x1b0   : > { %v2176_v40 = vadd.f32 %v2175_v47, %v2049_v61  ;;  %v2436_v16 = vadd.f32 %v2435_v11, %v2309_v49  ;;  %v1803_v53 = vadd.s32 %v3210_v9, %v1674_v14  ;;  %v2054_v26 = vsel %vm1926_vm0, %v4106_v35, 0.0 }
 0x1b1   : > { %v1675_v50 = vadd.s32 920, %v3199_v5  ;;  %v2055_v19 = vsel %vm1927_vm15, %v4070_v31, 0.0  ;;  %v2314_v52 = vmul.f32 %v2053_v59, %v2053_v59  ;;  %vm1929_vm2 = vcmp.lt.s32.totalorder %v1801_v44, 2048 }
 0x1b2   : > { %v2437_v12 = vadd.f32 %v2436_v16, %v2310_v20  ;;  %v2177_v54 = vadd.f32 %v2176_v40, %v2050_v21  ;;  %v1802_v62 = vadd.s32 %v3210_v9, %v1673_v33  ;;  %v1676_v23 = vadd.s32 928, %v3199_v5 }
 0x1b3   : > { %v2056_v34 = vsel %vm1928_vm1, %v4096_v36, 0.0  ;;  %v2315_v42 = vmul.f32 %v2054_v26, %v2054_v26  ;;  %vm1931_vm3 = vcmp.lt.s32.totalorder %v1803_v53, 2048  ;;  %v1804_v35 = vadd.s32 %v3210_v9, %v1675_v50  ;;  %v4375_v36 = vld [vmem:[#allocation2_spill] sm:$0xff] }
 0x1b4   : > { %v2178_v43 = vadd.f32 %v2177_v54, %v2051_v30  ;;  %v2438_v3 = vadd.f32 %v2437_v12, %v2311_v51  ;;  %v1678_v39 = vadd.s32 944, %v3199_v5  ;;  %v2316_v45 = vmul.f32 %v2055_v19, %v2055_v19 }
 0x1b5   : > { %v2057_v31 = vsel %vm1929_vm2, %v4125_v0, 0.0  ;;  %v1677_v61 = vadd.s32 936, %v3199_v5  ;;  %vm1930_vm4 = vcmp.lt.s32.totalorder %v1802_v62, 2048  ;;  %v1805_v49 = vadd.s32 %v3210_v9, %v1676_v23 }
 0x1b6   : > { %v2439_v2 = vadd.f32 %v2438_v3, %v2312_v58  ;;  %v2179_v63 = vadd.f32 %v2178_v43, %v2052_v27  ;;  %v2317_v11 = vmul.f32 %v2056_v34, %v2056_v34  ;;  %v2059_v47 = vsel %vm1931_vm3, %v4375_v36, 0.0 }
 0x1b7   : > { %vm1932_vm5 = vcmp.lt.s32.totalorder %v1804_v35, 2048  ;;  %v1807_v6 = vadd.s32 %v3210_v9, %v1678_v39  ;;  %v2318_v15 = vmul.f32 %v2057_v31, %v2057_v31  ;;  %v2058_v30 = vsel %vm1930_vm4, %v4148_v10, 0.0 }
 0x1b8   : > { %v2180_v60 = vadd.f32 %v2179_v63, %v2053_v59  ;;  %v2440_v48 = vadd.f32 %v2439_v2, %v2313_v8  ;;  %v1679_v0 = vadd.s32 952, %v3199_v5  ;;  %v1806_v40 = vadd.s32 %v3210_v9, %v1677_v61 }
 0x1b9   : > { %vm1933_vm6 = vcmp.lt.s32.totalorder %v1805_v49, 2048  ;;  %v1680_v32 = vadd.s32 960, %v3199_v5  ;;  %v2320_v14 = vmul.f32 %v2059_v47, %v2059_v47  ;;  %v2060_v12 = vsel %vm1932_vm5, %v4138_v17, 0.0 }
 0x1ba   : > { %v2441_v41 = vadd.f32 %v2440_v48, %v2314_v52  ;;  %v2181_v18 = vadd.f32 %v2180_v60, %v2054_v26  ;;  %v2319_v51 = vmul.f32 %v2058_v30, %v2058_v30  ;;  %vm1935_vm7 = vcmp.lt.s32.totalorder %v1807_v6, 2048 }
 0x1bb   : > { %v2061_v58 = vsel %vm1933_vm6, %v4166_v56, 0.0  ;;  %v1808_v10 = vadd.s32 %v3210_v9, %v1679_v0  ;;  %vm1934_vm8 = vcmp.lt.s32.totalorder %v1806_v40, 2048  ;;  %v1682_v44 = vadd.s32 976, %v3199_v5 }
 0x1bc   : > { %v2182_v55 = vadd.f32 %v2181_v18, %v2055_v19  ;;  %v2442_v38 = vadd.f32 %v2441_v41, %v2315_v42  ;;  %v1809_v59 = vadd.s32 %v3210_v9, %v1680_v32  ;;  %v1681_v33 = vadd.s32 968, %v3199_v5 }
 0x1bd   : > { %v2321_v8 = vmul.f32 %v2060_v12, %v2060_v12  ;;  %v2063_v17 = vsel %vm1935_vm7, %v4157_v7, 0.0  ;;  %v2322_v63 = vmul.f32 %v2061_v58, %v2061_v58  ;;  %vm1936_vm9 = vcmp.lt.s32.totalorder %v1808_v10, 2048 }
 0x1be   : > { %v2443_v21 = vadd.f32 %v2442_v38, %v2316_v45  ;;  %v2183_v22 = vadd.f32 %v2182_v55, %v2056_v34  ;;  %v2062_v56 = vsel %vm1934_vm8, %v4184_v28, 0.0  ;;  %v1811_v26 = vadd.s32 %v3210_v9, %v1682_v44 }
 0x1bf   : > { %v1683_v50 = vadd.s32 984, %v3199_v5  ;;  %vm1937_vm10 = vcmp.lt.s32.totalorder %v1809_v59, 2048  ;;  %v1810_v60 = vadd.s32 %v3210_v9, %v1681_v33  ;;  %v2324_v48 = vmul.f32 %v2063_v17, %v2063_v17 }
 0x1c0   : > { %v2184_v20 = vadd.f32 %v2183_v22, %v2057_v31  ;;  %v2444_v16 = vadd.f32 %v2443_v21, %v2317_v11  ;;  %v2323_v34 = vmul.f32 %v2062_v56, %v2062_v56  ;;  %v1684_v7 = vadd.s32 992, %v3199_v5 }
 0x1c1   : > { %v2064_v42 = vsel %vm1936_vm9, %v4175_v24, 0.0  ;;  %vm1939_vm11 = vcmp.lt.s32.totalorder %v1811_v26, 2048  ;;  %v2065_v28 = vsel %vm1937_vm10, %v4206_v37, 0.0  ;;  %v1812_v41 = vadd.s32 %v3210_v9, %v1683_v50 }
 0x1c2   : > { %v2445_v27 = vadd.f32 %v2444_v16, %v2318_v15  ;;  %v2185_v54 = vadd.f32 %v2184_v20, %v2058_v30  ;;  %vm1938_vm12 = vcmp.lt.s32.totalorder %v1810_v60, 2048  ;;  %v1685_v39 = vadd.s32 1000, %v3199_v5 }
 0x1c3   : > { %v1686_v45 = vadd.s32 1008, %v3199_v5  ;;  %v2325_v31 = vmul.f32 %v2064_v42, %v2064_v42  ;;  %v1813_v38 = vadd.s32 %v3210_v9, %v1684_v7  ;;  %v2067_v49 = vsel %vm1939_vm11, %v4196_v46, 0.0 }
 0x1c4   : > { %v2186_v43 = vadd.f32 %v2185_v54, %v2059_v47  ;;  %v2446_v3 = vadd.f32 %v2445_v27, %v2319_v51  ;;  %v2326_v24 = vmul.f32 %v2065_v28, %v2065_v28  ;;  %vm1940_vm13 = vcmp.lt.s32.totalorder %v1812_v41, 2048 }
 0x1c5   : > { %v2066_v37 = vsel %vm1938_vm12, %v4220_v29, 0.0  ;;  %v1687_v47 = vadd.s32 1016, %v3199_v5  ;;  %v1814_v21 = vadd.s32 %v3210_v9, %v1685_v39  ;;  %v1815_v22 = vadd.s32 %v3210_v9, %v1686_v45 }
 0x1c6   : > { %v2447_v53 = vadd.f32 %v2446_v3, %v2320_v14  ;;  %v2187_v2 = vadd.f32 %v2186_v43, %v2060_v12  ;;  %v2327_v30 = vmul.f32 %v2066_v37, %v2066_v37  ;;  %vm1941_vm14 = vcmp.lt.s32.totalorder %v1813_v38, 2048 }
 0x1c7   : > { %v2328_v0 = vmul.f32 %v2067_v49, %v2067_v49  ;;  %v2068_v40 = vsel %vm1940_vm13, %v4213_v25, 0.0  ;;  %v1816_v16 = vadd.s32 %v3210_v9, %v1687_v47  ;;  %vm1942_vm15 = vcmp.lt.s32.totalorder %v1814_v21, 2048 }
 0x1c8   : > { %v2188_v19 = vadd.f32 %v2187_v2, %v2061_v58  ;;  %v2448_v52 = vadd.f32 %v2447_v53, %v2321_v8  ;;  %v2069_v29 = vsel %vm1941_vm14, %v4237_v13, 0.0  ;;  %v2329_v32 = vmul.f32 %v2068_v40, %v2068_v40 }
 0x1c9   : > { %vm1943_vm0 = vcmp.lt.s32.totalorder %v1815_v22, 2048  ;;  %v2070_v27 = vsel %vm1942_vm15, %v4255_v4, 0.0  ;;  %v2330_v51 = vmul.f32 %v2069_v29, %v2069_v29  ;;  %vm1944_vm1 = vcmp.lt.s32.totalorder %v1816_v16, 2048 }
 0x1ca   : > { %v2449_v62 = vadd.f32 %v2448_v52, %v2322_v63  ;;  %v2189_v23 = vadd.f32 %v2188_v19, %v2062_v56  ;;  %v2071_v25 = vsel %vm1943_vm0, %v4229_v57, 0.0  ;;  %v2331_v43 = vmul.f32 %v2070_v27, %v2070_v27 }
 0x1cb   : > { %v2072_v9 = vsel %vm1944_vm1, %v4246_v1, 0.0  ;;  %v2332_v13 = vmul.f32 %v2071_v25, %v2071_v25  ;;  %vm2467_vm2 = vcmp.eq.s32.totalorder %v3199_v5, 0  ;;  %vm2469_vm3 = vcmp.eq.s32.totalorder %v3199_v5, 1 }
 0x1cc   : > { %v2190_v18 = vadd.f32 %v2189_v23, %v2063_v17  ;;  %v2450_v35 = vadd.f32 %v2449_v62, %v2323_v34  ;;  %v2333_v33 = vmul.f32 %v2072_v9, %v2072_v9 }
 0x1ce   : > { %v2451_v61 = vadd.f32 %v2450_v35, %v2324_v48  ;;  %v2191_v55 = vadd.f32 %v2190_v18, %v2064_v42 }
 0x1d0   : > { %v2192_v11 = vadd.f32 %v2191_v55, %v2065_v28  ;;  %v2452_v36 = vadd.f32 %v2451_v61, %v2325_v31 }
 0x1d2   : > { %v2453_v6 = vadd.f32 %v2452_v36, %v2326_v24  ;;  %v2193_v15 = vadd.f32 %v2192_v11, %v2066_v37 }
 0x1d4   : > { %v2194_v46 = vadd.f32 %v2193_v15, %v2067_v49  ;;  %v2454_v20 = vadd.f32 %v2453_v6, %v2327_v30 }
 0x1d6   : > { %v2455_v14 = vadd.f32 %v2454_v20, %v2328_v0  ;;  %v2195_v12 = vadd.f32 %v2194_v46, %v2068_v40 }
 0x1d8   : > { %v2196_v54 = vadd.f32 %v2195_v12, %v2069_v29  ;;  %v2456_v58 = vadd.f32 %v2455_v14, %v2329_v32 }
 0x1da   : > { %v2457_v10 = vadd.f32 %v2456_v58, %v2330_v51  ;;  %v2197_v44 = vadd.f32 %v2196_v54, %v2070_v27 }
 0x1dc   : > { %v2198_v3 = vadd.f32 %v2197_v44, %v2071_v25  ;;  %v2458_v59 = vadd.f32 %v2457_v10, %v2331_v43 }
 0x1de   : > { %v2199_v8 = vadd.f32 %v2198_v3, %v2072_v9  ;;  %v2459_v53 = vadd.f32 %v2458_v59, %v2332_v13 }
 0x1e0   : > { %v2200_v4 = vrot.slane %v2199_v8, 4  ;;  %v2460_v17 = vadd.f32 %v2459_v53, %v2333_v33 }
 0x1e2   : > { %v2201_v2 = vadd.f32 %v2200_v4, %v2199_v8  ;;  %v2461_v63 = vrot.slane %v2460_v17, 4 }
 0x1e4   : > { %v2202_v56 = vrot.slane %v2201_v2, 2  ;;  %v2462_v26 = vadd.f32 %v2461_v63, %v2460_v17 }
 0x1e6   : > { %v2203_v57 = vadd.f32 %v2202_v56, %v2201_v2  ;;  %v2463_v50 = vrot.slane %v2462_v26, 2 }
 0x1e8   : > { %v2204_v19 = vrot.slane %v2203_v57, 1  ;;  %v2464_v52 = vadd.f32 %v2463_v50, %v2462_v26 }
 0x1ea   : > { %v2205_v1 = vadd.f32 %v2204_v19, %v2203_v57  ;;  %v2465_v60 = vrot.slane %v2464_v52, 1 }
 0x1ec   : > { %v2466_v48 = vadd.f32 %v2465_v60, %v2464_v52  ;;  %v2468_v62 = vsel %vm2467_vm2, %v2205_v1, 0.0 }
 0x1ee   : > { %v2470_v23 = vsel %vm2469_vm3, %v2466_v48, 0.0 }
 0x1ef   : > { %v2471_v34 = vadd.f32 %v2470_v23, %v2468_v62 }
 0x1f1   : > { %2472 = vst [vmem:[%s211_s18] sm:$0xff] %v2471_v34 }
 0x1f2 PF: > { %s15_s15 = sadd.s32 1, %s3016_s15  }
 0x1f3   : > { %p12_p5 = scmp.ge.s32.totalorder %s15_s15, 4  }
 0x1f5   :  { %14 = sbr.rel (!%p12_p5) target bundleno = 1 (0x1), region = 74 }

</bundles_post_ra>
